<compile_context>
chip_gen: v7x
topology: tpu7x:2x2x1
jax: 0.10.0
libtpu: 0.0.40
codegen_flags: <defaults>
</compile_context>

<pallas_src>
import jax
import jax.numpy as jnp
import numpy as np
from jax import lax
from jax.experimental import pallas as pl
from jax.experimental.pallas import tpu as pltpu

_LP = 16  # left pad inside the bf16 VMEM pad buffers: keeps the interior store (16,128)-aligned


# ----------------------------------- fused network kernel -----------------------------------

def _cnn_kernel(x_ref,
                w1_ref, t1_ref, w2_ref, t2_ref, w3_ref, t3_ref,
                wf1_ref, bf1_ref, wf2_ref, bf2_ref,
                out_ref,
                pad2, pad3, hp1, hp2, hp3):
    B = x_ref.shape[0]
    f32 = jnp.float32
    bf16 = jnp.bfloat16

    def conv_relu_taps(src_ref, w_ref, t_ref, H, W, Cin):
        # im2col from the bf16 pad buffer: 9 shifted (B*H*W, Cin) taps concatenated on the lane
        # axis -> one MXU pass with K = 9*Cin.  BN scale is pre-folded into w; t is the f32 shift.
        col0 = _LP - 1
        taps = []
        for dy in range(3):
            for dx in range(3):
                p = src_ref[:, pl.ds(dy, H), pl.ds(col0 + dx, W), :]        # (B,H,W,Cin) bf16
                taps.append(p.reshape(B * H * W, Cin))
        pat = jnp.concatenate(taps, axis=-1)                                # (B*H*W, 9*Cin) bf16
        y = jnp.dot(pat, w_ref[...], preferred_element_type=f32)
        return jnp.maximum(y + t_ref[...], 0.0)                             # (B*H*W, Cout) f32

    def pool2x2(y, hp_ref, H, W, C):
        # H-pool: free row regrouping (W multiple of 8) + pairwise max in registers.
        yh = jnp.max(y.reshape(B * (H // 2), 2, W, C), axis=1)              # (B*H/2, W, C)
        hp_ref[...] = yh
        # W-pool: stride-2 sublane reads from f32 VMEM scratch (proven lowering).
        left = hp_ref[:, pl.ds(0, W // 2, stride=2), :]
        right = hp_ref[:, pl.ds(1, W // 2, stride=2), :]
        return jnp.maximum(left, right).reshape(B, H // 2, W // 2, C)

    def store_padded(pad_ref, val):
        # Zero ONLY the border strips the conv taps read (cols _LP-1 / _LP+W, rows 0 / H+1),
        # every grid step (megacore-safe), then write the interior at the aligned column _LP.
        _, H, W, C = val.shape
        z_row = jnp.zeros((B, 1, W + 2, C), pad_ref.dtype)
        pad_ref[:, pl.ds(0, 1), pl.ds(_LP - 1, W + 2), :] = z_row
        pad_ref[:, pl.ds(H + 1, 1), pl.ds(_LP - 1, W + 2), :] = z_row
        z_col = jnp.zeros((B, H, 1, C), pad_ref.dtype)
        pad_ref[:, pl.ds(1, H), pl.ds(_LP - 1, 1), :] = z_col
        pad_ref[:, pl.ds(1, H), pl.ds(_LP + W, 1), :] = z_col
        pad_ref[:, pl.ds(1, H), pl.ds(_LP, W), :] = val.astype(pad_ref.dtype)

    # conv block 1: wrapper already did the im2col -> single matmul (B*1024, 72) @ (72, 32).
    y1 = jnp.dot(x_ref[...].reshape(B * 1024, 72), w1_ref[...], preferred_element_type=f32)
    y1 = jnp.maximum(y1 + t1_ref[...], 0.0)
    store_padded(pad2, pool2x2(y1, hp1, 32, 32, 32))

    # conv block 2: (B,16,16,32) -> (B,8,8,64)
    y2 = conv_relu_taps(pad2, w2_ref, t2_ref, 16, 16, 32)
    store_padded(pad3, pool2x2(y2, hp2, 16, 16, 64))

    # conv block 3: (B,8,8,64) -> (B,4,4,128)
    y3 = conv_relu_taps(pad3, w3_ref, t3_ref, 8, 8, 64)
    p3 = pool2x2(y3, hp3, 8, 8, 128)                                        # (B,4,4,128) f32

    # NHWC flatten (fc1 weight rows pre-permuted to match) + MLP head, bf16 operands / f32 acc.
    xf = jnp.concatenate([p3[:, h, w, :] for h in range(4) for w in range(4)], axis=-1)
    h1 = jnp.dot(xf.astype(bf16), wf1_ref[...], preferred_element_type=f32)
    h1 = jnp.maximum(h1 + bf1_ref[...], 0.0)
    # TODO(synk): dropout(0.5) is eval-mode identity here (train-mode RNG mask not replicated).
    out = jnp.dot(h1.astype(bf16), wf2_ref[...], preferred_element_type=f32) + bf2_ref[...]
    out_ref[...] = out.reshape(out_ref.shape).astype(out_ref.dtype)


# --------------------------------------- host wrapper ---------------------------------------

def _prep_weights(p):
    bf16 = jnp.bfloat16
    # Fold the BN scale into the conv weights (per-Cout scale on the HWIO last axis) so the MXU
    # applies it implicitly; the f32 shift is the only per-layer VPU affine left in the kernel.
    w1 = p["w1c"] * p["scale1"]                                            # (3,3,3,32)
    w1 = jnp.pad(w1, ((0, 0), (0, 0), (0, 5), (0, 0))).reshape(72, 32).astype(bf16)
    w2 = (p["w2c"] * p["scale2"]).reshape(288, 64).astype(bf16)
    w3 = (p["w3c"] * p["scale3"]).reshape(576, 128).astype(bf16)
    # fc1 consumes the kernel's NHWC flatten; permute rows once from torch's NCHW flatten order
    # (c*16 + h*4 + w) to NHWC order (h*512 + w*128 + c).
    wf1 = (p["wf1"].reshape(128, 4, 4, 256).transpose(1, 2, 0, 3)
           .reshape(2048, 256).astype(bf16))
    wf2 = p["wf2"].astype(bf16)
    return (w1, p["shift1"].reshape(1, 32),
            w2, p["shift2"].reshape(1, 64),
            w3, p["shift3"].reshape(1, 128),
            wf1, p["bf1"].reshape(1, 256),
            wf2, p["bf2"].reshape(1, 2))


def _pick_batch_tile(n, batch_tile):
    b = min(batch_tile, n)
    if n >= 2:
        b = min(b, n // 2)      # guarantee >= 2 grid steps so both v7x TensorCores get work
    while b > 1 and n % b:
        b -= 1
    return max(b, 1)


def cnn_forward(x_nchw, p, *, batch_tile=16):
    # batch_tile: sweep per generation (v7x: keep the tile within ~48 MiB VMEM; v6e/v5e can go
    # larger with vmem_limit_bytes raised).  16 is a safe default across generations.
    n = x_nchw.shape[0]
    b = _pick_batch_tile(n, batch_tile)

    # Wrapper-side conv1 im2col: NCHW -> NHWC, SAME spatial pad, Cin 3->8 (8-aligned taps), then
    # the 9 shifted patches concatenated on the channel axis -> lane-dense (n, 1024, 72) bf16.
    x = jnp.transpose(x_nchw, (0, 2, 3, 1))
    xp = jnp.pad(x, ((0, 0), (1, 1), (1, 1), (0, 5)))                      # (n, 34, 34, 8)
    taps = [xp[:, dy:dy + 32, dx:dx + 32, :] for dy in range(3) for dx in range(3)]
    x_col = jnp.concatenate(taps, axis=-1).reshape(n, 1024, 72).astype(jnp.bfloat16)

    args = _prep_weights(p)

    def const_spec(shape):
        return pl.BlockSpec(shape, lambda i: (0,) * len(shape))            # weights stay resident

    in_specs = [pl.BlockSpec((b, 1024, 72), lambda i: (i, 0, 0))]
    in_specs += [const_spec(a.shape) for a in args]

    out = pl.pallas_call(
        _cnn_kernel,
        out_shape=jax.ShapeDtypeStruct((n // b, b, 2), jnp.float32),
        grid=(n // b,),
        in_specs=in_specs,
        out_specs=pl.BlockSpec((1, b, 2), lambda i: (i, 0, 0)),
        scratch_shapes=[
            pltpu.VMEM((b, 18, _LP + 17, 32), jnp.bfloat16),   # pad2: conv2 input (+zero border)
            pltpu.VMEM((b, 10, _LP + 9, 64), jnp.bfloat16),    # pad3: conv3 input (+zero border)
            pltpu.VMEM((b * 16, 32, 32), jnp.float32),         # hp1: H-pooled conv1 activations
            pltpu.VMEM((b * 8, 16, 64), jnp.float32),          # hp2
            pltpu.VMEM((b * 4, 8, 128), jnp.float32),          # hp3
        ],
        compiler_params=pltpu.CompilerParams(
            dimension_semantics=("parallel",),                 # megacore: TCs split the batch grid
            vmem_limit_bytes=48 * 1024 * 1024),
    )(x_col, *args)
    return out.reshape(n, 2)


# ------------------------------------ pure-JAX reference ------------------------------------

def cnn_reference(x_nchw, p):
    """f32 reference with the same eval-mode BN / dropout semantics as the PyTorch module."""
    x = jnp.transpose(x_nchw, (0, 2, 3, 1))
    for w, s, t in ((p["w1c"], p["scale1"], p["shift1"]),
                    (p["w2c"], p["scale2"], p["shift2"]),
                    (p["w3c"], p["scale3"], p["shift3"])):
        y = lax.conv_general_dilated(x, w, (1, 1), "SAME",
                                     dimension_numbers=("NHWC", "HWIO", "NHWC"))
        y = jnp.maximum(y * s + t, 0.0)
        x = lax.reduce_window(y, -jnp.inf, lax.max, (1, 2, 2, 1), (1, 2, 2, 1), "VALID")
    n = x.shape[0]
    xf = jnp.transpose(x, (0, 3, 1, 2)).reshape(n, 128 * 4 * 4)   # torch-order (NCHW) flatten
    h = jnp.maximum(xf @ p["wf1"] + p["bf1"], 0.0)
    return h @ p["wf2"] + p["bf2"]


# ------------------------------------ deterministic params ----------------------------------

def init_params(key):
    def conv_params(k, cin, cout):
        k1, k2, k3, k4, k5, k6 = jax.random.split(k, 6)
        w = jax.random.normal(k1, (3, 3, cin, cout), jnp.float32) / np.sqrt(9.0 * cin)
        b = jax.random.normal(k2, (cout,), jnp.float32) * 0.05
        gamma = jax.random.uniform(k3, (cout,), jnp.float32, 0.8, 1.2)
        beta = jax.random.normal(k4, (cout,), jnp.float32) * 0.1
        mean = jax.random.normal(k5, (cout,), jnp.float32) * 0.1
        var = jax.random.uniform(k6, (cout,), jnp.float32, 0.5, 1.5)
        scale = gamma / jnp.sqrt(var + 1e-5)
        shift = (b - mean) * scale + beta
        return w, scale, shift

    ks = jax.random.split(key, 7)
    w1c, s1, t1 = conv_params(ks[0], 3, 32)
    w2c, s2, t2 = conv_params(ks[1], 32, 64)
    w3c, s3, t3 = conv_params(ks[2], 64, 128)
    wf1 = jax.random.normal(ks[3], (128 * 4 * 4, 256), jnp.float32) / np.sqrt(2048.0)
    bf1 = jax.random.normal(ks[4], (256,), jnp.float32) * 0.05
    wf2 = jax.random.normal(ks[5], (256, 2), jnp.float32) / np.sqrt(256.0)
    bf2 = jax.random.normal(ks[6], (2,), jnp.float32) * 0.05
    return dict(w1c=w1c, scale1=s1, shift1=t1,
                w2c=w2c, scale2=s2, shift2=t2,
                w3c=w3c, scale3=s3, shift3=t3,
                wf1=wf1, bf1=bf1, wf2=wf2, bf2=bf2)


if __name__ == "__main__":
    key = jax.random.PRNGKey(0)
    kx, kp = jax.random.split(key)
    # Spatial size 32x32 is required by fc1 = Linear(128*4*4, 256) after three /2 pools.
    x = jax.random.normal(kx, (2, 3, 32, 32), jnp.float32)
    params = init_params(kp)

    fwd = jax.jit(cnn_forward)
    out = jax.block_until_ready(fwd(x, params))
    ref = jax.block_until_ready(cnn_reference(x, params))

    assert out.shape == (2, 2), out.shape
    err = float(jnp.max(jnp.abs(out - ref)))
    mag = float(jnp.max(jnp.abs(ref))) + 1e-6
    # Tolerance accounts for bf16 MXU operands (f32 accumulation, BN scale folded into bf16
    # weights) vs. the pure-f32 reference.
    assert err <= 3e-2 * mag + 1e-2, (err, mag)
    print("KERNEL_OK")
</pallas_src>

<mosaic_0001>
module attributes {stable_mosaic.version = 11 : i64} {
  func.func @_cnn_kernel(%arg0: i32, %arg1: memref<1x1024x72xbf16, #tpu.memory_space<vmem>>, %arg2: memref<72x32xbf16, #tpu.memory_space<vmem>>, %arg3: memref<1x32xf32, #tpu.memory_space<vmem>>, %arg4: memref<288x64xbf16, #tpu.memory_space<vmem>>, %arg5: memref<1x64xf32, #tpu.memory_space<vmem>>, %arg6: memref<576x128xbf16, #tpu.memory_space<vmem>>, %arg7: memref<1x128xf32, #tpu.memory_space<vmem>>, %arg8: memref<2048x256xbf16, #tpu.memory_space<vmem>>, %arg9: memref<1x256xf32, #tpu.memory_space<vmem>>, %arg10: memref<256x2xbf16, #tpu.memory_space<vmem>>, %arg11: memref<1x2xf32, #tpu.memory_space<vmem>>, %arg12: memref<1x1x2xf32, #tpu.memory_space<vmem>>, %arg13: memref<1x18x33x32xbf16, #tpu.memory_space<vmem>>, %arg14: memref<1x10x25x64xbf16, #tpu.memory_space<vmem>>, %arg15: memref<16x32x32xf32, #tpu.memory_space<vmem>>, %arg16: memref<8x16x64xf32, #tpu.memory_space<vmem>>, %arg17: memref<4x8x128xf32, #tpu.memory_space<vmem>>) attributes {dimension_semantics = [#tpu.dimension_semantics<parallel>], iteration_bounds = array<i64: 2>, scalar_prefetch = 0 : i64, scratch_operands = 5 : i64, tpu.core_type = #tpu.core_type<tc>, window_params = [{transform_indices = @transform_0, window_bounds = array<i64: 1, 1024, 72>}, {pipeline_mode = #tpu.pipeline_mode<synchronous>, transform_indices = @transform_1, window_bounds = array<i64: 72, 32>}, {pipeline_mode = #tpu.pipeline_mode<synchronous>, transform_indices = @transform_2, window_bounds = array<i64: 1, 32>}, {pipeline_mode = #tpu.pipeline_mode<synchronous>, transform_indices = @transform_3, window_bounds = array<i64: 288, 64>}, {pipeline_mode = #tpu.pipeline_mode<synchronous>, transform_indices = @transform_4, window_bounds = array<i64: 1, 64>}, {pipeline_mode = #tpu.pipeline_mode<synchronous>, transform_indices = @transform_5, window_bounds = array<i64: 576, 128>}, {pipeline_mode = #tpu.pipeline_mode<synchronous>, transform_indices = @transform_6, window_bounds = array<i64: 1, 128>}, {pipeline_mode = #tpu.pipeline_mode<synchronous>, transform_indices = @transform_7, window_bounds = array<i64: 2048, 256>}, {pipeline_mode = #tpu.pipeline_mode<synchronous>, transform_indices = @transform_8, window_bounds = array<i64: 1, 256>}, {pipeline_mode = #tpu.pipeline_mode<synchronous>, transform_indices = @transform_9, window_bounds = array<i64: 256, 2>}, {pipeline_mode = #tpu.pipeline_mode<synchronous>, transform_indices = @transform_10, window_bounds = array<i64: 1, 2>}, {transform_indices = @transform_11, window_bounds = array<i64: 1, 1, 2>}]} {
    %c0 = arith.constant 0 : index
    %c0_0 = arith.constant 0 : index
    %c0_1 = arith.constant 0 : index
    %0 = vector.load %arg1[%c0, %c0_0, %c0_1] : memref<1x1024x72xbf16, #tpu.memory_space<vmem>>, vector<1x1024x72xbf16>
    %1 = vector.shape_cast %0 : vector<1x1024x72xbf16> to vector<1024x72xbf16>
    %c0_2 = arith.constant 0 : index
    %c0_3 = arith.constant 0 : index
    %2 = vector.load %arg2[%c0_2, %c0_3] : memref<72x32xbf16, #tpu.memory_space<vmem>>, vector<72x32xbf16>
    %cst = arith.constant dense<0.000000e+00> : vector<1024x32xf32>
    %3 = tpu.matmul %1, %2, %cst {dimension_numbers = #tpu.dot_dimension_numbers<[1], [0], [0], [1], [0, 0, 1, 1], [], []>} : vector<1024x72xbf16>, vector<72x32xbf16>, vector<1024x32xf32> -> vector<1024x32xf32>
    %c0_4 = arith.constant 0 : index
    %c0_5 = arith.constant 0 : index
    %4 = vector.load %arg3[%c0_4, %c0_5] : memref<1x32xf32, #tpu.memory_space<vmem>>, vector<1x32xf32>
    %5 = vector.broadcast %4 : vector<1x32xf32> to vector<1024x32xf32>
    %6 = arith.addf %3, %5 : vector<1024x32xf32>
    %cst_6 = arith.constant 0.000000e+00 : f32
    %7 = vector.broadcast %cst_6 : f32 to vector<1024x32xf32>
    %8 = arith.maximumf %6, %7 : vector<1024x32xf32>
    %9 = vector.shape_cast %8 : vector<1024x32xf32> to vector<16x2x32x32xf32>
    %cst_7 = arith.constant dense<0xFF800000> : vector<16x32x32xf32>
    %10 = vector.multi_reduction <maximumf>, %9, %cst_7 [1] : vector<16x2x32x32xf32> to vector<16x32x32xf32>
    %c0_8 = arith.constant 0 : index
    %c0_9 = arith.constant 0 : index
    %c0_10 = arith.constant 0 : index
    %11 = vector.load %arg15[%c0_8, %c0_9, %c0_10] : memref<16x32x32xf32, #tpu.memory_space<vmem>>, vector<16x32x32xf32>
    tpu.vector_store %arg15[%c0_8, %c0_9, %c0_10], %10 {strides = array<i32>} : memref<16x32x32xf32, #tpu.memory_space<vmem>>, vector<16x32x32xf32>,
    %c0_11 = arith.constant 0 : index
    %c0_12 = arith.constant 0 : index
    %c0_13 = arith.constant 0 : index
    %12 = tpu.strided_load %arg15[%c0_11, %c0_12, %c0_13] {strides = array<i32: 1, 2, 1>} : memref<16x32x32xf32, #tpu.memory_space<vmem>>, vector<16x16x32xf32>
    %c0_14 = arith.constant 0 : index
    %c1 = arith.constant 1 : index
    %c0_15 = arith.constant 0 : index
    %13 = tpu.strided_load %arg15[%c0_14, %c1, %c0_15] {strides = array<i32: 1, 2, 1>} : memref<16x32x32xf32, #tpu.memory_space<vmem>>, vector<16x16x32xf32>
    %14 = arith.maximumf %12, %13 : vector<16x16x32xf32>
    %15 = vector.shape_cast %14 : vector<16x16x32xf32> to vector<1x16x16x32xf32>
    %cst_16 = arith.constant 0.000000e+00 : bf16
    %16 = vector.broadcast %cst_16 : bf16 to vector<1x1x18x32xbf16>
    %c0_17 = arith.constant 0 : index
    %c0_18 = arith.constant 0 : index
    %c15 = arith.constant 15 : index
    %c0_19 = arith.constant 0 : index
    %17 = vector.load %arg13[%c0_17, %c0_18, %c15, %c0_19] : memref<1x18x33x32xbf16, #tpu.memory_space<vmem>>, vector<1x1x18x32xbf16>
    tpu.vector_store %arg13[%c0_17, %c0_18, %c15, %c0_19], %16 {strides = array<i32>} : memref<1x18x33x32xbf16, #tpu.memory_space<vmem>>, vector<1x1x18x32xbf16>,
    %c0_20 = arith.constant 0 : index
    %c17 = arith.constant 17 : index
    %c15_21 = arith.constant 15 : index
    %c0_22 = arith.constant 0 : index
    %18 = vector.load %arg13[%c0_20, %c17, %c15_21, %c0_22] : memref<1x18x33x32xbf16, #tpu.memory_space<vmem>>, vector<1x1x18x32xbf16>
    tpu.vector_store %arg13[%c0_20, %c17, %c15_21, %c0_22], %16 {strides = array<i32>} : memref<1x18x33x32xbf16, #tpu.memory_space<vmem>>, vector<1x1x18x32xbf16>,
    %cst_23 = arith.constant 0.000000e+00 : bf16
    %19 = vector.broadcast %cst_23 : bf16 to vector<1x16x1x32xbf16>
    %c0_24 = arith.constant 0 : index
    %c1_25 = arith.constant 1 : index
    %c15_26 = arith.constant 15 : index
    %c0_27 = arith.constant 0 : index
    %20 = vector.load %arg13[%c0_24, %c1_25, %c15_26, %c0_27] : memref<1x18x33x32xbf16, #tpu.memory_space<vmem>>, vector<1x16x1x32xbf16>
    tpu.vector_store %arg13[%c0_24, %c1_25, %c15_26, %c0_27], %19 {strides = array<i32>} : memref<1x18x33x32xbf16, #tpu.memory_space<vmem>>, vector<1x16x1x32xbf16>,
    %c0_28 = arith.constant 0 : index
    %c1_29 = arith.constant 1 : index
    %c32 = arith.constant 32 : index
    %c0_30 = arith.constant 0 : index
    %21 = vector.load %arg13[%c0_28, %c1_29, %c32, %c0_30] : memref<1x18x33x32xbf16, #tpu.memory_space<vmem>>, vector<1x16x1x32xbf16>
    tpu.vector_store %arg13[%c0_28, %c1_29, %c32, %c0_30], %19 {strides = array<i32>} : memref<1x18x33x32xbf16, #tpu.memory_space<vmem>>, vector<1x16x1x32xbf16>,
    %22 = arith.truncf %15 : vector<1x16x16x32xf32> to vector<1x16x16x32xbf16>
    %c0_31 = arith.constant 0 : index
    %c1_32 = arith.constant 1 : index
    %c16 = arith.constant 16 : index
    %c0_33 = arith.constant 0 : index
    %23 = vector.load %arg13[%c0_31, %c1_32, %c16, %c0_33] : memref<1x18x33x32xbf16, #tpu.memory_space<vmem>>, vector<1x16x16x32xbf16>
    tpu.vector_store %arg13[%c0_31, %c1_32, %c16, %c0_33], %22 {strides = array<i32>} : memref<1x18x33x32xbf16, #tpu.memory_space<vmem>>, vector<1x16x16x32xbf16>,
    %c0_34 = arith.constant 0 : index
    %c0_35 = arith.constant 0 : index
    %c15_36 = arith.constant 15 : index
    %c0_37 = arith.constant 0 : index
    %24 = vector.load %arg13[%c0_34, %c0_35, %c15_36, %c0_37] : memref<1x18x33x32xbf16, #tpu.memory_space<vmem>>, vector<1x16x16x32xbf16>
    %25 = vector.shape_cast %24 : vector<1x16x16x32xbf16> to vector<256x32xbf16>
    %c0_38 = arith.constant 0 : index
    %c0_39 = arith.constant 0 : index
    %c16_40 = arith.constant 16 : index
    %c0_41 = arith.constant 0 : index
    %26 = vector.load %arg13[%c0_38, %c0_39, %c16_40, %c0_41] : memref<1x18x33x32xbf16, #tpu.memory_space<vmem>>, vector<1x16x16x32xbf16>
    %27 = vector.shape_cast %26 : vector<1x16x16x32xbf16> to vector<256x32xbf16>
    %c0_42 = arith.constant 0 : index
    %c0_43 = arith.constant 0 : index
    %c17_44 = arith.constant 17 : index
    %c0_45 = arith.constant 0 : index
    %28 = vector.load %arg13[%c0_42, %c0_43, %c17_44, %c0_45] : memref<1x18x33x32xbf16, #tpu.memory_space<vmem>>, vector<1x16x16x32xbf16>
    %29 = vector.shape_cast %28 : vector<1x16x16x32xbf16> to vector<256x32xbf16>
    %c0_46 = arith.constant 0 : index
    %c1_47 = arith.constant 1 : index
    %c15_48 = arith.constant 15 : index
    %c0_49 = arith.constant 0 : index
    %30 = vector.load %arg13[%c0_46, %c1_47, %c15_48, %c0_49] : memref<1x18x33x32xbf16, #tpu.memory_space<vmem>>, vector<1x16x16x32xbf16>
    %31 = vector.shape_cast %30 : vector<1x16x16x32xbf16> to vector<256x32xbf16>
    %c0_50 = arith.constant 0 : index
    %c1_51 = arith.constant 1 : index
    %c16_52 = arith.constant 16 : index
    %c0_53 = arith.constant 0 : index
    %32 = vector.load %arg13[%c0_50, %c1_51, %c16_52, %c0_53] : memref<1x18x33x32xbf16, #tpu.memory_space<vmem>>, vector<1x16x16x32xbf16>
    %33 = vector.shape_cast %32 : vector<1x16x16x32xbf16> to vector<256x32xbf16>
    %c0_54 = arith.constant 0 : index
    %c1_55 = arith.constant 1 : index
    %c17_56 = arith.constant 17 : index
    %c0_57 = arith.constant 0 : index
    %34 = vector.load %arg13[%c0_54, %c1_55, %c17_56, %c0_57] : memref<1x18x33x32xbf16, #tpu.memory_space<vmem>>, vector<1x16x16x32xbf16>
    %35 = vector.shape_cast %34 : vector<1x16x16x32xbf16> to vector<256x32xbf16>
    %c0_58 = arith.constant 0 : index
    %c2 = arith.constant 2 : index
    %c15_59 = arith.constant 15 : index
    %c0_60 = arith.constant 0 : index
    %36 = vector.load %arg13[%c0_58, %c2, %c15_59, %c0_60] : memref<1x18x33x32xbf16, #tpu.memory_space<vmem>>, vector<1x16x16x32xbf16>
    %37 = vector.shape_cast %36 : vector<1x16x16x32xbf16> to vector<256x32xbf16>
    %c0_61 = arith.constant 0 : index
    %c2_62 = arith.constant 2 : index
    %c16_63 = arith.constant 16 : index
    %c0_64 = arith.constant 0 : index
    %38 = vector.load %arg13[%c0_61, %c2_62, %c16_63, %c0_64] : memref<1x18x33x32xbf16, #tpu.memory_space<vmem>>, vector<1x16x16x32xbf16>
    %39 = vector.shape_cast %38 : vector<1x16x16x32xbf16> to vector<256x32xbf16>
    %c0_65 = arith.constant 0 : index
    %c2_66 = arith.constant 2 : index
    %c17_67 = arith.constant 17 : index
    %c0_68 = arith.constant 0 : index
    %40 = vector.load %arg13[%c0_65, %c2_66, %c17_67, %c0_68] : memref<1x18x33x32xbf16, #tpu.memory_space<vmem>>, vector<1x16x16x32xbf16>
    %41 = vector.shape_cast %40 : vector<1x16x16x32xbf16> to vector<256x32xbf16>
    %42 = tpu.concatenate %25, %27, %29, %31, %33, %35, %37, %39, %41 in 1 : vector<256x32xbf16>, vector<256x32xbf16>, vector<256x32xbf16>, vector<256x32xbf16>, vector<256x32xbf16>, vector<256x32xbf16>, vector<256x32xbf16>, vector<256x32xbf16>, vector<256x32xbf16> -> vector<256x288xbf16>
    %c0_69 = arith.constant 0 : index
    %c0_70 = arith.constant 0 : index
    %43 = vector.load %arg4[%c0_69, %c0_70] : memref<288x64xbf16, #tpu.memory_space<vmem>>, vector<288x64xbf16>
    %cst_71 = arith.constant dense<0.000000e+00> : vector<256x64xf32>
    %44 = tpu.matmul %42, %43, %cst_71 {dimension_numbers = #tpu.dot_dimension_numbers<[1], [0], [0], [1], [0, 0, 1, 1], [], []>} : vector<256x288xbf16>, vector<288x64xbf16>, vector<256x64xf32> -> vector<256x64xf32>
    %c0_72 = arith.constant 0 : index
    %c0_73 = arith.constant 0 : index
    %45 = vector.load %arg5[%c0_72, %c0_73] : memref<1x64xf32, #tpu.memory_space<vmem>>, vector<1x64xf32>
    %46 = vector.broadcast %45 : vector<1x64xf32> to vector<256x64xf32>
    %47 = arith.addf %44, %46 : vector<256x64xf32>
    %cst_74 = arith.constant 0.000000e+00 : f32
    %48 = vector.broadcast %cst_74 : f32 to vector<256x64xf32>
    %49 = arith.maximumf %47, %48 : vector<256x64xf32>
    %50 = vector.shape_cast %49 : vector<256x64xf32> to vector<8x2x16x64xf32>
    %cst_75 = arith.constant dense<0xFF800000> : vector<8x16x64xf32>
    %51 = vector.multi_reduction <maximumf>, %50, %cst_75 [1] : vector<8x2x16x64xf32> to vector<8x16x64xf32>
    %c0_76 = arith.constant 0 : index
    %c0_77 = arith.constant 0 : index
    %c0_78 = arith.constant 0 : index
    %52 = vector.load %arg16[%c0_76, %c0_77, %c0_78] : memref<8x16x64xf32, #tpu.memory_space<vmem>>, vector<8x16x64xf32>
    tpu.vector_store %arg16[%c0_76, %c0_77, %c0_78], %51 {strides = array<i32>} : memref<8x16x64xf32, #tpu.memory_space<vmem>>, vector<8x16x64xf32>,
    %c0_79 = arith.constant 0 : index
    %c0_80 = arith.constant 0 : index
    %c0_81 = arith.constant 0 : index
    %53 = tpu.strided_load %arg16[%c0_79, %c0_80, %c0_81] {strides = array<i32: 1, 2, 1>} : memref<8x16x64xf32, #tpu.memory_space<vmem>>, vector<8x8x64xf32>
    %c0_82 = arith.constant 0 : index
    %c1_83 = arith.constant 1 : index
    %c0_84 = arith.constant 0 : index
    %54 = tpu.strided_load %arg16[%c0_82, %c1_83, %c0_84] {strides = array<i32: 1, 2, 1>} : memref<8x16x64xf32, #tpu.memory_space<vmem>>, vector<8x8x64xf32>
    %55 = arith.maximumf %53, %54 : vector<8x8x64xf32>
    %56 = vector.shape_cast %55 : vector<8x8x64xf32> to vector<1x8x8x64xf32>
    %cst_85 = arith.constant 0.000000e+00 : bf16
    %57 = vector.broadcast %cst_85 : bf16 to vector<1x1x10x64xbf16>
    %c0_86 = arith.constant 0 : index
    %c0_87 = arith.constant 0 : index
    %c15_88 = arith.constant 15 : index
    %c0_89 = arith.constant 0 : index
    %58 = vector.load %arg14[%c0_86, %c0_87, %c15_88, %c0_89] : memref<1x10x25x64xbf16, #tpu.memory_space<vmem>>, vector<1x1x10x64xbf16>
    tpu.vector_store %arg14[%c0_86, %c0_87, %c15_88, %c0_89], %57 {strides = array<i32>} : memref<1x10x25x64xbf16, #tpu.memory_space<vmem>>, vector<1x1x10x64xbf16>,
    %c0_90 = arith.constant 0 : index
    %c9 = arith.constant 9 : index
    %c15_91 = arith.constant 15 : index
    %c0_92 = arith.constant 0 : index
    %59 = vector.load %arg14[%c0_90, %c9, %c15_91, %c0_92] : memref<1x10x25x64xbf16, #tpu.memory_space<vmem>>, vector<1x1x10x64xbf16>
    tpu.vector_store %arg14[%c0_90, %c9, %c15_91, %c0_92], %57 {strides = array<i32>} : memref<1x10x25x64xbf16, #tpu.memory_space<vmem>>, vector<1x1x10x64xbf16>,
    %cst_93 = arith.constant 0.000000e+00 : bf16
    %60 = vector.broadcast %cst_93 : bf16 to vector<1x8x1x64xbf16>
    %c0_94 = arith.constant 0 : index
    %c1_95 = arith.constant 1 : index
    %c15_96 = arith.constant 15 : index
    %c0_97 = arith.constant 0 : index
    %61 = vector.load %arg14[%c0_94, %c1_95, %c15_96, %c0_97] : memref<1x10x25x64xbf16, #tpu.memory_space<vmem>>, vector<1x8x1x64xbf16>
    tpu.vector_store %arg14[%c0_94, %c1_95, %c15_96, %c0_97], %60 {strides = array<i32>} : memref<1x10x25x64xbf16, #tpu.memory_space<vmem>>, vector<1x8x1x64xbf16>,
    %c0_98 = arith.constant 0 : index
    %c1_99 = arith.constant 1 : index
    %c24 = arith.constant 24 : index
    %c0_100 = arith.constant 0 : index
    %62 = vector.load %arg14[%c0_98, %c1_99, %c24, %c0_100] : memref<1x10x25x64xbf16, #tpu.memory_space<vmem>>, vector<1x8x1x64xbf16>
    tpu.vector_store %arg14[%c0_98, %c1_99, %c24, %c0_100], %60 {strides = array<i32>} : memref<1x10x25x64xbf16, #tpu.memory_space<vmem>>, vector<1x8x1x64xbf16>,
    %63 = arith.truncf %56 : vector<1x8x8x64xf32> to vector<1x8x8x64xbf16>
    %c0_101 = arith.constant 0 : index
    %c1_102 = arith.constant 1 : index
    %c16_103 = arith.constant 16 : index
    %c0_104 = arith.constant 0 : index
    %64 = vector.load %arg14[%c0_101, %c1_102, %c16_103, %c0_104] : memref<1x10x25x64xbf16, #tpu.memory_space<vmem>>, vector<1x8x8x64xbf16>
    tpu.vector_store %arg14[%c0_101, %c1_102, %c16_103, %c0_104], %63 {strides = array<i32>} : memref<1x10x25x64xbf16, #tpu.memory_space<vmem>>, vector<1x8x8x64xbf16>,
    %c0_105 = arith.constant 0 : index
    %c0_106 = arith.constant 0 : index
    %c15_107 = arith.constant 15 : index
    %c0_108 = arith.constant 0 : index
    %65 = vector.load %arg14[%c0_105, %c0_106, %c15_107, %c0_108] : memref<1x10x25x64xbf16, #tpu.memory_space<vmem>>, vector<1x8x8x64xbf16>
    %66 = vector.shape_cast %65 : vector<1x8x8x64xbf16> to vector<64x64xbf16>
    %c0_109 = arith.constant 0 : index
    %c0_110 = arith.constant 0 : index
    %c16_111 = arith.constant 16 : index
    %c0_112 = arith.constant 0 : index
    %67 = vector.load %arg14[%c0_109, %c0_110, %c16_111, %c0_112] : memref<1x10x25x64xbf16, #tpu.memory_space<vmem>>, vector<1x8x8x64xbf16>
    %68 = vector.shape_cast %67 : vector<1x8x8x64xbf16> to vector<64x64xbf16>
    %c0_113 = arith.constant 0 : index
    %c0_114 = arith.constant 0 : index
    %c17_115 = arith.constant 17 : index
    %c0_116 = arith.constant 0 : index
    %69 = vector.load %arg14[%c0_113, %c0_114, %c17_115, %c0_116] : memref<1x10x25x64xbf16, #tpu.memory_space<vmem>>, vector<1x8x8x64xbf16>
    %70 = vector.shape_cast %69 : vector<1x8x8x64xbf16> to vector<64x64xbf16>
    %c0_117 = arith.constant 0 : index
    %c1_118 = arith.constant 1 : index
    %c15_119 = arith.constant 15 : index
    %c0_120 = arith.constant 0 : index
    %71 = vector.load %arg14[%c0_117, %c1_118, %c15_119, %c0_120] : memref<1x10x25x64xbf16, #tpu.memory_space<vmem>>, vector<1x8x8x64xbf16>
    %72 = vector.shape_cast %71 : vector<1x8x8x64xbf16> to vector<64x64xbf16>
    %c0_121 = arith.constant 0 : index
    %c1_122 = arith.constant 1 : index
    %c16_123 = arith.constant 16 : index
    %c0_124 = arith.constant 0 : index
    %73 = vector.load %arg14[%c0_121, %c1_122, %c16_123, %c0_124] : memref<1x10x25x64xbf16, #tpu.memory_space<vmem>>, vector<1x8x8x64xbf16>
    %74 = vector.shape_cast %73 : vector<1x8x8x64xbf16> to vector<64x64xbf16>
    %c0_125 = arith.constant 0 : index
    %c1_126 = arith.constant 1 : index
    %c17_127 = arith.constant 17 : index
    %c0_128 = arith.constant 0 : index
    %75 = vector.load %arg14[%c0_125, %c1_126, %c17_127, %c0_128] : memref<1x10x25x64xbf16, #tpu.memory_space<vmem>>, vector<1x8x8x64xbf16>
    %76 = vector.shape_cast %75 : vector<1x8x8x64xbf16> to vector<64x64xbf16>
    %c0_129 = arith.constant 0 : index
    %c2_130 = arith.constant 2 : index
    %c15_131 = arith.constant 15 : index
    %c0_132 = arith.constant 0 : index
    %77 = vector.load %arg14[%c0_129, %c2_130, %c15_131, %c0_132] : memref<1x10x25x64xbf16, #tpu.memory_space<vmem>>, vector<1x8x8x64xbf16>
    %78 = vector.shape_cast %77 : vector<1x8x8x64xbf16> to vector<64x64xbf16>
    %c0_133 = arith.constant 0 : index
    %c2_134 = arith.constant 2 : index
    %c16_135 = arith.constant 16 : index
    %c0_136 = arith.constant 0 : index
    %79 = vector.load %arg14[%c0_133, %c2_134, %c16_135, %c0_136] : memref<1x10x25x64xbf16, #tpu.memory_space<vmem>>, vector<1x8x8x64xbf16>
    %80 = vector.shape_cast %79 : vector<1x8x8x64xbf16> to vector<64x64xbf16>
    %c0_137 = arith.constant 0 : index
    %c2_138 = arith.constant 2 : index
    %c17_139 = arith.constant 17 : index
    %c0_140 = arith.constant 0 : index
    %81 = vector.load %arg14[%c0_137, %c2_138, %c17_139, %c0_140] : memref<1x10x25x64xbf16, #tpu.memory_space<vmem>>, vector<1x8x8x64xbf16>
    %82 = vector.shape_cast %81 : vector<1x8x8x64xbf16> to vector<64x64xbf16>
    %83 = tpu.concatenate %66, %68, %70, %72, %74, %76, %78, %80, %82 in 1 : vector<64x64xbf16>, vector<64x64xbf16>, vector<64x64xbf16>, vector<64x64xbf16>, vector<64x64xbf16>, vector<64x64xbf16>, vector<64x64xbf16>, vector<64x64xbf16>, vector<64x64xbf16> -> vector<64x576xbf16>
    %c0_141 = arith.constant 0 : index
    %c0_142 = arith.constant 0 : index
    %84 = vector.load %arg6[%c0_141, %c0_142] : memref<576x128xbf16, #tpu.memory_space<vmem>>, vector<576x128xbf16>
    %cst_143 = arith.constant dense<0.000000e+00> : vector<64x128xf32>
    %85 = tpu.matmul %83, %84, %cst_143 {dimension_numbers = #tpu.dot_dimension_numbers<[1], [0], [0], [1], [0, 0, 1, 1], [], []>} : vector<64x576xbf16>, vector<576x128xbf16>, vector<64x128xf32> -> vector<64x128xf32>
    %c0_144 = arith.constant 0 : index
    %c0_145 = arith.constant 0 : index
    %86 = vector.load %arg7[%c0_144, %c0_145] : memref<1x128xf32, #tpu.memory_space<vmem>>, vector<1x128xf32>
    %87 = vector.broadcast %86 : vector<1x128xf32> to vector<64x128xf32>
    %88 = arith.addf %85, %87 : vector<64x128xf32>
    %cst_146 = arith.constant 0.000000e+00 : f32
    %89 = vector.broadcast %cst_146 : f32 to vector<64x128xf32>
    %90 = arith.maximumf %88, %89 : vector<64x128xf32>
    %91 = vector.shape_cast %90 : vector<64x128xf32> to vector<4x2x8x128xf32>
    %cst_147 = arith.constant dense<0xFF800000> : vector<4x8x128xf32>
    %92 = vector.multi_reduction <maximumf>, %91, %cst_147 [1] : vector<4x2x8x128xf32> to vector<4x8x128xf32>
    %c0_148 = arith.constant 0 : index
    %c0_149 = arith.constant 0 : index
    %c0_150 = arith.constant 0 : index
    %93 = vector.load %arg17[%c0_148, %c0_149, %c0_150] : memref<4x8x128xf32, #tpu.memory_space<vmem>>, vector<4x8x128xf32>
    tpu.vector_store %arg17[%c0_148, %c0_149, %c0_150], %92 {strides = array<i32>} : memref<4x8x128xf32, #tpu.memory_space<vmem>>, vector<4x8x128xf32>,
    %c0_151 = arith.constant 0 : index
    %c0_152 = arith.constant 0 : index
    %c0_153 = arith.constant 0 : index
    %94 = tpu.strided_load %arg17[%c0_151, %c0_152, %c0_153] {strides = array<i32: 1, 2, 1>} : memref<4x8x128xf32, #tpu.memory_space<vmem>>, vector<4x4x128xf32>
    %c0_154 = arith.constant 0 : index
    %c1_155 = arith.constant 1 : index
    %c0_156 = arith.constant 0 : index
    %95 = tpu.strided_load %arg17[%c0_154, %c1_155, %c0_156] {strides = array<i32: 1, 2, 1>} : memref<4x8x128xf32, #tpu.memory_space<vmem>>, vector<4x4x128xf32>
    %96 = arith.maximumf %94, %95 : vector<4x4x128xf32>
    %97 = vector.shape_cast %96 : vector<4x4x128xf32> to vector<1x4x4x128xf32>
    %98 = vector.extract_strided_slice %97 {offsets = [0, 0, 0, 0], sizes = [1, 1, 1, 128], strides = [1, 1, 1, 1]} : vector<1x4x4x128xf32> to vector<1x1x1x128xf32>
    %99 = vector.shape_cast %98 : vector<1x1x1x128xf32> to vector<1x128xf32>
    %100 = vector.extract_strided_slice %97 {offsets = [0, 0, 1, 0], sizes = [1, 1, 1, 128], strides = [1, 1, 1, 1]} : vector<1x4x4x128xf32> to vector<1x1x1x128xf32>
    %101 = vector.shape_cast %100 : vector<1x1x1x128xf32> to vector<1x128xf32>
    %102 = vector.extract_strided_slice %97 {offsets = [0, 0, 2, 0], sizes = [1, 1, 1, 128], strides = [1, 1, 1, 1]} : vector<1x4x4x128xf32> to vector<1x1x1x128xf32>
    %103 = vector.shape_cast %102 : vector<1x1x1x128xf32> to vector<1x128xf32>
    %104 = vector.extract_strided_slice %97 {offsets = [0, 0, 3, 0], sizes = [1, 1, 1, 128], strides = [1, 1, 1, 1]} : vector<1x4x4x128xf32> to vector<1x1x1x128xf32>
    %105 = vector.shape_cast %104 : vector<1x1x1x128xf32> to vector<1x128xf32>
    %106 = vector.extract_strided_slice %97 {offsets = [0, 1, 0, 0], sizes = [1, 1, 1, 128], strides = [1, 1, 1, 1]} : vector<1x4x4x128xf32> to vector<1x1x1x128xf32>
    %107 = vector.shape_cast %106 : vector<1x1x1x128xf32> to vector<1x128xf32>
    %108 = vector.extract_strided_slice %97 {offsets = [0, 1, 1, 0], sizes = [1, 1, 1, 128], strides = [1, 1, 1, 1]} : vector<1x4x4x128xf32> to vector<1x1x1x128xf32>
    %109 = vector.shape_cast %108 : vector<1x1x1x128xf32> to vector<1x128xf32>
    %110 = vector.extract_strided_slice %97 {offsets = [0, 1, 2, 0], sizes = [1, 1, 1, 128], strides = [1, 1, 1, 1]} : vector<1x4x4x128xf32> to vector<1x1x1x128xf32>
    %111 = vector.shape_cast %110 : vector<1x1x1x128xf32> to vector<1x128xf32>
    %112 = vector.extract_strided_slice %97 {offsets = [0, 1, 3, 0], sizes = [1, 1, 1, 128], strides = [1, 1, 1, 1]} : vector<1x4x4x128xf32> to vector<1x1x1x128xf32>
    %113 = vector.shape_cast %112 : vector<1x1x1x128xf32> to vector<1x128xf32>
    %114 = vector.extract_strided_slice %97 {offsets = [0, 2, 0, 0], sizes = [1, 1, 1, 128], strides = [1, 1, 1, 1]} : vector<1x4x4x128xf32> to vector<1x1x1x128xf32>
    %115 = vector.shape_cast %114 : vector<1x1x1x128xf32> to vector<1x128xf32>
    %116 = vector.extract_strided_slice %97 {offsets = [0, 2, 1, 0], sizes = [1, 1, 1, 128], strides = [1, 1, 1, 1]} : vector<1x4x4x128xf32> to vector<1x1x1x128xf32>
    %117 = vector.shape_cast %116 : vector<1x1x1x128xf32> to vector<1x128xf32>
    %118 = vector.extract_strided_slice %97 {offsets = [0, 2, 2, 0], sizes = [1, 1, 1, 128], strides = [1, 1, 1, 1]} : vector<1x4x4x128xf32> to vector<1x1x1x128xf32>
    %119 = vector.shape_cast %118 : vector<1x1x1x128xf32> to vector<1x128xf32>
    %120 = vector.extract_strided_slice %97 {offsets = [0, 2, 3, 0], sizes = [1, 1, 1, 128], strides = [1, 1, 1, 1]} : vector<1x4x4x128xf32> to vector<1x1x1x128xf32>
    %121 = vector.shape_cast %120 : vector<1x1x1x128xf32> to vector<1x128xf32>
    %122 = vector.extract_strided_slice %97 {offsets = [0, 3, 0, 0], sizes = [1, 1, 1, 128], strides = [1, 1, 1, 1]} : vector<1x4x4x128xf32> to vector<1x1x1x128xf32>
    %123 = vector.shape_cast %122 : vector<1x1x1x128xf32> to vector<1x128xf32>
    %124 = vector.extract_strided_slice %97 {offsets = [0, 3, 1, 0], sizes = [1, 1, 1, 128], strides = [1, 1, 1, 1]} : vector<1x4x4x128xf32> to vector<1x1x1x128xf32>
    %125 = vector.shape_cast %124 : vector<1x1x1x128xf32> to vector<1x128xf32>
    %126 = vector.extract_strided_slice %97 {offsets = [0, 3, 2, 0], sizes = [1, 1, 1, 128], strides = [1, 1, 1, 1]} : vector<1x4x4x128xf32> to vector<1x1x1x128xf32>
    %127 = vector.shape_cast %126 : vector<1x1x1x128xf32> to vector<1x128xf32>
    %128 = vector.extract_strided_slice %97 {offsets = [0, 3, 3, 0], sizes = [1, 1, 1, 128], strides = [1, 1, 1, 1]} : vector<1x4x4x128xf32> to vector<1x1x1x128xf32>
    %129 = vector.shape_cast %128 : vector<1x1x1x128xf32> to vector<1x128xf32>
    %130 = tpu.concatenate %99, %101, %103, %105, %107, %109, %111, %113, %115, %117, %119, %121, %123, %125, %127, %129 in 1 : vector<1x128xf32>, vector<1x128xf32>, vector<1x128xf32>, vector<1x128xf32>, vector<1x128xf32>, vector<1x128xf32>, vector<1x128xf32>, vector<1x128xf32>, vector<1x128xf32>, vector<1x128xf32>, vector<1x128xf32>, vector<1x128xf32>, vector<1x128xf32>, vector<1x128xf32>, vector<1x128xf32>, vector<1x128xf32> -> vector<1x2048xf32>
    %131 = arith.truncf %130 : vector<1x2048xf32> to vector<1x2048xbf16>
    %c0_157 = arith.constant 0 : index
    %c0_158 = arith.constant 0 : index
    %132 = vector.load %arg8[%c0_157, %c0_158] : memref<2048x256xbf16, #tpu.memory_space<vmem>>, vector<2048x256xbf16>
    %cst_159 = arith.constant dense<0.000000e+00> : vector<1x256xf32>
    %133 = tpu.matmul %131, %132, %cst_159 {dimension_numbers = #tpu.dot_dimension_numbers<[1], [0], [0], [1], [0, 0, 1, 1], [], []>} : vector<1x2048xbf16>, vector<2048x256xbf16>, vector<1x256xf32> -> vector<1x256xf32>
    %c0_160 = arith.constant 0 : index
    %c0_161 = arith.constant 0 : index
    %134 = vector.load %arg9[%c0_160, %c0_161] : memref<1x256xf32, #tpu.memory_space<vmem>>, vector<1x256xf32>
    %135 = arith.addf %133, %134 : vector<1x256xf32>
    %cst_162 = arith.constant 0.000000e+00 : f32
    %136 = vector.broadcast %cst_162 : f32 to vector<1x256xf32>
    %137 = arith.maximumf %135, %136 : vector<1x256xf32>
    %138 = arith.truncf %137 : vector<1x256xf32> to vector<1x256xbf16>
    %c0_163 = arith.constant 0 : index
    %c0_164 = arith.constant 0 : index
    %139 = vector.load %arg10[%c0_163, %c0_164] : memref<256x2xbf16, #tpu.memory_space<vmem>>, vector<256x2xbf16>
    %cst_165 = arith.constant dense<0.000000e+00> : vector<1x2xf32>
    %140 = tpu.matmul %138, %139, %cst_165 {dimension_numbers = #tpu.dot_dimension_numbers<[1], [0], [0], [1], [0, 0, 1, 1], [], []>} : vector<1x256xbf16>, vector<256x2xbf16>, vector<1x2xf32> -> vector<1x2xf32>
    %c0_166 = arith.constant 0 : index
    %c0_167 = arith.constant 0 : index
    %141 = vector.load %arg11[%c0_166, %c0_167] : memref<1x2xf32, #tpu.memory_space<vmem>>, vector<1x2xf32>
    %142 = arith.addf %140, %141 : vector<1x2xf32>
    %143 = vector.shape_cast %142 : vector<1x2xf32> to vector<1x1x2xf32>
    %c0_168 = arith.constant 0 : index
    %c0_169 = arith.constant 0 : index
    %c0_170 = arith.constant 0 : index
    %144 = vector.load %arg12[%c0_168, %c0_169, %c0_170] : memref<1x1x2xf32, #tpu.memory_space<vmem>>, vector<1x1x2xf32>
    tpu.vector_store %arg12[%c0_168, %c0_169, %c0_170], %143 {strides = array<i32>} : memref<1x1x2xf32, #tpu.memory_space<vmem>>, vector<1x1x2xf32>,
    return
  }
  func.func @transform_0(%arg0: i32) -> (i32, i32, i32) {
    %c0_i32 = arith.constant 0 : i32
    %c0_i32_0 = arith.constant 0 : i32
    %c0_i32_1 = arith.constant 0 : i32
    return %arg0, %c0_i32, %c0_i32_0 : i32, i32, i32
  }
  func.func @transform_1(%arg0: i32) -> (i32, i32) {
    %c0_i32 = arith.constant 0 : i32
    %c0_i32_0 = arith.constant 0 : i32
    %c0_i32_1 = arith.constant 0 : i32
    return %c0_i32, %c0_i32_0 : i32, i32
  }
  func.func @transform_2(%arg0: i32) -> (i32, i32) {
    %c0_i32 = arith.constant 0 : i32
    %c0_i32_0 = arith.constant 0 : i32
    %c0_i32_1 = arith.constant 0 : i32
    return %c0_i32, %c0_i32_0 : i32, i32
  }
  func.func @transform_3(%arg0: i32) -> (i32, i32) {
    %c0_i32 = arith.constant 0 : i32
    %c0_i32_0 = arith.constant 0 : i32
    %c0_i32_1 = arith.constant 0 : i32
    return %c0_i32, %c0_i32_0 : i32, i32
  }
  func.func @transform_4(%arg0: i32) -> (i32, i32) {
    %c0_i32 = arith.constant 0 : i32
    %c0_i32_0 = arith.constant 0 : i32
    %c0_i32_1 = arith.constant 0 : i32
    return %c0_i32, %c0_i32_0 : i32, i32
  }
  func.func @transform_5(%arg0: i32) -> (i32, i32) {
    %c0_i32 = arith.constant 0 : i32
    %c0_i32_0 = arith.constant 0 : i32
    %c0_i32_1 = arith.constant 0 : i32
    return %c0_i32, %c0_i32_0 : i32, i32
  }
  func.func @transform_6(%arg0: i32) -> (i32, i32) {
    %c0_i32 = arith.constant 0 : i32
    %c0_i32_0 = arith.constant 0 : i32
    %c0_i32_1 = arith.constant 0 : i32
    return %c0_i32, %c0_i32_0 : i32, i32
  }
  func.func @transform_7(%arg0: i32) -> (i32, i32) {
    %c0_i32 = arith.constant 0 : i32
    %c0_i32_0 = arith.constant 0 : i32
    %c0_i32_1 = arith.constant 0 : i32
    return %c0_i32, %c0_i32_0 : i32, i32
  }
  func.func @transform_8(%arg0: i32) -> (i32, i32) {
    %c0_i32 = arith.constant 0 : i32
    %c0_i32_0 = arith.constant 0 : i32
    %c0_i32_1 = arith.constant 0 : i32
    return %c0_i32, %c0_i32_0 : i32, i32
  }
  func.func @transform_9(%arg0: i32) -> (i32, i32) {
    %c0_i32 = arith.constant 0 : i32
    %c0_i32_0 = arith.constant 0 : i32
    %c0_i32_1 = arith.constant 0 : i32
    return %c0_i32, %c0_i32_0 : i32, i32
  }
  func.func @transform_10(%arg0: i32) -> (i32, i32) {
    %c0_i32 = arith.constant 0 : i32
    %c0_i32_0 = arith.constant 0 : i32
    %c0_i32_1 = arith.constant 0 : i32
    return %c0_i32, %c0_i32_0 : i32, i32
  }
  func.func @transform_11(%arg0: i32) -> (i32, i32, i32) {
    %c0_i32 = arith.constant 0 : i32
    %c0_i32_0 = arith.constant 0 : i32
    %c0_i32_1 = arith.constant 0 : i32
    return %arg0, %c0_i32, %c0_i32_0 : i32, i32, i32
  }
}

</mosaic_0001>

<bundles_post_ra>
// kernel: cnn_forward.1
= control target key start
LH: loop header
LB: loop body
LE: loop exit
PB: predicated region body
PF: predicated region fallthrough
CT: control target
= control target key end

     0   :  { %s16675_s0 = inlined_call_operand.vmem [shape: bf16[2,1024,72], index: 0, kind: input, shape index: {}]   ;;  %s16676_s1 = inlined_call_operand.vmem [shape: bf16[72,32], index: 1, kind: input, shape index: {}]   ;;  %s16677_s2 = inlined_call_operand.vmem [shape: f32[1,32], index: 2, kind: input, shape index: {}]   ;;  %s16678_s3 = inlined_call_operand.vmem [shape: bf16[288,64], index: 3, kind: input, shape index: {}]   ;;  %s16679_s4 = inlined_call_operand.vmem [shape: f32[1,64], index: 4, kind: input, shape index: {}]   ;;  %s16680_s5 = inlined_call_operand.vmem [shape: bf16[576,128], index: 5, kind: input, shape index: {}]   ;;  %s16681_s6 = inlined_call_operand.vmem [shape: f32[1,128], index: 6, kind: input, shape index: {}]   ;;  %s16682_s7 = inlined_call_operand.vmem [shape: bf16[2048,256], index: 7, kind: input, shape index: {}]   ;;  %s16683_s8 = inlined_call_operand.vmem [shape: f32[1,256], index: 8, kind: input, shape index: {}]   ;;  %s16684_s9 = inlined_call_operand.vmem [shape: bf16[256,2], index: 9, kind: input, shape index: {}]   ;;  %s16685_s10 = inlined_call_operand.vmem [shape: f32[1,2], index: 10, kind: input, shape index: {}]   ;;  %s16686_s11 = inlined_call_operand.hbm [shape: f32[2,1,2], index: 11, kind: output, shape index: {}]  }
   0x1   :  { %16789 = sst [smem:[#allocation69_spill]] %s16675_s0 }
   0x2   :  { %16 = vsyncpa [#allocation8], 0 }
   0x3   :  { %18 = vsyncpa [#allocation8 + $0x1], 0  ;;  %s11731_s17 = smov 0   ;;  %s11733_s18 = smov 0  }
   0x4   :  { %s11735_s19 = smov 0   ;;  %s11737_s20 = smov 0  }
   0x5 LB: > { %s11752_s21 = sadd.s32 4294967295, %s11664_s20   ;;  %s9617_s22 = sadd.s32 4294967294, %s11664_s20   ;;  %s11664_s20 = sphi %s11737_s20, %s17057_s20   ;;  %s11660_s19 = sphi %s11735_s19, %s17056_s19   ;;  %s11656_s18 = sphi %s11733_s18, %s17055_s18   ;;  %s11652_s17 = sphi %s11731_s17, %s17054_s17  }
   0x6   : > { %s11756_s23 = sadd.s32 1, %s11664_s20   ;;  %s267_s24 = sadd.s32 1, %s11660_s19 }
   0x7   : > { %s264_s25 = ssub.s32 %s11664_s20, %s11756_s23  ;;  %p277_p0 = scmp.ne.s32.totalorder %s11660_s19, %s11656_s18 }
   0x8   : > { %p265_p1 = scmp.eq.s32.totalorder %s264_s25, 0  ;;  %p278_p2 = scmp.eq.s32.totalorder %s11752_s21, 1 }
   0x9   : > { %p283_p3 = scmp.ne.s32.totalorder %s11656_s18, %s11652_s17  ;;  %p284_p4 = scmp.eq.s32.totalorder %s9617_s22, 1 }
   0xa   : > { %s11767_s26 = scalar_select %p265_p1, %s11660_s19, %s267_s24  }
   0xb   : > { %p11769_p5 = por %p278_p2, %p277_p0  ;;  %p11773_p6 = por %p284_p4, %p283_p3 }
   0xc   : > { %p9620_p7 = scmp.ge.s32.totalorder %s11664_s20, 1  ;;  %p340_p8 = scmp.lt.s32.totalorder %s11664_s20, 3 }
   0xe   : > { %p341_p9 = pnand %p9620_p7, %p340_p8 }
  0x10   : > { %344 = sbr.rel (%p341_p9) target bundleno = 2347 (0x92b), region = 64 }
  0x17   : > { %v11000_v0 = vld [vmem:[%s16676_s1] sm:$0xff]   ;;  %v11001_v1 = vld [vmem:[%s16676_s1 + $0x8] sm:$0xff]   ;;  %p379_p10 = scmp.lt.s32.totalorder %s11752_s21, 1  ;;  %v11002_v2 = vld [vmem:[%s16676_s1 + $0x10] sm:$0xff]   ;;  %s16792_s0 = sld [smem:[#allocation69_spill]]  ;;  %vm876_vm0 = vcmask 588800  }
  0x18   : > { %10734 = vmatprep.subr.bf16.mxu0 %v11000_v0  ;;  %v11003_v4 = vld [vmem:[%s16676_s1 + $0x18] sm:$0xff]   ;;  %v11004_v5 = vld [vmem:[%s16676_s1 + $0x20] ss:$0 sps:$4 sm:$0xff]   ;;  %vm1069_vm1 = vcmask 1043456   ;;  %vm2168_vm2 = vcmask 257024   ;;  %v16687_v35 = vmov 0  }
  0x19   : > { %10735 = vmatpush3.bf16.msra.mxu0 %v11000_v0  ;;  %s380_s14 = scalar_select %p379_p10, %s11752_s21, 1  ;;  %v1071_v6 = vsel %vm1069_vm1, %v11004_v5, 0  ;;  %2169 = vst.msk [vmem:[#allocation2 + $0x8] sm:$0xf] %vm2168_vm2, %v16687_v35  ;;  %2170 = vst.msk [vmem:[#allocation2 + $0xc] sm:$0xf] %vm2168_vm2, %v16687_v35 }
  0x1a   : > { %10736 = vmatprep.subr.bf16.mxu0 %v11001_v1  ;;  %2181 = vst.msk [vmem:[#allocation2 + $0x15c] sm:$0xf] %vm2168_vm2, %v16687_v35  ;;  %2182 = vst.msk [vmem:[#allocation2 + $0x160] sm:$0xf] %vm2168_vm2, %v16687_v35  ;;  %vm2171_vm3 = vcmask 253952   ;;  %vm2162_vm9 = vcmask 257027  }
  0x1b   : > { %s10392_s22 = sshll.u32 %s380_s14, 9  ;;  %vm2172_vm4 = vsmask.f32 256  ;;  %v2174_v37 = vld [vmem:[#allocation2 + $0x10] sm:$0x1]  ;;  %s16747_s15 = smov 64  }
  0x1c   : > { %vm11866_vm5 = vmand %vm2171_vm3, %vm2172_vm4  ;;  %vm2861_vm6 = vsmask.f32 3328  ;;  %vm2862_vm7 = vsmask.f32 7440  ;;  %vm2163_vm10 = vsmask.f32 7950 }
  0x1d   : > { %s11793_s29 = scalar_lea.vmem %s16792_s0, %s10392_s22  ;;  %10737 = vmatpush3.bf16.msra.mxu0 %v11001_v1  ;;  %v2175_v38 = vsel %vm11866_vm5, 0, %v2174_v37  ;;  %vm11887_vm8 = vmor %vm2861_vm6, %vm2862_vm7  ;;  %v2187_v60 = vld [vmem:[#allocation2 + $0x18] sm:$0x8]  ;;  %s11668_s24 = smov 32   ;;  %vm1746_vm12 = vcmask 261120   ;;  %vm5137_vm15 = vcmask 523264  }
  0x1e   : > { %v11005_v3 = vld [vmem:[%s11793_s29] sm:$0xff]   ;;  %10738 = vmatprep.subr.bf16.mxu0 %v11002_v2  ;;  %v11006_v7 = vld [vmem:[%s11793_s29 + $0x8] sm:$0xff]   ;;  %v11007_v8 = vld [vmem:[%s11793_s29 + $0x10] sm:$0xff]   ;;  %2176 = vst [vmem:[#allocation2 + $0x10] sm:$0x1] %v2175_v38  ;;  %s17005_s25 = smov 64  }
  0x1f   : > { %10744 = vmatprep.mubr.msk.bf16.mxu0 %vm876_vm0, %v11005_v3  ;;  %v11008_v9 = vld [vmem:[%s11793_s29 + $0x18] sm:$0xff]   ;;  %v11009_v10 = vld [vmem:[%s11793_s29 + $0x20] sm:$0xff]   ;;  %v11010_v11 = vld [vmem:[%s11793_s29 + $0x28] sm:$0xff]   ;;  %vm2491_vm13 = vsmask.f32 4368  ;;  %s377_s22 = sand.u32 1, %s11656_s18  }
  0x20   : > { %v11011_v12 = vld [vmem:[%s11793_s29 + $0x30] sm:$0xff]   ;;  %v11012_v13 = vld [vmem:[%s11793_s29 + $0x38] sm:$0xff]   ;;  %v11013_v14 = vld [vmem:[%s11793_s29 + $0x40] sm:$0xff]   ;;  %s10389_s30 = sshll.u32 %s11752_s21, 4 }
  0x21   : > { %10739 = vmatpush3.bf16.msra.mxu0 %v11002_v2  ;;  %v11014_v15 = vld [vmem:[%s11793_s29 + $0x48] sm:$0xff]   ;;  %v11015_v16 = vld [vmem:[%s11793_s29 + $0x50] sm:$0xff]   ;;  %v11016_v17 = vld [vmem:[%s11793_s29 + $0x58] sm:$0xff]   ;;  %s16633_s16 = scalar_lea.hbm %s16686_s11, %s10389_s30 }
  0x22   : > { %10740 = vmatprep.subr.bf16.mxu0 %v11003_v4  ;;  %v11017_v18 = vld [vmem:[%s11793_s29 + $0x60] sm:$0xff]   ;;  %v11018_v19 = vld [vmem:[%s11793_s29 + $0x68] sm:$0xff]   ;;  %v11019_v20 = vld [vmem:[%s11793_s29 + $0x70] sm:$0xff]  }
  0x23   : > { %v11020_v21 = vld [vmem:[%s11793_s29 + $0x78] sm:$0xff]   ;;  %v11021_v22 = vld [vmem:[%s11793_s29 + $0x80] sm:$0xff]   ;;  %v11022_v23 = vld [vmem:[%s11793_s29 + $0x88] sm:$0xff]  }
  0x24   : > { %v11023_v24 = vld [vmem:[%s11793_s29 + $0x90] sm:$0xff]   ;;  %v11024_v25 = vld [vmem:[%s11793_s29 + $0x98] sm:$0xff]   ;;  %v11025_v26 = vld [vmem:[%s11793_s29 + $0xa0] sm:$0xff]  }
  0x25   : > { %10741 = vmatpush3.bf16.msra.mxu0 %v11003_v4  ;;  %v11026_v27 = vld [vmem:[%s11793_s29 + $0xa8] sm:$0xff]   ;;  %v11027_v28 = vld [vmem:[%s11793_s29 + $0xb0] sm:$0xff]   ;;  %v11028_v29 = vld [vmem:[%s11793_s29 + $0xb8] sm:$0xff]  }
  0x26   : > { %10956 = vmatprep.subr.msk.bf16.mxu0 %vm1069_vm1, %v11004_v5  ;;  %v11029_v30 = vld [vmem:[%s11793_s29 + $0xc0] sm:$0xff]   ;;  %v11030_v31 = vld [vmem:[%s11793_s29 + $0xc8] sm:$0xff]   ;;  %v11031_v32 = vld [vmem:[%s11793_s29 + $0xd0] sm:$0xff]   ;;  %vm6008_vm1 = vcmask 519168  }
  0x27   : > { %v11032_v33 = vld [vmem:[%s11793_s29 + $0xd8] sm:$0xff]   ;;  %v11033_v34 = vld [vmem:[%s11793_s29 + $0xe0] sm:$0xff]   ;;  %v11034_v39 = vld [vmem:[%s11793_s29 + $0xe8] sm:$0xff]  }
  0x28   : > { %v11875_v40 = vld [vmem:[#allocation2 + $0x8] sm:$0xf]  ;;  %v2445_v41 = vld [vmem:[#allocation2 + $0xc] sm:$0xf]  ;;  %v11035_v42 = vld [vmem:[%s11793_s29 + $0xf0] sm:$0xff]  }
  0x29   : > { %10743 = vmatpush3.bf16.msra.mxu0 %v1071_v6  ;;  %v2499_v43 = vshrl.u32 %v11875_v40, 16  ;;  %v16689_v44 = vshll.u32 %v11875_v40, 16  ;;  %v2508_v45 = vshrl.u32 %v2445_v41, 16  ;;  %v2511_v46 = vshll.u32 %v2445_v41, 16  ;;  %v2845_v51 = vld [vmem:[#allocation2 + $0x10] sm:$0x1]  ;;  %vm11895_vm11 = vmand %vm2162_vm9, %vm2163_vm10 }
  0x2a   : > { %v2874_v54 = vshll.u32 %v2845_v51, 16  ;;  %v11036_v55 = vld [vmem:[%s11793_s29 + $0xf8] sm:$0xff]   ;;  %v11037_v61 = vld [vmem:[%s11793_s29 + $0x100] sm:$0xff]   ;;  %v2188_v1 = vsel %vm11895_vm11, 0, %v2187_v60  ;;  %v11038_v3 = vld [vmem:[%s11793_s29 + $0x108] sm:$0xff]  }
  0x2b   : > { %v2864_v47 = vrot.slane %v2499_v43, 4  ;;  %v2865_v48 = vrot.slane %v16689_v44, 5  ;;  %v2868_v49 = vrot.slane %v2511_v46, 5  ;;  %v2870_v50 = vrot.slane %v2508_v45, 4  ;;  %2189 = vst [vmem:[#allocation2 + $0x18] sm:$0x8] %v2188_v1  ;;  %vm12171_vm14 = vmor %vm2172_vm4, %vm2491_vm13 }
  0x2c   : > { %10745 = vmatmul.mubr.msk.bf16.vlgmr.msra.gmra.mrb[0].mxu0 %vm876_vm0, %v11006_v7  ;;  %v2876_v59 = vrot.slane %v2874_v54, 5  ;;  %v11039_v4 = vld [vmem:[%s11793_s29 + $0x110] sm:$0xff]   ;;  %v2235_v5 = vld [vmem:[#allocation2 + $0x24] sm:$0x1]  ;;  %v2510_v7 = vrot.slane %v2508_v45, 7  ;;  %v11054_v38 = vld [vmem:[%s11793_s29 + $0x188] sm:$0xff]  }
  0x2d   : > { %10748 = vmatprep.mubr.msk.bf16.mxu0 %vm876_vm0, %v11007_v8  ;;  %v2866_v52 = vor.u32 %v2865_v48, %v2864_v47  ;;  %v2871_v53 = vor.u32 %v2870_v50, %v2868_v49  ;;  %v2236_v6 = vsel %vm11866_vm5, 0, %v2235_v5  ;;  %v9853_v8 = vcombine.low %v11875_v40, %v2445_v41  ;;  %v11053_v37 = vld [vmem:[%s11793_s29 + $0x180] sm:$0xff]   ;;  %v2196_v41 = vld [vmem:[#allocation2 + $0x54] sm:$0x8]  ;;  %v11056_v45 = vld [vmem:[%s11793_s29 + $0x198] sm:$0xff]  }
  0x2e   : > { %2237 = vst [vmem:[#allocation2 + $0x24] sm:$0x1] %v2236_v6  ;;  %v2244_v47 = vld [vmem:[#allocation2 + $0x60] sm:$0x1]  ;;  %v11059_v50 = vld [vmem:[%s11793_s29 + $0x1b0] sm:$0xff]   ;;  %v11062_v5 = vld [vmem:[%s11793_s29 + $0x1c8] sm:$0xff]  }
  0x2f   : > { %v2867_v56 = vrot.slane %v2866_v52, 4  ;;  %v2872_v57 = vrot.slane %v2871_v53, 4  ;;  %4497 = vrot.lane.b32.xlu0 %v9853_v8, %s11668_s24  ;;  %v2245_v48 = vsel %vm11866_vm5, 0, %v2244_v47  ;;  %v11060_v53 = vld [vmem:[%s11793_s29 + $0x1b8] sm:$0xff]   ;;  %v11984_v54 = vld [vmem:[%s16677_s2] ss:$0 sm:$0xff] }
  0x30   : > { %2246 = vst [vmem:[#allocation2 + $0x60] sm:$0x1] %v2245_v48  ;;  %v11150_v58 = vld [vmem:[%s16680_s5 + $0xc8] sm:$0xff]  }
  0x31   : > { %v2869_v62 = vsel %vm11887_vm8, %v2867_v56, %v2868_v49  ;;  %v2877_v0 = vsel %vm11887_vm8, %v2872_v57, %v2876_v59  ;;  %v11058_v49 = vld [vmem:[%s11793_s29 + $0x1a8] sm:$0xff]   ;;  %v11061_v56 = vld [vmem:[%s11793_s29 + $0x1c0] sm:$0xff]  }
  0x32   : > { %v9869_v2 = vcombine.low %v2869_v62, %v2877_v0  ;;  %v11987_v59 = vld [vmem:[#allocation2 + $0x18] sm:$0x8] }
  0x33   : > { %v3137_v6 = vshrl.u32 %v11987_v59, 16 }
  0x34   : > { %10749 = vmatmul.mubr.msk.bf16.gmra.mrb[4].mxu0 %vm876_vm0, %v11008_v9  ;;  %4577 = vrot.lane.b32.xlu1 %v9869_v2, %s16747_s15  ;;  %v11040_v9 = vld [vmem:[%s11793_s29 + $0x118] sm:$0xff]  }
  0x35   : > { %10752 = vmatprep.mubr.msk.bf16.mxu0 %vm876_vm0, %v11009_v10  ;;  %v11914_v10 = vor.u32 %v2511_v46, %v2510_v7  ;;  %v11057_v46 = vld [vmem:[%s11793_s29 + $0x1a0] sm:$0xff]  }
  0x36   : > { %v11993_v62 = vld [vmem:[#allocation2 + $0x24] sm:$0x1] }
  0x3c   : > { %10753 = vmatmul.mubr.msk.bf16.gmra.mrb[8].mxu0 %vm876_vm0, %v11010_v11  ;;  %v11041_v11 = vld [vmem:[%s11793_s29 + $0x120] sm:$0xff]  }
  0x3d   : > { %10756 = vmatprep.mubr.msk.bf16.mxu0 %vm876_vm0, %v11011_v12  ;;  %v11069_v12 = vld [vmem:[%s16678_s3 + $0x40] sm:$0xff]  }
  0x3e   : > { %10494 = vmatprep.subr.bf16.mxu0 %v11069_v12  ;;  %v12010_v12 = vrot.slane %v2499_v43, 7 }
  0x44   : > { %10757 = vmatmul.mubr.msk.bf16.gmra.mrb[12].mxu0 %vm876_vm0, %v11012_v13  ;;  %v11070_v13 = vld [vmem:[%s16678_s3] sm:$0xff]  }
  0x45   : > { %10760 = vmatprep.mubr.msk.bf16.mxu0 %vm876_vm0, %v11013_v14  ;;  %10495 = vmatpush3.bf16.msra.mxu0 %v11070_v13  ;;  %v11042_v14 = vld [vmem:[%s11793_s29 + $0x128] sm:$0xff]  }
  0x4c   : > { %10761 = vmatmul.mubr.msk.bf16.gmra.mrb[16].mxu0 %vm876_vm0, %v11014_v15  ;;  %v11043_v15 = vld [vmem:[%s11793_s29 + $0x130] sm:$0xff]  }
  0x4d   : > { %10764 = vmatprep.mubr.msk.bf16.mxu0 %vm876_vm0, %v11015_v16  ;;  %v2190_v16 = vld [vmem:[#allocation2 + $0x2c] sm:$0x8] }
  0x54   : > { %10765 = vmatmul.mubr.msk.bf16.gmra.mrb[20].mxu0 %vm876_vm0, %v11016_v17  ;;  %v11044_v17 = vld [vmem:[%s11793_s29 + $0x138] sm:$0xff]  }
  0x55   : > { %10768 = vmatprep.mubr.msk.bf16.mxu0 %vm876_vm0, %v11017_v18  ;;  %v2191_v18 = vsel %vm11895_vm11, 0, %v2190_v16  ;;  %v11081_v16 = vld [vmem:[%s16678_s3 + $0x10] sm:$0xff]  }
  0x56   : > { %2192 = vst [vmem:[#allocation2 + $0x2c] sm:$0x8] %v2191_v18 }
  0x5c   : > { %10769 = vmatmul.mubr.msk.bf16.gmra.mrb[24].mxu0 %vm876_vm0, %v11018_v19  ;;  %v2238_v19 = vld [vmem:[#allocation2 + $0x38] sm:$0x1] }
  0x5d   : > { %10772 = vmatprep.mubr.msk.bf16.mxu0 %vm876_vm0, %v11019_v20  ;;  %v11045_v20 = vld [vmem:[%s11793_s29 + $0x140] sm:$0xff]   ;;  %v11997_v1 = vld [vmem:[#allocation2 + $0x2c] sm:$0x8] }
  0x5e   : > { %v11999_v2 = vld [vmem:[#allocation2 + $0x2c] sm:$0x8]  ;;  %v3778_v43 = vshrl.u32 %v11997_v1, 16 }
  0x64   : > { %10773 = vmatmul.mubr.msk.bf16.gmra.mrb[28].mxu0 %vm876_vm0, %v11020_v21  ;;  %v2239_v21 = vsel %vm11866_vm5, 0, %v2238_v19 }
  0x65   : > { %10776 = vmatprep.mubr.msk.bf16.mxu0 %vm876_vm0, %v11021_v22  ;;  %2240 = vst [vmem:[#allocation2 + $0x38] sm:$0x1] %v2239_v21  ;;  %v11046_v22 = vld [vmem:[%s11793_s29 + $0x148] sm:$0xff]   ;;  %v3159_v21 = vshrl.u32 %v11999_v2, 16 }
  0x6c   : > { %10777 = vmatmul.mubr.msk.bf16.gmra.mrb[32].mxu0 %vm876_vm0, %v11022_v23  ;;  %v11047_v23 = vld [vmem:[%s11793_s29 + $0x150] sm:$0xff]  }
  0x6d   : > { %10780 = vmatprep.mubr.msk.bf16.mxu0 %vm876_vm0, %v11023_v24  ;;  %v11048_v24 = vld [vmem:[%s11793_s29 + $0x158] sm:$0xff]  }
  0x74   : > { %10781 = vmatmul.mubr.msk.bf16.gmra.mrb[36].mxu0 %vm876_vm0, %v11024_v25  ;;  %v11049_v25 = vld [vmem:[%s11793_s29 + $0x160] sm:$0xff]  }
  0x75   : > { %10784 = vmatprep.mubr.msk.bf16.mxu0 %vm876_vm0, %v11025_v26  ;;  %v11074_v26 = vld [vmem:[%s16678_s3 + $0x48] sm:$0xff]  }
  0x76   : > { %10496 = vmatprep.subr.bf16.mxu0 %v11074_v26  ;;  %v2247_v26 = vld [vmem:[#allocation2 + $0x74] sm:$0x1] }
  0x7c   : > { %10785 = vmatmul.mubr.msk.bf16.gmra.mrb[40].mxu0 %vm876_vm0, %v11026_v27  ;;  %v11050_v27 = vld [vmem:[%s11793_s29 + $0x168] sm:$0xff]  }
  0x7d   : > { %10788 = vmatprep.mubr.msk.bf16.mxu0 %vm876_vm0, %v11027_v28  ;;  %v2193_v28 = vld [vmem:[#allocation2 + $0x40] sm:$0x8] }
  0x84   : > { %10789 = vmatmul.mubr.msk.bf16.gmra.mrb[44].mxu0 %vm876_vm0, %v11028_v29  ;;  %v11051_v29 = vld [vmem:[%s11793_s29 + $0x170] sm:$0xff]  }
  0x85   : > { %10792 = vmatprep.mubr.msk.bf16.mxu0 %vm876_vm0, %v11029_v30  ;;  %v2241_v30 = vld [vmem:[#allocation2 + $0x4c] sm:$0x1] }
  0x8c   : > { %10793 = vmatmul.mubr.msk.bf16.gmra.mrb[48].mxu0 %vm876_vm0, %v11030_v31  ;;  %v2194_v31 = vsel %vm11895_vm11, 0, %v2193_v28 }
  0x8d   : > { %10796 = vmatprep.mubr.msk.bf16.mxu0 %vm876_vm0, %v11031_v32  ;;  %v11075_v32 = vld [vmem:[%s16678_s3 + $0x8] sm:$0xff]   ;;  %2195 = vst [vmem:[#allocation2 + $0x40] sm:$0x8] %v2194_v31  ;;  %v2248_v31 = vsel %vm11866_vm5, 0, %v2247_v26  ;;  %v12069_v26 = vld [vmem:[#allocation2 + $0x60] sm:$0x1] }
  0x8e   : > { %10497 = vmatpush3.bf16.msra.mxu0 %v11075_v32  ;;  %2249 = vst [vmem:[#allocation2 + $0x74] sm:$0x1] %v2248_v31 }
  0x94   : > { %10797 = vmatmul.mubr.msk.bf16.gmra.mrb[52].mxu0 %vm876_vm0, %v11032_v33  ;;  %v2242_v33 = vsel %vm11866_vm5, 0, %v2241_v30 }
  0x95   : > { %10800 = vmatprep.mubr.msk.bf16.mxu0 %vm876_vm0, %v11033_v34  ;;  %2243 = vst [vmem:[#allocation2 + $0x4c] sm:$0x1] %v2242_v33  ;;  %v11052_v34 = vld [vmem:[%s11793_s29 + $0x178] sm:$0xff]  }
  0x9c   : > { %10801 = vmatmul.mubr.msk.bf16.gmra.mrb[56].mxu0 %vm876_vm0, %v11034_v39  ;;  %v11055_v39 = vld [vmem:[%s11793_s29 + $0x190] sm:$0xff]  }
  0x9d   : > { %10804 = vmatprep.mubr.msk.bf16.mxu0 %vm876_vm0, %v11035_v42  ;;  %v2197_v42 = vsel %vm11895_vm11, 0, %v2196_v41 }
  0x9e   : > { %2198 = vst [vmem:[#allocation2 + $0x54] sm:$0x8] %v2197_v42 }
  0xa4   : > { %10805 = vmatmul.mubr.msk.bf16.gmra.mrb[60].mxu0 %vm876_vm0, %v11036_v55 }
  0xa5   : > { %10808 = vmatprep.mubr.msk.bf16.mxu0 %vm876_vm0, %v11037_v61  ;;  %v11991_v61 = vld [vmem:[#allocation2 + $0x24] sm:$0x1] }
  0xa6   : > { %v3514_v13 = vshll.u32 %v11991_v61, 16 }
  0xac   : > { %10809 = vmatmul.mubr.msk.bf16.gmra.mrb[64].mxu0 %vm876_vm0, %v11038_v3  ;;  %v2199_v3 = vld [vmem:[#allocation2 + $0x68] sm:$0x8] }
  0xad   : > { %10812 = vmatprep.mubr.msk.bf16.mxu0 %vm876_vm0, %v11039_v4  ;;  %v2200_v7 = vsel %vm11895_vm11, 0, %v2199_v3  ;;  %v11064_v3 = vld [vmem:[%s11793_s29 + $0x1d8] sm:$0xff]  }
  0xae   : > { %2201 = vst [vmem:[#allocation2 + $0x68] sm:$0x8] %v2200_v7 }
  0xb4   : > { %10813 = vmatmul.mubr.msk.bf16.gmra.mrb[68].mxu0 %vm876_vm0, %v11040_v9 }
  0xb5   : > { %10816 = vmatprep.mubr.msk.bf16.mxu0 %vm876_vm0, %v11041_v11  ;;  %v11063_v11 = vld [vmem:[%s11793_s29 + $0x1d0] sm:$0xff]  }
  0xbc   : > { %10817 = vmatmul.mubr.msk.bf16.gmra.mrb[72].mxu0 %vm876_vm0, %v11042_v14  ;;  %v2888_v14 = vshll.u32 %v11993_v62, 16 }
  0xbd   : > { %10820 = vmatprep.mubr.msk.bf16.mxu0 %vm876_vm0, %v11043_v15  ;;  %v11080_v15 = vld [vmem:[%s16678_s3 + $0x50] sm:$0xff]  }
  0xbe   : > { %10498 = vmatprep.subr.bf16.mxu0 %v11080_v15  ;;  %v12045_v7 = vrot.slane %v2888_v14, 5 }
  0xbf   : > { %10499 = vmatpush3.bf16.msra.mxu0 %v11081_v16 }
  0xc4   : > { %10821 = vmatmul.mubr.msk.bf16.gmra.mrb[76].mxu0 %vm876_vm0, %v11044_v17 }
  0xc5   : > { %10824 = vmatprep.mubr.msk.bf16.mxu0 %vm876_vm0, %v11045_v20  ;;  %v3489_v20 = vld [vmem:[#allocation2 + $0x38] sm:$0x1] }
  0xcc   : > { %10825 = vmatmul.mubr.msk.bf16.gmra.mrb[80].mxu0 %vm876_vm0, %v11046_v22 }
  0xcd   : > { %10828 = vmatprep.mubr.msk.bf16.mxu0 %vm876_vm0, %v11047_v23 }
  0xd4   : > { %10829 = vmatmul.mubr.msk.bf16.gmra.mrb[84].mxu0 %vm876_vm0, %v11048_v24 }
  0xd5   : > { %10832 = vmatprep.mubr.msk.bf16.mxu0 %vm876_vm0, %v11049_v25  ;;  %v2847_v25 = vld [vmem:[#allocation2 + $0x38] sm:$0x1] }
  0xd6   : > { %v2902_v42 = vshll.u32 %v2847_v25, 16 }
  0xdc   : > { %10833 = vmatmul.mubr.msk.bf16.gmra.mrb[88].mxu0 %vm876_vm0, %v11050_v27 }
  0xdd   : > { %10836 = vmatprep.mubr.msk.bf16.mxu0 %vm876_vm0, %v11051_v29 }
  0xe4   : > { %10837 = vmatmul.mubr.msk.bf16.gmra.mrb[92].mxu0 %vm876_vm0, %v11052_v34 }
  0xe5   : > { %10840 = vmatprep.mubr.msk.bf16.mxu0 %vm876_vm0, %v11053_v37  ;;  %v3528_v37 = vshll.u32 %v3489_v20, 16  ;;  %v12057_v20 = vrot.slane %v2902_v42, 5 }
  0xec   : > { %10841 = vmatmul.mubr.msk.bf16.gmra.mrb[96].mxu0 %vm876_vm0, %v11054_v38 }
  0xed   : > { %10844 = vmatprep.mubr.msk.bf16.mxu0 %vm876_vm0, %v11055_v39 }
  0xf4   : > { %10845 = vmatmul.mubr.msk.bf16.gmra.mrb[100].mxu0 %vm876_vm0, %v11056_v45  ;;  %v3732_v45 = vld [vmem:[#allocation2 + $0x40] sm:$0x8] }
  0xf5   : > { %10848 = vmatprep.mubr.msk.bf16.mxu0 %vm876_vm0, %v11057_v46  ;;  %v3800_v62 = vshrl.u32 %v3732_v45, 16  ;;  %v3556_v45 = vshll.u32 %v12069_v26, 16 }
  0xfc   : > { %10849 = vmatmul.mubr.msk.bf16.gmra.mrb[104].mxu0 %vm876_vm0, %v11058_v49 }
  0xfd   : > { %10852 = vmatprep.mubr.msk.bf16.mxu0 %vm876_vm0, %v11059_v50  ;;  %v3094_v50 = vld [vmem:[#allocation2 + $0x40] sm:$0x8] }
  0xfe   : > { %v3181_v16 = vshrl.u32 %v3094_v50, 16 }
  0xff   : > { %v10746_v51 = vpop.f32.mrb[0].mxu0 }
 0x100   : > { %v1107_v52 = vpop.f32.mrb[1].mxu0  ;;  %v1116_v60 = vadd.f32 %v10746_v51, %v11984_v54 }
 0x101   : > { %v10747_v55 = vpop.f32.mrb[2].mxu0  ;;  %v1108_v0 = vadd.f32 %v11984_v54, %v1107_v52 }
 0x102   : > { %v1110_v57 = vpop.f32.mrb[3].mxu0  ;;  %v1119_v4 = vadd.f32 %v10747_v55, %v11984_v54  ;;  %v1620_v17 = vmax.f32 %v1116_v60, 0.0  ;;  %v4130_v55 = vld [vmem:[#allocation2 + $0x4c] sm:$0x1] }
 0x103   : > { %v1111_v8 = vadd.f32 %v11984_v54, %v1110_v57  ;;  %v1618_v22 = vmax.f32 %v1108_v0, 0.0  ;;  %v2848_v0 = vld [vmem:[#allocation2 + $0x4c] sm:$0x1]  ;;  %v4169_v15 = vshll.u32 %v4130_v55, 16 }
 0x104   : > { %10853 = vmatmul.mubr.msk.bf16.gmra.mrb[108].mxu0 %vm876_vm0, %v11060_v53  ;;  %v1621_v27 = vmax.f32 %v1119_v4, 0.0  ;;  %v1753_v38 = vsel %vm1746_vm12, %v1620_v17, -inf  ;;  %v12041_v4 = vrot.slane %v3137_v6, 11  ;;  %v12053_v6 = vrot.slane %v3528_v37, 5 }
 0x105   : > { %10856 = vmatprep.mubr.msk.bf16.mxu0 %vm876_vm0, %v11061_v56  ;;  %v1619_v32 = vmax.f32 %v1111_v8, 0.0  ;;  %v1747_v46 = vsel %vm1746_vm12, %v1618_v22, -inf  ;;  %v3490_v56 = vld [vmem:[#allocation2 + $0x4c] sm:$0x1]  ;;  %v2916_v14 = vshll.u32 %v2848_v0, 16  ;;  %v12059_v22 = vrot.slane %v3800_v62, 11 }
 0x106   : > { %v1756_v51 = vsel %vm1746_vm12, %v1621_v27, -inf  ;;  %v3542_v17 = vshll.u32 %v3490_v56, 16 }
 0x107   : > { %v10750_v9 = vpop.f32.mrb[4].mxu0  ;;  %v1750_v57 = vsel %vm1746_vm12, %v1619_v32, -inf  ;;  %v12081_v32 = vrot.slane %v2916_v14, 5 }
 0x108   : > { %v1132_v18 = vadd.f32 %v10750_v9, %v11984_v54  ;;  %v1123_v19 = vpop.f32.mrb[5].mxu0 }
 0x109   : > { %v1124_v23 = vadd.f32 %v11984_v54, %v1123_v19  ;;  %v10751_v24 = vpop.f32.mrb[6].mxu0  ;;  %v12051_v19 = vrot.slane %v3778_v43, 11  ;;  %v12067_v43 = vld [vmem:[#allocation2 + $0x54] sm:$0x8] }
 0x10a   : > { %v1624_v28 = vmax.f32 %v1132_v18, 0.0  ;;  %v1135_v29 = vadd.f32 %v10751_v24, %v11984_v54  ;;  %v1126_v30 = vpop.f32.mrb[7].mxu0  ;;  %v12063_v24 = vld [vmem:[#allocation2 + $0x18] sm:$0x8]  ;;  %v3203_v42 = vshrl.u32 %v12067_v43, 16 }
 0x10b   : > { %v1622_v33 = vmax.f32 %v1124_v23, 0.0  ;;  %v1127_v34 = vadd.f32 %v11984_v54, %v1126_v30  ;;  %v12061_v23 = vld [vmem:[#allocation2 + $0x54] sm:$0x8]  ;;  %v12078_v30 = vrot.slane %v3542_v17, 5 }
 0x10c   : > { %v1754_v39 = vsel %vm1746_vm12, %v1624_v28, -inf  ;;  %v1625_v41 = vmax.f32 %v1135_v29, 0.0  ;;  %10857 = vmatmul.mubr.msk.bf16.gmra.mrb[112].mxu0 %vm876_vm0, %v11062_v5  ;;  %v12043_v5 = vrot.slane %v3514_v13, 5  ;;  %v12055_v13 = vrot.slane %v3159_v21, 11  ;;  %v12071_v21 = vld [vmem:[#allocation2 + $0x60] sm:$0x1] }
 0x10d   : > { %v1755_v47 = vmax.f32 %v1753_v38, %v1754_v39  ;;  %v1748_v48 = vsel %vm1746_vm12, %v1622_v33, -inf  ;;  %v1623_v49 = vmax.f32 %v1127_v34, 0.0  ;;  %10860 = vmatprep.mubr.msk.bf16.mxu0 %vm876_vm0, %v11063_v11  ;;  %v11065_v11 = vld [vmem:[%s11793_s29 + $0x1e0] sm:$0xff]   ;;  %v12074_v28 = vrot.slane %v4169_v15, 5  ;;  %v11066_v39 = vld [vmem:[%s11793_s29 + $0x1e8] sm:$0xff]  }
 0x10e   : > { %v1749_v52 = vmax.f32 %v1747_v46, %v1748_v48  ;;  %v1757_v53 = vsel %vm1746_vm12, %v1625_v41, -inf  ;;  %v12076_v29 = vrot.slane %v3181_v16, 11  ;;  %v3822_v33 = vshrl.u32 %v12061_v23, 16  ;;  %v11067_v41 = vld [vmem:[%s11793_s29 + $0x1f0] sm:$0xff]   ;;  %v3100_v15 = vld [vmem:[#allocation2 + $0x68] sm:$0x8] }
 0x10f   : > { %1941 = vst.msk [vmem:[#allocation4 + $0x10] sm:$0xff] %vm1746_vm12, %v1755_v47  ;;  %v1758_v59 = vmax.f32 %v1756_v51, %v1757_v53  ;;  %v1751_v60 = vsel %vm1746_vm12, %v1623_v49, -inf  ;;  %v10754_v61 = vpop.f32.mrb[8].mxu0  ;;  %v2930_v46 = vshll.u32 %v12071_v21, 16  ;;  %v2202_v16 = vld [vmem:[#allocation2 + $0x7c] sm:$0x8] }
 0x110   : > { %1939 = vst.msk [vmem:[#allocation4] sm:$0xff] %vm1746_vm12, %v1749_v52  ;;  %v1752_v1 = vmax.f32 %v1750_v57, %v1751_v60  ;;  %v1139_v2 = vpop.f32.mrb[9].mxu0  ;;  %v1148_v8 = vadd.f32 %v10754_v61, %v11984_v54  ;;  %v2203_v43 = vsel %vm11895_vm11, 0, %v2202_v16  ;;  %v2250_v23 = vld [vmem:[#allocation2 + $0x88] sm:$0x1] }
 0x111   : > { %1942 = vst.msk [vmem:[#allocation4 + $0x18] sm:$0xff] %vm1746_vm12, %v1758_v59  ;;  %v10755_v9 = vpop.f32.mrb[10].mxu0  ;;  %v1140_v25 = vadd.f32 %v11984_v54, %v1139_v2  ;;  %v3738_v2 = vld [vmem:[#allocation2 + $0x68] sm:$0x8]  ;;  %2204 = vst [vmem:[#allocation2 + $0x7c] sm:$0x8] %v2203_v43 }
 0x112   : > { %1940 = vst.msk [vmem:[#allocation4 + $0x8] sm:$0xff] %vm1746_vm12, %v1752_v1  ;;  %v1142_v18 = vpop.f32.mrb[11].mxu0  ;;  %v1628_v27 = vmax.f32 %v1148_v8, 0.0  ;;  %v1151_v31 = vadd.f32 %v10755_v9, %v11984_v54 }
 0x113   : > { %v1143_v37 = vadd.f32 %v11984_v54, %v1142_v18  ;;  %v1626_v49 = vmax.f32 %v1140_v25, 0.0  ;;  %v3492_v25 = vld [vmem:[#allocation2 + $0x74] sm:$0x1] }
 0x114   : > { %10861 = vmatmul.mubr.msk.bf16.gmra.mrb[116].mxu0 %vm876_vm0, %v11064_v3  ;;  %v1765_v56 = vsel %vm1746_vm12, %v1628_v27, -inf  ;;  %v1629_v61 = vmax.f32 %v1151_v31, 0.0 }
 0x115   : > { %10864 = vmatprep.mubr.msk.bf16.mxu0 %vm876_vm0, %v11065_v11  ;;  %v1627_v8 = vmax.f32 %v1143_v37, 0.0  ;;  %v1759_v26 = vsel %vm1746_vm12, %v1626_v49, -inf }
 0x117   : > { %v10758_v38 = vpop.f32.mrb[12].mxu0  ;;  %v1762_v49 = vsel %vm1746_vm12, %v1627_v8, -inf }
 0x118   : > { %v2005_v47 = vld [vmem:[#allocation4 + $0x10] ss:$2 sm:$0xff]  ;;  %v2069_v48 = vld [vmem:[#allocation4 + $0x11] ss:$2 sm:$0xff]  ;;  %v1164_v50 = vadd.f32 %v10758_v38, %v11984_v54  ;;  %v1155_v51 = vpop.f32.mrb[13].mxu0 }
 0x119   : > { %v2131_v52 = vmax.f32 %v2005_v47, %v2069_v48  ;;  %v2003_v53 = vld [vmem:[#allocation4] ss:$2 sm:$0xff]  ;;  %v2067_v55 = vld [vmem:[#allocation4 + $0x1] ss:$2 sm:$0xff]  ;;  %v1156_v57 = vadd.f32 %v11984_v54, %v1155_v51  ;;  %v10759_v59 = vpop.f32.mrb[14].mxu0  ;;  %v1768_v47 = vsel %vm1746_vm12, %v1629_v61, -inf }
 0x11a   : > { %v2130_v60 = vmax.f32 %v2003_v53, %v2067_v55  ;;  %v1632_v62 = vmax.f32 %v1164_v50, 0.0  ;;  %v1167_v0 = vadd.f32 %v10759_v59, %v11984_v54  ;;  %v1158_v1 = vpop.f32.mrb[15].mxu0  ;;  %v2850_v38 = vld [vmem:[#allocation2 + $0x74] sm:$0x1]  ;;  %v3844_v50 = vshrl.u32 %v3738_v2, 16  ;;  %v11068_v59 = vld [vmem:[%s11793_s29 + $0x1f8] sm:$0xff]  }
 0x11b   : > { %v10394_v3 = vpack.c.bf16 %v2131_v52, %v2131_v52  ;;  %v1630_v9 = vmax.f32 %v1156_v57, 0.0  ;;  %v1159_v11 = vadd.f32 %v11984_v54, %v1158_v1  ;;  %v3225_v53 = vshrl.u32 %v3100_v15, 16  ;;  %s11669_s29 = smov 96  }
 0x11c   : > { %v10393_v17 = vpack.c.bf16 %v2130_v60, %v2130_v60  ;;  %v1766_v18 = vsel %vm1746_vm12, %v1632_v62, -inf  ;;  %v1633_v14 = vmax.f32 %v1167_v0, 0.0  ;;  %10865 = vmatmul.mubr.msk.bf16.gmra.mrb[120].mxu0 %vm876_vm0, %v11066_v39  ;;  %v3570_v60 = vshll.u32 %v3492_v25, 16 }
 0x11d   : > { %v1767_v27 = vmax.f32 %v1765_v56, %v1766_v18  ;;  %v1760_v31 = vsel %vm1746_vm12, %v1630_v9, -inf  ;;  %v1631_v37 = vmax.f32 %v1159_v11, 0.0  ;;  %10868 = vmatprep.mubr.msk.bf16.mxu0 %vm876_vm0, %v11067_v41  ;;  %2412 = vst.msk [vmem:[#allocation2 + $0x20] sm:$0xf] %vm2168_vm2, %v10394_v3  ;;  %v2944_v61 = vshll.u32 %v2850_v38, 16 }
 0x11e   : > { %v1761_v39 = vmax.f32 %v1759_v26, %v1760_v31  ;;  %v1769_v48 = vsel %vm1746_vm12, %v1633_v14, -inf  ;;  %2411 = vst.msk [vmem:[#allocation2 + $0x1c] sm:$0xf] %vm2168_vm2, %v10393_v17  ;;  %v12117_v1 = vrot.slane %v3822_v33, 11  ;;  %v12119_v2 = vrot.slane %v3203_v42, 11 }
 0x11f   : > { %1945 = vst.msk [vmem:[#allocation4 + $0x30] sm:$0xff] %vm1746_vm12, %v1767_v27  ;;  %v1770_v51 = vmax.f32 %v1768_v47, %v1769_v48  ;;  %v1763_v41 = vsel %vm1746_vm12, %v1631_v37, -inf  ;;  %v10762_v52 = vpop.f32.mrb[16].mxu0  ;;  %v12121_v3 = vrot.slane %v3556_v45, 5  ;;  %v12127_v15 = vrot.slane %v2930_v46, 5 }
 0x120   : > { %1943 = vst.msk [vmem:[#allocation4 + $0x20] sm:$0xff] %vm1746_vm12, %v1761_v39  ;;  %v1764_v55 = vmax.f32 %v1762_v49, %v1763_v41  ;;  %v1180_v56 = vadd.f32 %v10762_v52, %v11984_v54  ;;  %v1171_v57 = vpop.f32.mrb[17].mxu0  ;;  %v12129_v16 = vrot.slane %v3844_v50, 11  ;;  %v12132_v17 = vrot.slane %v3225_v53, 11 }
 0x121   : > { %1946 = vst.msk [vmem:[#allocation4 + $0x38] sm:$0xff] %vm1746_vm12, %v1770_v51  ;;  %v1172_v62 = vadd.f32 %v11984_v54, %v1171_v57  ;;  %v10763_v0 = vpop.f32.mrb[18].mxu0  ;;  %v2251_v45 = vsel %vm11866_vm5, 0, %v2250_v23  ;;  %v12140_v21 = vrot.slane %v3570_v60, 5  ;;  %v12142_v46 = vrot.slane %v2944_v61, 5 }
 0x122   : > { %1944 = vst.msk [vmem:[#allocation4 + $0x28] sm:$0xff] %vm1746_vm12, %v1764_v55  ;;  %v1636_v8 = vmax.f32 %v1180_v56, 0.0  ;;  %v1183_v9 = vadd.f32 %v10763_v0, %v11984_v54  ;;  %v1174_v11 = vpop.f32.mrb[19].mxu0  ;;  %2252 = vst [vmem:[#allocation2 + $0x88] sm:$0x1] %v2251_v45 }
 0x123   : > { %v1634_v33 = vmax.f32 %v1172_v62, 0.0  ;;  %v1175_v42 = vadd.f32 %v11984_v54, %v1174_v11 }
 0x124   : > { %v1777_v18 = vsel %vm1746_vm12, %v1636_v8, -inf  ;;  %v1637_v14 = vmax.f32 %v1183_v9, 0.0  ;;  %10869 = vmatmul.mubr.msk.bf16.gmra.mrb[124].mxu0 %vm876_vm0, %v11068_v59  ;;  %v12138_v25 = vld [vmem:[#allocation2 + $0x20] sm:$0xf]  ;;  %vm5170_vm0 = vcmask 785408  }
 0x125   : > { %v1771_v43 = vsel %vm1746_vm12, %v1634_v33, -inf  ;;  %v1635_v26 = vmax.f32 %v1175_v42, 0.0  ;;  %v2447_v27 = vld [vmem:[#allocation2 + $0x1c] sm:$0xf]  ;;  %v2530_v31 = vshrl.u32 %v12138_v25, 16  ;;  %v2533_v37 = vshll.u32 %v12138_v25, 16 }
 0x126   : > { %v12148_v38 = vsel %vm1746_vm12, %v1637_v14, -inf  ;;  %v9854_v47 = vcombine.low %v2447_v27, %v12138_v25  ;;  %v2521_v39 = vshrl.u32 %v2447_v27, 16  ;;  %v2524_v48 = vshll.u32 %v2447_v27, 16  ;;  %v3089_v50 = vld [vmem:[#allocation2 + $0x1c] sm:$0xf] }
 0x127   : > { %v1774_v49 = vsel %vm1746_vm12, %v1635_v26, -inf  ;;  %v10766_v51 = vpop.f32.mrb[20].mxu0  ;;  %v2532_v41 = vrot.slane %v2530_v31, 7  ;;  %v12152_v52 = vrot.slane %v2530_v31, 4  ;;  %v3142_v53 = vshrl.u32 %v3089_v50, 16 }
 0x128   : > { %v2009_v55 = vld [vmem:[#allocation4 + $0x30] ss:$2 sm:$0xff]  ;;  %v2073_v56 = vld [vmem:[#allocation4 + $0x31] ss:$2 sm:$0xff]  ;;  %v1196_v57 = vadd.f32 %v10766_v51, %v11984_v54  ;;  %v1187_v59 = vpop.f32.mrb[21].mxu0  ;;  %4499 = vrot.lane.b32.xlu1 %v9854_v47, %s11668_s24  ;;  %v12156_v60 = vrot.slane %v2521_v39, 7 }
 0x129   : > { %v2133_v61 = vmax.f32 %v2009_v55, %v2073_v56  ;;  %v2007_v62 = vld [vmem:[#allocation4 + $0x20] ss:$2 sm:$0xff]  ;;  %v2071_v0 = vld [vmem:[#allocation4 + $0x21] ss:$2 sm:$0xff]  ;;  %v1188_v8 = vadd.f32 %v11984_v54, %v1187_v59  ;;  %v12161_v9 = vor.u32 %v2533_v37, %v2532_v41  ;;  %v2878_v11 = vrot.slane %v2521_v39, 4  ;;  %v10767_v23 = vpop.f32.mrb[22].mxu0 }
 0x12a   : > { %v2132_v33 = vmax.f32 %v2007_v62, %v2071_v0  ;;  %v1640_v42 = vmax.f32 %v1196_v57, 0.0  ;;  %v12164_v45 = vor.u32 %v2524_v48, %v12156_v60  ;;  %v2879_v14 = vrot.slane %v2524_v48, 5  ;;  %v1190_v26 = vpop.f32.mrb[23].mxu0  ;;  %v3090_v55 = vld [vmem:[#allocation2 + $0x20] sm:$0xf] }
 0x12b   : > { %v10396_v27 = vpack.c.bf16 %v2133_v61, %v2133_v61  ;;  %v1638_v31 = vmax.f32 %v1188_v8, 0.0  ;;  %v1199_v47 = vadd.f32 %v10767_v23, %v11984_v54  ;;  %v1191_v51 = vadd.f32 %v11984_v54, %v1190_v26  ;;  %v11171_v57 = vld [vmem:[%s16682_s7 + $0x110] ss:$8 sps:$4 sm:$0xff]  }
 0x12c   : > { %v10395_v56 = vpack.c.bf16 %v2132_v33, %v2132_v33  ;;  %v1778_v41 = vsel %vm1746_vm12, %v1640_v42, -inf  ;;  %v3144_v59 = vrot.slane %v3142_v53, 7  ;;  %v3145_v39 = vshll.u32 %v3089_v50, 16 }
 0x12d   : > { %2414 = vst.msk [vmem:[#allocation2 + $0x34] sm:$0xf] %vm2168_vm2, %v10396_v27  ;;  %v1779_v48 = vmax.f32 %v1777_v18, %v1778_v41  ;;  %v1772_v61 = vsel %vm1746_vm12, %v1638_v31, -inf  ;;  %v1641_v62 = vmax.f32 %v1199_v47, 0.0  ;;  %v1639_v0 = vmax.f32 %v1191_v51, 0.0 }
 0x12e   : > { %2413 = vst.msk [vmem:[#allocation2 + $0x30] sm:$0xf] %vm2168_vm2, %v10395_v56  ;;  %v1773_v8 = vmax.f32 %v1771_v43, %v1772_v61  ;;  %v3147_v23 = vor.u32 %v3145_v39, %v3144_v59  ;;  %v3149_v33 = vrot.slane %v3144_v59, 4  ;;  %v3151_v42 = vshrl.u32 %v3090_v55, 16 }
 0x12f   : > { %1949 = vst.msk [vmem:[#allocation4 + $0x50] sm:$0xff] %vm1746_vm12, %v1779_v48  ;;  %v1781_v50 = vsel %vm1746_vm12, %v1641_v62, -inf  ;;  %v1775_v26 = vsel %vm1746_vm12, %v1639_v0, -inf  ;;  %v10770_v35 = vpop.f32.mrb[24].mxu0  ;;  %v3154_v44 = vshll.u32 %v3090_v55, 16  ;;  %v3504_v27 = vrot.slane %v3142_v53, 4 }
 0x130   : > { %1947 = vst.msk [vmem:[#allocation4 + $0x40] sm:$0xff] %vm1746_vm12, %v1773_v8  ;;  %v1782_v18 = vmax.f32 %v12148_v38, %v1781_v50  ;;  %v1776_v31 = vmax.f32 %v1774_v49, %v1775_v26  ;;  %v1212_v47 = vadd.f32 %v10770_v35, %v11984_v54  ;;  %v3148_v43 = vsel %vm12171_vm14, %v12041_v4, %v3147_v23  ;;  %v1203_v51 = vpop.f32.mrb[25].mxu0 }
 0x131   : > { %v3153_v56 = vrot.slane %v3151_v42, 7  ;;  %v1204_v41 = vadd.f32 %v11984_v54, %v1203_v51  ;;  %v10771_v59 = vpop.f32.mrb[26].mxu0  ;;  %v3505_v48 = vrot.slane %v3145_v39, 5  ;;  %v3508_v61 = vrot.slane %v3154_v44, 5 }
 0x132   : > { %1950 = vst.msk [vmem:[#allocation4 + $0x58] sm:$0xff] %vm1746_vm12, %v1782_v18  ;;  %1948 = vst.msk [vmem:[#allocation4 + $0x48] sm:$0xff] %vm1746_vm12, %v1776_v31  ;;  %v1644_v53 = vmax.f32 %v1212_v47, 0.0  ;;  %v1215_v38 = vadd.f32 %v10771_v59, %v11984_v54  ;;  %v3510_v49 = vrot.slane %v3151_v42, 4  ;;  %v1206_v35 = vpop.f32.mrb[27].mxu0  ;;  %v2880_v55 = vor.u32 %v2879_v14, %v2878_v11 }
 0x133   : > { %v3156_v62 = vor.u32 %v3154_v44, %v3153_v56  ;;  %v1642_v0 = vmax.f32 %v1204_v41, 0.0  ;;  %v3506_v4 = vor.u32 %v3505_v48, %v3504_v27  ;;  %v1207_v8 = vadd.f32 %v11984_v54, %v1206_v35 }
 0x134   : > { %v12193_v23 = vsel %vm1746_vm12, %v1644_v53, -inf  ;;  %v1645_v39 = vmax.f32 %v1215_v38, 0.0  ;;  %v3511_v50 = vor.u32 %v3510_v49, %v3508_v61  ;;  %v2881_v26 = vrot.slane %v2880_v55, 4  ;;  %v12195_v18 = vld [vmem:[#allocation2 + $0x34] sm:$0xf]  ;;  %v11086_v55 = vld [vmem:[%s16678_s3 + $0x58] sm:$0xff]  }
 0x135   : > { %v3157_v31 = vsel %vm12171_vm14, %v3149_v33, %v3156_v62  ;;  %v12200_v42 = vsel %vm1746_vm12, %v1642_v0, -inf  ;;  %v3507_v11 = vrot.slane %v3506_v4, 4  ;;  %v1643_v44 = vmax.f32 %v1207_v8, 0.0  ;;  %v12202_v14 = vld [vmem:[#allocation2 + $0x30] sm:$0xf]  ;;  %10500 = vmatprep.subr.bf16.mxu0 %v11086_v55 }
 0x136   : > { %v9885_v27 = vcombine.low %v3148_v43, %v3157_v31  ;;  %v12205_v47 = vsel %vm1746_vm12, %v1645_v39, -inf  ;;  %v3512_v51 = vrot.slane %v3511_v50, 4  ;;  %v2882_v56 = vrot.slane %v2533_v37, 5  ;;  %v12209_v41 = vld [vmem:[#allocation2 + $0x30] sm:$0xf] }
 0x137   : > { %v3509_v33 = vsel %vm11887_vm8, %v3507_v11, %v3508_v61  ;;  %v12214_v59 = vsel %vm1746_vm12, %v1643_v44, -inf  ;;  %v10774_v48 = vpop.f32.mrb[28].mxu0  ;;  %v3783_v53 = vshrl.u32 %v12202_v14, 16  ;;  %v3786_v43 = vshll.u32 %v12202_v14, 16  ;;  %v12218_v38 = vld [vmem:[#allocation2 + $0x34] sm:$0xf] }
 0x138   : > { %4657 = vrot.lane.b32.xlu1 %v9885_v27, %s11669_s29  ;;  %v3517_v25 = vsel %vm11887_vm8, %v3512_v51, %v12043_v5  ;;  %v2883_v37 = vsel %vm11887_vm8, %v2881_v26, %v2882_v56  ;;  %v2885_v61 = vor.u32 %v12152_v52, %v2882_v56  ;;  %v1228_v49 = vadd.f32 %v10774_v48, %v11984_v54  ;;  %v1219_v35 = vpop.f32.mrb[29].mxu0  ;;  %v3093_v34 = vld [vmem:[#allocation2 + $0x34] sm:$0xf] }
 0x139   : > { %v2013_v62 = vld [vmem:[#allocation4 + $0x50] ss:$2 sm:$0xff]  ;;  %v2077_v0 = vld [vmem:[#allocation4 + $0x51] ss:$2 sm:$0xff]  ;;  %v2011_v4 = vld [vmem:[#allocation4 + $0x40] ss:$2 sm:$0xff]  ;;  %v9917_v8 = vcombine.low %v3509_v33, %v3517_v25  ;;  %v1220_v39 = vadd.f32 %v11984_v54, %v1219_v35  ;;  %v9949_v5 = vcombine.low %v12202_v14, %v12195_v18  ;;  %v9855_v50 = vcombine.low %v12209_v41, %v12218_v38 }
 0x13a   : > { %v2135_v52 = vmax.f32 %v2013_v62, %v2077_v0  ;;  %v2075_v26 = vld [vmem:[#allocation4 + $0x41] ss:$2 sm:$0xff]  ;;  %v2886_v31 = vrot.slane %v2885_v61, 4  ;;  %v1648_v11 = vmax.f32 %v1228_v49, 0.0  ;;  %v12236_v44 = vrot.slane %v3783_v53, 7  ;;  %v10775_v27 = vpop.f32.mrb[30].mxu0 }
 0x13b   : > { %v2134_v51 = vmax.f32 %v2011_v4, %v2075_v26  ;;  %4817 = vrot.lane.b32.xlu0 %v9917_v8, %s11668_s24  ;;  %v1646_v56 = vmax.f32 %v1220_v39, 0.0  ;;  %v3792_v33 = vshrl.u32 %v12195_v18, 16  ;;  %v3795_v48 = vshll.u32 %v12195_v18, 16  ;;  %v1222_v25 = vpop.f32.mrb[31].mxu0  ;;  %v11087_v35 = vld [vmem:[%s16678_s3 + $0x18] sm:$0xff]  }
 0x13c   : > { %v10398_v62 = vpack.c.bf16 %v2135_v52, %v2135_v52  ;;  %v2891_v61 = vsel %vm11887_vm8, %v2886_v31, %v12045_v7  ;;  %v1790_v49 = vsel %vm1746_vm12, %v1648_v11, -inf  ;;  %v12248_v55 = vrot.slane %v3783_v53, 4  ;;  %10501 = vmatpush3.bf16.msra.mxu0 %v11087_v35 }
 0x13d   : > { %v10397_v0 = vpack.c.bf16 %v2134_v51, %v2134_v51  ;;  %v9870_v4 = vcombine.low %v2883_v37, %v2891_v61  ;;  %v1791_v8 = vmax.f32 %v12193_v23, %v1790_v49  ;;  %v1784_v18 = vsel %vm1746_vm12, %v1646_v56, -inf }
 0x13e   : > { %16801 = vst [vmem:[#allocation10_spill] sm:$0xff] %v12248_v55  ;;  %2416 = vst.msk [vmem:[#allocation2 + $0x48] sm:$0xf] %vm2168_vm2, %v10398_v62  ;;  %v1785_v39 = vmax.f32 %v12200_v42, %v1784_v18  ;;  %v3794_v52 = vrot.slane %v3792_v33, 7  ;;  %v12256_v26 = vrot.slane %v3786_v43, 5  ;;  %v12258_v7 = vrot.slane %v3795_v48, 5 }
 0x13f   : > { %2415 = vst.msk [vmem:[#allocation2 + $0x44] sm:$0xf] %vm2168_vm2, %v10397_v0  ;;  %4579 = vrot.lane.b32.xlu1 %v9870_v4, %s16747_s15  ;;  %v12263_v23 = vrot.slane %v3792_v33, 4  ;;  %5009 = vrot.lane.b32.xlu0 %v9949_v5, %s11669_s29  ;;  %v2543_v53 = vshrl.u32 %v12209_v41, 16  ;;  %v2546_v42 = vshll.u32 %v12209_v41, 16  ;;  %v2552_v37 = vshrl.u32 %v12218_v38, 16 }
 0x140   : > { %16802 = vst [vmem:[#allocation11_spill] sm:$0xff] %v12256_v26  ;;  %16803 = vst [vmem:[#allocation12_spill] sm:$0xff] %v12258_v7  ;;  %v10778_v31 = vpop.f32.mrb[32].mxu0  ;;  %v16690_v51 = vshll.u32 %v12218_v38, 16  ;;  %v1231_v56 = vadd.f32 %v10775_v27, %v11984_v54  ;;  %v1223_v33 = vadd.f32 %v11984_v54, %v1222_v25  ;;  %v3788_v5 = vor.u32 %v3786_v43, %v12236_v44 }
 0x141   : > { %1953 = vst.msk [vmem:[#allocation4 + $0x70] sm:$0xff] %vm1746_vm12, %v1791_v8  ;;  %16804 = vst [vmem:[#allocation13_spill] sm:$0xff] %v12263_v23  ;;  %v1235_v35 = vpop.f32.mrb[33].mxu0  ;;  %v12277_v62 = vrot.slane %v2543_v53, 7  ;;  %v2554_v41 = vrot.slane %v2552_v37, 7  ;;  %v12279_v61 = vrot.slane %v2543_v53, 4  ;;  %v1244_v53 = vadd.f32 %v10778_v31, %v11984_v54 }
 0x142   : > { %1951 = vst.msk [vmem:[#allocation4 + $0x60] sm:$0xff] %vm1746_vm12, %v1785_v39  ;;  %v10779_v49 = vpop.f32.mrb[34].mxu0  ;;  %v12281_v0 = vrot.slane %v2546_v42, 5  ;;  %v12283_v4 = vrot.slane %v2552_v37, 4  ;;  %v1649_v8 = vmax.f32 %v1231_v56, 0.0  ;;  %v1647_v18 = vmax.f32 %v1223_v33, 0.0 }
 0x143   : > { %16805 = vst [vmem:[#allocation14_spill] sm:$0xff] %v12277_v62  ;;  %v1238_v39 = vpop.f32.mrb[35].mxu0  ;;  %v12286_v27 = vor.u32 %v2546_v42, %v12277_v62  ;;  %v12290_v25 = vor.u32 %v16690_v51, %v2554_v41  ;;  %4501 = vrot.lane.b32.xlu1 %v9855_v50, %s11668_s24  ;;  %v3092_v37 = vld [vmem:[#allocation2 + $0x30] sm:$0xf]  ;;  %v3790_v42 = vrot.slane %v12236_v44, 4  ;;  %v3797_v11 = vor.u32 %v3795_v48, %v3794_v52 }
 0x144   : > { %v1793_v56 = vsel %vm1746_vm12, %v1649_v8, -inf  ;;  %v1787_v33 = vsel %vm1746_vm12, %v1647_v18, -inf  ;;  %v1652_v50 = vmax.f32 %v1244_v53, 0.0  ;;  %v3789_v31 = vsel %vm12171_vm14, %v12051_v19, %v3788_v5 }
 0x145   : > { %16806 = vst [vmem:[#allocation15_spill] sm:$0xff] %v12286_v27  ;;  %16807 = vst [vmem:[#allocation16_spill] sm:$0xff] %v12290_v25  ;;  %v1794_v41 = vmax.f32 %v12205_v47, %v1793_v56  ;;  %v1788_v51 = vmax.f32 %v12214_v59, %v1787_v33  ;;  %v3798_v14 = vsel %vm12171_vm14, %v3790_v42, %v3797_v11  ;;  %v3164_v18 = vshrl.u32 %v3092_v37, 16 }
 0x146   : > { %v1236_v43 = vadd.f32 %v11984_v54, %v1235_v35  ;;  %v1247_v8 = vadd.f32 %v10779_v49, %v11984_v54  ;;  %v12312_v47 = vsel %vm1746_vm12, %v1652_v50, -inf  ;;  %v9933_v59 = vcombine.low %v3789_v31, %v3798_v14 }
 0x147   : > { %1954 = vst.msk [vmem:[#allocation4 + $0x78] sm:$0xff] %vm1746_vm12, %v1794_v41  ;;  %1952 = vst.msk [vmem:[#allocation4 + $0x68] sm:$0xff] %vm1746_vm12, %v1788_v51  ;;  %v3167_v44 = vshll.u32 %v3092_v37, 16  ;;  %v3173_v48 = vshrl.u32 %v3093_v34, 16  ;;  %v10782_v52 = vpop.f32.mrb[36].mxu0  ;;  %v3176_v53 = vshll.u32 %v3093_v34, 16  ;;  %v1239_v33 = vadd.f32 %v11984_v54, %v1238_v39 }
 0x148   : > { %v1650_v19 = vmax.f32 %v1236_v43, 0.0  ;;  %v1653_v5 = vmax.f32 %v1247_v8, 0.0  ;;  %v3518_v11 = vrot.slane %v3164_v18, 4  ;;  %v1251_v56 = vpop.f32.mrb[37].mxu0  ;;  %4897 = vrot.lane.b32.xlu1 %v9933_v59, %s16747_s15  ;;  %v3166_v42 = vrot.slane %v3164_v18, 7 }
 0x149   : > { %v3519_v35 = vrot.slane %v3167_v44, 5  ;;  %v3524_v49 = vrot.slane %v3173_v48, 4  ;;  %v10783_v51 = vpop.f32.mrb[38].mxu0  ;;  %v3522_v50 = vrot.slane %v3176_v53, 5  ;;  %v3175_v31 = vrot.slane %v3173_v48, 7 }
 0x14a   : > { %v12317_v41 = vsel %vm1746_vm12, %v1650_v19, -inf  ;;  %v12320_v37 = vsel %vm1746_vm12, %v1653_v5, -inf  ;;  %v1254_v14 = vpop.f32.mrb[39].mxu0  ;;  %v1651_v43 = vmax.f32 %v1239_v33, 0.0  ;;  %v3169_v8 = vor.u32 %v3167_v44, %v3166_v42  ;;  %v12333_v44 = vld [vmem:[#allocation2 + $0x44] sm:$0xf] }
 0x14b   : > { %v3520_v34 = vor.u32 %v3519_v35, %v3518_v11  ;;  %v3171_v7 = vrot.slane %v3166_v42, 4  ;;  %v3525_v59 = vor.u32 %v3524_v49, %v3522_v50  ;;  %v3178_v23 = vor.u32 %v3176_v53, %v3175_v31 }
 0x14c   : > { %v1260_v55 = vadd.f32 %v10782_v52, %v11984_v54  ;;  %v2894_v39 = vor.u32 %v12281_v0, %v12279_v61  ;;  %v12326_v19 = vsel %vm1746_vm12, %v1651_v43, -inf  ;;  %v3170_v48 = vsel %vm12171_vm14, %v12055_v13, %v3169_v8 }
 0x14d   : > { %v3521_v18 = vrot.slane %v3520_v34, 4  ;;  %v16808_v5 = vshll.u32 %v12218_v38, 16  ;;  %v3179_v52 = vsel %vm12171_vm14, %v3171_v7, %v3178_v23  ;;  %v1252_v61 = vadd.f32 %v11984_v54, %v1251_v56  ;;  %v12341_v34 = vld [vmem:[#allocation2 + $0x48] sm:$0xf] }
 0x14e   : > { %v2017_v35 = vld [vmem:[#allocation4 + $0x70] ss:$2 sm:$0xff]  ;;  %v2081_v53 = vld [vmem:[#allocation4 + $0x71] ss:$2 sm:$0xff]  ;;  %v2015_v49 = vld [vmem:[#allocation4 + $0x60] ss:$2 sm:$0xff]  ;;  %v1263_v0 = vadd.f32 %v10783_v51, %v11984_v54  ;;  %v9886_v38 = vcombine.low %v3170_v48, %v3179_v52 }
 0x14f   : > { %v2896_v11 = vrot.slane %v16808_v5, 5  ;;  %v2137_v33 = vmax.f32 %v2017_v35, %v2081_v53  ;;  %v2079_v42 = vld [vmem:[#allocation4 + $0x61] ss:$2 sm:$0xff]  ;;  %v3523_v13 = vsel %vm11887_vm8, %v3521_v18, %v3522_v50  ;;  %v3526_v31 = vrot.slane %v3525_v59, 4  ;;  %v12343_v43 = vpop.f32.mrb[40].mxu0 }
 0x150   : > { %v2136_v8 = vmax.f32 %v2015_v49, %v2079_v42  ;;  %v1656_v5 = vmax.f32 %v1260_v55, 0.0  ;;  %v2895_v26 = vrot.slane %v2894_v39, 4  ;;  %v12346_v23 = vpop.f32.mrb[41].mxu0  ;;  %4659 = vrot.lane.b32.xlu1 %v9886_v38, %s11669_s29  ;;  %v1654_v50 = vmax.f32 %v1252_v61, 0.0 }
 0x151   : > { %v2899_v7 = vor.u32 %v12283_v4, %v2896_v11  ;;  %v10400_v56 = vpack.c.bf16 %v2137_v33, %v2137_v33  ;;  %v3531_v51 = vsel %vm11887_vm8, %v3526_v31, %v12053_v6  ;;  %v3805_v59 = vshrl.u32 %v12333_v44, 16  ;;  %v12353_v18 = vpop.f32.mrb[42].mxu0  ;;  %v2453_v31 = vld [vmem:[#allocation2 + $0x44] sm:$0xf] }
 0x152   : > { %v10399_v48 = vpack.c.bf16 %v2136_v8, %v2136_v8  ;;  %v9918_v35 = vcombine.low %v3523_v13, %v3531_v51  ;;  %v1802_v55 = vsel %vm1746_vm12, %v1656_v5, -inf  ;;  %v9950_v4 = vcombine.low %v12333_v44, %v12341_v34  ;;  %v12358_v39 = vpop.f32.mrb[43].mxu0  ;;  %v12376_v8 = vld [vmem:[#allocation2 + $0x48] sm:$0xf] }
 0x153   : > { %2418 = vst.msk [vmem:[#allocation2 + $0x5c] sm:$0xf] %vm2168_vm2, %v10400_v56  ;;  %v1803_v6 = vmax.f32 %v12312_v47, %v1802_v55  ;;  %v2897_v53 = vsel %vm11887_vm8, %v2895_v26, %v2896_v11  ;;  %v2900_v49 = vrot.slane %v2899_v7, 4  ;;  %v1796_v52 = vsel %vm1746_vm12, %v1654_v50, -inf }
 0x154   : > { %2417 = vst.msk [vmem:[#allocation2 + $0x58] sm:$0xf] %vm2168_vm2, %v10399_v48  ;;  %4819 = vrot.lane.b32.xlu0 %v9918_v35, %s11668_s24  ;;  %v1797_v61 = vmax.f32 %v12317_v41, %v1796_v52  ;;  %v3808_v33 = vshll.u32 %v12333_v44, 16  ;;  %v3814_v42 = vshrl.u32 %v12341_v34, 16  ;;  %v3817_v13 = vshll.u32 %v12341_v34, 16 }
 0x155   : > { %1957 = vst.msk [vmem:[#allocation4 + $0x90] sm:$0xff] %vm1746_vm12, %v1803_v6  ;;  %v2905_v26 = vsel %vm11887_vm8, %v2900_v49, %v12057_v20  ;;  %v4159_v47 = vrot.slane %v3805_v59, 4  ;;  %v1657_v11 = vmax.f32 %v1263_v0, 0.0  ;;  %v1255_v38 = vadd.f32 %v11984_v54, %v1254_v14 }
 0x156   : > { %v9871_v41 = vcombine.low %v2897_v53, %v2905_v26  ;;  %1955 = vst.msk [vmem:[#allocation4 + $0x80] sm:$0xff] %vm1746_vm12, %v1797_v61  ;;  %v3807_v44 = vrot.slane %v3805_v59, 7  ;;  %v4160_v5 = vrot.slane %v3808_v33, 5  ;;  %v4163_v7 = vrot.slane %v3817_v13, 5 }
 0x157   : > { %v4165_v34 = vrot.slane %v3814_v42, 4  ;;  %v1805_v56 = vsel %vm1746_vm12, %v1657_v11, -inf  ;;  %v1655_v51 = vmax.f32 %v1255_v38, 0.0  ;;  %v2565_v50 = vshrl.u32 %v2453_v31, 16  ;;  %v12380_v48 = vpop.f32.mrb[44].mxu0 }
 0x158   : > { %4581 = vrot.lane.b32.xlu1 %v9871_v41, %s16747_s15  ;;  %v4161_v20 = vor.u32 %v4160_v5, %v4159_v47  ;;  %5011 = vrot.lane.b32.xlu0 %v9950_v4, %s11669_s29  ;;  %v1806_v14 = vmax.f32 %v12320_v37, %v1805_v56  ;;  %v2568_v0 = vshll.u32 %v2453_v31, 16  ;;  %v2574_v35 = vshrl.u32 %v12376_v8, 16  ;;  %v12386_v59 = vpop.f32.mrb[45].mxu0  ;;  %v3095_v5 = vld [vmem:[#allocation2 + $0x44] sm:$0xf] }
 0x159   : > { %v3816_v55 = vrot.slane %v3814_v42, 7  ;;  %v4166_v6 = vor.u32 %v4165_v34, %v4163_v7  ;;  %v1799_v53 = vsel %vm1746_vm12, %v1655_v51, -inf  ;;  %v12389_v49 = vrot.slane %v2565_v50, 7  ;;  %v12391_v52 = vpop.f32.mrb[46].mxu0 }
 0x15a   : > { %v4162_v61 = vrot.slane %v4161_v20, 4  ;;  %1958 = vst.msk [vmem:[#allocation4 + $0x98] sm:$0xff] %vm1746_vm12, %v1806_v14  ;;  %v1800_v4 = vmax.f32 %v12326_v19, %v1799_v53  ;;  %v2576_v26 = vrot.slane %v2574_v35, 7  ;;  %v16696_v37 = vshll.u32 %v12376_v8, 16  ;;  %v12396_v47 = vpop.f32.mrb[47].mxu0 }
 0x15b   : > { %16809 = vst [vmem:[#allocation17_spill] sm:$0xff] %v12389_v49  ;;  %v4167_v11 = vrot.slane %v4166_v6, 4  ;;  %v12399_v42 = vor.u32 %v2568_v0, %v12389_v49  ;;  %v12401_v38 = vrot.slane %v2565_v50, 4  ;;  %v2907_v41 = vrot.slane %v2568_v0, 5  ;;  %v3096_v20 = vld [vmem:[#allocation2 + $0x48] sm:$0xf] }
 0x15c   : > { %v4164_v34 = vsel %vm11887_vm8, %v4162_v61, %v4163_v7  ;;  %1956 = vst.msk [vmem:[#allocation4 + $0x88] sm:$0xff] %vm1746_vm12, %v1800_v4  ;;  %v12408_v19 = vor.u32 %v16696_v37, %v2576_v26  ;;  %v9856_v56 = vcombine.low %v2453_v31, %v12376_v8  ;;  %v1276_v51 = vadd.f32 %v12343_v43, %v11984_v54 }
 0x15d   : > { %16810 = vst [vmem:[#allocation18_spill] sm:$0xff] %v12399_v42  ;;  %v4172_v50 = vsel %vm11887_vm8, %v4167_v11, %v12074_v28  ;;  %v3810_v14 = vor.u32 %v3808_v33, %v3807_v44  ;;  %v3812_v0 = vrot.slane %v3807_v44, 4  ;;  %v3819_v6 = vor.u32 %v3817_v13, %v3816_v55 }
 0x15e   : > { %16811 = vst [vmem:[#allocation19_spill] sm:$0xff] %v12408_v19  ;;  %v12416_v7 = vcombine.low %v4164_v34, %v4172_v50  ;;  %v12418_v53 = vrot.slane %v2574_v35, 4  ;;  %4503 = vrot.lane.b32.xlu1 %v9856_v56, %s11668_s24  ;;  %v1660_v61 = vmax.f32 %v1276_v51, 0.0  ;;  %v3186_v4 = vshrl.u32 %v3095_v5, 16  ;;  %v12431_v35 = vld [vmem:[%s16677_s2] ss:$0 sm:$0xff] }
 0x15f   : > { %v3811_v54 = vsel %vm12171_vm14, %v12059_v22, %v3810_v14  ;;  %v3820_v43 = vsel %vm12171_vm14, %v3812_v0, %v3819_v6  ;;  %v3189_v31 = vshll.u32 %v3095_v5, 16  ;;  %v3195_v28 = vshrl.u32 %v3096_v20, 16  ;;  %v12426_v33 = vpop.f32.mrb[48].mxu0 }
 0x160   : > { %16812 = vst [vmem:[#allocation20_spill] sm:$0xff] %v12416_v7  ;;  %v9934_v13 = vcombine.low %v3811_v54, %v3820_v43  ;;  %v3188_v44 = vrot.slane %v3186_v4, 7  ;;  %v3198_v55 = vshll.u32 %v3096_v20, 16  ;;  %v1268_v26 = vadd.f32 %v12431_v35, %v12346_v23  ;;  %v12435_v11 = vpop.f32.mrb[49].mxu0 }
 0x161   : > { %v2021_v22 = vld [vmem:[#allocation4 + $0x90] ss:$2 sm:$0xff]  ;;  %v2085_v34 = vld [vmem:[#allocation4 + $0x91] ss:$2 sm:$0xff]  ;;  %v12438_v5 = vsel %vm1746_vm12, %v1660_v61, -inf  ;;  %v3197_v56 = vrot.slane %v3195_v28, 7  ;;  %v1279_v51 = vadd.f32 %v12431_v35, %v12353_v18  ;;  %v1271_v20 = vadd.f32 %v12431_v35, %v12358_v39 }
 0x162   : > { %v2139_v50 = vmax.f32 %v2021_v22, %v2085_v34  ;;  %4899 = vrot.lane.b32.xlu0 %v9934_v13, %s16747_s15  ;;  %v3191_v14 = vor.u32 %v3189_v31, %v3188_v44  ;;  %v3193_v0 = vrot.slane %v3188_v44, 4  ;;  %v1658_v23 = vmax.f32 %v1268_v26, 0.0  ;;  %v12445_v6 = vpop.f32.mrb[50].mxu0 }
 0x163   : > { %v2019_v54 = vld [vmem:[#allocation4 + $0x80] ss:$2 sm:$0xff]  ;;  %v2083_v43 = vld [vmem:[#allocation4 + $0x81] ss:$2 sm:$0xff]  ;;  %v3200_v37 = vor.u32 %v3198_v55, %v3197_v56  ;;  %v1661_v61 = vmax.f32 %v1279_v51, 0.0  ;;  %v3532_v7 = vrot.slane %v3186_v4, 4  ;;  %v2908_v42 = vor.u32 %v2907_v41, %v12401_v38 }
 0x164   : > { %v10402_v19 = vpack.c.bf16 %v2139_v50, %v2139_v50  ;;  %v2138_v18 = vmax.f32 %v2019_v54, %v2083_v43  ;;  %v3192_v39 = vsel %vm12171_vm14, %v12076_v29, %v3191_v14  ;;  %v1659_v22 = vmax.f32 %v1271_v20, 0.0  ;;  %v12451_v13 = vpop.f32.mrb[51].mxu0  ;;  %v12459_v56 = vld [vmem:[#allocation2 + $0x58] sm:$0xf] }
 0x165   : > { %v3201_v44 = vsel %vm12171_vm14, %v3193_v0, %v3200_v37  ;;  %v1807_v26 = vsel %vm1746_vm12, %v1658_v23, -inf  ;;  %v12457_v34 = vsel %vm1746_vm12, %v1661_v61, -inf  ;;  %v3533_v4 = vrot.slane %v3189_v31, 5  ;;  %v12466_v0 = vld [vmem:[#allocation2 + $0x5c] sm:$0xf] }
 0x166   : > { %2420 = vst.msk [vmem:[#allocation2 + $0x70] sm:$0xf] %vm2168_vm2, %v10402_v19  ;;  %v10401_v38 = vpack.c.bf16 %v2138_v18, %v2138_v18  ;;  %v9887_v41 = vcombine.low %v3192_v39, %v3201_v44  ;;  %v3536_v51 = vrot.slane %v3198_v55, 5  ;;  %v3538_v29 = vrot.slane %v3195_v28, 4 }
 0x167   : > { %v3534_v20 = vor.u32 %v3533_v4, %v3532_v7  ;;  %v2909_v50 = vrot.slane %v2908_v42, 4  ;;  %v16813_v14 = vshll.u32 %v12376_v8, 16  ;;  %v1292_v37 = vadd.f32 %v12431_v35, %v12380_v48  ;;  %v12468_v23 = vpop.f32.mrb[52].mxu0 }
 0x168   : > { %2419 = vst.msk [vmem:[#allocation2 + $0x6c] sm:$0xf] %vm2168_vm2, %v10401_v38  ;;  %4661 = vrot.lane.b32.xlu1 %v9887_v41, %s11669_s29  ;;  %v12473_v19 = vsel %vm1746_vm12, %v1659_v22, -inf  ;;  %v3539_v31 = vor.u32 %v3538_v29, %v3536_v51  ;;  %v1284_v42 = vadd.f32 %v12431_v35, %v12386_v59  ;;  %v3827_v8 = vshrl.u32 %v12459_v56, 16  ;;  %v12478_v7 = vpop.f32.mrb[53].mxu0 }
 0x169   : > { %v2910_v54 = vrot.slane %v16813_v14, 5  ;;  %v3535_v48 = vrot.slane %v3534_v20, 4  ;;  %v1664_v55 = vmax.f32 %v1292_v37, 0.0  ;;  %v3830_v43 = vshll.u32 %v12459_v56, 16  ;;  %v12482_v61 = vpop.f32.mrb[54].mxu0 }
 0x16a   : > { %v3540_v18 = vrot.slane %v3539_v31, 4  ;;  %v1662_v22 = vmax.f32 %v1284_v42, 0.0  ;;  %v3836_v44 = vshrl.u32 %v12466_v0, 16  ;;  %v12487_v59 = vpop.f32.mrb[55].mxu0  ;;  %v3839_v41 = vshll.u32 %v12466_v0, 16 }
 0x16b   : > { %v2913_v28 = vor.u32 %v12418_v53, %v2910_v54  ;;  %v2911_v39 = vsel %vm11887_vm8, %v2909_v50, %v2910_v54  ;;  %v3537_v4 = vsel %vm11887_vm8, %v3535_v48, %v3536_v51  ;;  %v1814_v53 = vsel %vm1746_vm12, %v1664_v55, -inf  ;;  %v2456_v54 = vld [vmem:[#allocation2 + $0x58] sm:$0xf]  ;;  %v12498_v37 = vld [vmem:[#allocation2 + $0x5c] sm:$0xf] }
 0x16c   : > { %v3545_v29 = vsel %vm11887_vm8, %v3540_v18, %v12078_v30  ;;  %v1815_v20 = vmax.f32 %v12438_v5, %v1814_v53  ;;  %v1808_v50 = vsel %vm1746_vm12, %v1662_v22, -inf  ;;  %v3829_v14 = vrot.slane %v3827_v8, 7 }
 0x16d   : > { %v2914_v38 = vrot.slane %v2913_v28, 4  ;;  %v9919_v31 = vcombine.low %v3537_v4, %v3545_v29  ;;  %v1809_v42 = vmax.f32 %v1807_v26, %v1808_v50  ;;  %v12503_v48 = vrot.slane %v3827_v8, 4  ;;  %v3102_v49 = vld [vmem:[#allocation2 + $0x70] sm:$0xf] }
 0x16e   : > { %1961 = vst.msk [vmem:[#allocation4 + $0xb0] sm:$0xff] %vm1746_vm12, %v1815_v20  ;;  %v12506_v30 = vrot.slane %v3830_v43, 5  ;;  %v12508_v5 = vrot.slane %v3839_v41, 5  ;;  %v12510_v55 = vrot.slane %v3836_v44, 4  ;;  %v9951_v18 = vcombine.low %v12459_v56, %v12466_v0 }
 0x16f   : > { %v2919_v51 = vsel %vm11887_vm8, %v2914_v38, %v12081_v32  ;;  %16814 = vst [vmem:[#allocation21_spill] sm:$0xff] %v12503_v48  ;;  %4821 = vrot.lane.b32.xlu0 %v9919_v31, %s11668_s24  ;;  %1959 = vst.msk [vmem:[#allocation4 + $0xa0] sm:$0xff] %vm1746_vm12, %v1809_v42  ;;  %v2587_v32 = vshrl.u32 %v2456_v54, 16  ;;  %v2590_v26 = vshll.u32 %v2456_v54, 16  ;;  %v2596_v8 = vshrl.u32 %v12498_v37, 16 }
 0x170   : > { %v9872_v28 = vcombine.low %v2911_v39, %v2919_v51  ;;  %16815 = vst [vmem:[#allocation22_spill] sm:$0xff] %v12506_v30  ;;  %16816 = vst [vmem:[#allocation23_spill] sm:$0xff] %v12508_v5  ;;  %v12517_v39 = vpop.f32.mrb[56].mxu0  ;;  %v3838_v22 = vrot.slane %v3836_v44, 7  ;;  %v9857_v53 = vcombine.low %v2456_v54, %v12498_v37  ;;  %v16702_v20 = vshll.u32 %v12498_v37, 16 }
 0x171   : > { %16817 = vst [vmem:[#allocation24_spill] sm:$0xff] %v12510_v55  ;;  %v12525_v29 = vpop.f32.mrb[57].mxu0  ;;  %v12527_v56 = vrot.slane %v2587_v32, 7  ;;  %v2598_v0 = vrot.slane %v2596_v8, 7  ;;  %v12530_v50 = vrot.slane %v2587_v32, 4  ;;  %v12534_v44 = vrot.slane %v2590_v26, 5 }
 0x172   : > { %4583 = vrot.lane.b32.xlu1 %v9872_v28, %s16747_s15  ;;  %v12532_v31 = vpop.f32.mrb[58].mxu0  ;;  %v1295_v51 = vadd.f32 %v12431_v35, %v12391_v52  ;;  %v1287_v42 = vadd.f32 %v12431_v35, %v12396_v47  ;;  %v1308_v54 = vadd.f32 %v12431_v35, %v12426_v33  ;;  %v3098_v28 = vld [vmem:[#allocation2 + $0x58] sm:$0xf]  ;;  %v3099_v38 = vld [vmem:[#allocation2 + $0x5c] sm:$0xf]  ;;  %v3832_v52 = vor.u32 %v3830_v43, %v3829_v14  ;;  %v11092_v47 = vld [vmem:[%s16678_s3 + $0x60] sm:$0xff]  }
 0x173   : > { %16818 = vst [vmem:[#allocation25_spill] sm:$0xff] %v12527_v56  ;;  %v12542_v4 = vpop.f32.mrb[59].mxu0  ;;  %5013 = vrot.lane.b32.xlu0 %v9951_v18, %s11669_s29  ;;  %v12546_v32 = vor.u32 %v2590_v26, %v12527_v56  ;;  %v12550_v5 = vor.u32 %v16702_v20, %v2598_v0  ;;  %v3834_v55 = vrot.slane %v3829_v14, 4  ;;  %v11093_v33 = vld [vmem:[%s16678_s3 + $0x20] sm:$0xff]   ;;  %v12558_v48 = vrot.slane %v2596_v8, 4  ;;  %10502 = vmatprep.subr.bf16.mxu0 %v11092_v47 }
 0x174   : > { %v1665_v18 = vmax.f32 %v1295_v51, 0.0  ;;  %v1663_v26 = vmax.f32 %v1287_v42, 0.0  ;;  %v3841_v30 = vor.u32 %v3839_v41, %v3838_v22  ;;  %v3833_v43 = vsel %vm12171_vm14, %v12117_v1, %v3832_v52  ;;  %10503 = vmatpush3.bf16.msra.mxu0 %v11093_v33 }
 0x175   : > { %16819 = vst [vmem:[#allocation26_spill] sm:$0xff] %v12546_v32  ;;  %16820 = vst [vmem:[#allocation27_spill] sm:$0xff] %v12550_v5  ;;  %v1668_v32 = vmax.f32 %v1308_v54, 0.0  ;;  %v3208_v14 = vshrl.u32 %v3098_v28, 16  ;;  %v3217_v0 = vshrl.u32 %v3099_v38, 16  ;;  %v3211_v56 = vshll.u32 %v3098_v28, 16 }
 0x176   : > { %4505 = vrot.lane.b32.xlu1 %v9857_v53, %s11668_s24  ;;  %v1817_v20 = vsel %vm1746_vm12, %v1665_v18, -inf  ;;  %v1811_v5 = vsel %vm1746_vm12, %v1663_v26, -inf  ;;  %v3842_v8 = vsel %vm12171_vm14, %v3834_v55, %v3841_v30  ;;  %v3220_v54 = vshll.u32 %v3099_v38, 16 }
 0x177   : > { %v1818_v53 = vmax.f32 %v12457_v34, %v1817_v20  ;;  %v1812_v41 = vmax.f32 %v12473_v19, %v1811_v5  ;;  %v9935_v22 = vcombine.low %v3833_v43, %v3842_v8  ;;  %v3210_v51 = vrot.slane %v3208_v14, 7  ;;  %v12570_v42 = vpop.f32.mrb[60].mxu0 }
 0x178   : > { %v3219_v1 = vrot.slane %v3217_v0, 7  ;;  %v1300_v52 = vadd.f32 %v12431_v35, %v12435_v11  ;;  %v1311_v47 = vadd.f32 %v12431_v35, %v12445_v6  ;;  %v12576_v18 = vpop.f32.mrb[61].mxu0  ;;  %v12583_v30 = vadd.f32 %v12431_v35, %v12451_v13 }
 0x179   : > { %1962 = vst.msk [vmem:[#allocation4 + $0xb8] sm:$0xff] %vm1746_vm12, %v1818_v53  ;;  %1960 = vst.msk [vmem:[#allocation4 + $0xa8] sm:$0xff] %vm1746_vm12, %v1812_v41  ;;  %4901 = vrot.lane.b32.xlu0 %v9935_v22, %s16747_s15  ;;  %v3213_v34 = vor.u32 %v3211_v56, %v3210_v51  ;;  %v3215_v19 = vrot.slane %v3210_v51, 4  ;;  %v3546_v5 = vrot.slane %v3208_v14, 4  ;;  %v12585_v55 = vpop.f32.mrb[62].mxu0  ;;  %v3547_v20 = vrot.slane %v3211_v56, 5 }
 0x17a   : > { %v3222_v11 = vor.u32 %v3220_v54, %v3219_v1  ;;  %v1666_v38 = vmax.f32 %v1300_v52, 0.0  ;;  %v1669_v6 = vmax.f32 %v1311_v47, 0.0  ;;  %v12587_v28 = vpop.f32.mrb[63].mxu0  ;;  %v1825_v33 = vsel %vm1746_vm12, %v1668_v32, -inf  ;;  %v12597_v22 = vld [vmem:[#allocation2 + $0x6c] sm:$0xf] }
 0x17b   : > { %v3214_v26 = vsel %vm12171_vm14, %v12119_v2, %v3213_v34  ;;  %v3550_v43 = vrot.slane %v3220_v54, 5  ;;  %v3552_v8 = vrot.slane %v3217_v0, 4  ;;  %v3548_v41 = vor.u32 %v3547_v20, %v3546_v5  ;;  %v12610_v34 = vld [vmem:[#allocation2 + $0x70] sm:$0xf] }
 0x17c   : > { %v3223_v13 = vsel %vm12171_vm14, %v3215_v19, %v3222_v11  ;;  %v1819_v14 = vsel %vm1746_vm12, %v1666_v38, -inf  ;;  %v12600_v51 = vsel %vm1746_vm12, %v1669_v6, -inf  ;;  %v2922_v2 = vor.u32 %v12534_v44, %v12530_v50 }
 0x17d   : > { %v9888_v56 = vcombine.low %v3214_v26, %v3223_v13  ;;  %v3553_v32 = vor.u32 %v3552_v8, %v3550_v43  ;;  %v3549_v1 = vrot.slane %v3548_v41, 4  ;;  %v16821_v0 = vshll.u32 %v12498_v37, 16 }
 0x17e   : > { %v1324_v52 = vadd.f32 %v12431_v35, %v12468_v23  ;;  %v1316_v47 = vadd.f32 %v12431_v35, %v12478_v7  ;;  %v2923_v5 = vrot.slane %v2922_v2, 4  ;;  %v3849_v11 = vshrl.u32 %v12597_v22, 16 }
 0x17f   : > { %v2924_v54 = vrot.slane %v16821_v0, 5  ;;  %4663 = vrot.lane.b32.xlu1 %v9888_v56, %s11669_s29  ;;  %v3554_v19 = vrot.slane %v3553_v32, 4  ;;  %v16705_v50 = vshll.u32 %v12597_v22, 16  ;;  %v12615_v44 = vpop.f32.mrb[64].mxu0  ;;  %v3551_v23 = vsel %vm11887_vm8, %v3549_v1, %v3550_v43  ;;  %v12625_v56 = vld [vmem:[#allocation2 + $0x70] sm:$0xf] }
 0x180   : > { %v2025_v37 = vld [vmem:[#allocation4 + $0xb0] ss:$2 sm:$0xff]  ;;  %v2089_v38 = vld [vmem:[#allocation4 + $0xb1] ss:$2 sm:$0xff]  ;;  %v2023_v6 = vld [vmem:[#allocation4 + $0xa0] ss:$2 sm:$0xff] }
 0x181   : > { %v2927_v7 = vor.u32 %v12558_v48, %v2924_v54  ;;  %v2141_v20 = vmax.f32 %v2025_v37, %v2089_v38  ;;  %v2087_v26 = vld [vmem:[#allocation4 + $0xa1] ss:$2 sm:$0xff]  ;;  %v3559_v8 = vsel %vm11887_vm8, %v3554_v19, %v12121_v3  ;;  %v2925_v13 = vsel %vm11887_vm8, %v2923_v5, %v2924_v54  ;;  %v12627_v32 = vpop.f32.mrb[65].mxu0 }
 0x182   : > { %v1672_v41 = vmax.f32 %v1324_v52, 0.0  ;;  %v2140_v2 = vmax.f32 %v2023_v6, %v2087_v26  ;;  %v9920_v0 = vcombine.low %v3551_v23, %v3559_v8  ;;  %v1670_v43 = vmax.f32 %v1316_v47, 0.0  ;;  %v12629_v1 = vld [vmem:[#allocation2 + $0x6c] sm:$0xf]  ;;  %v12631_v48 = vpop.f32.mrb[66].mxu0 }
 0x183   : > { %v2928_v53 = vrot.slane %v2927_v7, 4  ;;  %v10404_v37 = vpack.c.bf16 %v2141_v20, %v2141_v20  ;;  %v3858_v3 = vshrl.u32 %v12610_v34, 16  ;;  %v9952_v54 = vcombine.low %v12597_v22, %v12610_v34  ;;  %v12637_v52 = vpop.f32.mrb[67].mxu0 }
 0x184   : > { %v1826_v38 = vsel %vm1746_vm12, %v1672_v41, -inf  ;;  %v10403_v19 = vpack.c.bf16 %v2140_v2, %v2140_v2  ;;  %4823 = vrot.lane.b32.xlu0 %v9920_v0, %s11668_s24  ;;  %v1820_v6 = vsel %vm1746_vm12, %v1670_v43, -inf  ;;  %v3861_v20 = vshll.u32 %v12610_v34, 16  ;;  %v12664_v2 = vld [vmem:[#allocation2 + $0x6c] sm:$0xf] }
 0x185   : > { %v2933_v47 = vsel %vm11887_vm8, %v2928_v53, %v12127_v15  ;;  %v1827_v5 = vmax.f32 %v1825_v33, %v1826_v38  ;;  %2422 = vst.msk [vmem:[#allocation2 + $0x84] sm:$0xf] %vm2168_vm2, %v10404_v37  ;;  %v1821_v7 = vmax.f32 %v1819_v14, %v1820_v6  ;;  %v9858_v26 = vcombine.low %v12629_v1, %v12625_v56  ;;  %v11100_v6 = vld [vmem:[%s16678_s3 + $0x88] sm:$0xff]  }
 0x186   : > { %v9873_v23 = vcombine.low %v2925_v13, %v2933_v47  ;;  %2421 = vst.msk [vmem:[#allocation2 + $0x80] sm:$0xf] %vm2168_vm2, %v10403_v19  ;;  %v12650_v8 = vrot.slane %v3849_v11, 4  ;;  %v12654_v15 = vrot.slane %v16705_v50, 5  ;;  %v12656_v33 = vrot.slane %v3858_v3, 4  ;;  %v11096_v19 = vld [vmem:[%s16678_s3 + $0x68] sm:$0xff]  }
 0x187   : > { %1965 = vst.msk [vmem:[#allocation4 + $0xd0] sm:$0xff] %vm1746_vm12, %v1827_v5  ;;  %v2609_v53 = vshrl.u32 %v12629_v1, 16  ;;  %1963 = vst.msk [vmem:[#allocation4 + $0xc0] sm:$0xff] %vm1746_vm12, %v1821_v7  ;;  %v3851_v14 = vrot.slane %v3849_v11, 7  ;;  %v3860_v34 = vrot.slane %v3858_v3, 7  ;;  %v12661_v13 = vrot.slane %v3861_v20, 5  ;;  %10504 = vmatprep.subr.bf16.mxu0 %v11096_v19 }
 0x188   : > { %16822 = vst [vmem:[#allocation28_spill] sm:$0xff] %v12650_v8  ;;  %16823 = vst [vmem:[#allocation29_spill] sm:$0xff] %v12654_v15  ;;  %4585 = vrot.lane.b32.xlu1 %v9873_v23, %s16747_s15  ;;  %v16704_v41 = vshrl.u32 %v12625_v56, 16  ;;  %v12666_v0 = vpop.f32.mrb[68].mxu0  ;;  %5015 = vrot.lane.b32.xlu0 %v9952_v54, %s11669_s29  ;;  %v2612_v38 = vshll.u32 %v12629_v1, 16  ;;  %v1327_v11 = vadd.f32 %v12431_v35, %v12482_v61  ;;  %v12684_v47 = vld [vmem:[%s16678_s3 + $0x80] sm:$0xff]  }
 0x189   : > { %16824 = vst [vmem:[#allocation30_spill] sm:$0xff] %v12656_v33  ;;  %16825 = vst [vmem:[#allocation31_spill] sm:$0xff] %v12661_v13  ;;  %v12671_v37 = vrot.slane %v2609_v53, 7  ;;  %v12676_v3 = vpop.f32.mrb[69].mxu0  ;;  %v16827_v54 = vmax.f32 %v12583_v30, 0.0  ;;  %v11098_v7 = vld [vmem:[%s16678_s3 + $0x28] sm:$0xff]   ;;  %v1319_v1 = vadd.f32 %v12431_v35, %v12487_v59  ;;  %10924 = vmatprep.subr.bf16.mxu1 %v12684_v47 }
 0x18a   : > { %v2620_v61 = vrot.slane %v16704_v41, 7  ;;  %v12694_v23 = vpop.f32.mrb[70].mxu0  ;;  %v11099_v30 = vld [vmem:[%s16678_s3 + $0x70] sm:$0xff]   ;;  %v1673_v43 = vmax.f32 %v1327_v11, 0.0  ;;  %v1340_v41 = vadd.f32 %v12431_v35, %v12517_v39  ;;  %v16829_v13 = vshll.u32 %v12625_v56, 16  ;;  %10505 = vmatpush3.bf16.msra.mxu0 %v11098_v7  ;;  %10926 = vmatpush3.bf16.msra.mxu1 %v12684_v47 }
 0x18b   : > { %16826 = vst [vmem:[#allocation32_spill] sm:$0xff] %v12671_v37  ;;  %v1822_v5 = vsel %vm1746_vm12, %v16827_v54, -inf  ;;  %v12703_v54 = vor.u32 %v2612_v38, %v12671_v37  ;;  %v12709_v50 = vpop.f32.mrb[71].mxu0  ;;  %v16831_v59 = vshll.u32 %v12597_v22, 16  ;;  %v3856_v8 = vrot.slane %v3851_v14, 4  ;;  %v11101_v19 = vld [vmem:[%s16678_s3 + $0x30] sm:$0xff]   ;;  %10506 = vmatprep.subr.bf16.mxu0 %v11099_v30  ;;  %10925 = vmatprep.subr.bf16.mxu1 %v11100_v6 }
 0x18c   : > { %v12717_v33 = vor.u32 %v16829_v13, %v2620_v61  ;;  %4507 = vrot.lane.b32.xlu1 %v9858_v26, %s11668_s24  ;;  %v3863_v39 = vor.u32 %v3861_v20, %v3860_v34  ;;  %v12725_v15 = vrot.slane %v2609_v53, 4  ;;  %v1671_v37 = vmax.f32 %v1319_v1, 0.0 }
 0x18d   : > { %16828 = vst [vmem:[#allocation33_spill] sm:$0xff] %v12703_v54  ;;  %v3854_v11 = vor.u32 %v16831_v59, %v3851_v14  ;;  %v1829_v54 = vsel %vm1746_vm12, %v1673_v43, -inf  ;;  %v3230_v13 = vshrl.u32 %v12664_v2, 16  ;;  %v3233_v53 = vshll.u32 %v12664_v2, 16  ;;  %v11102_v14 = vld [vmem:[%s16678_s3 + $0x78] sm:$0xff]  }
 0x18e   : > { %16830 = vst [vmem:[#allocation34_spill] sm:$0xff] %v12717_v33  ;;  %v1830_v22 = vmax.f32 %v12600_v51, %v1829_v54  ;;  %v3864_v26 = vsel %vm12171_vm14, %v3856_v8, %v3863_v39  ;;  %v1823_v34 = vsel %vm1746_vm12, %v1671_v37, -inf  ;;  %v1676_v43 = vmax.f32 %v1340_v41, 0.0  ;;  %10507 = vmatpush3.bf16.msra.mxu0 %v11101_v19  ;;  %v11103_v2 = vld [vmem:[%s16678_s3 + $0x38] sm:$0xff]   ;;  %10927 = vmatpush3.bf16.msra.mxu1 %v11100_v6 }
 0x18f   : > { %v3855_v20 = vsel %vm12171_vm14, %v12129_v16, %v3854_v11  ;;  %v3232_v61 = vrot.slane %v3230_v13, 7  ;;  %v1824_v51 = vmax.f32 %v1822_v5, %v1823_v34  ;;  %v3239_v7 = vshrl.u32 %v3102_v49, 16  ;;  %v12752_v5 = vpop.f32.mrb[72].mxu0  ;;  %10508 = vmatprep.subr.bf16.mxu0 %v11102_v14 }
 0x190   : > { %v9936_v1 = vcombine.low %v3855_v20, %v3864_v26  ;;  %1966 = vst.msk [vmem:[#allocation4 + $0xd8] sm:$0xff] %vm1746_vm12, %v1830_v22  ;;  %v3242_v16 = vshll.u32 %v3102_v49, 16  ;;  %v1332_v8 = vadd.f32 %v12431_v35, %v12525_v29  ;;  %v2935_v30 = vrot.slane %v2612_v38, 5  ;;  %v12755_v39 = vpop.f32.mrb[73].mxu0 }
 0x191   : > { %v3235_v37 = vor.u32 %v3233_v53, %v3232_v61  ;;  %v3237_v41 = vrot.slane %v3232_v61, 4  ;;  %v12750_v54 = vadd.f32 %v12431_v35, %v12532_v31  ;;  %1964 = vst.msk [vmem:[#allocation4 + $0xc8] sm:$0xff] %vm1746_vm12, %v1824_v51  ;;  %v3241_v49 = vrot.slane %v3239_v7, 7  ;;  %v12764_v6 = vpop.f32.mrb[74].mxu0 }
 0x192   : > { %4903 = vrot.lane.b32.xlu0 %v9936_v1, %s16747_s15  ;;  %v1674_v29 = vmax.f32 %v1332_v8, 0.0  ;;  %v3560_v59 = vrot.slane %v3230_v13, 4  ;;  %v3561_v11 = vrot.slane %v3233_v53, 5  ;;  %v16832_v38 = vshrl.u32 %v12625_v56, 16  ;;  %v12769_v14 = vpop.f32.mrb[75].mxu0  ;;  %10509 = vmatpush3.bf16.msra.mxu0 %v11103_v2 }
 0x193   : > { %v1837_v22 = vsel %vm1746_vm12, %v1676_v43, -inf  ;;  %v12762_v31 = vadd.f32 %v12431_v35, %v12542_v4  ;;  %v3564_v20 = vrot.slane %v3242_v16, 5  ;;  %v3236_v13 = vsel %vm12171_vm14, %v12132_v17, %v3235_v37  ;;  %10872 = vmatprep.subr.bf16.mxu0 %v12684_v47  ;;  %v12781_v2 = vld [vmem:[#allocation2 + $0x80] sm:$0xf]  ;;  %v12783_v37 = vld [vmem:[#allocation2 + $0x84] sm:$0xf] }
 0x194   : > { %v2940_v19 = vrot.slane %v16832_v38, 4  ;;  %v3244_v26 = vor.u32 %v3242_v16, %v3241_v49  ;;  %v3562_v53 = vor.u32 %v3561_v11, %v3560_v59  ;;  %v3566_v34 = vrot.slane %v3239_v7, 4 }
 0x195   : > { %v1831_v1 = vsel %vm1746_vm12, %v1674_v29, -inf  ;;  %v1677_v43 = vmax.f32 %v12750_v54, 0.0  ;;  %v2936_v4 = vor.u32 %v2935_v30, %v12725_v15  ;;  %v16833_v61 = vshll.u32 %v12625_v56, 16 }
 0x196   : > { %v3245_v17 = vsel %vm12171_vm14, %v3237_v41, %v3244_v26  ;;  %v3563_v16 = vrot.slane %v3562_v53, 4  ;;  %v3567_v8 = vor.u32 %v3566_v34, %v3564_v20  ;;  %v1356_v7 = vadd.f32 %v12431_v35, %v12570_v42 }
 0x197   : > { %v2938_v51 = vrot.slane %v16833_v61, 5  ;;  %v2029_v49 = vld [vmem:[#allocation4 + $0xd0] ss:$2 sm:$0xff]  ;;  %v2093_v29 = vld [vmem:[#allocation4 + $0xd1] ss:$2 sm:$0xff]  ;;  %v9889_v15 = vcombine.low %v3236_v13, %v3245_v17  ;;  %v2937_v30 = vrot.slane %v2936_v4, 4  ;;  %v1348_v47 = vadd.f32 %v12431_v35, %v12576_v18 }
 0x198   : > { %v2143_v59 = vmax.f32 %v2029_v49, %v2093_v29  ;;  %v3565_v41 = vsel %vm11887_vm8, %v3563_v16, %v3564_v20  ;;  %v3568_v11 = vrot.slane %v3567_v8, 4  ;;  %v1680_v38 = vmax.f32 %v1356_v7, 0.0  ;;  %v12789_v26 = vpop.f32.mrb[76].mxu0  ;;  %v2027_v42 = vld [vmem:[#allocation4 + $0xc0] ss:$2 sm:$0xff] }
 0x199   : > { %v2941_v56 = vor.u32 %v2940_v19, %v2938_v51  ;;  %v2091_v53 = vld [vmem:[#allocation4 + $0xc1] ss:$2 sm:$0xff]  ;;  %4665 = vrot.lane.b32.xlu1 %v9889_v15, %s11669_s29  ;;  %v2939_v13 = vsel %vm11887_vm8, %v2937_v30, %v2938_v51  ;;  %v1678_v19 = vmax.f32 %v1348_v47, 0.0  ;;  %v9953_v18 = vcombine.low %v12781_v2, %v12783_v37  ;;  %v12800_v16 = vld [vmem:[#allocation2 + $0x80] sm:$0xf]  ;;  %v12802_v8 = vpop.f32.mrb[77].mxu0 }
 0x19a   : > { %v10406_v4 = vpack.c.bf16 %v2143_v59, %v2143_v59  ;;  %v2142_v61 = vmax.f32 %v2027_v42, %v2091_v53  ;;  %v3573_v20 = vsel %vm11887_vm8, %v3568_v11, %v12140_v21  ;;  %v1838_v17 = vsel %vm1746_vm12, %v1680_v38, -inf  ;;  %v12808_v15 = vld [vmem:[#allocation2 + $0x84] sm:$0xf]  ;;  %v12810_v30 = vpop.f32.mrb[78].mxu0 }
 0x19b   : > { %v2942_v34 = vrot.slane %v2941_v56, 4  ;;  %v9921_v7 = vcombine.low %v3565_v41, %v3573_v20  ;;  %v1839_v49 = vmax.f32 %v1837_v22, %v1838_v17  ;;  %v1832_v29 = vsel %vm1746_vm12, %v1678_v19, -inf  ;;  %v12814_v11 = vpop.f32.mrb[79].mxu0 }
 0x19c   : > { %2424 = vst.msk [vmem:[#allocation2 + $0x98] sm:$0xf] %vm2168_vm2, %v10406_v4  ;;  %v10405_v21 = vpack.c.bf16 %v2142_v61, %v2142_v61  ;;  %v1833_v47 = vmax.f32 %v1831_v1, %v1832_v29  ;;  %v3871_v59 = vshrl.u32 %v12781_v2, 16  ;;  %v3880_v22 = vshrl.u32 %v12783_v37, 16  ;;  %v3741_v61 = vld [vmem:[#allocation2 + $0x7c] sm:$0x8] }
 0x19d   : > { %v2947_v51 = vsel %vm11887_vm8, %v2942_v34, %v12142_v46  ;;  %4825 = vrot.lane.b32.xlu0 %v9921_v7, %s11668_s24  ;;  %1969 = vst.msk [vmem:[#allocation4 + $0xf0] sm:$0xff] %vm1746_vm12, %v1839_v49  ;;  %v3874_v46 = vshll.u32 %v12781_v2, 16  ;;  %v3883_v41 = vshll.u32 %v12783_v37, 16  ;;  %v2631_v38 = vshrl.u32 %v12800_v16, 16 }
 0x19e   : > { %v9874_v56 = vcombine.low %v2939_v13, %v2947_v51  ;;  %2423 = vst.msk [vmem:[#allocation2 + $0x94] sm:$0xf] %vm2168_vm2, %v10405_v21  ;;  %v3873_v1 = vrot.slane %v3871_v59, 7  ;;  %v12825_v42 = vrot.slane %v3871_v59, 4  ;;  %v16713_v53 = vshrl.u32 %v12808_v15, 16 }
 0x19f   : > { %1967 = vst.msk [vmem:[#allocation4 + $0xe0] sm:$0xff] %vm1746_vm12, %v1833_v47  ;;  %v16835_v13 = vshrl.u32 %v12063_v24, 16  ;;  %v12832_v34 = vrot.slane %v3874_v46, 5  ;;  %v12834_v37 = vrot.slane %v3883_v41, 5  ;;  %v12836_v19 = vrot.slane %v3880_v22, 4  ;;  %v12844_v24 = vpop.f32.mrb[80].mxu0 }
 0x1a0   : > { %4587 = vrot.lane.b32.xlu1 %v9874_v56, %s16747_s15  ;;  %16834 = vst [vmem:[#allocation35_spill] sm:$0xff] %v12825_v42  ;;  %v2634_v4 = vshll.u32 %v12800_v16, 16  ;;  %v3882_v20 = vrot.slane %v3880_v22, 7  ;;  %v12839_v17 = vrot.slane %v2631_v38, 7  ;;  %v2642_v7 = vrot.slane %v16713_v53, 7  ;;  %v12855_v59 = vpop.f32.mrb[81].mxu0 }
 0x1a1   : > { %v12830_v2 = vrot.slane %v16835_v13, 11  ;;  %16836 = vst [vmem:[#allocation36_spill] sm:$0xff] %v12832_v34  ;;  %16837 = vst [vmem:[#allocation37_spill] sm:$0xff] %v12834_v37  ;;  %v16717_v51 = vshll.u32 %v12808_v15, 16  ;;  %v1840_v49 = vsel %vm1746_vm12, %v1677_v43, -inf  ;;  %v1675_v29 = vmax.f32 %v12762_v31, 0.0  ;;  %5017 = vrot.lane.b32.xlu0 %v9953_v18, %s11669_s29 }
 0x1a2   : > { %16838 = vst [vmem:[#allocation38_spill] sm:$0xff] %v12836_v19  ;;  %16839 = vst [vmem:[#allocation39_spill] sm:$0xff] %v12839_v17  ;;  %v3103_v47 = vld [vmem:[#allocation2 + $0x7c] sm:$0x8]  ;;  %v12858_v22 = vor.u32 %v2634_v4, %v12839_v17  ;;  %v9859_v31 = vcombine.low %v12800_v16, %v12808_v15  ;;  %v1359_v43 = vadd.f32 %v12431_v35, %v12585_v55  ;;  %v3104_v13 = vld [vmem:[#allocation2 + $0x80] sm:$0xf] }
 0x1a3   : > { %v12862_v54 = vor.u32 %v16717_v51, %v2642_v7  ;;  %v12868_v56 = vpop.f32.mrb[82].mxu0  ;;  %v1351_v18 = vadd.f32 %v12431_v35, %v12587_v28  ;;  %v1372_v21 = vadd.f32 %v12431_v35, %v12615_v44  ;;  %v3866_v53 = vshrl.u32 %v3741_v61, 16 }
 0x1a4   : > { %16840 = vst [vmem:[#allocation40_spill] sm:$0xff] %v12858_v22  ;;  %v3876_v37 = vor.u32 %v3874_v46, %v3873_v1  ;;  %v12874_v19 = vpop.f32.mrb[83].mxu0  ;;  %4509 = vrot.lane.b32.xlu1 %v9859_v31, %s11668_s24  ;;  %v1681_v7 = vmax.f32 %v1359_v43, 0.0  ;;  %v3878_v16 = vrot.slane %v3873_v1, 4  ;;  %v3885_v51 = vor.u32 %v3883_v41, %v3882_v20 }
 0x1a5   : > { %16841 = vst [vmem:[#allocation41_spill] sm:$0xff] %v12862_v54  ;;  %v3247_v42 = vshrl.u32 %v3103_v47, 16  ;;  %v1834_v55 = vsel %vm1746_vm12, %v1675_v29, -inf  ;;  %v1679_v34 = vmax.f32 %v1351_v18, 0.0  ;;  %v9825_v22 = vrot.slane %v3866_v53, 11 }
 0x1a6   : > { %v3105_v54 = vld [vmem:[#allocation2 + $0x84] sm:$0xf]  ;;  %v3252_v17 = vshrl.u32 %v3104_v13, 16  ;;  %v1841_v28 = vsel %vm1746_vm12, %v1681_v7, -inf  ;;  %v1684_v33 = vmax.f32 %v1372_v21, 0.0  ;;  %v3886_v44 = vsel %vm12171_vm14, %v3878_v16, %v3885_v51 }
 0x1a7   : > { %v9810_v46 = vrot.slane %v3247_v42, 11  ;;  %v1842_v61 = vmax.f32 %v1840_v49, %v1841_v28  ;;  %v1835_v31 = vsel %vm1746_vm12, %v1679_v34, -inf  ;;  %v3877_v41 = vsel %vm12171_vm14, %v9825_v22, %v3876_v37  ;;  %v12884_v43 = vpop.f32.mrb[84].mxu0  ;;  %v12919_v27 = vld [vmem:[#allocation2 + $0x94] sm:$0xf] }
 0x1a8   : > { %v3255_v1 = vshll.u32 %v3104_v13, 16  ;;  %v1836_v20 = vmax.f32 %v1834_v55, %v1835_v31  ;;  %v9937_v29 = vcombine.low %v3877_v41, %v3886_v44  ;;  %v3254_v47 = vrot.slane %v3252_v17, 7  ;;  %v12891_v34 = vpop.f32.mrb[85].mxu0  ;;  %v2851_v41 = vld [vmem:[#allocation2 + $0x88] sm:$0x1] }
 0x1a9   : > { %v3261_v53 = vshrl.u32 %v3105_v54, 16  ;;  %v2948_v18 = vrot.slane %v2631_v38, 4  ;;  %v2949_v7 = vrot.slane %v2634_v4, 5  ;;  %1970 = vst.msk [vmem:[#allocation4 + $0xf8] sm:$0xff] %vm1746_vm12, %v1842_v61  ;;  %v3264_v21 = vshll.u32 %v3105_v54, 16  ;;  %v12895_v13 = vpop.f32.mrb[86].mxu0 }
 0x1aa   : > { %v12889_v42 = vadd.f32 %v12431_v35, %v12627_v32  ;;  %1968 = vst.msk [vmem:[#allocation4 + $0xe8] sm:$0xff] %vm1746_vm12, %v1836_v20  ;;  %4905 = vrot.lane.b32.xlu0 %v9937_v29, %s16747_s15  ;;  %v3257_v37 = vor.u32 %v3255_v1, %v3254_v47  ;;  %v3259_v51 = vrot.slane %v3254_v47, 4  ;;  %v3574_v22 = vrot.slane %v3252_v17, 4  ;;  %v3493_v32 = vld [vmem:[#allocation2 + $0x88] sm:$0x1]  ;;  %v12902_v55 = vpop.f32.mrb[87].mxu0 }
 0x1ab   : > { %v3263_v49 = vrot.slane %v3261_v53, 7  ;;  %v16842_v38 = vshrl.u32 %v12808_v15, 16  ;;  %v12900_v54 = vsel %vm1746_vm12, %v1684_v33, -inf  ;;  %v3575_v16 = vrot.slane %v3255_v1, 5 }
 0x1ac   : > { %v3258_v28 = vsel %vm12171_vm14, %v9810_v46, %v3257_v37  ;;  %v3578_v61 = vrot.slane %v3264_v21, 5  ;;  %v3580_v31 = vrot.slane %v3261_v53, 4  ;;  %v1682_v17 = vmax.f32 %v12889_v42, 0.0 }
 0x1ad   : > { %v2954_v4 = vrot.slane %v16842_v38, 4  ;;  %v3266_v44 = vor.u32 %v3264_v21, %v3263_v49  ;;  %v12909_v20 = vadd.f32 %v12431_v35, %v12631_v48  ;;  %v12913_v33 = vadd.f32 %v12431_v35, %v12637_v52 }
 0x1ae   : > { %v3576_v1 = vor.u32 %v3575_v16, %v3574_v22  ;;  %v3581_v47 = vor.u32 %v3580_v31, %v3578_v61  ;;  %v3584_v46 = vshll.u32 %v3493_v32, 16  ;;  %v2950_v37 = vor.u32 %v2949_v7, %v2948_v18 }
 0x1af   : > { %v3267_v29 = vsel %vm12171_vm14, %v3259_v51, %v3266_v44  ;;  %v16843_v49 = vshll.u32 %v12808_v15, 16  ;;  %v2958_v38 = vshll.u32 %v2851_v41, 16  ;;  %v1388_v22 = vadd.f32 %v12431_v35, %v12666_v0  ;;  %v12928_v44 = vpop.f32.mrb[88].mxu0 }
 0x1b0   : > { %v9890_v21 = vcombine.low %v3258_v28, %v3267_v29  ;;  %v3577_v53 = vrot.slane %v3576_v1, 4  ;;  %v2033_v48 = vld [vmem:[#allocation4 + $0xf0] ss:$2 sm:$0xff]  ;;  %v2097_v25 = vld [vmem:[#allocation4 + $0xf1] ss:$2 sm:$0xff]  ;;  %v3582_v62 = vrot.slane %v3581_v47, 4  ;;  %v1380_v51 = vadd.f32 %v12431_v35, %v12676_v3 }
 0x1b1   : > { %v2952_v42 = vrot.slane %v16843_v49, 5  ;;  %v3586_v52 = vrot.slane %v3584_v46, 5  ;;  %v2145_v32 = vmax.f32 %v2033_v48, %v2097_v25  ;;  %v2031_v18 = vld [vmem:[#allocation4 + $0xe0] ss:$2 sm:$0xff]  ;;  %v2095_v7 = vld [vmem:[#allocation4 + $0xe1] ss:$2 sm:$0xff] }
 0x1b2   : > { %4667 = vrot.lane.b32.xlu1 %v9890_v21, %s11669_s29  ;;  %v3579_v15 = vsel %vm11887_vm8, %v3577_v53, %v3578_v61  ;;  %v2951_v16 = vrot.slane %v2950_v37, 4  ;;  %v2144_v31 = vmax.f32 %v2031_v18, %v2095_v7  ;;  %v2960_v0 = vrot.slane %v2958_v38, 5  ;;  %v12932_v29 = vld [vmem:[#allocation2 + $0x98] sm:$0xf]  ;;  %v12936_v46 = vpop.f32.mrb[89].mxu0 }
 0x1b3   : > { %v2955_v28 = vor.u32 %v2954_v4, %v2952_v42  ;;  %v3587_v41 = vsel %vm11887_vm8, %v3582_v62, %v3586_v52  ;;  %v1688_v1 = vmax.f32 %v1388_v22, 0.0  ;;  %v10408_v25 = vpack.c.bf16 %v2145_v32, %v2145_v32  ;;  %v12940_v53 = vpop.f32.mrb[90].mxu0  ;;  %v2465_v48 = vld [vmem:[#allocation2 + $0x94] sm:$0xf]  ;;  %v12955_v7 = vld [vmem:[#allocation2 + $0x98] sm:$0xf] }
 0x1b4   : > { %v9922_v35 = vcombine.low %v3579_v15, %v3587_v41  ;;  %v2953_v3 = vsel %vm11887_vm8, %v2951_v16, %v2952_v42  ;;  %v10407_v61 = vpack.c.bf16 %v2144_v31, %v2144_v31  ;;  %v1686_v37 = vmax.f32 %v1380_v51, 0.0  ;;  %v12949_v52 = vpop.f32.mrb[91].mxu0 }
 0x1b5   : > { %v2956_v47 = vrot.slane %v2955_v28, 4  ;;  %v1850_v4 = vsel %vm1746_vm12, %v1688_v1, -inf  ;;  %v3893_v21 = vshrl.u32 %v12919_v27, 16  ;;  %2426 = vst.msk [vmem:[#allocation2 + $0xac] sm:$0xf] %vm2168_vm2, %v10408_v25  ;;  %v16722_v42 = vshll.u32 %v12919_v27, 16 }
 0x1b6   : > { %4827 = vrot.lane.b32.xlu0 %v9922_v35, %s11668_s24  ;;  %v1851_v49 = vmax.f32 %v12900_v54, %v1850_v4  ;;  %v3902_v38 = vshrl.u32 %v12932_v29, 16  ;;  %2425 = vst.msk [vmem:[#allocation2 + $0xa8] sm:$0xf] %vm2168_vm2, %v10407_v61  ;;  %v1843_v22 = vsel %vm1746_vm12, %v1682_v17, -inf  ;;  %v1844_v32 = vsel %vm1746_vm12, %v1686_v37, -inf }
 0x1b7   : > { %v2961_v62 = vsel %vm11887_vm8, %v2956_v47, %v2960_v0  ;;  %v3905_v18 = vshll.u32 %v12932_v29, 16  ;;  %v1685_v54 = vmax.f32 %v12909_v20, 0.0  ;;  %v1845_v15 = vmax.f32 %v1843_v22, %v1844_v32  ;;  %v12972_v20 = vpop.f32.mrb[92].mxu0  ;;  %v2205_v47 = vld [vmem:[#allocation2 + $0x90] sm:$0x8] }
 0x1b8   : > { %v9875_v51 = vcombine.low %v2953_v3, %v2961_v62  ;;  %1973 = vst.msk [vmem:[#allocation4 + $0x110] sm:$0xff] %vm1746_vm12, %v1851_v49  ;;  %v12959_v16 = vrot.slane %v3893_v21, 4  ;;  %v12963_v28 = vrot.slane %v16722_v42, 5  ;;  %v12968_v31 = vrot.slane %v3902_v38, 4  ;;  %v12981_v61 = vpop.f32.mrb[93].mxu0 }
 0x1b9   : > { %v12966_v17 = vrot.slane %v3905_v18, 5  ;;  %v9954_v41 = vcombine.low %v12919_v27, %v12932_v29  ;;  %v2653_v0 = vshrl.u32 %v2465_v48, 16  ;;  %v1683_v1 = vmax.f32 %v12913_v33, 0.0  ;;  %1971 = vst.msk [vmem:[#allocation4 + $0x100] sm:$0xff] %vm1746_vm12, %v1845_v15  ;;  %16848 = vst [vmem:[#allocation46_spill] sm:$0xff] %v12981_v61 }
 0x1ba   : > { %16844 = vst [vmem:[#allocation42_spill] sm:$0xff] %v12959_v16  ;;  %16845 = vst [vmem:[#allocation43_spill] sm:$0xff] %v12963_v28  ;;  %4589 = vrot.lane.b32.xlu1 %v9875_v51, %s16747_s15  ;;  %v12976_v25 = vrot.slane %v3893_v21, 7  ;;  %v2662_v3 = vshrl.u32 %v12955_v7, 16  ;;  %v2656_v33 = vshll.u32 %v2465_v48, 16  ;;  %v9860_v37 = vcombine.low %v2465_v48, %v12955_v7  ;;  %v12989_v21 = vpop.f32.mrb[94].mxu0 }
 0x1bb   : > { %16846 = vst [vmem:[#allocation44_spill] sm:$0xff] %v12966_v17  ;;  %16847 = vst [vmem:[#allocation45_spill] sm:$0xff] %v12968_v31  ;;  %5019 = vrot.lane.b32.xlu0 %v9954_v41, %s11669_s29  ;;  %v12986_v4 = vrot.slane %v2653_v0, 7  ;;  %v3904_v62 = vrot.slane %v3902_v38, 7  ;;  %v12995_v51 = vld [vmem:[%s16677_s2] ss:$0 sm:$0xff] }
 0x1bc   : > { %16850 = vst [vmem:[#allocation48_spill] sm:$0xff] %v12989_v21  ;;  %v2664_v49 = vrot.slane %v2662_v3, 7  ;;  %v1391_v32 = vadd.f32 %v12995_v51, %v12694_v23  ;;  %v3107_v15 = vld [vmem:[#allocation2 + $0x94] sm:$0xf]  ;;  %v12999_v41 = vpop.f32.mrb[95].mxu0  ;;  %v1383_v38 = vadd.f32 %v12995_v51, %v12709_v50  ;;  %v1404_v48 = vadd.f32 %v12995_v51, %v12752_v5 }
 0x1bd   : > { %16849 = vst [vmem:[#allocation47_spill] sm:$0xff] %v12986_v4  ;;  %16851 = vst [vmem:[#allocation49_spill] sm:$0xff] %v12999_v41  ;;  %v13002_v29 = vor.u32 %v2656_v33, %v12986_v4  ;;  %v2206_v35 = vsel %vm11895_vm11, 0, %v2205_v47  ;;  %v3108_v42 = vld [vmem:[#allocation2 + $0x98] sm:$0xf]  ;;  %v1852_v23 = vsel %vm1746_vm12, %v1685_v54, -inf }
 0x1be   : > { %4511 = vrot.lane.b32.xlu1 %v9860_v37, %s11668_s24  ;;  %v1846_v22 = vsel %vm1746_vm12, %v1683_v1, -inf  ;;  %v16853_v17 = vshll.u32 %v12955_v7, 16  ;;  %v1689_v16 = vmax.f32 %v1391_v32, 0.0  ;;  %2207 = vst [vmem:[#allocation2 + $0x90] sm:$0x8] %v2206_v35  ;;  %v2962_v37 = vrot.slane %v2653_v0, 4 }
 0x1bf   : > { %16852 = vst [vmem:[#allocation50_spill] sm:$0xff] %v13002_v29  ;;  %v2963_v28 = vrot.slane %v2656_v33, 5  ;;  %v1687_v50 = vmax.f32 %v1383_v38, 0.0  ;;  %v3274_v29 = vshrl.u32 %v3107_v15, 16  ;;  %v13017_v4 = vrot.slane %v2662_v3, 4 }
 0x1c0   : > { %v13015_v31 = vor.u32 %v16853_v17, %v2664_v49  ;;  %v1853_v5 = vsel %vm1746_vm12, %v1689_v16, -inf  ;;  %v1692_v47 = vmax.f32 %v1404_v48, 0.0  ;;  %v3283_v41 = vshrl.u32 %v3108_v42, 16  ;;  %v2253_v21 = vld [vmem:[#allocation2 + $0x9c] sm:$0x1]  ;;  %v13022_v49 = vpop.f32.mrb[96].mxu0 }
 0x1c1   : > { %v1854_v54 = vmax.f32 %v1852_v23, %v1853_v5  ;;  %v1847_v1 = vsel %vm1746_vm12, %v1687_v50, -inf  ;;  %v3900_v61 = vrot.slane %v12976_v25, 4  ;;  %v3907_v17 = vor.u32 %v3905_v18, %v3904_v62  ;;  %v13024_v38 = vpop.f32.mrb[97].mxu0 }
 0x1c2   : > { %16854 = vst [vmem:[#allocation51_spill] sm:$0xff] %v13015_v31  ;;  %v1848_v35 = vmax.f32 %v1846_v22, %v1847_v1  ;;  %v3276_v0 = vrot.slane %v3274_v29, 7  ;;  %v3285_v33 = vrot.slane %v3283_v41, 7  ;;  %v3286_v32 = vshll.u32 %v3108_v42, 16  ;;  %16855 = vst [vmem:[#allocation52_spill] sm:$0xff] %v13024_v38  ;;  %v13037_v62 = vpop.f32.mrb[98].mxu0 }
 0x1c3   : > { %1974 = vst.msk [vmem:[#allocation4 + $0x118] sm:$0xff] %vm1746_vm12, %v1854_v54  ;;  %v3277_v16 = vshll.u32 %v3107_v15, 16  ;;  %v13029_v3 = vadd.f32 %v12995_v51, %v12755_v39  ;;  %v13033_v48 = vadd.f32 %v12995_v51, %v12764_v6  ;;  %v2254_v18 = vsel %vm11866_vm5, 0, %v2253_v21  ;;  %16856 = vst [vmem:[#allocation53_spill] sm:$0xff] %v13037_v62  ;;  %v13046_v50 = vpop.f32.mrb[99].mxu0 }
 0x1c4   : > { %1972 = vst.msk [vmem:[#allocation4 + $0x108] sm:$0xff] %vm1746_vm12, %v1848_v35  ;;  %v13041_v42 = vsel %vm1746_vm12, %v1692_v47, -inf  ;;  %v16857_v22 = vshll.u32 %v12919_v27, 16  ;;  %v3281_v39 = vrot.slane %v3276_v0, 4  ;;  %v3288_v23 = vor.u32 %v3286_v32, %v3285_v33  ;;  %2255 = vst [vmem:[#allocation2 + $0x9c] sm:$0x1] %v2254_v18 }
 0x1c5   : > { %16858 = vst [vmem:[#allocation54_spill] sm:$0xff] %v13046_v50  ;;  %v3744_v6 = vld [vmem:[#allocation2 + $0x90] sm:$0x8]  ;;  %v3908_v21 = vsel %vm12171_vm14, %v3900_v61, %v3907_v17  ;;  %v13052_v54 = vadd.f32 %v12995_v51, %v12769_v14  ;;  %v3588_v47 = vrot.slane %v3274_v29, 4  ;;  %v1420_v1 = vadd.f32 %v12995_v51, %v12789_v26 }
 0x1c6   : > { %v3898_v15 = vor.u32 %v16857_v22, %v12976_v25  ;;  %v3106_v5 = vld [vmem:[#allocation2 + $0x90] sm:$0x8]  ;;  %v3888_v27 = vshrl.u32 %v3744_v6, 16  ;;  %v3279_v35 = vor.u32 %v3277_v16, %v3276_v0  ;;  %v2964_v33 = vor.u32 %v2963_v28, %v2962_v37 }
 0x1c7   : > { %v3269_v25 = vshrl.u32 %v3106_v5, 16  ;;  %v1690_v18 = vmax.f32 %v13029_v3, 0.0  ;;  %v1693_v22 = vmax.f32 %v13033_v48, 0.0  ;;  %v3589_v31 = vrot.slane %v3277_v16, 5  ;;  %v13063_v28 = vpop.f32.mrb[100].mxu0 }
 0x1c8   : > { %v3592_v50 = vrot.slane %v3286_v32, 5  ;;  %v9826_v61 = vrot.slane %v3888_v27, 11  ;;  %v3289_v14 = vsel %vm12171_vm14, %v3281_v39, %v3288_v23  ;;  %v3594_v62 = vrot.slane %v3283_v41, 4  ;;  %16860 = vst [vmem:[#allocation55_spill] sm:$0xff] %v13063_v28  ;;  %v13069_v41 = vpop.f32.mrb[101].mxu0 }
 0x1c9   : > { %v9811_v17 = vrot.slane %v3269_v25, 11  ;;  %v1691_v29 = vmax.f32 %v13052_v54, 0.0  ;;  %v3590_v38 = vor.u32 %v3589_v31, %v3588_v47  ;;  %v16859_v26 = vshll.u32 %v12955_v7, 16 }
 0x1ca   : > { %v1696_v0 = vmax.f32 %v1420_v1, 0.0  ;;  %v2037_v37 = vld [vmem:[#allocation4 + $0x110] ss:$2 sm:$0xff]  ;;  %v2101_v3 = vld [vmem:[#allocation4 + $0x111] ss:$2 sm:$0xff]  ;;  %v3899_v32 = vsel %vm12171_vm14, %v9826_v61, %v3898_v15  ;;  %v3595_v48 = vor.u32 %v3594_v62, %v3592_v50  ;;  %v2965_v39 = vrot.slane %v2964_v33, 4 }
 0x1cb   : > { %v2966_v6 = vrot.slane %v16859_v26, 5  ;;  %v3280_v16 = vsel %vm12171_vm14, %v9811_v17, %v3279_v35  ;;  %v2147_v23 = vmax.f32 %v2037_v37, %v2101_v3  ;;  %v2035_v31 = vld [vmem:[#allocation4 + $0x100] ss:$2 sm:$0xff]  ;;  %v2099_v5 = vld [vmem:[#allocation4 + $0x101] ss:$2 sm:$0xff]  ;;  %v9938_v7 = vcombine.low %v3899_v32, %v3908_v21  ;;  %v13077_v33 = vpop.f32.mrb[102].mxu0 }
 0x1cc   : > { %v9891_v54 = vcombine.low %v3280_v16, %v3289_v14  ;;  %v3494_v47 = vld [vmem:[#allocation2 + $0x9c] sm:$0x1]  ;;  %v1412_v1 = vadd.f32 %v12995_v51, %v12802_v8  ;;  %v2146_v27 = vmax.f32 %v2035_v31, %v2099_v5  ;;  %v3591_v25 = vrot.slane %v3590_v38, 4  ;;  %v13082_v37 = vld [vmem:[#allocation2 + $0xa8] sm:$0xf]  ;;  %v13084_v3 = vpop.f32.mrb[103].mxu0 }
 0x1cd   : > { %v3596_v26 = vrot.slane %v3595_v48, 4  ;;  %v3598_v15 = vshll.u32 %v3494_v47, 16  ;;  %v2852_v61 = vld [vmem:[#allocation2 + $0x9c] sm:$0x1]  ;;  %v10410_v28 = vpack.c.bf16 %v2147_v23, %v2147_v23  ;;  %4907 = vrot.lane.b32.xlu0 %v9938_v7, %s16747_s15  ;;  %v2969_v62 = vor.u32 %v13017_v4, %v2966_v6  ;;  %v13089_v48 = vld [vmem:[#allocation2 + $0xa8] sm:$0xf] }
 0x1ce   : > { %4669 = vrot.lane.b32.xlu1 %v9891_v54, %s11669_s29  ;;  %v2972_v35 = vshll.u32 %v2852_v61, 16  ;;  %v1862_v21 = vsel %vm1746_vm12, %v1696_v0, -inf  ;;  %v10409_v17 = vpack.c.bf16 %v2146_v27, %v2146_v27  ;;  %v3593_v8 = vsel %vm11887_vm8, %v3591_v25, %v3592_v50 }
 0x1cf   : > { %v3600_v38 = vrot.slane %v3598_v15, 5  ;;  %v1863_v14 = vmax.f32 %v13041_v42, %v1862_v21  ;;  %2428 = vst.msk [vmem:[#allocation2 + $0xc0] sm:$0xf] %vm2168_vm2, %v10410_v28  ;;  %v2967_v4 = vsel %vm11887_vm8, %v2965_v39, %v2966_v6  ;;  %v2970_v32 = vrot.slane %v2969_v62, 4  ;;  %v13099_v28 = vld [vmem:[#allocation2 + $0xac] sm:$0xf] }
 0x1d0   : > { %v2974_v0 = vrot.slane %v2972_v35, 5  ;;  %v1694_v16 = vmax.f32 %v1412_v1, 0.0  ;;  %2427 = vst.msk [vmem:[#allocation2 + $0xbc] sm:$0xf] %vm2168_vm2, %v10409_v17  ;;  %v1855_v50 = vsel %vm1746_vm12, %v1690_v18, -inf  ;;  %v13094_v42 = vsel %vm1746_vm12, %v1693_v22, -inf }
 0x1d1   : > { %v3601_v23 = vsel %vm11887_vm8, %v3596_v26, %v3600_v38  ;;  %1977 = vst.msk [vmem:[#allocation4 + $0x130] sm:$0xff] %vm1746_vm12, %v1863_v14  ;;  %v13101_v6 = vld [vmem:[#allocation2 + $0xac] sm:$0xf]  ;;  %v3915_v18 = vshrl.u32 %v13082_v37, 16  ;;  %v13107_v7 = vpop.f32.mrb[104].mxu0  ;;  %v1858_v22 = vsel %vm1746_vm12, %v1691_v29, -inf  ;;  %v9955_v26 = vcombine.low %v13082_v37, %v13099_v28 }
 0x1d2   : > { %v9923_v39 = vcombine.low %v3593_v8, %v3601_v23  ;;  %v2975_v31 = vsel %vm11887_vm8, %v2970_v32, %v2974_v0  ;;  %v1856_v5 = vsel %vm1746_vm12, %v1694_v16, -inf  ;;  %v2675_v1 = vshrl.u32 %v13089_v48, 16  ;;  %v13111_v27 = vpop.f32.mrb[105].mxu0  ;;  %v2165_v8 = vld [vmem:[#allocation2 + $0x4] sm:$0x8] }
 0x1d3   : > { %v9876_v54 = vcombine.low %v2967_v4, %v2975_v31  ;;  %v1857_v47 = vmax.f32 %v1855_v50, %v1856_v5  ;;  %v16730_v25 = vshrl.u32 %v13099_v28, 16  ;;  %v2678_v15 = vshll.u32 %v13089_v48, 16  ;;  %v13119_v62 = vpop.f32.mrb[106].mxu0 }
 0x1d4   : > { %4829 = vrot.lane.b32.xlu0 %v9923_v39, %s11668_s24  ;;  %v2684_v61 = vshrl.u32 %v13101_v6, 16  ;;  %v13123_v29 = vrot.slane %v2675_v1, 7  ;;  %v9861_v35 = vcombine.low %v13089_v48, %v13101_v6  ;;  %v1423_v21 = vadd.f32 %v12995_v51, %v12810_v30  ;;  %v13131_v38 = vpop.f32.mrb[107].mxu0 }
 0x1d5   : > { %4591 = vrot.lane.b32.xlu1 %v9876_v54, %s16747_s15  ;;  %1975 = vst.msk [vmem:[#allocation4 + $0x120] sm:$0xff] %vm1746_vm12, %v1857_v47  ;;  %v1415_v17 = vadd.f32 %v12995_v51, %v12814_v11  ;;  %16862 = vst [vmem:[#allocation57_spill] sm:$0xff] %v13131_v38  ;;  %v13135_v14 = vrot.slane %v3915_v18, 7  ;;  %v16729_v32 = vshll.u32 %v13101_v6, 16  ;;  %v2527_v0 = vsel %vm12171_vm14, %v12830_v2, %v12164_v45  ;;  %v2208_v2 = vld [vmem:[#allocation2 + $0xa4] sm:$0x8] }
 0x1d6   : > { %16861 = vst [vmem:[#allocation56_spill] sm:$0xff] %v13123_v29  ;;  %v2686_v4 = vrot.slane %v2684_v61, 7  ;;  %v13143_v30 = vor.u32 %v2678_v15, %v13123_v29  ;;  %v1697_v16 = vmax.f32 %v1423_v21, 0.0  ;;  %v2528_v48 = vrot.slane %v12156_v60, 4  ;;  %v13164_v47 = vld [vmem:[#allocation2 + $0xa8] sm:$0xf] }
 0x1d7   : > { %v1695_v11 = vmax.f32 %v1415_v17, 0.0  ;;  %v3926_v50 = vrot.slane %v16730_v25, 7  ;;  %v2166_v39 = vsel %vm11895_vm11, 0, %v2165_v8  ;;  %v2506_v45 = vrot.slane %v12010_v12, 4 }
 0x1d8   : > { %16863 = vst [vmem:[#allocation58_spill] sm:$0xff] %v13143_v30  ;;  %5021 = vrot.lane.b32.xlu0 %v9955_v26, %s11669_s29  ;;  %v13151_v23 = vor.u32 %v16729_v32, %v2686_v4  ;;  %v1865_v31 = vsel %vm1746_vm12, %v1697_v16, -inf  ;;  %v2536_v5 = vsel %vm12171_vm14, %v2528_v48, %v12161_v9  ;;  %2167 = vst [vmem:[#allocation2 + $0x4] sm:$0x8] %v2166_v39  ;;  %v13166_v26 = vpop.permute.xlu1 %4577  ;;  %v13174_v4 = vld [vmem:[#allocation2 + $0xac] sm:$0xf] }
 0x1d9   : > { %4513 = vrot.lane.b32.xlu1 %v9861_v35, %s11668_s24  ;;  %v1859_v60 = vsel %vm1746_vm12, %v1695_v11, -inf  ;;  %v1436_v54 = vadd.f32 %v12995_v51, %v12844_v24  ;;  %v1866_v21 = vmax.f32 %v13094_v42, %v1865_v31  ;;  %v9838_v35 = vcombine.low %v2527_v0, %v2536_v5  ;;  %v2256_v9 = vld [vmem:[#allocation2 + $0xb0] sm:$0x1]  ;;  %v13176_v16 = vpop.f32.mrb[108].mxu0 }
 0x1da   : > { %16864 = vst [vmem:[#allocation59_spill] sm:$0xff] %v13151_v23  ;;  %v1860_v17 = vmax.f32 %v1858_v22, %v1859_v60  ;;  %v13172_v8 = vsel %vm12171_vm14, %v2506_v45, %v11914_v10  ;;  %16865 = vst [vmem:[#allocation60_spill] sm:$0xff] %v13176_v16  ;;  %v3918_v24 = vshll.u32 %v13082_v37, 16  ;;  %v3927_v11 = vshll.u32 %v13099_v28, 16  ;;  %v13184_v22 = vpop.f32.mrb[109].mxu0 }
 0x1db   : > { %v13180_v48 = vrot.slane %v2675_v1, 4  ;;  %v2209_v42 = vsel %vm11895_vm11, 0, %v2208_v2  ;;  %16866 = vst [vmem:[#allocation61_spill] sm:$0xff] %v13184_v22  ;;  %v13186_v0 = vrot.slane %v2678_v15, 5  ;;  %v13188_v10 = vrot.slane %v2684_v61, 4  ;;  %1978 = vst.msk [vmem:[#allocation4 + $0x138] sm:$0xff] %vm1746_vm12, %v1866_v21 }
 0x1dc   : > { %1976 = vst.msk [vmem:[#allocation4 + $0x128] sm:$0xff] %vm1746_vm12, %v1860_v17  ;;  %v1700_v39 = vmax.f32 %v1436_v54, 0.0  ;;  %2210 = vst [vmem:[#allocation2 + $0xa4] sm:$0x8] %v2209_v42  ;;  %v3296_v45 = vshrl.u32 %v13164_v47, 16  ;;  %v13193_v31 = vpop.f32.mrb[110].mxu0  ;;  %v3929_v60 = vor.u32 %v3927_v11, %v3926_v50  ;;  %v1428_v15 = vadd.f32 %v12995_v51, %v12855_v59  ;;  %v4500_v25 = vpop.permute.xlu1 %4499 }
 0x1dd   : > { %16867 = vst [vmem:[#allocation62_spill] sm:$0xff] %v13193_v31  ;;  %v3922_v1 = vrot.slane %v13135_v14, 4  ;;  %v16732_v2 = vshrl.u32 %v13174_v4, 16  ;;  %v3308_v5 = vshll.u32 %v13174_v4, 16  ;;  %v1439_v21 = vadd.f32 %v12995_v51, %v12868_v56 }
 0x1de   : > { %v3298_v61 = vrot.slane %v3296_v45, 7  ;;  %v2257_v54 = vsel %vm11866_vm5, 0, %v2256_v9  ;;  %v1698_v42 = vmax.f32 %v1428_v15, 0.0  ;;  %v4229_v50 = vrot.slane %v3915_v18, 4 }
 0x1df   : > { %v3307_v17 = vrot.slane %v16732_v2, 7  ;;  %2258 = vst [vmem:[#allocation2 + $0xb0] sm:$0x1] %v2257_v54  ;;  %v4230_v32 = vrot.slane %v3918_v24, 5  ;;  %v2443_v59 = vld [vmem:[#allocation2 + $0x4] sm:$0x8] }
 0x1e0   : > { %v16868_v30 = vshll.u32 %v11875_v40, 16  ;;  %v3299_v56 = vshll.u32 %v13164_v47, 16  ;;  %v1701_v29 = vmax.f32 %v1439_v21, 0.0  ;;  %v13212_v31 = vrot.slane %v3927_v11, 5 }
 0x1e1   : > { %v2494_v9 = vshrl.u32 %v2443_v59, 16  ;;  %v13215_v2 = vsel %vm1746_vm12, %v1700_v39, -inf  ;;  %v3303_v15 = vrot.slane %v3298_v61, 4  ;;  %v3310_v54 = vor.u32 %v3308_v5, %v3307_v17 }
 0x1e2   : > { %v2504_v23 = vor.u32 %v16868_v30, %v12010_v12  ;;  %v13218_v37 = vsel %vm1746_vm12, %v1698_v42, -inf  ;;  %v13221_v18 = vsel %vm1746_vm12, %v1701_v29, -inf  ;;  %v4231_v22 = vor.u32 %v4230_v32, %v4229_v50  ;;  %v2041_v30 = vld [vmem:[#allocation4 + $0x130] ss:$2 sm:$0xff]  ;;  %v2105_v47 = vld [vmem:[#allocation4 + $0x131] ss:$2 sm:$0xff] }
 0x1e3   : > { %v16869_v40 = vshrl.u32 %v13099_v28, 16  ;;  %v2039_v11 = vld [vmem:[#allocation4 + $0x120] ss:$2 sm:$0xff]  ;;  %v13226_v21 = vsel %vm1746_vm12, %v9838_v35, %v4500_v25  ;;  %v3920_v39 = vor.u32 %v3918_v24, %v13135_v14  ;;  %v3930_v17 = vsel %vm12171_vm14, %v3922_v1, %v3929_v60  ;;  %v2103_v16 = vld [vmem:[#allocation4 + $0x121] ss:$2 sm:$0xff] }
 0x1e4   : > { %v3301_v42 = vor.u32 %v3299_v56, %v3298_v61  ;;  %v2149_v59 = vmax.f32 %v2041_v30, %v2105_v47  ;;  %v9789_v29 = vrot.slane %v2494_v9, 11  ;;  %v3747_v38 = vld [vmem:[#allocation2 + $0xa4] sm:$0x8]  ;;  %v2148_v28 = vmax.f32 %v2039_v11, %v2103_v16  ;;  %v13240_v11 = vpop.f32.mrb[111].mxu0 }
 0x1e5   : > { %v4235_v12 = vrot.slane %v16869_v40, 4  ;;  %v3910_v50 = vshrl.u32 %v3747_v38, 16  ;;  %v3109_v40 = vld [vmem:[#allocation2 + $0xa4] sm:$0x8]  ;;  %v3311_v25 = vsel %vm12171_vm14, %v3303_v15, %v3310_v54  ;;  %v2978_v14 = vor.u32 %v13186_v0, %v13180_v48  ;;  %v4498_v48 = vpop.permute.xlu0 %4497 }
 0x1e6   : > { %v10412_v35 = vpack.c.bf16 %v2149_v59, %v2149_v59  ;;  %v2505_v24 = vsel %vm12171_vm14, %v9789_v29, %v2504_v23  ;;  %v3291_v1 = vshrl.u32 %v3109_v40, 16  ;;  %v4135_v60 = vld [vmem:[#allocation2 + $0xb0] sm:$0x1]  ;;  %v4232_v61 = vrot.slane %v4231_v22, 4  ;;  %v13249_v29 = vpop.f32.mrb[112].mxu0 }
 0x1e7   : > { %v4236_v32 = vor.u32 %v4235_v12, %v13212_v31  ;;  %v10411_v9 = vpack.c.bf16 %v2148_v28, %v2148_v28  ;;  %v9837_v12 = vcombine.low %v2505_v24, %v13172_v8  ;;  %v9827_v30 = vrot.slane %v3910_v50, 11  ;;  %v3495_v22 = vld [vmem:[#allocation2 + $0xb0] sm:$0x1]  ;;  %v13256_v50 = vpop.f32.mrb[113].mxu0  ;;  %v11568_v24 = vld [vmem:[#allocation2 + $0x20] sm:$0xf] }
 0x1e8   : > { %v3602_v16 = vrot.slane %v3296_v45, 4  ;;  %2430 = vst.msk [vmem:[#allocation2 + $0xd4] sm:$0xf] %vm2168_vm2, %v10412_v35  ;;  %v9812_v38 = vrot.slane %v3291_v1, 11  ;;  %v4239_v15 = vshll.u32 %v4135_v60, 16  ;;  %v3603_v54 = vrot.slane %v3299_v56, 5 }
 0x1e9   : > { %v4237_v47 = vrot.slane %v4236_v32, 4  ;;  %2429 = vst.msk [vmem:[#allocation2 + $0xd0] sm:$0xf] %vm2168_vm2, %v10411_v9  ;;  %v3921_v23 = vsel %vm12171_vm14, %v9827_v30, %v3920_v39  ;;  %v1431_v8 = vadd.f32 %v12995_v51, %v12874_v19  ;;  %v3606_v0 = vrot.slane %v3308_v5, 5  ;;  %v11567_v5 = vld [vmem:[#allocation2 + $0x1c] sm:$0xf] }
 0x1ea   : > { %v16870_v45 = vshrl.u32 %v13174_v4, 16  ;;  %v9939_v56 = vcombine.low %v3921_v23, %v3930_v17  ;;  %v3302_v32 = vsel %vm12171_vm14, %v9812_v38, %v3301_v42  ;;  %v4234_v28 = vsel %vm11887_vm8, %v4232_v61, %v13212_v31  ;;  %v2853_v1 = vld [vmem:[#allocation2 + $0xb0] sm:$0x1]  ;;  %v13258_v60 = vpop.f32.mrb[114].mxu0  ;;  %v4658_v31 = vpop.permute.xlu1 %4657 }
 0x1eb   : > { %v4241_v39 = vrot.slane %v4239_v15, 5  ;;  %v9892_v40 = vcombine.low %v3302_v32, %v3311_v25  ;;  %v3604_v19 = vor.u32 %v3603_v54, %v3602_v16  ;;  %v9901_v4 = vcombine.low %v11567_v5, %v11568_v24  ;;  %v13267_v54 = vpop.f32.mrb[115].mxu0 }
 0x1ec   : > { %v3608_v59 = vrot.slane %v16870_v45, 4  ;;  %v5091_v17 = vsel %vm1746_vm12, %v9837_v12, %v4498_v48  ;;  %4909 = vrot.lane.b32.xlu0 %v9939_v56, %s16747_s15  ;;  %v3612_v61 = vshll.u32 %v3495_v22, 16  ;;  %v2979_v9 = vrot.slane %v2978_v14, 4 }
 0x1ed   : > { %v4242_v42 = vsel %vm11887_vm8, %v4237_v47, %v4241_v39  ;;  %4671 = vrot.lane.b32.xlu1 %v9892_v40, %s11669_s29  ;;  %v3605_v30 = vrot.slane %v3604_v19, 4  ;;  %v16871_v38 = vshll.u32 %v13101_v6, 16  ;;  %v1699_v23 = vmax.f32 %v1431_v8, 0.0  ;;  %v13271_v47 = vld [vmem:[#allocation2 + $0xbc] sm:$0xf] }
 0x1ee   : > { %v3609_v35 = vor.u32 %v3608_v59, %v3606_v0  ;;  %v9971_v25 = vcombine.low %v4234_v28, %v4242_v42  ;;  %v3614_v12 = vrot.slane %v3612_v61, 5  ;;  %v2986_v48 = vshll.u32 %v2853_v1, 16  ;;  %v13281_v59 = vld [vmem:[#allocation2 + $0xc0] sm:$0xf] }
 0x1ef   : > { %v2980_v15 = vrot.slane %v16871_v38, 5  ;;  %v1452_v45 = vadd.f32 %v12995_v51, %v12884_v43  ;;  %v5139_v14 = vsel %vm5137_vm15, %v5091_v17, %v13166_v26  ;;  %v3607_v22 = vsel %vm11887_vm8, %v3605_v30, %v3606_v0  ;;  %v4818_v26 = vpop.permute.xlu0 %4817  ;;  %v13296_v17 = vld [vmem:[#allocation2 + $0xbc] sm:$0xf]  ;;  %v13304_v30 = vld [vmem:[#allocation2 + $0xc0] sm:$0xf] }
 0x1f0   : > { %v3610_v16 = vrot.slane %v3609_v35, 4  ;;  %10888 = vmatprep.mubr.msk.bf16.mxu1 %vm1746_vm12, %v9971_v25  ;;  %v1444_v8 = vadd.f32 %v12995_v51, %v12891_v34  ;;  %v2988_v32 = vrot.slane %v2986_v48, 5  ;;  %v3937_v0 = vshrl.u32 %v13271_v47, 16  ;;  %v4580_v35 = vpop.permute.xlu1 %4579 }
 0x1f1   : > { %v2983_v6 = vor.u32 %v13188_v10, %v2980_v15  ;;  %v2981_v56 = vsel %vm11887_vm8, %v2979_v9, %v2980_v15  ;;  %v1704_v28 = vmax.f32 %v1452_v45, 0.0  ;;  %v13288_v10 = vpop.f32.mrb[116].mxu0  ;;  %v13291_v34 = vsel %vm1746_vm12, %v1699_v23, -inf }
 0x1f2   : > { %v3615_v43 = vsel %vm11887_vm8, %v3610_v16, %v3614_v12  ;;  %v1702_v19 = vmax.f32 %v1444_v8, 0.0  ;;  %v3940_v24 = vshll.u32 %v13271_v47, 16  ;;  %v3946_v1 = vshrl.u32 %v13281_v59, 16  ;;  %v13306_v16 = vpop.f32.mrb[117].mxu0 }
 0x1f3   : > { %v9924_v39 = vcombine.low %v3607_v22, %v3615_v43  ;;  %v2984_v40 = vrot.slane %v2983_v6, 4  ;;  %v1874_v5 = vsel %vm1746_vm12, %v1704_v28, -inf  ;;  %v3949_v25 = vshll.u32 %v13281_v59, 16  ;;  %v13334_v6 = vpop.f32.mrb[118].mxu0 }
 0x1f4   : > { %v1875_v61 = vmax.f32 %v13215_v2, %v1874_v5  ;;  %v1868_v9 = vsel %vm1746_vm12, %v1702_v19, -inf  ;;  %v13309_v38 = vsel %vm5170_vm0, %v5139_v14, %v4658_v31  ;;  %v13312_v15 = vsel %vm1746_vm12, %v9901_v4, %v4818_v26  ;;  %v2449_v14 = vld [vmem:[#allocation2 + $0x2c] sm:$0x8] }
 0x1f5   : > { %4831 = vrot.lane.b32.xlu0 %v9924_v39, %s11668_s24  ;;  %v2989_v42 = vsel %vm11887_vm8, %v2984_v40, %v2988_v32  ;;  %v1869_v12 = vmax.f32 %v13218_v37, %v1868_v9  ;;  %v13317_v2 = vsel %vm5137_vm15, %v13226_v21, %v4580_v35  ;;  %v13320_v48 = vrot.slane %v3937_v0, 7  ;;  %v2211_v32 = vld [vmem:[#allocation2 + $0xb8] sm:$0x8]  ;;  %v16874_v5 = vld [vmem:[#allocation14_spill] sm:$0xff]  ;;  %v3113_v9 = vld [vmem:[#allocation2 + $0xbc] sm:$0xf] }
 0x1f6   : > { %v9877_v23 = vcombine.low %v2981_v56, %v2989_v42  ;;  %1981 = vst.msk [vmem:[#allocation4 + $0x150] sm:$0xff] %vm1746_vm12, %v1875_v61  ;;  %v9956_v45 = vcombine.low %v13271_v47, %v13281_v59  ;;  %v2697_v31 = vshrl.u32 %v13296_v17, 16  ;;  %v3948_v4 = vrot.slane %v3946_v1, 7 }
 0x1f7   : > { %1979 = vst.msk [vmem:[#allocation4 + $0x140] sm:$0xff] %vm1746_vm12, %v1869_v12  ;;  %v13327_v37 = vrot.slane %v3937_v0, 4  ;;  %v13331_v21 = vrot.slane %v3940_v24, 5  ;;  %v2706_v22 = vshrl.u32 %v13304_v30, 16  ;;  %v13336_v8 = vrot.slane %v3949_v25, 5 }
 0x1f8   : > { %4593 = vrot.lane.b32.xlu1 %v9877_v23, %s16747_s15  ;;  %v13339_v59 = vrot.slane %v2697_v31, 7  ;;  %v2700_v43 = vshll.u32 %v13296_v17, 16  ;;  %v9862_v56 = vcombine.low %v13296_v17, %v13304_v30  ;;  %v13344_v28 = vrot.slane %v3946_v1, 4 }
 0x1f9   : > { %5023 = vrot.lane.b32.xlu0 %v9956_v45, %s11669_s29  ;;  %v2708_v39 = vrot.slane %v2706_v22, 7  ;;  %v16733_v26 = vshll.u32 %v13304_v30, 16  ;;  %v1455_v40 = vadd.f32 %v12995_v51, %v12895_v13  ;;  %v1447_v0 = vadd.f32 %v12995_v51, %v12902_v55  ;;  %v16876_v45 = vld [vmem:[#allocation16_spill] sm:$0xff] }
 0x1fa   : > { %16872 = vst [vmem:[#allocation63_spill] sm:$0xff] %v13339_v59  ;;  %v13350_v19 = vor.u32 %v2700_v43, %v13339_v59  ;;  %v2538_v35 = vshrl.u32 %v2449_v14, 16  ;;  %v2550_v42 = vrot.slane %v16874_v5, 4  ;;  %v1468_v61 = vadd.f32 %v12995_v51, %v12928_v44 }
 0x1fb   : > { %v13357_v17 = vor.u32 %v16733_v26, %v2708_v39  ;;  %v1705_v1 = vmax.f32 %v1455_v40, 0.0  ;;  %v2212_v13 = vsel %vm11895_vm11, 0, %v2211_v32  ;;  %v4245_v55 = vor.u32 %v13331_v21, %v13327_v37  ;;  %v13374_v32 = vld [vmem:[#allocation2 + $0xc0] sm:$0xf]  ;;  %v16877_v21 = vld [vmem:[#allocation15_spill] sm:$0xff] }
 0x1fc   : > { %16873 = vst [vmem:[#allocation64_spill] sm:$0xff] %v13350_v19  ;;  %4515 = vrot.lane.b32.xlu1 %v9862_v56, %s11668_s24  ;;  %v1703_v23 = vmax.f32 %v1447_v0, 0.0  ;;  %v9791_v12 = vrot.slane %v2538_v35, 11  ;;  %v2558_v14 = vsel %vm12171_vm14, %v2550_v42, %v16876_v45  ;;  %2213 = vst [vmem:[#allocation2 + $0xb8] sm:$0x8] %v2212_v13  ;;  %v4250_v56 = vor.u32 %v13344_v28, %v13336_v8  ;;  %v4502_v35 = vpop.permute.xlu1 %4501 }
 0x1fd   : > { %16875 = vst [vmem:[#allocation14_spill] sm:$0xff] %v13357_v17  ;;  %v13371_v39 = vrot.slane %v2697_v31, 4  ;;  %v1877_v44 = vsel %vm1746_vm12, %v1705_v1, -inf  ;;  %v1708_v40 = vmax.f32 %v1468_v61, 0.0  ;;  %v3318_v42 = vshrl.u32 %v3113_v9, 16 }
 0x1fe   : > { %v1878_v5 = vmax.f32 %v13221_v18, %v1877_v44  ;;  %v1871_v37 = vsel %vm1746_vm12, %v1703_v23, -inf  ;;  %v2549_v0 = vsel %vm12171_vm14, %v9791_v12, %v16877_v21  ;;  %v2259_v13 = vld [vmem:[#allocation2 + $0xc4] sm:$0x1]  ;;  %v3944_v45 = vrot.slane %v13320_v48, 4 }
 0x1ff   : > { %v1872_v28 = vmax.f32 %v13291_v34, %v1871_v37  ;;  %v9839_v31 = vcombine.low %v2549_v0, %v2558_v14  ;;  %v3951_v1 = vor.u32 %v3949_v25, %v3948_v4  ;;  %v13383_v61 = vrot.slane %v2700_v43, 5 }
 0x200   : > { %v13385_v26 = vrot.slane %v2706_v22, 4  ;;  %1982 = vst.msk [vmem:[#allocation4 + $0x158] sm:$0xff] %vm1746_vm12, %v1878_v5  ;;  %v3320_v18 = vrot.slane %v3318_v42, 7  ;;  %v3327_v23 = vshrl.u32 %v13374_v32, 16  ;;  %v3942_v12 = vor.u32 %v3940_v24, %v13320_v48  ;;  %v4898_v5 = vpop.permute.xlu1 %4897 }
 0x201   : > { %1980 = vst.msk [vmem:[#allocation4 + $0x148] sm:$0xff] %vm1746_vm12, %v1872_v28  ;;  %v13395_v34 = vadd.f32 %v12995_v51, %v12936_v46  ;;  %v13399_v25 = vadd.f32 %v12995_v51, %v12940_v53  ;;  %v2260_v4 = vsel %vm11866_vm5, 0, %v2259_v13  ;;  %v3321_v22 = vshll.u32 %v3113_v9, 16 }
 0x202   : > { %v3325_v43 = vrot.slane %v3320_v18, 4  ;;  %v3329_v14 = vrot.slane %v3327_v23, 7  ;;  %v3330_v44 = vshll.u32 %v13374_v32, 16  ;;  %2261 = vst [vmem:[#allocation2 + $0xc4] sm:$0x1] %v2260_v4  ;;  %v13405_v47 = vsel %vm1746_vm12, %v9839_v31, %v4502_v35 }
 0x203   : > { %v13408_v46 = vsel %vm1746_vm12, %v1708_v40, -inf  ;;  %v3750_v24 = vld [vmem:[#allocation2 + $0xb8] sm:$0x8]  ;;  %v3952_v53 = vsel %vm12171_vm14, %v3944_v45, %v3951_v1  ;;  %v13412_v37 = vrot.slane %v4245_v55, 4  ;;  %v3323_v0 = vor.u32 %v3321_v22, %v3320_v18 }
 0x204   : > { %v3112_v48 = vld [vmem:[#allocation2 + $0xb8] sm:$0x8]  ;;  %v3932_v9 = vshrl.u32 %v3750_v24, 16  ;;  %v3332_v13 = vor.u32 %v3330_v44, %v3329_v14  ;;  %v5268_v35 = vsel %vm5137_vm15, %v13312_v15, %v4898_v5  ;;  %v13420_v40 = vadd.f32 %v12995_v51, %v12949_v52 }
 0x205   : > { %v3313_v21 = vshrl.u32 %v3112_v48, 16  ;;  %v3616_v1 = vrot.slane %v3318_v42, 4  ;;  %v4248_v14 = vsel %vm11887_vm8, %v13412_v37, %v13336_v8  ;;  %v4251_v24 = vrot.slane %v4250_v56, 4 }
 0x206   : > { %v9828_v31 = vrot.slane %v3932_v9, 11  ;;  %v3333_v55 = vsel %vm12171_vm14, %v3325_v43, %v3332_v13  ;;  %v3617_v48 = vrot.slane %v3321_v22, 5  ;;  %v2992_v15 = vor.u32 %v13383_v61, %v13371_v39  ;;  %v13434_v13 = vpop.f32.mrb[119].mxu0 }
 0x207   : > { %v9813_v45 = vrot.slane %v3313_v21, 11  ;;  %v2045_v4 = vld [vmem:[#allocation4 + $0x150] ss:$2 sm:$0xff]  ;;  %v2109_v18 = vld [vmem:[#allocation4 + $0x151] ss:$2 sm:$0xff]  ;;  %v3620_v43 = vrot.slane %v3330_v44, 5 }
 0x208   : > { %v2151_v52 = vmax.f32 %v2045_v4, %v2109_v18  ;;  %v2043_v5 = vld [vmem:[#allocation4 + $0x140] ss:$2 sm:$0xff]  ;;  %v2107_v9 = vld [vmem:[#allocation4 + $0x141] ss:$2 sm:$0xff]  ;;  %v3943_v21 = vsel %vm12171_vm14, %v9828_v31, %v3942_v12  ;;  %v3618_v37 = vor.u32 %v3617_v48, %v3616_v1  ;;  %v3622_v61 = vrot.slane %v3327_v23, 4  ;;  %v13436_v17 = vpop.f32.mrb[120].mxu0 }
 0x209   : > { %v3324_v42 = vsel %vm12171_vm14, %v9813_v45, %v3323_v0  ;;  %v2150_v28 = vmax.f32 %v2043_v5, %v2107_v9  ;;  %v9940_v32 = vcombine.low %v3943_v21, %v3952_v53  ;;  %v4136_v56 = vld [vmem:[#allocation2 + $0xc4] sm:$0x1]  ;;  %v1707_v44 = vmax.f32 %v13420_v40, 0.0  ;;  %v13441_v31 = vpop.f32.mrb[121].mxu0  ;;  %v5010_v45 = vpop.permute.xlu0 %5009  ;;  %v13454_v5 = vld [vmem:[#allocation2 + $0xd0] sm:$0xf] }
 0x20a   : > { %v9893_v8 = vcombine.low %v3324_v42, %v3333_v55  ;;  %v3496_v22 = vld [vmem:[#allocation2 + $0xc4] sm:$0x1]  ;;  %v10414_v19 = vpack.c.bf16 %v2151_v52, %v2151_v52  ;;  %v4253_v39 = vshll.u32 %v4136_v56, 16  ;;  %v3619_v0 = vrot.slane %v3618_v37, 4  ;;  %16878 = vst [vmem:[#allocation16_spill] sm:$0xff] %v13441_v31 }
 0x20b   : > { %v3626_v4 = vshll.u32 %v3496_v22, 16  ;;  %v2854_v18 = vld [vmem:[#allocation2 + $0xc4] sm:$0x1]  ;;  %v10413_v12 = vpack.c.bf16 %v2150_v28, %v2150_v28  ;;  %4911 = vrot.lane.b32.xlu0 %v9940_v32, %s16747_s15  ;;  %v2993_v53 = vrot.slane %v2992_v15, 4  ;;  %v3623_v23 = vor.u32 %v3622_v61, %v3620_v43  ;;  %v13446_v28 = vpop.f32.mrb[122].mxu0 }
 0x20c   : > { %4673 = vrot.lane.b32.xlu1 %v9893_v8, %s11669_s29  ;;  %2432 = vst.msk [vmem:[#allocation2 + $0xe8] sm:$0xf] %vm2168_vm2, %v10414_v19  ;;  %v4255_v55 = vrot.slane %v4253_v39, 5  ;;  %v16879_v48 = vshll.u32 %v13304_v30, 16  ;;  %16880 = vst [vmem:[#allocation15_spill] sm:$0xff] %v13446_v28  ;;  %v3621_v32 = vsel %vm11887_vm8, %v3619_v0, %v3620_v43  ;;  %v3000_v40 = vshll.u32 %v2854_v18, 16 }
 0x20d   : > { %v3628_v1 = vrot.slane %v3626_v4, 5  ;;  %2431 = vst.msk [vmem:[#allocation2 + $0xe4] sm:$0xf] %vm2168_vm2, %v10413_v12  ;;  %v5300_v15 = vsel %vm5170_vm0, %v5268_v35, %v5010_v45  ;;  %v1484_v19 = vadd.f32 %v12995_v51, %v12972_v20  ;;  %v13456_v9 = vpop.f32.mrb[123].mxu0  ;;  %v3624_v21 = vrot.slane %v3623_v23, 4  ;;  %v16882_v20 = vld [vmem:[#allocation46_spill] sm:$0xff]  ;;  %v4820_v23 = vpop.permute.xlu0 %4819 }
 0x20e   : > { %v2994_v52 = vrot.slane %v16879_v48, 5  ;;  %16881 = vst [vmem:[#allocation65_spill] sm:$0xff] %v13456_v9  ;;  %v4256_v30 = vsel %vm11887_vm8, %v4251_v24, %v4255_v55  ;;  %5578 = vmatprep.mubr.bf16.mxu0 %v5300_v15  ;;  %v3002_v56 = vrot.slane %v3000_v40, 5  ;;  %v1476_v22 = vadd.f32 %v12995_v51, %v16882_v20  ;;  %v13466_v37 = vld [vmem:[#allocation2 + $0xd4] sm:$0xf]  ;;  %v13482_v45 = vpop.f32.mrb[124].mxu0 }
 0x20f   : > { %v9972_v43 = vcombine.low %v4248_v14, %v4256_v30  ;;  %5579 = vmatmul.mubr.bf16.vlgmr.msra.gmra.mrb[128].mxu0 %v13309_v38  ;;  %v1712_v35 = vmax.f32 %v1484_v19, 0.0  ;;  %v3629_v24 = vsel %vm11887_vm8, %v3624_v21, %v3628_v1  ;;  %v3959_v61 = vshrl.u32 %v13454_v5, 16  ;;  %16884 = vst [vmem:[#allocation46_spill] sm:$0xff] %v13482_v45  ;;  %v11570_v55 = vld [vmem:[%s16678_s3 + $0x88] sm:$0xff]   ;;  %v13492_v40 = vpop.f32.mrb[125].mxu0 }
 0x210   : > { %v2995_v42 = vsel %vm11887_vm8, %v2993_v53, %v2994_v52  ;;  %v2997_v8 = vor.u32 %v13385_v26, %v2994_v52  ;;  %v16734_v4 = vshll.u32 %v13454_v5, 16  ;;  %v11569_v26 = vld [vmem:[%s16678_s3 + $0x80] sm:$0xff]   ;;  %v16883_v38 = vmax.f32 %v13395_v34, 0.0  ;;  %v13480_v53 = vld [vmem:[#allocation2 + $0xd4] sm:$0xf]  ;;  %16885 = vst [vmem:[#allocation66_spill] sm:$0xff] %v13492_v40 }
 0x211   : > { %10873 = vmatpush3.bf16.msra.mxu0 %v11569_v26  ;;  %10889 = vmatmul.mubr.msk.bf16.vlgmr.msra.gmra.mrb[0].mxu1 %vm1746_vm12, %v9972_v43  ;;  %v9925_v18 = vcombine.low %v3621_v32, %v3629_v24  ;;  %v1886_v12 = vsel %vm1746_vm12, %v1712_v35, -inf  ;;  %v1710_v0 = vmax.f32 %v1476_v22, 0.0  ;;  %v3968_v48 = vshrl.u32 %v13466_v37, 16  ;;  %v2474_v32 = vld [vmem:[#allocation2 + $0xd0] sm:$0xf] }
 0x212   : > { %v2998_v39 = vrot.slane %v2997_v8, 4  ;;  %v1879_v14 = vsel %vm1746_vm12, %v16883_v38, -inf  ;;  %10874 = vmatprep.subr.bf16.mxu0 %v11570_v55  ;;  %v1887_v1 = vmax.f32 %v13408_v46, %v1886_v12  ;;  %v16735_v52 = vshll.u32 %v13466_v37, 16  ;;  %v11571_v30 = vld [vmem:[#allocation2 + $0x30] sm:$0xf] }
 0x213   : > { %v16886_v15 = vmax.f32 %v13399_v25, 0.0  ;;  %4833 = vrot.lane.b32.xlu0 %v9925_v18, %s11668_s24  ;;  %v11572_v21 = vld [vmem:[#allocation2 + $0x34] sm:$0xf]  ;;  %v1880_v46 = vsel %vm1746_vm12, %v1710_v0, -inf  ;;  %v13504_v35 = vsel %vm1746_vm12, %v1707_v44, -inf  ;;  %v13507_v25 = vrot.slane %v3959_v61, 4 }
 0x214   : > { %v3003_v34 = vsel %vm11887_vm8, %v2998_v39, %v3002_v56  ;;  %v9902_v8 = vcombine.low %v11571_v30, %v11572_v21  ;;  %v13500_v56 = vpop.permute.xlu1 %4659  ;;  %1985 = vst.msk [vmem:[#allocation4 + $0x170] sm:$0xff] %vm1746_vm12, %v1887_v1  ;;  %v1881_v20 = vmax.f32 %v1879_v14, %v1880_v46  ;;  %v13511_v22 = vrot.slane %v16734_v4, 5  ;;  %v2452_v12 = vld [vmem:[#allocation2 + $0x40] sm:$0x8]  ;;  %v13530_v0 = vpop.f32.mrb[126].mxu0  ;;  %v16889_v21 = vld [vmem:[#allocation48_spill] sm:$0xff] }
 0x215   : > { %v13497_v19 = vsel %vm1746_vm12, %v16886_v15, -inf  ;;  %v9878_v43 = vcombine.low %v2995_v42, %v3003_v34  ;;  %10875 = vmatpush3.bf16.msra.mxu0 %v11570_v55  ;;  %v9957_v42 = vcombine.low %v13454_v5, %v13466_v37  ;;  %v2719_v44 = vshrl.u32 %v2474_v32, 16  ;;  %16887 = vst [vmem:[#allocation67_spill] sm:$0xff] %v13530_v0  ;;  %v2214_v1 = vld [vmem:[#allocation2 + $0xcc] sm:$0x8]  ;;  %v16893_v4 = vld [vmem:[#allocation17_spill] sm:$0xff] }
 0x216   : > { %v13514_v24 = vsel %vm1746_vm12, %v9902_v8, %v4820_v23  ;;  %v2728_v39 = vshrl.u32 %v13480_v53, 16  ;;  %1983 = vst.msk [vmem:[#allocation4 + $0x160] sm:$0xff] %vm1746_vm12, %v1881_v20  ;;  %v13521_v26 = vrot.slane %v3959_v61, 7  ;;  %v13525_v38 = vrot.slane %v16735_v52, 5 }
 0x217   : > { %4595 = vrot.lane.b32.xlu1 %v9878_v43, %s16747_s15  ;;  %v13527_v14 = vrot.slane %v3968_v48, 4  ;;  %v9863_v18 = vcombine.low %v2474_v32, %v13480_v53  ;;  %5025 = vrot.lane.b32.xlu0 %v9957_v42, %s11669_s29  ;;  %v13533_v55 = vrot.slane %v2719_v44, 7  ;;  %v2722_v23 = vshll.u32 %v2474_v32, 16  ;;  %v16890_v43 = vld [vmem:[#allocation49_spill] sm:$0xff] }
 0x218   : > { %v2730_v34 = vrot.slane %v2728_v39, 7  ;;  %v16736_v61 = vshll.u32 %v13480_v53, 16  ;;  %v3970_v15 = vrot.slane %v3968_v48, 7  ;;  %v4259_v30 = vor.u32 %v13511_v22, %v13507_v25  ;;  %v4582_v42 = vpop.permute.xlu1 %4581 }
 0x219   : > { %16888 = vst [vmem:[#allocation68_spill] sm:$0xff] %v13533_v55  ;;  %v1487_v8 = vadd.f32 %v12995_v51, %v16889_v21  ;;  %v1479_v46 = vadd.f32 %v12995_v51, %v16890_v43  ;;  %v13543_v20 = vor.u32 %v2722_v23, %v13533_v55  ;;  %v2560_v48 = vshrl.u32 %v2452_v12, 16  ;;  %v13554_v21 = vld [vmem:[%s16677_s2] ss:$0 sm:$0xff]  ;;  %v3116_v43 = vld [vmem:[#allocation2 + $0xd0] sm:$0xf] }
 0x21a   : > { %v13547_v32 = vor.u32 %v16736_v61, %v2730_v34  ;;  %v2572_v52 = vrot.slane %v16893_v4, 4  ;;  %v1500_v51 = vadd.f32 %v13554_v21, %v13022_v49  ;;  %v2215_v34 = vsel %vm11895_vm11, 0, %v2214_v1  ;;  %v13571_v55 = vld [vmem:[#allocation2 + $0xd4] sm:$0xf] }
 0x21b   : > { %16891 = vst [vmem:[#allocation48_spill] sm:$0xff] %v13543_v20  ;;  %4517 = vrot.lane.b32.xlu1 %v9863_v18, %s11668_s24  ;;  %v1713_v25 = vmax.f32 %v1487_v8, 0.0  ;;  %v1711_v22 = vmax.f32 %v1479_v46, 0.0  ;;  %v4264_v18 = vor.u32 %v13527_v14, %v13525_v38  ;;  %v13562_v12 = vrot.slane %v2719_v44, 4  ;;  %v16894_v8 = vld [vmem:[#allocation19_spill] sm:$0xff] }
 0x21c   : > { %16892 = vst [vmem:[#allocation49_spill] sm:$0xff] %v13547_v32  ;;  %v9792_v4 = vrot.slane %v2560_v48, 11  ;;  %v2580_v46 = vsel %vm12171_vm14, %v2572_v52, %v16894_v8  ;;  %2216 = vst [vmem:[#allocation2 + $0xcc] sm:$0x8] %v2215_v34  ;;  %v13567_v61 = vrot.slane %v2722_v23, 5  ;;  %v5012_v32 = vpop.permute.xlu0 %5011  ;;  %v1716_v1 = vmax.f32 %v1500_v51, 0.0 }
 0x21d   : > { %v1889_v20 = vsel %vm1746_vm12, %v1713_v25, -inf  ;;  %v1883_v49 = vsel %vm1746_vm12, %v1711_v22, -inf  ;;  %v16895_v48 = vld [vmem:[#allocation18_spill] sm:$0xff]  ;;  %v3340_v52 = vshrl.u32 %v3116_v43, 16  ;;  %v2262_v34 = vld [vmem:[#allocation2 + $0xd8] sm:$0x1] }
 0x21e   : > { %v1890_v14 = vmax.f32 %v13497_v19, %v1889_v20  ;;  %v1884_v44 = vmax.f32 %v13504_v35, %v1883_v49  ;;  %v2571_v59 = vsel %vm12171_vm14, %v9792_v4, %v16895_v48  ;;  %v13578_v23 = vrot.slane %v2728_v39, 4  ;;  %v4504_v35 = vpop.permute.xlu1 %4503  ;;  %v16898_v49 = vld [vmem:[#allocation52_spill] sm:$0xff] }
 0x21f   : > { %v9840_v8 = vcombine.low %v2571_v59, %v2580_v46  ;;  %v3966_v25 = vrot.slane %v13521_v26, 4  ;;  %v16896_v22 = vshll.u32 %v13466_v37, 16  ;;  %v13586_v19 = vsel %vm5137_vm15, %v13405_v47, %v4582_v42 }
 0x220   : > { %1986 = vst.msk [vmem:[#allocation4 + $0x178] sm:$0xff] %vm1746_vm12, %v1890_v14  ;;  %1984 = vst.msk [vmem:[#allocation4 + $0x168] sm:$0xff] %vm1746_vm12, %v1884_v44  ;;  %v16897_v20 = vshll.u32 %v13454_v5, 16  ;;  %v3342_v4 = vrot.slane %v3340_v52, 7  ;;  %v3349_v59 = vshrl.u32 %v13571_v55, 16  ;;  %v3343_v46 = vshll.u32 %v3116_v43, 16  ;;  %v4900_v42 = vpop.permute.xlu0 %4899 }
 0x221   : > { %v3973_v51 = vor.u32 %v16896_v22, %v3970_v15  ;;  %v1492_v37 = vadd.f32 %v13554_v21, %v16898_v49  ;;  %v16899_v15 = vld [vmem:[#allocation53_spill] sm:$0xff]  ;;  %v2263_v47 = vsel %vm11866_vm5, 0, %v2262_v34  ;;  %v13602_v44 = vsel %vm1746_vm12, %v1716_v1, -inf }
 0x222   : > { %v3964_v39 = vor.u32 %v16897_v20, %v13521_v26  ;;  %v13597_v14 = vadd.f32 %v13554_v21, %v16899_v15  ;;  %v3347_v5 = vrot.slane %v3342_v4, 4  ;;  %v3351_v26 = vrot.slane %v3349_v59, 7  ;;  %2264 = vst [vmem:[#allocation2 + $0xd8] sm:$0x1] %v2263_v47 }
 0x223   : > { %v3352_v48 = vshll.u32 %v13571_v55, 16  ;;  %v13606_v43 = vsel %vm1746_vm12, %v9840_v8, %v4504_v35  ;;  %v3753_v22 = vld [vmem:[#allocation2 + $0xcc] sm:$0x8]  ;;  %v3974_v20 = vsel %vm12171_vm14, %v3966_v25, %v3973_v51  ;;  %v3345_v15 = vor.u32 %v3343_v46, %v3342_v4 }
 0x224   : > { %v3115_v49 = vld [vmem:[#allocation2 + $0xcc] sm:$0x8]  ;;  %v4260_v0 = vrot.slane %v4259_v30, 4  ;;  %v3954_v34 = vshrl.u32 %v3753_v22, 16  ;;  %v5270_v1 = vsel %vm5137_vm15, %v13514_v24, %v4900_v42  ;;  %v1714_v9 = vmax.f32 %v1492_v37, 0.0 }
 0x225   : > { %v3335_v40 = vshrl.u32 %v3115_v49, 16  ;;  %v3354_v45 = vor.u32 %v3352_v48, %v3351_v26  ;;  %v1717_v55 = vmax.f32 %v13597_v14, 0.0  ;;  %v3630_v47 = vrot.slane %v3340_v52, 4  ;;  %v13625_v14 = vpop.f32.mrb[127].mxu0 }
 0x226   : > { %v3631_v28 = vrot.slane %v3343_v46, 5  ;;  %v9829_v8 = vrot.slane %v3954_v34, 11  ;;  %v4265_v25 = vrot.slane %v4264_v18, 4  ;;  %v4262_v26 = vsel %vm11887_vm8, %v4260_v0, %v13525_v38 }
 0x227   : > { %v9814_v35 = vrot.slane %v3335_v40, 11  ;;  %v3355_v31 = vsel %vm12171_vm14, %v3347_v5, %v3354_v45  ;;  %v2049_v51 = vld [vmem:[#allocation4 + $0x170] ss:$2 sm:$0xff]  ;;  %v2113_v4 = vld [vmem:[#allocation4 + $0x171] ss:$2 sm:$0xff]  ;;  %v3006_v24 = vor.u32 %v13567_v61, %v13562_v12  ;;  %v5303_v52 = vsel %vm5170_vm0, %v5270_v1, %v5012_v32  ;;  %v16900_v5 = vld [vmem:[#allocation54_spill] sm:$0xff] }
 0x228   : > { %v2047_v30 = vld [vmem:[#allocation4 + $0x160] ss:$2 sm:$0xff]  ;;  %v3632_v22 = vor.u32 %v3631_v28, %v3630_v47  ;;  %v2153_v46 = vmax.f32 %v2049_v51, %v2113_v4  ;;  %v2111_v37 = vld [vmem:[#allocation4 + $0x161] ss:$2 sm:$0xff]  ;;  %v3965_v40 = vsel %vm12171_vm14, %v9829_v8, %v3964_v39  ;;  %v3634_v18 = vrot.slane %v3352_v48, 5  ;;  %5586 = vmatprep.mubr.bf16.mxu0 %v5303_v52 }
 0x229   : > { %v3346_v45 = vsel %vm12171_vm14, %v9814_v35, %v3345_v15  ;;  %v2152_v42 = vmax.f32 %v2047_v30, %v2111_v37  ;;  %v9941_v38 = vcombine.low %v3965_v40, %v3974_v20  ;;  %v4137_v0 = vld [vmem:[#allocation2 + $0xd8] sm:$0x1]  ;;  %v1495_v61 = vadd.f32 %v13554_v21, %v16900_v5  ;;  %v13632_v15 = vpop.permute.xlu1 %4661  ;;  %v13649_v40 = vld [vmem:[#allocation2 + $0xe4] sm:$0xf] }
 0x22a   : > { %v9894_v28 = vcombine.low %v3346_v45, %v3355_v31  ;;  %v3497_v32 = vld [vmem:[#allocation2 + $0xd8] sm:$0x1]  ;;  %v10416_v12 = vpack.c.bf16 %v2153_v46, %v2153_v46  ;;  %v4267_v49 = vshll.u32 %v4137_v0, 16  ;;  %v3633_v34 = vrot.slane %v3632_v22, 4  ;;  %v11575_v0 = vld [vmem:[#allocation2 + $0x48] sm:$0xf] }
 0x22b   : > { %v3636_v1 = vrot.slane %v3349_v59, 4  ;;  %v2855_v39 = vld [vmem:[#allocation2 + $0xd8] sm:$0x1]  ;;  %v10415_v47 = vpack.c.bf16 %v2152_v42, %v2152_v42  ;;  %4913 = vrot.lane.b32.xlu0 %v9941_v38, %s16747_s15  ;;  %v1891_v48 = vsel %vm1746_vm12, %v1714_v9, -inf  ;;  %v3640_v31 = vshll.u32 %v3497_v32, 16 }
 0x22c   : > { %4675 = vrot.lane.b32.xlu1 %v9894_v28, %s11669_s29  ;;  %v3007_v20 = vrot.slane %v3006_v24, 4  ;;  %2434 = vst.msk [vmem:[#allocation2 + $0xfc] sm:$0xf] %vm2168_vm2, %v10416_v12  ;;  %v4269_v8 = vrot.slane %v4267_v49, 5  ;;  %v16901_v51 = vshll.u32 %v13480_v53, 16  ;;  %v3014_v59 = vshll.u32 %v2855_v39, 16 }
 0x22d   : > { %v3637_v35 = vor.u32 %v3636_v1, %v3634_v18  ;;  %2433 = vst.msk [vmem:[#allocation2 + $0xf8] sm:$0xf] %vm2168_vm2, %v10415_v47  ;;  %v13639_v30 = vsel %vm1746_vm12, %v1717_v55, -inf  ;;  %v1715_v22 = vmax.f32 %v1495_v61, 0.0  ;;  %v3642_v52 = vrot.slane %v3640_v31, 5  ;;  %v16902_v42 = vld [vmem:[#allocation55_spill] sm:$0xff]  ;;  %v4822_v61 = vpop.permute.xlu0 %4821  ;;  %v4584_v32 = vpop.permute.xlu1 %4583 }
 0x22e   : > { %v3008_v4 = vrot.slane %v16901_v51, 5  ;;  %v5175_v9 = vsel %vm5170_vm0, %v13317_v2, %v13500_v56  ;;  %v4270_v24 = vsel %vm11887_vm8, %v4265_v25, %v4269_v8  ;;  %v3635_v46 = vsel %vm11887_vm8, %v3633_v34, %v3634_v18  ;;  %v13655_v56 = vld [vmem:[#allocation2 + $0xe8] sm:$0xf]  ;;  %v11574_v28 = vld [vmem:[#allocation2 + $0x44] sm:$0xf] }
 0x22f   : > { %v3638_v53 = vrot.slane %v3637_v35, 4  ;;  %5587 = vmatmul.mubr.bf16.gmra.mrb[132].mxu0 %v5175_v9  ;;  %v9973_v55 = vcombine.low %v4262_v26, %v4270_v24  ;;  %v3016_v45 = vrot.slane %v3014_v59, 5  ;;  %v1516_v38 = vadd.f32 %v13554_v21, %v16902_v42  ;;  %v2477_v31 = vld [vmem:[#allocation2 + $0xe4] sm:$0xf] }
 0x230   : > { %v3011_v37 = vor.u32 %v13578_v23, %v3008_v4  ;;  %v1508_v2 = vadd.f32 %v13554_v21, %v13069_v41  ;;  %v3009_v18 = vsel %vm11887_vm8, %v3007_v20, %v3008_v4  ;;  %v9903_v5 = vcombine.low %v11574_v28, %v11575_v0  ;;  %v13674_v4 = vld [vmem:[#allocation2 + $0xe8] sm:$0xf] }
 0x231   : > { %v3643_v25 = vsel %vm11887_vm8, %v3638_v53, %v3642_v52  ;;  %10892 = vmatprep.mubr.msk.bf16.mxu1 %vm1746_vm12, %v9973_v55  ;;  %v1720_v12 = vmax.f32 %v1516_v38, 0.0  ;;  %v3981_v41 = vshrl.u32 %v13649_v40, 16  ;;  %v13664_v34 = vsel %vm1746_vm12, %v1715_v22, -inf }
 0x232   : > { %v3012_v23 = vrot.slane %v3011_v37, 4  ;;  %v9926_v26 = vcombine.low %v3635_v46, %v3643_v25  ;;  %v1718_v49 = vmax.f32 %v1508_v2, 0.0  ;;  %v3984_v39 = vshll.u32 %v13649_v40, 16  ;;  %v2217_v25 = vld [vmem:[#allocation2 + $0xe0] sm:$0x8] }
 0x233   : > { %v3990_v47 = vshrl.u32 %v13655_v56, 16  ;;  %v1898_v8 = vsel %vm1746_vm12, %v1720_v12, -inf  ;;  %v3993_v51 = vshll.u32 %v13655_v56, 16  ;;  %v13677_v59 = vsel %vm1746_vm12, %v9903_v5, %v4822_v61  ;;  %v16903_v61 = vld [vmem:[#allocation25_spill] sm:$0xff] }
 0x234   : > { %v3017_v1 = vsel %vm11887_vm8, %v3012_v23, %v3016_v45  ;;  %4835 = vrot.lane.b32.xlu0 %v9926_v26, %s11668_s24  ;;  %v1892_v35 = vsel %vm1746_vm12, %v1718_v49, -inf  ;;  %v13681_v22 = vsel %vm5137_vm15, %v13606_v43, %v4584_v32  ;;  %v1899_v52 = vmax.f32 %v13602_v44, %v1898_v8  ;;  %v2455_v45 = vld [vmem:[#allocation2 + $0x54] sm:$0x8]  ;;  %v3119_v8 = vld [vmem:[#allocation2 + $0xe4] sm:$0xf] }
 0x235   : > { %v9879_v20 = vcombine.low %v3009_v18, %v3017_v1  ;;  %v1893_v9 = vmax.f32 %v1891_v48, %v1892_v35  ;;  %v13685_v24 = vrot.slane %v3981_v41, 7  ;;  %v13687_v46 = vrot.slane %v3981_v41, 4 }
 0x236   : > { %v9958_v53 = vcombine.low %v13649_v40, %v13655_v56  ;;  %v2741_v37 = vshrl.u32 %v2477_v31, 16  ;;  %1989 = vst.msk [vmem:[#allocation4 + $0x190] sm:$0xff] %vm1746_vm12, %v1899_v52  ;;  %v3992_v55 = vrot.slane %v3990_v47, 7  ;;  %v13695_v43 = vrot.slane %v3984_v39, 5 }
 0x237   : > { %4597 = vrot.lane.b32.xlu1 %v9879_v20, %s16747_s15  ;;  %1987 = vst.msk [vmem:[#allocation4 + $0x180] sm:$0xff] %vm1746_vm12, %v1893_v9  ;;  %v2750_v44 = vshrl.u32 %v13674_v4, 16  ;;  %v9864_v48 = vcombine.low %v2477_v31, %v13674_v4  ;;  %v13699_v42 = vrot.slane %v3993_v51, 5  ;;  %v13701_v38 = vrot.slane %v3990_v47, 4  ;;  %v16904_v20 = vld [vmem:[#allocation27_spill] sm:$0xff]  ;;  %v5014_v9 = vpop.permute.xlu0 %5013 }
 0x238   : > { %5027 = vrot.lane.b32.xlu0 %v9958_v53, %s11669_s29  ;;  %v13704_v2 = vrot.slane %v2741_v37, 7  ;;  %v2744_v56 = vshll.u32 %v2477_v31, 16  ;;  %v2753_v23 = vshll.u32 %v13674_v4, 16  ;;  %v1519_v28 = vadd.f32 %v13554_v21, %v13077_v33 }
 0x239   : > { %v2752_v18 = vrot.slane %v2750_v44, 7  ;;  %v1511_v0 = vadd.f32 %v13554_v21, %v13084_v3  ;;  %v2582_v26 = vshrl.u32 %v2455_v45, 16  ;;  %v2594_v32 = vrot.slane %v16903_v61, 4  ;;  %v13734_v45 = vld [vmem:[#allocation2 + $0xe8] sm:$0xf] }
 0x23a   : > { %v13712_v5 = vor.u32 %v2744_v56, %v13704_v2  ;;  %v1532_v12 = vadd.f32 %v13554_v21, %v13107_v7  ;;  %v1721_v41 = vmax.f32 %v1519_v28, 0.0  ;;  %v2218_v3 = vsel %vm11895_vm11, 0, %v2217_v25  ;;  %v2265_v28 = vld [vmem:[#allocation2 + $0xec] sm:$0x1] }
 0x23b   : > { %4519 = vrot.lane.b32.xlu1 %v9864_v48, %s11668_s24  ;;  %v13720_v49 = vor.u32 %v2753_v23, %v2752_v18  ;;  %v1719_v33 = vmax.f32 %v1511_v0, 0.0  ;;  %v4273_v1 = vor.u32 %v13695_v43, %v13687_v46  ;;  %v4278_v47 = vor.u32 %v13701_v38, %v13699_v42  ;;  %2219 = vst [vmem:[#allocation2 + $0xe0] sm:$0x8] %v2218_v3  ;;  %v16905_v38 = vld [vmem:[#allocation26_spill] sm:$0xff] }
 0x23c   : > { %v9793_v31 = vrot.slane %v2582_v26, 11  ;;  %v2602_v7 = vsel %vm12171_vm14, %v2594_v32, %v16904_v20  ;;  %v1901_v35 = vsel %vm1746_vm12, %v1721_v41, -inf  ;;  %v1724_v53 = vmax.f32 %v1532_v12, 0.0 }
 0x23d   : > { %v1895_v52 = vsel %vm1746_vm12, %v1719_v33, -inf  ;;  %v3988_v48 = vrot.slane %v13685_v24, 4  ;;  %v1902_v46 = vmax.f32 %v13639_v30, %v1901_v35  ;;  %v3995_v18 = vor.u32 %v3993_v51, %v3992_v55  ;;  %v4506_v30 = vpop.permute.xlu1 %4505  ;;  %v4902_v33 = vpop.permute.xlu0 %4901 }
 0x23e   : > { %v1896_v43 = vmax.f32 %v13664_v34, %v1895_v52  ;;  %v2593_v25 = vsel %vm12171_vm14, %v9793_v31, %v16905_v38  ;;  %v13741_v0 = vrot.slane %v2741_v37, 4  ;;  %v13743_v26 = vrot.slane %v2744_v56, 5 }
 0x23f   : > { %v9841_v61 = vcombine.low %v2593_v25, %v2602_v7  ;;  %v3362_v32 = vshrl.u32 %v3119_v8, 16  ;;  %v13745_v12 = vrot.slane %v2750_v44, 4  ;;  %1990 = vst.msk [vmem:[#allocation4 + $0x198] sm:$0xff] %vm1746_vm12, %v1902_v46  ;;  %v3986_v34 = vor.u32 %v3984_v39, %v13685_v24 }
 0x240   : > { %1988 = vst.msk [vmem:[#allocation4 + $0x188] sm:$0xff] %vm1746_vm12, %v1896_v43  ;;  %v3365_v41 = vshll.u32 %v3119_v8, 16  ;;  %v3371_v51 = vshrl.u32 %v13734_v45, 16  ;;  %v1524_v55 = vadd.f32 %v13554_v21, %v13111_v27  ;;  %v13757_v44 = vadd.f32 %v13554_v21, %v13119_v62 }
 0x241   : > { %v3364_v37 = vrot.slane %v3362_v32, 7  ;;  %v2266_v56 = vsel %vm11866_vm5, 0, %v2265_v28  ;;  %v13762_v3 = vsel %vm1746_vm12, %v1724_v53, -inf  ;;  %v3996_v40 = vsel %vm12171_vm14, %v3988_v48, %v3995_v18 }
 0x242   : > { %v3373_v39 = vrot.slane %v3371_v51, 7  ;;  %v3374_v24 = vshll.u32 %v13734_v45, 16  ;;  %2267 = vst [vmem:[#allocation2 + $0xec] sm:$0x1] %v2266_v56  ;;  %v13768_v27 = vsel %vm1746_vm12, %v9841_v61, %v4506_v30  ;;  %v3756_v31 = vld [vmem:[#allocation2 + $0xe0] sm:$0x8]  ;;  %v5272_v53 = vsel %vm5137_vm15, %v13677_v59, %v4902_v33 }
 0x243   : > { %v3118_v62 = vld [vmem:[#allocation2 + $0xe0] sm:$0x8]  ;;  %v3367_v20 = vor.u32 %v3365_v41, %v3364_v37  ;;  %v3369_v7 = vrot.slane %v3364_v37, 4  ;;  %v4274_v8 = vrot.slane %v4273_v1, 4  ;;  %v3976_v35 = vshrl.u32 %v3756_v31, 16 }
 0x244   : > { %v3357_v52 = vshrl.u32 %v3118_v62, 16  ;;  %v3376_v46 = vor.u32 %v3374_v24, %v3373_v39  ;;  %v1722_v43 = vmax.f32 %v1524_v55, 0.0  ;;  %v1725_v48 = vmax.f32 %v13757_v44, 0.0 }
 0x245   : > { %v3644_v38 = vrot.slane %v3362_v32, 4  ;;  %v3645_v45 = vrot.slane %v3365_v41, 5  ;;  %v9830_v25 = vrot.slane %v3976_v35, 11  ;;  %v4279_v61 = vrot.slane %v4278_v47, 4 }
 0x246   : > { %v9815_v18 = vrot.slane %v3357_v52, 11  ;;  %v3377_v28 = vsel %vm12171_vm14, %v3369_v7, %v3376_v46  ;;  %v2053_v30 = vld [vmem:[#allocation4 + $0x190] ss:$2 sm:$0xff]  ;;  %v2117_v37 = vld [vmem:[#allocation4 + $0x191] ss:$2 sm:$0xff]  ;;  %v4276_v56 = vsel %vm11887_vm8, %v4274_v8, %v13699_v42  ;;  %v3020_v59 = vor.u32 %v13743_v26, %v13741_v0 }
 0x247   : > { %v2051_v1 = vld [vmem:[#allocation4 + $0x180] ss:$2 sm:$0xff]  ;;  %v3646_v39 = vor.u32 %v3645_v45, %v3644_v38  ;;  %v5306_v32 = vsel %vm5170_vm0, %v5272_v53, %v5014_v9  ;;  %v2155_v41 = vmax.f32 %v2053_v30, %v2117_v37  ;;  %v2115_v55 = vld [vmem:[#allocation4 + $0x181] ss:$2 sm:$0xff]  ;;  %v3987_v44 = vsel %vm12171_vm14, %v9830_v25, %v3986_v34 }
 0x248   : > { %v3368_v47 = vsel %vm12171_vm14, %v9815_v18, %v3367_v20  ;;  %v3648_v33 = vrot.slane %v3374_v24, 5  ;;  %5594 = vmatprep.mubr.bf16.mxu0 %v5306_v32  ;;  %v2154_v31 = vmax.f32 %v2051_v1, %v2115_v55  ;;  %v9942_v62 = vcombine.low %v3987_v44, %v3996_v40  ;;  %v16906_v8 = vld [vmem:[#allocation57_spill] sm:$0xff]  ;;  %v13790_v24 = vpop.permute.xlu1 %4663 }
 0x249   : > { %v9895_v7 = vcombine.low %v3368_v47, %v3377_v28  ;;  %v4138_v42 = vld [vmem:[#allocation2 + $0xec] sm:$0x1]  ;;  %v1527_v35 = vadd.f32 %v13554_v21, %v16906_v8  ;;  %v10418_v26 = vpack.c.bf16 %v2155_v41, %v2155_v41  ;;  %v3647_v52 = vrot.slane %v3646_v39, 4  ;;  %v16907_v41 = vld [vmem:[#allocation60_spill] sm:$0xff]  ;;  %v16908_v44 = vld [vmem:[#allocation61_spill] sm:$0xff] }
 0x24a   : > { %v3498_v0 = vld [vmem:[#allocation2 + $0xec] sm:$0x1]  ;;  %v4281_v9 = vshll.u32 %v4138_v42, 16  ;;  %v3650_v46 = vrot.slane %v3371_v51, 4  ;;  %v10417_v38 = vpack.c.bf16 %v2154_v31, %v2154_v31  ;;  %4915 = vrot.lane.b32.xlu0 %v9942_v62, %s16747_s15  ;;  %v1903_v34 = vsel %vm1746_vm12, %v1722_v43, -inf }
 0x24b   : > { %v2856_v53 = vld [vmem:[#allocation2 + $0xec] sm:$0x1]  ;;  %4677 = vrot.lane.b32.xlu1 %v9895_v7, %s11669_s29  ;;  %v3654_v40 = vshll.u32 %v3498_v0, 16  ;;  %v3021_v20 = vrot.slane %v3020_v59, 4  ;;  %2436 = vst.msk [vmem:[#allocation2 + $0x110] sm:$0xf] %vm2168_vm2, %v10418_v26  ;;  %v5178_v43 = vsel %vm5170_vm0, %v13586_v19, %v13632_v15  ;;  %v3649_v39 = vsel %vm11887_vm8, %v3647_v52, %v3648_v33  ;;  %v4824_v7 = vpop.permute.xlu0 %4823 }
 0x24c   : > { %v4283_v45 = vrot.slane %v4281_v9, 5  ;;  %v3651_v25 = vor.u32 %v3650_v46, %v3648_v33  ;;  %v3022_v18 = vrot.slane %v2753_v23, 5  ;;  %v3028_v51 = vshll.u32 %v2856_v53, 16  ;;  %2435 = vst.msk [vmem:[#allocation2 + $0x10c] sm:$0xf] %vm2168_vm2, %v10417_v38  ;;  %5595 = vmatmul.mubr.bf16.gmra.mrb[136].mxu0 %v5178_v43  ;;  %v4586_v42 = vpop.permute.xlu1 %4585 }
 0x24d   : > { %v13797_v28 = vsel %vm1746_vm12, %v1725_v48, -inf  ;;  %v1723_v30 = vmax.f32 %v1527_v35, 0.0  ;;  %v3656_v37 = vrot.slane %v3654_v40, 5  ;;  %v13807_v59 = vld [vmem:[#allocation2 + $0xf8] sm:$0xf]  ;;  %v1548_v55 = vadd.f32 %v13554_v21, %v16907_v41 }
 0x24e   : > { %v4284_v1 = vsel %vm11887_vm8, %v4279_v61, %v4283_v45  ;;  %v3652_v4 = vrot.slane %v3651_v25, 4  ;;  %v3025_v23 = vor.u32 %v13745_v12, %v3022_v18  ;;  %v3030_v32 = vrot.slane %v3028_v51, 5  ;;  %v13813_v15 = vld [vmem:[#allocation2 + $0xfc] sm:$0xf]  ;;  %v11576_v33 = vld [vmem:[#allocation2 + $0x58] sm:$0xf] }
 0x24f   : > { %v9974_v48 = vcombine.low %v4276_v56, %v4284_v1  ;;  %v1540_v19 = vadd.f32 %v13554_v21, %v16908_v44  ;;  %v3023_v47 = vsel %vm11887_vm8, %v3021_v20, %v3022_v18  ;;  %v11577_v31 = vld [vmem:[#allocation2 + $0x5c] sm:$0xf]  ;;  %v1728_v8 = vmax.f32 %v1548_v55, 0.0  ;;  %v2480_v53 = vld [vmem:[#allocation2 + $0xf8] sm:$0xf] }
 0x250   : > { %v3657_v61 = vsel %vm11887_vm8, %v3652_v4, %v3656_v37  ;;  %v3026_v12 = vrot.slane %v3025_v23, 4  ;;  %v9904_v62 = vcombine.low %v11576_v33, %v11577_v31  ;;  %v4003_v0 = vshrl.u32 %v13807_v59, 16  ;;  %v13832_v25 = vld [vmem:[#allocation2 + $0xfc] sm:$0xf] }
 0x251   : > { %10893 = vmatmul.mubr.msk.bf16.gmra.mrb[4].mxu1 %vm1746_vm12, %v9974_v48  ;;  %v9927_v56 = vcombine.low %v3649_v39, %v3657_v61  ;;  %v1726_v35 = vmax.f32 %v1540_v19, 0.0  ;;  %v13822_v26 = vsel %vm1746_vm12, %v1723_v30, -inf  ;;  %v4006_v52 = vshll.u32 %v13807_v59, 16  ;;  %v2458_v48 = vld [vmem:[#allocation2 + $0x68] sm:$0x8] }
 0x252   : > { %v3031_v9 = vsel %vm11887_vm8, %v3026_v12, %v3030_v32  ;;  %v4012_v46 = vshrl.u32 %v13813_v15, 16  ;;  %v1910_v40 = vsel %vm1746_vm12, %v1728_v8, -inf  ;;  %v4015_v45 = vshll.u32 %v13813_v15, 16  ;;  %v2220_v19 = vld [vmem:[#allocation2 + $0xf4] sm:$0x8] }
 0x253   : > { %4837 = vrot.lane.b32.xlu0 %v9927_v56, %s11668_s24  ;;  %v9880_v38 = vcombine.low %v3023_v47, %v3031_v9  ;;  %v1904_v20 = vsel %vm1746_vm12, %v1726_v35, -inf  ;;  %v13835_v18 = vsel %vm1746_vm12, %v9904_v62, %v4824_v7  ;;  %v13839_v51 = vsel %vm5137_vm15, %v13768_v27, %v4586_v42  ;;  %v16909_v47 = vld [vmem:[#allocation62_spill] sm:$0xff]  ;;  %v16910_v56 = vld [vmem:[#allocation32_spill] sm:$0xff] }
 0x254   : > { %v1911_v30 = vmax.f32 %v13762_v3, %v1910_v40  ;;  %v1905_v37 = vmax.f32 %v1903_v34, %v1904_v20  ;;  %v13843_v43 = vrot.slane %v4003_v0, 7  ;;  %v13845_v1 = vrot.slane %v4003_v0, 4  ;;  %v3122_v40 = vld [vmem:[#allocation2 + $0xf8] sm:$0xf] }
 0x255   : > { %4599 = vrot.lane.b32.xlu1 %v9880_v38, %s16747_s15  ;;  %v9959_v39 = vcombine.low %v13807_v59, %v13813_v15  ;;  %v2763_v4 = vshrl.u32 %v2480_v53, 16  ;;  %v4014_v23 = vrot.slane %v4012_v46, 7  ;;  %v13853_v27 = vrot.slane %v4006_v52, 5  ;;  %v16911_v38 = vld [vmem:[#allocation34_spill] sm:$0xff] }
 0x256   : > { %1993 = vst.msk [vmem:[#allocation4 + $0x1b0] sm:$0xff] %vm1746_vm12, %v1911_v30  ;;  %1991 = vst.msk [vmem:[#allocation4 + $0x1a0] sm:$0xff] %vm1746_vm12, %v1905_v37  ;;  %v2772_v3 = vshrl.u32 %v13832_v25, 16  ;;  %v9865_v34 = vcombine.low %v2480_v53, %v13832_v25  ;;  %v13857_v32 = vrot.slane %v4015_v45, 5  ;;  %v13859_v41 = vrot.slane %v4012_v46, 4  ;;  %v5016_v37 = vpop.permute.xlu0 %5015 }
 0x257   : > { %5029 = vrot.lane.b32.xlu0 %v9959_v39, %s11669_s29  ;;  %v13862_v55 = vrot.slane %v2763_v4, 7  ;;  %v2766_v44 = vshll.u32 %v2480_v53, 16  ;;  %v2775_v61 = vshll.u32 %v13832_v25, 16  ;;  %v1551_v12 = vadd.f32 %v13554_v21, %v16909_v47  ;;  %v2268_v47 = vld [vmem:[#allocation2 + $0x100] sm:$0x1] }
 0x258   : > { %v2774_v15 = vrot.slane %v2772_v3, 7  ;;  %v1543_v33 = vadd.f32 %v13554_v21, %v13240_v11  ;;  %v2604_v62 = vshrl.u32 %v2458_v48, 16  ;;  %v2616_v7 = vrot.slane %v16910_v56, 4  ;;  %v13892_v48 = vld [vmem:[#allocation2 + $0xfc] sm:$0xf] }
 0x259   : > { %v13870_v31 = vor.u32 %v2766_v44, %v13862_v55  ;;  %4521 = vrot.lane.b32.xlu1 %v9865_v34, %s11668_s24  ;;  %v1564_v42 = vadd.f32 %v13554_v21, %v13249_v29  ;;  %v1729_v35 = vmax.f32 %v1551_v12, 0.0  ;;  %v2221_v11 = vsel %vm11895_vm11, 0, %v2220_v19 }
 0x25a   : > { %v13878_v8 = vor.u32 %v2775_v61, %v2774_v15  ;;  %v1727_v0 = vmax.f32 %v1543_v33, 0.0  ;;  %v4287_v9 = vor.u32 %v13853_v27, %v13845_v1  ;;  %v4292_v46 = vor.u32 %v13859_v41, %v13857_v32  ;;  %2222 = vst [vmem:[#allocation2 + $0xf4] sm:$0x8] %v2221_v11  ;;  %v16912_v41 = vld [vmem:[#allocation33_spill] sm:$0xff] }
 0x25b   : > { %v9794_v53 = vrot.slane %v2604_v62, 11  ;;  %v2624_v29 = vsel %vm12171_vm14, %v2616_v7, %v16911_v38  ;;  %v1913_v20 = vsel %vm1746_vm12, %v1729_v35, -inf  ;;  %v1732_v39 = vmax.f32 %v1564_v42, 0.0  ;;  %v4904_v35 = vpop.permute.xlu0 %4903 }
 0x25c   : > { %v1907_v30 = vsel %vm1746_vm12, %v1727_v0, -inf  ;;  %v4010_v34 = vrot.slane %v13843_v43, 4  ;;  %v1914_v1 = vmax.f32 %v13797_v28, %v1913_v20  ;;  %v4017_v15 = vor.u32 %v4015_v45, %v4014_v23  ;;  %v4508_v28 = vpop.permute.xlu1 %4507 }
 0x25d   : > { %v1908_v27 = vmax.f32 %v13822_v26, %v1907_v30  ;;  %v2615_v19 = vsel %vm12171_vm14, %v9794_v53, %v16912_v41  ;;  %v13899_v12 = vrot.slane %v2763_v4, 4  ;;  %v13901_v33 = vrot.slane %v2766_v44, 5 }
 0x25e   : > { %v9842_v62 = vcombine.low %v2615_v19, %v2624_v29  ;;  %v3384_v56 = vshrl.u32 %v3122_v40, 16  ;;  %v13903_v7 = vrot.slane %v2772_v3, 4  ;;  %1994 = vst.msk [vmem:[#allocation4 + $0x1b8] sm:$0xff] %vm1746_vm12, %v1914_v1  ;;  %v4008_v26 = vor.u32 %v4006_v52, %v13843_v43 }
 0x25f   : > { %1992 = vst.msk [vmem:[#allocation4 + $0x1a8] sm:$0xff] %vm1746_vm12, %v1908_v27  ;;  %v3387_v42 = vshll.u32 %v3122_v40, 16  ;;  %v3393_v45 = vshrl.u32 %v13892_v48, 16  ;;  %v1556_v23 = vadd.f32 %v13554_v21, %v13256_v50  ;;  %v13915_v3 = vadd.f32 %v13554_v21, %v13258_v60 }
 0x260   : > { %v3386_v4 = vrot.slane %v3384_v56, 7  ;;  %v2269_v44 = vsel %vm11866_vm5, 0, %v2268_v47  ;;  %v13920_v0 = vsel %vm1746_vm12, %v1732_v39, -inf  ;;  %v4018_v59 = vsel %vm12171_vm14, %v4010_v34, %v4017_v15 }
 0x261   : > { %v3395_v52 = vrot.slane %v3393_v45, 7  ;;  %v3396_v43 = vshll.u32 %v13892_v48, 16  ;;  %2270 = vst [vmem:[#allocation2 + $0x100] sm:$0x1] %v2269_v44  ;;  %v13926_v50 = vsel %vm1746_vm12, %v9842_v62, %v4508_v28  ;;  %v3759_v11 = vld [vmem:[#allocation2 + $0xf4] sm:$0x8]  ;;  %v5274_v39 = vsel %vm5137_vm15, %v13835_v18, %v4904_v35 }
 0x262   : > { %v3121_v60 = vld [vmem:[#allocation2 + $0xf4] sm:$0x8]  ;;  %v3389_v53 = vor.u32 %v3387_v42, %v3386_v4  ;;  %v3391_v38 = vrot.slane %v3386_v4, 4  ;;  %v4288_v29 = vrot.slane %v4287_v9, 4  ;;  %v3998_v40 = vshrl.u32 %v3759_v11, 16 }
 0x263   : > { %v3379_v20 = vshrl.u32 %v3121_v60, 16  ;;  %v3398_v30 = vor.u32 %v3396_v43, %v3395_v52  ;;  %v1730_v1 = vmax.f32 %v1556_v23, 0.0  ;;  %v1733_v34 = vmax.f32 %v13915_v3, 0.0 }
 0x264   : > { %v3658_v27 = vrot.slane %v3384_v56, 4  ;;  %v3659_v48 = vrot.slane %v3387_v42, 5  ;;  %v9831_v41 = vrot.slane %v3998_v40, 11  ;;  %v4293_v47 = vrot.slane %v4292_v46, 4 }
 0x265   : > { %v9816_v19 = vrot.slane %v3379_v20, 11  ;;  %v3399_v15 = vsel %vm12171_vm14, %v3391_v38, %v3398_v30  ;;  %v2057_v62 = vld [vmem:[#allocation4 + $0x1b0] ss:$2 sm:$0xff]  ;;  %v2121_v28 = vld [vmem:[#allocation4 + $0x1b1] ss:$2 sm:$0xff]  ;;  %v4290_v4 = vsel %vm11887_vm8, %v4288_v29, %v13857_v32  ;;  %v3034_v18 = vor.u32 %v13901_v33, %v13899_v12 }
 0x266   : > { %v2055_v9 = vld [vmem:[#allocation4 + $0x1a0] ss:$2 sm:$0xff]  ;;  %v3660_v44 = vor.u32 %v3659_v48, %v3658_v27  ;;  %v5309_v56 = vsel %vm5170_vm0, %v5274_v39, %v5016_v37  ;;  %v2157_v42 = vmax.f32 %v2057_v62, %v2121_v28  ;;  %v2119_v23 = vld [vmem:[#allocation4 + $0x1a1] ss:$2 sm:$0xff]  ;;  %v4009_v3 = vsel %vm12171_vm14, %v9831_v41, %v4008_v26 }
 0x267   : > { %v3390_v46 = vsel %vm12171_vm14, %v9816_v19, %v3389_v53  ;;  %v3662_v35 = vrot.slane %v3396_v43, 5  ;;  %5602 = vmatprep.mubr.bf16.mxu0 %v5309_v56  ;;  %v2156_v52 = vmax.f32 %v2055_v9, %v2119_v23  ;;  %v9943_v11 = vcombine.low %v4009_v3, %v4018_v59  ;;  %v13948_v43 = vpop.permute.xlu1 %4665  ;;  %v13965_v28 = vld [vmem:[#allocation2 + $0x10c] sm:$0xf]  ;;  %v4826_v3 = vpop.permute.xlu0 %4825 }
 0x268   : > { %v9896_v60 = vcombine.low %v3390_v46, %v3399_v15  ;;  %v4139_v32 = vld [vmem:[#allocation2 + $0x100] sm:$0x1]  ;;  %v1559_v38 = vadd.f32 %v13554_v21, %v13267_v54  ;;  %v10420_v33 = vpack.c.bf16 %v2157_v42, %v2157_v42  ;;  %v3661_v29 = vrot.slane %v3660_v44, 4  ;;  %v11578_v56 = vld [vmem:[#allocation2 + $0x6c] sm:$0xf] }
 0x269   : > { %v3499_v12 = vld [vmem:[#allocation2 + $0x100] sm:$0x1]  ;;  %v4295_v37 = vshll.u32 %v4139_v32, 16  ;;  %v3664_v40 = vrot.slane %v3393_v45, 4  ;;  %v10419_v30 = vpack.c.bf16 %v2156_v52, %v2156_v52  ;;  %4917 = vrot.lane.b32.xlu0 %v9943_v11, %s16747_s15  ;;  %v1915_v26 = vsel %vm1746_vm12, %v1730_v1, -inf }
 0x26a   : > { %v2857_v20 = vld [vmem:[#allocation2 + $0x100] sm:$0x1]  ;;  %4679 = vrot.lane.b32.xlu1 %v9896_v60, %s11669_s29  ;;  %v3668_v59 = vshll.u32 %v3499_v12, 16  ;;  %v3035_v53 = vrot.slane %v3034_v18, 4  ;;  %2438 = vst.msk [vmem:[#allocation2 + $0x124] sm:$0xf] %vm2168_vm2, %v10420_v33  ;;  %v5181_v1 = vsel %vm5170_vm0, %v13681_v22, %v13790_v24  ;;  %v3663_v62 = vsel %vm11887_vm8, %v3661_v29, %v3662_v35 }
 0x26b   : > { %v4297_v54 = vrot.slane %v4295_v37, 5  ;;  %v3665_v39 = vor.u32 %v3664_v40, %v3662_v35  ;;  %v3036_v27 = vrot.slane %v2775_v61, 5  ;;  %v3042_v45 = vshll.u32 %v2857_v20, 16  ;;  %2437 = vst.msk [vmem:[#allocation2 + $0x120] sm:$0xf] %vm2168_vm2, %v10419_v30  ;;  %5603 = vmatmul.mubr.bf16.gmra.mrb[140].mxu0 %v5181_v1 }
 0x26c   : > { %v13955_v48 = vsel %vm1746_vm12, %v1733_v34, -inf  ;;  %v1731_v41 = vmax.f32 %v1559_v38, 0.0  ;;  %v3670_v19 = vrot.slane %v3668_v59, 5  ;;  %v1580_v44 = vadd.f32 %v13554_v21, %v13288_v10  ;;  %v13971_v24 = vld [vmem:[#allocation2 + $0x110] sm:$0xf]  ;;  %v4588_v10 = vpop.permute.xlu1 %4587 }
 0x26d   : > { %v4298_v15 = vsel %vm11887_vm8, %v4293_v47, %v4297_v54  ;;  %v3666_v25 = vrot.slane %v3665_v39, 4  ;;  %v3039_v61 = vor.u32 %v13903_v7, %v3036_v27  ;;  %v3044_v9 = vrot.slane %v3042_v45, 5  ;;  %v11579_v42 = vld [vmem:[#allocation2 + $0x70] sm:$0xf]  ;;  %v2483_v38 = vld [vmem:[#allocation2 + $0x10c] sm:$0xf] }
 0x26e   : > { %v9975_v34 = vcombine.low %v4290_v4, %v4298_v15  ;;  %v1572_v22 = vadd.f32 %v13554_v21, %v13306_v16  ;;  %v3037_v18 = vsel %vm11887_vm8, %v3035_v53, %v3036_v27  ;;  %v9905_v23 = vcombine.low %v11578_v56, %v11579_v42  ;;  %v13990_v40 = vld [vmem:[#allocation2 + $0x110] sm:$0xf] }
 0x26f   : > { %v3671_v47 = vsel %vm11887_vm8, %v3666_v25, %v3670_v19  ;;  %v3040_v7 = vrot.slane %v3039_v61, 4  ;;  %v1736_v46 = vmax.f32 %v1580_v44, 0.0  ;;  %v4025_v16 = vshrl.u32 %v13965_v28, 16  ;;  %v2461_v19 = vld [vmem:[#allocation2 + $0x7c] sm:$0x8] }
 0x270   : > { %10896 = vmatprep.mubr.msk.bf16.mxu1 %vm1746_vm12, %v9975_v34  ;;  %v9928_v4 = vcombine.low %v3663_v62, %v3671_v47  ;;  %v1734_v35 = vmax.f32 %v1572_v22, 0.0  ;;  %v13980_v52 = vsel %vm1746_vm12, %v1731_v41, -inf  ;;  %v4028_v60 = vshll.u32 %v13965_v28, 16  ;;  %v2223_v61 = vld [vmem:[#allocation2 + $0x108] sm:$0x8]  ;;  %v14029_v47 = vpop.permute.xlu0 %5017 }
 0x271   : > { %v3045_v11 = vsel %vm11887_vm8, %v3040_v7, %v3044_v9  ;;  %v4034_v32 = vshrl.u32 %v13971_v24, 16  ;;  %v1922_v33 = vsel %vm1746_vm12, %v1736_v46, -inf  ;;  %v4037_v29 = vshll.u32 %v13971_v24, 16  ;;  %v16913_v7 = vld [vmem:[#allocation39_spill] sm:$0xff] }
 0x272   : > { %4839 = vrot.lane.b32.xlu0 %v9928_v4, %s11668_s24  ;;  %v9881_v12 = vcombine.low %v3037_v18, %v3045_v11  ;;  %v1916_v37 = vsel %vm1746_vm12, %v1734_v35, -inf  ;;  %v13993_v20 = vsel %vm1746_vm12, %v9905_v23, %v4826_v3  ;;  %v13997_v30 = vsel %vm5137_vm15, %v13926_v50, %v4588_v10  ;;  %v16914_v35 = vld [vmem:[#allocation41_spill] sm:$0xff] }
 0x273   : > { %v1923_v59 = vmax.f32 %v13920_v0, %v1922_v33  ;;  %v1917_v53 = vmax.f32 %v1915_v26, %v1916_v37  ;;  %v14001_v54 = vrot.slane %v4025_v16, 7  ;;  %v14003_v39 = vrot.slane %v4025_v16, 4 }
 0x274   : > { %4601 = vrot.lane.b32.xlu1 %v9881_v12, %s16747_s15  ;;  %v9960_v27 = vcombine.low %v13965_v28, %v13971_v24  ;;  %v2785_v45 = vshrl.u32 %v2483_v38, 16  ;;  %v4036_v41 = vrot.slane %v4034_v32, 7  ;;  %v4300_v50 = vrot.slane %v4028_v60, 5  ;;  %v14052_v12 = vld [vmem:[#allocation2 + $0x110] sm:$0xf] }
 0x275   : > { %1997 = vst.msk [vmem:[#allocation4 + $0x1d0] sm:$0xff] %vm1746_vm12, %v1923_v59  ;;  %1995 = vst.msk [vmem:[#allocation4 + $0x1c0] sm:$0xff] %vm1746_vm12, %v1917_v53  ;;  %v2794_v0 = vshrl.u32 %v13990_v40, 16  ;;  %v9866_v26 = vcombine.low %v2483_v38, %v13990_v40  ;;  %v14013_v1 = vrot.slane %v4037_v29, 5  ;;  %v14015_v15 = vrot.slane %v4034_v32, 4  ;;  %v16915_v59 = vld [vmem:[#allocation40_spill] sm:$0xff] }
 0x276   : > { %5031 = vrot.lane.b32.xlu0 %v9960_v27, %s11669_s29  ;;  %v14018_v62 = vrot.slane %v2785_v45, 7  ;;  %v2788_v25 = vshll.u32 %v2483_v38, 16  ;;  %v2797_v9 = vshll.u32 %v13990_v40, 16  ;;  %v1583_v44 = vadd.f32 %v13554_v21, %v13334_v6  ;;  %v2271_v27 = vld [vmem:[#allocation2 + $0x114] sm:$0x1] }
 0x277   : > { %v2796_v34 = vrot.slane %v2794_v0, 7  ;;  %v1575_v22 = vadd.f32 %v13554_v21, %v13434_v13  ;;  %v2626_v18 = vshrl.u32 %v2461_v19, 16  ;;  %v2638_v56 = vrot.slane %v16913_v7, 4 }
 0x278   : > { %v14026_v24 = vor.u32 %v2788_v25, %v14018_v62  ;;  %4523 = vrot.lane.b32.xlu1 %v9866_v26, %s11668_s24  ;;  %v1596_v42 = vadd.f32 %v13554_v21, %v13436_v17  ;;  %v1737_v6 = vmax.f32 %v1583_v44, 0.0  ;;  %v2224_v13 = vsel %vm11895_vm11, 0, %v2223_v61  ;;  %v3125_v17 = vld [vmem:[#allocation2 + $0x10c] sm:$0xf]  ;;  %v14073_v61 = vld [vmem:[%s16677_s2] ss:$0 sm:$0xff] }
 0x279   : > { %v14036_v23 = vor.u32 %v2797_v9, %v2796_v34  ;;  %v1735_v4 = vmax.f32 %v1575_v22, 0.0  ;;  %v4301_v3 = vor.u32 %v4300_v50, %v14003_v39  ;;  %v4306_v10 = vor.u32 %v14015_v15, %v14013_v1  ;;  %2225 = vst [vmem:[#allocation2 + $0x108] sm:$0x8] %v2224_v13  ;;  %v16916_v34 = vld [vmem:[#allocation16_spill] sm:$0xff]  ;;  %v16917_v44 = vld [vmem:[#allocation15_spill] sm:$0xff] }
 0x27a   : > { %v9795_v46 = vrot.slane %v2626_v18, 11  ;;  %v2646_v16 = vsel %vm12171_vm14, %v2638_v56, %v16914_v35  ;;  %v14046_v21 = vrot.slane %v2785_v45, 4  ;;  %v14048_v11 = vrot.slane %v2788_v25, 5  ;;  %v4906_v45 = vpop.permute.xlu0 %4905 }
 0x27b   : > { %v1925_v32 = vsel %vm1746_vm12, %v1737_v6, -inf  ;;  %v1919_v38 = vsel %vm1746_vm12, %v1735_v4, -inf  ;;  %v1740_v39 = vmax.f32 %v1596_v42, 0.0  ;;  %v4032_v26 = vrot.slane %v14001_v54, 4 }
 0x27c   : > { %v1926_v33 = vmax.f32 %v13955_v48, %v1925_v32  ;;  %v1920_v37 = vmax.f32 %v13980_v52, %v1919_v38  ;;  %v2637_v53 = vsel %vm12171_vm14, %v9795_v46, %v16915_v59  ;;  %v4039_v19 = vor.u32 %v4037_v29, %v4036_v41 }
 0x27d   : > { %v14059_v50 = vcombine.low %v2637_v53, %v2646_v16  ;;  %v3406_v15 = vshrl.u32 %v3125_v17, 16  ;;  %v14062_v25 = vrot.slane %v2794_v0, 4  ;;  %v4030_v48 = vor.u32 %v4028_v60, %v14001_v54 }
 0x27e   : > { %1998 = vst.msk [vmem:[#allocation4 + $0x1d8] sm:$0xff] %vm1746_vm12, %v1926_v33  ;;  %1996 = vst.msk [vmem:[#allocation4 + $0x1c8] sm:$0xff] %vm1746_vm12, %v1920_v37  ;;  %v3415_v52 = vshrl.u32 %v14052_v12, 16  ;;  %v1588_v29 = vadd.f32 %v14073_v61, %v16916_v34  ;;  %v3409_v0 = vshll.u32 %v3125_v17, 16  ;;  %v1599_v22 = vadd.f32 %v14073_v61, %v16917_v44  ;;  %v14091_v38 = vpop.permute.xlu0 %4827 }
 0x27f   : > { %v3408_v41 = vrot.slane %v3406_v15, 7  ;;  %v2272_v18 = vsel %vm11866_vm5, 0, %v2271_v27  ;;  %v14082_v28 = vsel %vm1746_vm12, %v1740_v39, -inf  ;;  %v3418_v54 = vshll.u32 %v14052_v12, 16 }
 0x280   : > { %v3417_v60 = vrot.slane %v3415_v52, 7  ;;  %2273 = vst [vmem:[#allocation2 + $0x114] sm:$0x1] %v2272_v18  ;;  %v14085_v7 = vrot.slane %v4301_v3, 4  ;;  %v3762_v56 = vld [vmem:[#allocation2 + $0x108] sm:$0x8]  ;;  %v4040_v42 = vsel %vm12171_vm14, %v4032_v26, %v4039_v19  ;;  %v5276_v32 = vsel %vm5137_vm15, %v13993_v20, %v4906_v45 }
 0x281   : > { %v3124_v6 = vld [vmem:[#allocation2 + $0x108] sm:$0x8]  ;;  %v3411_v4 = vor.u32 %v3409_v0, %v3408_v41  ;;  %v3413_v13 = vrot.slane %v3408_v41, 4  ;;  %v1738_v46 = vmax.f32 %v1588_v29, 0.0  ;;  %v4020_v35 = vshrl.u32 %v3762_v56, 16  ;;  %v16918_v20 = vld [vmem:[#allocation65_spill] sm:$0xff] }
 0x282   : > { %v3401_v16 = vshrl.u32 %v3124_v6, 16  ;;  %v3420_v17 = vor.u32 %v3418_v54, %v3417_v60  ;;  %v1741_v12 = vmax.f32 %v1599_v22, 0.0  ;;  %v4307_v33 = vrot.slane %v4306_v10, 4 }
 0x283   : > { %v3672_v3 = vrot.slane %v3406_v15, 4  ;;  %v3673_v37 = vrot.slane %v3409_v0, 5  ;;  %v9832_v59 = vrot.slane %v4020_v35, 11  ;;  %v4304_v27 = vsel %vm11887_vm8, %v14085_v7, %v14013_v1 }
 0x284   : > { %v9817_v53 = vrot.slane %v3401_v16, 11  ;;  %v3421_v39 = vsel %vm12171_vm14, %v3413_v13, %v3420_v17  ;;  %v1591_v45 = vadd.f32 %v14073_v61, %v16918_v20  ;;  %v3048_v10 = vor.u32 %v14048_v11, %v14046_v21  ;;  %v14112_v17 = vpop.permute.xlu0 %5019 }
 0x285   : > { %v2061_v26 = vld [vmem:[#allocation4 + $0x1d0] ss:$2 sm:$0xff]  ;;  %v2125_v19 = vld [vmem:[#allocation4 + $0x1d1] ss:$2 sm:$0xff]  ;;  %v2059_v34 = vld [vmem:[#allocation4 + $0x1c0] ss:$2 sm:$0xff]  ;;  %v3674_v29 = vor.u32 %v3673_v37, %v3672_v3  ;;  %v5312_v15 = vsel %vm5170_vm0, %v5276_v32, %v14029_v47  ;;  %v4031_v44 = vsel %vm12171_vm14, %v9832_v59, %v4030_v48 }
 0x286   : > { %v2159_v41 = vmax.f32 %v2061_v26, %v2125_v19  ;;  %v2123_v0 = vld [vmem:[#allocation4 + $0x1c1] ss:$2 sm:$0xff]  ;;  %v3412_v1 = vsel %vm12171_vm14, %v9817_v53, %v3411_v4  ;;  %v3676_v22 = vrot.slane %v3418_v54, 5  ;;  %5610 = vmatprep.mubr.bf16.mxu0 %v5312_v15  ;;  %v9944_v60 = vcombine.low %v4031_v44, %v4040_v42 }
 0x287   : > { %v2158_v18 = vmax.f32 %v2059_v34, %v2123_v0  ;;  %v9897_v7 = vcombine.low %v3412_v1, %v3421_v39  ;;  %v4140_v56 = vld [vmem:[#allocation2 + $0x114] sm:$0x1]  ;;  %v3675_v13 = vrot.slane %v3674_v29, 4  ;;  %v14110_v11 = vsel %vm1746_vm12, %v1738_v46, -inf  ;;  %v14128_v39 = vld [vmem:[#allocation2 + $0x120] sm:$0xf] }
 0x288   : > { %v3500_v6 = vld [vmem:[#allocation2 + $0x114] sm:$0x1]  ;;  %v10422_v21 = vpack.c.bf16 %v2159_v41, %v2159_v41  ;;  %v4309_v47 = vshll.u32 %v4140_v56, 16  ;;  %v3678_v35 = vrot.slane %v3415_v52, 4  ;;  %4919 = vrot.lane.b32.xlu0 %v9944_v60, %s16747_s15  ;;  %v14117_v54 = vsel %vm1746_vm12, %v1741_v12, -inf  ;;  %v14137_v20 = vpop.permute.xlu0 %4907 }
 0x289   : > { %v2858_v16 = vld [vmem:[#allocation2 + $0x114] sm:$0x1]  ;;  %v10421_v48 = vpack.c.bf16 %v2158_v18, %v2158_v18  ;;  %4681 = vrot.lane.b32.xlu1 %v9897_v7, %s11669_s29  ;;  %v3682_v42 = vshll.u32 %v3500_v6, 16  ;;  %v3049_v4 = vrot.slane %v3048_v10, 4  ;;  %v3050_v52 = vrot.slane %v2797_v9, 5  ;;  %v16919_v10 = vld [vmem:[#allocation46_spill] sm:$0xff]  ;;  %v14149_v18 = vpop.permute.xlu1 %4509 }
 0x28a   : > { %2440 = vst.msk [vmem:[#allocation2 + $0x138] sm:$0xf] %vm2168_vm2, %v10422_v21  ;;  %v4311_v32 = vrot.slane %v4309_v47, 5  ;;  %v3679_v46 = vor.u32 %v3678_v35, %v3676_v22  ;;  %v3056_v3 = vshll.u32 %v2858_v16, 16  ;;  %v1739_v37 = vmax.f32 %v1591_v45, 0.0 }
 0x28b   : > { %2439 = vst.msk [vmem:[#allocation2 + $0x134] sm:$0xf] %vm2168_vm2, %v10421_v48  ;;  %v3677_v59 = vsel %vm11887_vm8, %v3675_v13, %v3676_v22  ;;  %v3684_v53 = vrot.slane %v3682_v42, 5  ;;  %v5184_v12 = vsel %vm5170_vm0, %v13839_v51, %v13948_v43  ;;  %v3051_v40 = vsel %vm11887_vm8, %v3049_v4, %v3050_v52  ;;  %v14135_v34 = vld [vmem:[#allocation2 + $0x124] sm:$0xf]  ;;  %v16920_v43 = vld [vmem:[#allocation66_spill] sm:$0xff] }
 0x28c   : > { %v4312_v26 = vsel %vm11887_vm8, %v4307_v33, %v4311_v32  ;;  %v3680_v19 = vrot.slane %v3679_v46, 4  ;;  %v3053_v9 = vor.u32 %v14062_v25, %v3050_v52  ;;  %5611 = vmatmul.mubr.bf16.gmra.mrb[144].mxu0 %v5184_v12  ;;  %v3058_v29 = vrot.slane %v3056_v3, 5  ;;  %v11581_v56 = vld [vmem:[#allocation2 + $0x80] sm:$0xf]  ;;  %v11582_v6 = vld [vmem:[#allocation2 + $0x84] sm:$0xf] }
 0x28d   : > { %v9976_v45 = vcombine.low %v4304_v27, %v4312_v26  ;;  %v1612_v51 = vadd.f32 %v14073_v61, %v16919_v10  ;;  %v1604_v15 = vadd.f32 %v14073_v61, %v16920_v43  ;;  %v4047_v0 = vshrl.u32 %v14128_v39, 16  ;;  %v2486_v47 = vld [vmem:[#allocation2 + $0x120] sm:$0xf]  ;;  %v14162_v4 = vld [vmem:[#allocation2 + $0x124] sm:$0xf]  ;;  %v14183_v26 = vpop.permute.xlu1 %4667 }
 0x28e   : > { %v3685_v33 = vsel %vm11887_vm8, %v3680_v19, %v3684_v53  ;;  %v3054_v41 = vrot.slane %v3053_v9, 4  ;;  %v4050_v25 = vshll.u32 %v14128_v39, 16  ;;  %v4056_v22 = vshrl.u32 %v14135_v34, 16  ;;  %v2464_v12 = vld [vmem:[#allocation2 + $0x90] sm:$0x8] }
 0x28f   : > { %10897 = vmatmul.mubr.msk.bf16.gmra.mrb[8].mxu1 %vm1746_vm12, %v9976_v45  ;;  %v9929_v44 = vcombine.low %v3677_v59, %v3685_v33  ;;  %v1744_v1 = vmax.f32 %v1612_v51, 0.0  ;;  %v1742_v27 = vmax.f32 %v1604_v15, 0.0  ;;  %v14152_v60 = vsel %vm1746_vm12, %v1739_v37, -inf  ;;  %v14172_v37 = vpop.permute.xlu0 %4829  ;;  %v2226_v45 = vld [vmem:[#allocation2 + $0x11c] sm:$0x8]  ;;  %v16921_v33 = vld [vmem:[#allocation67_spill] sm:$0xff] }
 0x290   : > { %v3059_v7 = vsel %vm11887_vm8, %v3054_v41, %v3058_v29  ;;  %v9906_v13 = vcombine.low %v11581_v56, %v11582_v6  ;;  %v4059_v21 = vshll.u32 %v14135_v34, 16  ;;  %v14160_v42 = vrot.slane %v4047_v0, 4  ;;  %v3128_v56 = vld [vmem:[#allocation2 + $0x120] sm:$0xf] }
 0x291   : > { %4841 = vrot.lane.b32.xlu0 %v9929_v44, %s11668_s24  ;;  %v9882_v35 = vcombine.low %v3051_v40, %v3059_v7  ;;  %v1934_v16 = vsel %vm1746_vm12, %v1744_v1, -inf  ;;  %v1928_v48 = vsel %vm1746_vm12, %v1742_v27, -inf  ;;  %v14168_v52 = vrot.slane %v4050_v25, 5  ;;  %v16923_v27 = vld [vmem:[#allocation47_spill] sm:$0xff] }
 0x292   : > { %v1935_v32 = vmax.f32 %v14082_v28, %v1934_v16  ;;  %v1929_v46 = vmax.f32 %v14110_v11, %v1928_v48  ;;  %v14170_v3 = vrot.slane %v4059_v21, 5  ;;  %v14177_v59 = vsel %vm1746_vm12, %v9906_v13, %v14091_v38 }
 0x293   : > { %4603 = vrot.lane.b32.xlu1 %v9882_v35, %s16747_s15  ;;  %v14179_v53 = vrot.slane %v4056_v22, 4  ;;  %v9961_v28 = vcombine.low %v14128_v39, %v14135_v34  ;;  %v2807_v11 = vshrl.u32 %v2486_v47, 16  ;;  %v4049_v19 = vrot.slane %v4047_v0, 7  ;;  %v14210_v16 = vpop.permute.xlu0 %5021 }
 0x294   : > { %2001 = vst.msk [vmem:[#allocation4 + $0x1f0] sm:$0xff] %vm1746_vm12, %v1935_v32  ;;  %1999 = vst.msk [vmem:[#allocation4 + $0x1e0] sm:$0xff] %vm1746_vm12, %v1929_v46  ;;  %v4058_v40 = vrot.slane %v4056_v22, 7  ;;  %v2816_v9 = vshrl.u32 %v14162_v4, 16  ;;  %v9867_v38 = vcombine.low %v2486_v47, %v14162_v4  ;;  %v4315_v29 = vor.u32 %v14168_v52, %v14160_v42  ;;  %v3129_v32 = vld [vmem:[#allocation2 + $0x124] sm:$0xf]  ;;  %v14215_v46 = vpop.permute.xlu1 %4589 }
 0x295   : > { %5033 = vrot.lane.b32.xlu0 %v9961_v28, %s11669_s29  ;;  %v14192_v34 = vrot.slane %v2807_v11, 7  ;;  %v2810_v10 = vshll.u32 %v2486_v47, 16  ;;  %v2819_v51 = vshll.u32 %v14162_v4, 16  ;;  %v4320_v43 = vor.u32 %v14179_v53, %v14170_v3 }
 0x296   : > { %v2818_v15 = vrot.slane %v2816_v9, 7  ;;  %v1615_v41 = vadd.f32 %v14073_v61, %v16921_v33  ;;  %v1607_v0 = vadd.f32 %v14073_v61, %v13625_v14  ;;  %v2648_v1 = vshrl.u32 %v2464_v12, 16  ;;  %v16924_v61 = vld [vmem:[#allocation51_spill] sm:$0xff]  ;;  %v16925_v33 = vld [vmem:[#allocation50_spill] sm:$0xff] }
 0x297   : > { %v14202_v44 = vor.u32 %v2810_v10, %v14192_v34  ;;  %4525 = vrot.lane.b32.xlu1 %v9867_v38, %s11668_s24  ;;  %v2660_v22 = vrot.slane %v16923_v27, 4  ;;  %v2227_v7 = vsel %vm11895_vm11, 0, %v2226_v45  ;;  %v3060_v13 = vrot.slane %v2807_v11, 4  ;;  %v2274_v38 = vld [vmem:[#allocation2 + $0x128] sm:$0x1]  ;;  %v14226_v27 = vpop.permute.xlu0 %4909 }
 0x298   : > { %v14208_v6 = vor.u32 %v2819_v51, %v2818_v15  ;;  %v1745_v47 = vmax.f32 %v1615_v41, 0.0  ;;  %v1743_v35 = vmax.f32 %v1607_v0, 0.0  ;;  %2228 = vst [vmem:[#allocation2 + $0x11c] sm:$0x8] %v2227_v7  ;;  %v9796_v14 = vrot.slane %v2648_v1, 11 }
 0x299   : > { %16922 = vst [vmem:[#allocation17_spill] sm:$0xff] %v14202_v44  ;;  %v2668_v48 = vsel %vm12171_vm14, %v2660_v22, %v16924_v61  ;;  %v4054_v42 = vrot.slane %v4049_v19, 4  ;;  %v4061_v4 = vor.u32 %v4059_v21, %v4058_v40  ;;  %v3061_v52 = vrot.slane %v2810_v10, 5 }
 0x29a   : > { %v1937_v28 = vsel %vm1746_vm12, %v1745_v47, -inf  ;;  %v1931_v11 = vsel %vm1746_vm12, %v1743_v35, -inf  ;;  %v3428_v12 = vshrl.u32 %v3128_v56, 16  ;;  %v2659_v41 = vsel %vm12171_vm14, %v9796_v14, %v16925_v33 }
 0x29b   : > { %v1938_v45 = vmax.f32 %v14117_v54, %v1937_v28  ;;  %v1932_v15 = vmax.f32 %v14152_v60, %v1931_v11  ;;  %v3431_v0 = vshll.u32 %v3128_v56, 16  ;;  %v14224_v21 = vcombine.low %v2659_v41, %v2668_v48 }
 0x29c   : > { %v3430_v40 = vrot.slane %v3428_v12, 7  ;;  %v3437_v1 = vshrl.u32 %v3129_v32, 16  ;;  %v3440_v10 = vshll.u32 %v3129_v32, 16  ;;  %v14228_v22 = vrot.slane %v2816_v9, 4  ;;  %v14243_v32 = vpop.permute.xlu1 %4511 }
 0x29d   : > { %2002 = vst.msk [vmem:[#allocation4 + $0x1f8] sm:$0xff] %vm1746_vm12, %v1938_v45  ;;  %2000 = vst.msk [vmem:[#allocation4 + $0x1e8] sm:$0xff] %vm1746_vm12, %v1932_v15  ;;  %v4052_v54 = vor.u32 %v4050_v25, %v4049_v19  ;;  %v4062_v60 = vsel %vm12171_vm14, %v4054_v42, %v4061_v4  ;;  %v2275_v7 = vsel %vm11866_vm5, 0, %v2274_v38  ;;  %v14238_v35 = vrot.slane %v4315_v29, 4 }
 0x29e   : > { %v3435_v56 = vrot.slane %v3430_v40, 4  ;;  %v3439_v47 = vrot.slane %v3437_v1, 7  ;;  %2276 = vst [vmem:[#allocation2 + $0x128] sm:$0x1] %v2275_v7  ;;  %v5278_v9 = vsel %vm5137_vm15, %v14177_v59, %v14137_v20  ;;  %v3433_v48 = vor.u32 %v3431_v0, %v3430_v40 }
 0x29f   : > { %v3765_v14 = vld [vmem:[#allocation2 + $0x11c] sm:$0x8]  ;;  %v3686_v39 = vrot.slane %v3428_v12, 4  ;;  %v3687_v25 = vrot.slane %v3431_v0, 5  ;;  %v3062_v19 = vor.u32 %v3061_v52, %v3060_v13  ;;  %v14245_v11 = vrot.slane %v3440_v10, 5  ;;  %v14255_v52 = vpop.permute.xlu0 %4831 }
 0x2a0   : > { %v3127_v61 = vld [vmem:[#allocation2 + $0x11c] sm:$0x8]  ;;  %v4042_v42 = vshrl.u32 %v3765_v14, 16  ;;  %v3442_v28 = vor.u32 %v3440_v10, %v3439_v47  ;;  %v3692_v29 = vrot.slane %v3437_v1, 4  ;;  %v14249_v15 = vrot.slane %v2819_v51, 5 }
 0x2a1   : > { %v3423_v4 = vshrl.u32 %v3127_v61, 16  ;;  %v3688_v38 = vor.u32 %v3687_v25, %v3686_v39  ;;  %v14247_v45 = vrot.slane %v3062_v19, 4  ;;  %v5315_v13 = vsel %vm5170_vm0, %v5278_v9, %v14112_v17  ;;  %v14278_v47 = vld [vmem:[#allocation2 + $0x138] sm:$0xf] }
 0x2a2   : > { %v9833_v20 = vrot.slane %v4042_v42, 11  ;;  %v3443_v12 = vsel %vm12171_vm14, %v3435_v56, %v3442_v28  ;;  %v4321_v33 = vrot.slane %v4320_v43, 4  ;;  %v3693_v0 = vor.u32 %v3692_v29, %v14245_v11  ;;  %5618 = vmatprep.mubr.bf16.mxu0 %v5315_v13  ;;  %v14276_v56 = vld [vmem:[#allocation2 + $0x134] sm:$0xf] }
 0x2a3   : > { %v9818_v59 = vrot.slane %v3423_v4, 11  ;;  %v3689_v41 = vrot.slane %v3688_v38, 4  ;;  %v3067_v51 = vor.u32 %v14228_v22, %v14249_v15  ;;  %v5109_v40 = vsel %vm1746_vm12, %v14059_v50, %v14149_v18  ;;  %v14274_v22 = vpop.permute.xlu1 %4669 }
 0x2a4   : > { %v2065_v1 = vld [vmem:[#allocation4 + $0x1f0] ss:$2 sm:$0xff]  ;;  %v2129_v10 = vld [vmem:[#allocation4 + $0x1f1] ss:$2 sm:$0xff]  ;;  %v2063_v17 = vld [vmem:[#allocation4 + $0x1e0] ss:$2 sm:$0xff]  ;;  %v4053_v7 = vsel %vm12171_vm14, %v9833_v20, %v4052_v54  ;;  %v4318_v43 = vsel %vm11887_vm8, %v14238_v35, %v14170_v3 }
 0x2a5   : > { %v3434_v53 = vsel %vm12171_vm14, %v9818_v59, %v3433_v48  ;;  %v2161_v50 = vmax.f32 %v2065_v1, %v2129_v10  ;;  %v2127_v18 = vld [vmem:[#allocation4 + $0x1e1] ss:$2 sm:$0xff]  ;;  %v9945_v9 = vcombine.low %v4053_v7, %v4062_v60  ;;  %v4141_v61 = vld [vmem:[#allocation2 + $0x128] sm:$0x1]  ;;  %v3065_v48 = vsel %vm11887_vm8, %v14247_v45, %v14249_v15  ;;  %v14292_v15 = vpop.permute.xlu0 %5023  ;;  %v14317_v7 = vld [vmem:[#allocation2 + $0x138] sm:$0xf] }
 0x2a6   : > { %v9898_v14 = vcombine.low %v3434_v53, %v3443_v12  ;;  %v3501_v54 = vld [vmem:[#allocation2 + $0x128] sm:$0x1]  ;;  %v2160_v39 = vmax.f32 %v2063_v17, %v2127_v18  ;;  %v4323_v25 = vshll.u32 %v4141_v61, 16  ;;  %v3694_v3 = vrot.slane %v3693_v0, 4  ;;  %v2489_v1 = vld [vmem:[#allocation2 + $0x134] sm:$0xf] }
 0x2a7   : > { %v3696_v35 = vshll.u32 %v3501_v54, 16  ;;  %v2859_v19 = vld [vmem:[#allocation2 + $0x128] sm:$0x1]  ;;  %v10424_v42 = vpack.c.bf16 %v2161_v50, %v2161_v50  ;;  %4921 = vrot.lane.b32.xlu0 %v9945_v9, %s16747_s15  ;;  %v3691_v60 = vsel %vm11887_vm8, %v3689_v41, %v14245_v11  ;;  %v3068_v4 = vrot.slane %v3067_v51, 4  ;;  %v14307_v0 = vpop.permute.xlu1 %4591  ;;  %v11583_v53 = vld [vmem:[#allocation2 + $0x94] sm:$0xf] }
 0x2a8   : > { %4683 = vrot.lane.b32.xlu1 %v9898_v14, %s11669_s29  ;;  %v3070_v28 = vshll.u32 %v2859_v19, 16  ;;  %v10423_v38 = vpack.c.bf16 %v2160_v39, %v2160_v39  ;;  %v4325_v29 = vrot.slane %v4323_v25, 5  ;;  %v5187_v45 = vsel %vm5170_vm0, %v13997_v30, %v14183_v26  ;;  %v11584_v50 = vld [vmem:[#allocation2 + $0x98] sm:$0xf]  ;;  %v2229_v19 = vld [vmem:[#allocation2 + $0x130] sm:$0x8] }
 0x2a9   : > { %v3698_v20 = vrot.slane %v3696_v35, 5  ;;  %2442 = vst.msk [vmem:[#allocation2 + $0x14c] sm:$0xf] %vm2168_vm2, %v10424_v42  ;;  %5619 = vmatmul.mubr.bf16.gmra.mrb[148].mxu0 %v5187_v45  ;;  %v4069_v12 = vshrl.u32 %v14276_v56, 16  ;;  %v4072_v13 = vshll.u32 %v14276_v56, 16  ;;  %v4078_v11 = vshrl.u32 %v14278_v47, 16  ;;  %v14321_v61 = vpop.permute.xlu0 %4911 }
 0x2aa   : > { %v3072_v59 = vrot.slane %v3070_v28, 5  ;;  %v14300_v41 = vsel %vm5137_vm15, %v5109_v40, %v14215_v46  ;;  %2441 = vst.msk [vmem:[#allocation2 + $0x148] sm:$0xf] %vm2168_vm2, %v10423_v38  ;;  %v4326_v30 = vsel %vm11887_vm8, %v4321_v33, %v4325_v29  ;;  %v4081_v51 = vshll.u32 %v14278_v47, 16  ;;  %v14338_v38 = vld [vmem:[#allocation2 + $0x134] sm:$0xf] }
 0x2ab   : > { %v3699_v26 = vsel %vm11887_vm8, %v3694_v3, %v3698_v20  ;;  %v14313_v10 = vsel %vm1746_vm12, %v14224_v21, %v14243_v32  ;;  %v9977_v46 = vcombine.low %v4318_v43, %v4326_v30  ;;  %v9907_v18 = vcombine.low %v11583_v53, %v11584_v50  ;;  %16926 = vst [vmem:[#allocation19_spill] sm:$0xff] %v14338_v38  ;;  %v16927_v45 = vld [vmem:[#allocation56_spill] sm:$0xff] }
 0x2ac   : > { %v9930_v40 = vcombine.low %v3691_v60, %v3699_v26  ;;  %v3073_v17 = vsel %vm11887_vm8, %v3068_v4, %v3072_v59  ;;  %v4327_v9 = vrot.slane %v4069_v12, 4  ;;  %v4328_v14 = vrot.slane %v4072_v13, 5 }
 0x2ad   : > { %v9883_v33 = vcombine.low %v3065_v48, %v3073_v17  ;;  %10900 = vmatprep.mubr.msk.bf16.mxu1 %vm1746_vm12, %v9977_v46  ;;  %v14325_v21 = vrot.slane %v4081_v51, 5  ;;  %v14327_v32 = vrot.slane %v4078_v11, 4  ;;  %v9962_v43 = vcombine.low %v14276_v56, %v14278_v47  ;;  %v2467_v48 = vld [vmem:[#allocation2 + $0xa4] sm:$0x8]  ;;  %v2277_v46 = vld [vmem:[#allocation2 + $0x13c] sm:$0x1]  ;;  %v14360_v50 = vpop.permute.xlu0 %4833 }
 0x2ae   : > { %4843 = vrot.lane.b32.xlu0 %v9930_v40, %s11668_s24  ;;  %v2829_v54 = vshrl.u32 %v2489_v1, 16  ;;  %v5239_v39 = vsel %vm1746_vm12, %v9907_v18, %v14172_v37  ;;  %v4071_v25 = vrot.slane %v4069_v12, 7  ;;  %v2838_v3 = vshrl.u32 %v14317_v7, 16  ;;  %v14342_v37 = vpop.permute.xlu1 %4513  ;;  %v14344_v12 = vld [vmem:[#allocation2 + $0x138] sm:$0xf] }
 0x2af   : > { %4605 = vrot.lane.b32.xlu1 %v9883_v33, %s16747_s15  ;;  %v9868_v35 = vcombine.low %v2489_v1, %v14317_v7  ;;  %v4080_v42 = vrot.slane %v4078_v11, 7  ;;  %v4329_v60 = vor.u32 %v4328_v14, %v4327_v9  ;;  %v2832_v28 = vshll.u32 %v2489_v1, 16 }
 0x2b0   : > { %v14336_v4 = vrot.slane %v2829_v54, 7  ;;  %v2840_v47 = vrot.slane %v2838_v3, 7  ;;  %v2841_v29 = vshll.u32 %v14317_v7, 16  ;;  %v2670_v20 = vshrl.u32 %v2467_v48, 16  ;;  %v16930_v7 = vld [vmem:[#allocation59_spill] sm:$0xff] }
 0x2b1   : > { %v2682_v59 = vrot.slane %v16927_v45, 4  ;;  %v4334_v30 = vor.u32 %v14327_v32, %v14325_v21  ;;  %v3074_v26 = vrot.slane %v2829_v54, 4  ;;  %v2230_v1 = vsel %vm11895_vm11, 0, %v2229_v19  ;;  %v16931_v54 = vld [vmem:[#allocation58_spill] sm:$0xff]  ;;  %v14381_v44 = vpop.permute.xlu0 %5025 }
 0x2b2   : > { %5035 = vrot.lane.b32.xlu0 %v9962_v43, %s11669_s29  ;;  %v14350_v11 = vor.u32 %v2832_v28, %v14336_v4  ;;  %v14354_v40 = vor.u32 %v2841_v29, %v2840_v47  ;;  %v9797_v17 = vrot.slane %v2670_v20, 11  ;;  %2231 = vst [vmem:[#allocation2 + $0x130] sm:$0x8] %v2230_v1  ;;  %v4076_v53 = vrot.slane %v4071_v25, 4  ;;  %v14371_v47 = vpop.permute.xlu1 %4671 }
 0x2b3   : > { %4527 = vrot.lane.b32.xlu1 %v9868_v35, %s11668_s24  ;;  %v2690_v33 = vsel %vm12171_vm14, %v2682_v59, %v16930_v7  ;;  %v4083_v18 = vor.u32 %v4081_v51, %v4080_v42  ;;  %v3450_v9 = vshrl.u32 %v14338_v38, 16  ;;  %v3453_v14 = vshll.u32 %v14338_v38, 16 }
 0x2b4   : > { %16928 = vst [vmem:[#allocation18_spill] sm:$0xff] %v14350_v11  ;;  %16929 = vst [vmem:[#allocation52_spill] sm:$0xff] %v14354_v40  ;;  %v3459_v32 = vshrl.u32 %v14344_v12, 16  ;;  %v3075_v43 = vrot.slane %v2832_v28, 5  ;;  %v2681_v48 = vsel %vm12171_vm14, %v9797_v17, %v16931_v54  ;;  %v3462_v35 = vshll.u32 %v14344_v12, 16 }
 0x2b5   : > { %v2278_v19 = vsel %vm11866_vm5, 0, %v2277_v46  ;;  %v3080_v20 = vrot.slane %v2838_v3, 4  ;;  %v14373_v51 = vcombine.low %v2681_v48, %v2690_v33  ;;  %v3452_v42 = vrot.slane %v3450_v9, 7 }
 0x2b6   : > { %v3461_v45 = vrot.slane %v3459_v32, 7  ;;  %2279 = vst [vmem:[#allocation2 + $0x13c] sm:$0x1] %v2278_v19  ;;  %v4074_v28 = vor.u32 %v4072_v13, %v4071_v25  ;;  %v5280_v59 = vsel %vm5137_vm15, %v5239_v39, %v14226_v27  ;;  %v3700_v1 = vrot.slane %v3450_v9, 4 }
 0x2b7   : > { %v3701_v17 = vrot.slane %v3453_v14, 5  ;;  %v4084_v7 = vsel %vm12171_vm14, %v4076_v53, %v4083_v18  ;;  %v3457_v46 = vrot.slane %v3452_v42, 4  ;;  %v4330_v11 = vrot.slane %v4329_v60, 4  ;;  %v14385_v60 = vpop.permute.xlu1 %4593 }
 0x2b8   : > { %v3464_v54 = vor.u32 %v3462_v35, %v3461_v45  ;;  %v3704_v33 = vrot.slane %v3462_v35, 5  ;;  %v3706_v48 = vrot.slane %v3459_v32, 4  ;;  %v3076_v40 = vor.u32 %v3075_v43, %v3074_v26  ;;  %v14394_v43 = vld [vmem:[#allocation2 + $0x14c] sm:$0xf] }
 0x2b9   : > { %v3702_v3 = vor.u32 %v3701_v17, %v3700_v1  ;;  %v3768_v19 = vld [vmem:[#allocation2 + $0x130] sm:$0x8]  ;;  %v3455_v13 = vor.u32 %v3453_v14, %v3452_v42  ;;  %v4335_v25 = vrot.slane %v4334_v30, 4  ;;  %v3078_v38 = vrot.slane %v2841_v29, 5  ;;  %v14392_v29 = vld [vmem:[#allocation2 + $0x148] sm:$0xf]  ;;  %v14401_v17 = vpop.permute.xlu0 %4913 }
 0x2ba   : > { %v3130_v56 = vld [vmem:[#allocation2 + $0x130] sm:$0x8]  ;;  %v5318_v27 = vsel %vm5170_vm0, %v5280_v59, %v14210_v16  ;;  %v4064_v39 = vshrl.u32 %v3768_v19, 16  ;;  %v3707_v18 = vor.u32 %v3706_v48, %v3704_v33  ;;  %v3465_v26 = vsel %vm12171_vm14, %v3457_v46, %v3464_v54 }
 0x2bb   : > { %v3445_v9 = vshrl.u32 %v3130_v56, 16  ;;  %v3703_v53 = vrot.slane %v3702_v3, 4  ;;  %5626 = vmatprep.mubr.bf16.mxu0 %v5318_v27  ;;  %v4332_v32 = vsel %vm11887_vm8, %v4330_v11, %v14325_v21  ;;  %v3077_v14 = vrot.slane %v3076_v40, 4 }
 0x2bc   : > { %v3081_v30 = vor.u32 %v3080_v20, %v3078_v38  ;;  %v9834_v16 = vrot.slane %v4064_v39, 11  ;;  %v5190_v1 = vsel %vm5170_vm0, %v14300_v41, %v14274_v22  ;;  %v3708_v11 = vrot.slane %v3707_v18, 4  ;;  %v11586_v18 = vld [vmem:[#allocation2 + $0xac] sm:$0xf] }
 0x2bd   : > { %v9819_v35 = vrot.slane %v3445_v9, 11  ;;  %v4142_v42 = vld [vmem:[#allocation2 + $0x13c] sm:$0x1]  ;;  %v3705_v59 = vsel %vm11887_vm8, %v3703_v53, %v3704_v33  ;;  %v3079_v46 = vsel %vm11887_vm8, %v3077_v14, %v3078_v38  ;;  %5627 = vmatmul.mubr.bf16.gmra.mrb[152].mxu0 %v5190_v1  ;;  %v4091_v39 = vshrl.u32 %v14392_v29, 16  ;;  %v14412_v53 = vpop.permute.xlu1 %4515  ;;  %v2232_v1 = vld [vmem:[#allocation2 + $0x144] sm:$0x8] }
 0x2be   : > { %v3502_v45 = vld [vmem:[#allocation2 + $0x13c] sm:$0x1]  ;;  %v4337_v21 = vshll.u32 %v4142_v42, 16  ;;  %v4075_v54 = vsel %vm12171_vm14, %v9834_v16, %v4074_v28  ;;  %v3082_v33 = vrot.slane %v3081_v30, 4  ;;  %v4094_v9 = vshll.u32 %v14392_v29, 16 }
 0x2bf   : > { %v3710_v40 = vshll.u32 %v3502_v45, 16  ;;  %v2860_v20 = vld [vmem:[#allocation2 + $0x13c] sm:$0x1]  ;;  %v3456_v3 = vsel %vm12171_vm14, %v9819_v35, %v3455_v13  ;;  %v9946_v19 = vcombine.low %v4075_v54, %v4084_v7  ;;  %v4100_v38 = vshrl.u32 %v14394_v43, 16  ;;  %v11585_v13 = vld [vmem:[#allocation2 + $0xa8] sm:$0xf] }
 0x2c0   : > { %v3084_v48 = vshll.u32 %v2860_v20, 16  ;;  %v9899_v22 = vcombine.low %v3456_v3, %v3465_v26  ;;  %v4339_v41 = vrot.slane %v4337_v21, 5  ;;  %v9908_v26 = vcombine.low %v11585_v13, %v11586_v18  ;;  %v2470_v30 = vld [vmem:[#allocation2 + $0xb8] sm:$0x8]  ;;  %v14423_v21 = vpop.permute.xlu0 %4835 }
 0x2c1   : > { %v3712_v56 = vrot.slane %v3710_v40, 5  ;;  %4923 = vrot.lane.b32.xlu0 %v9946_v19, %s16747_s15  ;;  %v4103_v14 = vshll.u32 %v14394_v43, 16  ;;  %v4093_v45 = vrot.slane %v4091_v39, 7  ;;  %v4341_v20 = vrot.slane %v4091_v39, 4  ;;  %v2280_v39 = vld [vmem:[#allocation2 + $0x150] sm:$0x1] }
 0x2c2   : > { %v3086_v27 = vrot.slane %v3084_v48, 5  ;;  %4685 = vrot.lane.b32.xlu1 %v9899_v22, %s11669_s29  ;;  %v4340_v28 = vsel %vm11887_vm8, %v4335_v25, %v4339_v41  ;;  %v4102_v25 = vrot.slane %v4100_v38, 7  ;;  %v4342_v54 = vrot.slane %v4094_v9, 5  ;;  %v14431_v22 = vld [vmem:[#allocation2 + $0x14c] sm:$0xf] }
 0x2c3   : > { %v3713_v7 = vsel %vm11887_vm8, %v3708_v11, %v3712_v56  ;;  %v9978_v16 = vcombine.low %v4332_v32, %v4340_v28  ;;  %v14425_v11 = vld [vmem:[#allocation2 + $0x148] sm:$0xf]  ;;  %v14428_v3 = vrot.slane %v4103_v14, 5  ;;  %v4347_v48 = vrot.slane %v4100_v38, 4  ;;  %v2178_v13 = vld [vmem:[#allocation2 + $0x158] sm:$0x8] }
 0x2c4   : > { %v9931_v35 = vcombine.low %v3705_v59, %v3713_v7  ;;  %v3087_v42 = vsel %vm11887_vm8, %v3082_v33, %v3086_v27  ;;  %16932 = vst [vmem:[#allocation53_spill] sm:$0xff] %v14425_v11  ;;  %v2692_v32 = vshrl.u32 %v2470_v30, 16  ;;  %v16933_v59 = vld [vmem:[#allocation63_spill] sm:$0xff]  ;;  %v14433_v33 = vpop.permute.xlu1 %4673  ;;  %v4343_v41 = vor.u32 %v4342_v54, %v4341_v20  ;;  %v16934_v28 = vld [vmem:[#allocation14_spill] sm:$0xff]  ;;  %v14472_v20 = vld [vmem:[#allocation2 + $0x160] sm:$0xf] }
 0x2c5   : > { %v9884_v40 = vcombine.low %v3079_v46, %v3087_v42  ;;  %10901 = vmatmul.mubr.msk.bf16.gmra.mrb[12].mxu1 %vm1746_vm12, %v9978_v16  ;;  %v2704_v19 = vrot.slane %v16933_v59, 4  ;;  %v5153_v46 = vsel %vm5137_vm15, %v14313_v10, %v14307_v0  ;;  %v9963_v56 = vcombine.low %v14392_v29, %v14394_v43  ;;  %v14456_v16 = vld [vmem:[#allocation2 + $0x15c] sm:$0xf]  ;;  %v14465_v42 = vpop.permute.xlu0 %5027 }
 0x2c6   : > { %4845 = vrot.lane.b32.xlu0 %v9931_v35, %s11668_s24  ;;  %v2233_v27 = vsel %vm11895_vm11, 0, %v2232_v1  ;;  %v14447_v38 = vsel %vm1746_vm12, %v14373_v51, %v14342_v37  ;;  %v5242_v0 = vsel %vm1746_vm12, %v9908_v26, %v14255_v52  ;;  %v9798_v10 = vrot.slane %v2692_v32, 11  ;;  %v16935_v51 = vld [vmem:[#allocation64_spill] sm:$0xff] }
 0x2c7   : > { %4607 = vrot.lane.b32.xlu1 %v9884_v40, %s16747_s15  ;;  %v2712_v7 = vsel %vm12171_vm14, %v2704_v19, %v16934_v28  ;;  %2234 = vst [vmem:[#allocation2 + $0x144] sm:$0x8] %v2233_v27  ;;  %v4098_v29 = vrot.slane %v4093_v45, 4  ;;  %v4105_v43 = vor.u32 %v4103_v14, %v4102_v25  ;;  %v3472_v18 = vshrl.u32 %v14425_v11, 16 }
 0x2c8   : > { %v3481_v30 = vshrl.u32 %v14431_v22, 16  ;;  %v4348_v37 = vor.u32 %v4347_v48, %v14428_v3  ;;  %v2703_v52 = vsel %vm12171_vm14, %v9798_v10, %v16935_v51  ;;  %v3484_v26 = vshll.u32 %v14431_v22, 16  ;;  %v14479_v19 = vpop.permute.xlu1 %4595 }
 0x2c9   : > { %v2281_v35 = vsel %vm11866_vm5, 0, %v2280_v39  ;;  %v14468_v14 = vcombine.low %v2703_v52, %v2712_v7  ;;  %v3474_v1 = vrot.slane %v3472_v18, 7  ;;  %v14470_v25 = vrot.slane %v4343_v41, 4 }
 0x2ca   : > { %5037 = vrot.lane.b32.xlu0 %v9963_v56, %s11669_s29  ;;  %v3483_v40 = vrot.slane %v3481_v30, 7  ;;  %2282 = vst [vmem:[#allocation2 + $0x150] sm:$0x1] %v2281_v35  ;;  %v4096_v54 = vor.u32 %v4094_v9, %v4093_v45  ;;  %v5282_v48 = vsel %vm5137_vm15, %v5242_v0, %v14321_v61  ;;  %v2179_v32 = vsel %vm11895_vm11, 0, %v2178_v13  ;;  %v14488_v45 = vpop.permute.xlu0 %4915 }
 0x2cb   : > { %v16741_v59 = vshrl.u32 %v14456_v16, 16  ;;  %v4106_v56 = vsel %vm12171_vm14, %v4098_v29, %v4105_v43  ;;  %v3475_v27 = vshll.u32 %v14425_v11, 16  ;;  %v3479_v41 = vrot.slane %v3474_v1, 4  ;;  %2180 = vst [vmem:[#allocation2 + $0x158] sm:$0x8] %v2179_v32 }
 0x2cc   : > { %v3486_v39 = vor.u32 %v3484_v26, %v3483_v40  ;;  %v4349_v10 = vrot.slane %v4348_v37, 4  ;;  %v16743_v61 = vshll.u32 %v14456_v16, 16  ;;  %v16742_v63 = vshrl.u32 %v14472_v20, 16  ;;  %v11587_v43 = vld [vmem:[#allocation2 + $0xbc] sm:$0xf] }
 0x2cd   : > { %v4115_v9 = vrot.slane %v16741_v59, 7  ;;  %v4346_v7 = vsel %vm11887_vm8, %v14470_v25, %v14428_v3  ;;  %v16744_v13 = vshll.u32 %v14472_v20, 16  ;;  %v5321_v29 = vsel %vm5170_vm0, %v5282_v48, %v14292_v15  ;;  %v11588_v37 = vld [vmem:[#allocation2 + $0xc0] sm:$0xf] }
 0x2ce   : > { %v3771_v0 = vld [vmem:[#allocation2 + $0x144] sm:$0x8]  ;;  %v9909_v51 = vcombine.low %v11587_v43, %v11588_v37  ;;  %v3477_v40 = vor.u32 %v3475_v27, %v3474_v1  ;;  %v3487_v32 = vsel %vm12171_vm14, %v3479_v41, %v3486_v39  ;;  %5634 = vmatprep.mubr.bf16.mxu0 %v5321_v29  ;;  %v4124_v3 = vrot.slane %v16742_v63, 7  ;;  %v14507_v43 = vpop.permute.xlu1 %4517 }
 0x2cf   : > { %v3133_v28 = vld [vmem:[#allocation2 + $0x144] sm:$0x8]  ;;  %v4086_v52 = vshrl.u32 %v3771_v0, 16  ;;  %v4118_v59 = vor.u32 %v16743_v61, %v4115_v9  ;;  %v5193_v15 = vsel %vm5170_vm0, %v5153_v46, %v14371_v47  ;;  %v4120_v1 = vrot.slane %v4115_v9, 4 }
 0x2d0   : > { %v3467_v35 = vshrl.u32 %v3133_v28, 16  ;;  %v5245_v25 = vsel %vm1746_vm12, %v9909_v51, %v14360_v50  ;;  %5635 = vmatmul.mubr.bf16.gmra.mrb[156].mxu0 %v5193_v15  ;;  %v4127_v29 = vor.u32 %v16744_v13, %v4124_v3  ;;  %v3714_v63 = vrot.slane %v3472_v18, 4  ;;  %v4838_v15 = vpop.permute.xlu0 %4837 }
 0x2d1   : > { %v9835_v48 = vrot.slane %v4086_v52, 11  ;;  %v4143_v28 = vld [vmem:[#allocation2 + $0x150] sm:$0x1]  ;;  %v5284_v41 = vsel %vm5137_vm15, %v5245_v25, %v14401_v17  ;;  %v3715_v50 = vrot.slane %v3475_v27, 5  ;;  %v3718_v51 = vrot.slane %v3484_v26, 5 }
 0x2d2   : > { %v9820_v0 = vrot.slane %v3467_v35, 11  ;;  %v4351_v39 = vshll.u32 %v4143_v28, 16  ;;  %v3503_v37 = vld [vmem:[#allocation2 + $0x150] sm:$0x1]  ;;  %v3774_v9 = vld [vmem:[#allocation2 + $0x158] sm:$0x8]  ;;  %v4128_v3 = vsel %vm12171_vm14, %v4120_v1, %v4127_v29  ;;  %v14519_v11 = vpop.permute.xlu1 %4675 }
 0x2d3   : > { %v4097_v47 = vsel %vm12171_vm14, %v9835_v48, %v4096_v54  ;;  %v3720_v52 = vrot.slane %v3481_v30, 4  ;;  %v2473_v35 = vld [vmem:[#allocation2 + $0xcc] sm:$0x8]  ;;  %v4108_v28 = vshrl.u32 %v3774_v9, 16  ;;  %v3716_v18 = vor.u32 %v3715_v50, %v3714_v63 }
 0x2d4   : > { %v3478_v46 = vsel %vm12171_vm14, %v9820_v0, %v3477_v40  ;;  %v9947_v61 = vcombine.low %v4097_v47, %v4106_v56  ;;  %v4353_v25 = vrot.slane %v4351_v39, 5  ;;  %v3724_v13 = vshll.u32 %v3503_v37, 16  ;;  %v16936_v56 = vld [vmem:[#allocation68_spill] sm:$0xff]  ;;  %v16937_v37 = vld [vmem:[#allocation49_spill] sm:$0xff]  ;;  %v5030_v47 = vpop.permute.xlu0 %5029 }
 0x2d5   : > { %v9900_v17 = vcombine.low %v3478_v46, %v3487_v32  ;;  %v3721_v27 = vor.u32 %v3720_v52, %v3718_v51  ;;  %v9836_v26 = vrot.slane %v4108_v28, 11  ;;  %v2714_v54 = vshrl.u32 %v2473_v35, 16  ;;  %v2476_v32 = vld [vmem:[#allocation2 + $0xe0] sm:$0x8]  ;;  %v2479_v46 = vld [vmem:[#allocation2 + $0xf4] sm:$0x8] }
 0x2d6   : > { %4925 = vrot.lane.b32.xlu0 %v9947_v61, %s16747_s15  ;;  %v4354_v30 = vsel %vm11887_vm8, %v4349_v10, %v4353_v25  ;;  %v2726_v40 = vrot.slane %v16936_v56, 4  ;;  %v3717_v0 = vrot.slane %v3716_v18, 4  ;;  %v3726_v63 = vrot.slane %v3724_v13, 5  ;;  %v16938_v52 = vld [vmem:[#allocation48_spill] sm:$0xff]  ;;  %v11590_v35 = vld [vmem:[#allocation2 + $0xd4] sm:$0xf] }
 0x2d7   : > { %4687 = vrot.lane.b32.xlu1 %v9900_v17, %s11669_s29  ;;  %v9979_v48 = vcombine.low %v4346_v7, %v4354_v30  ;;  %v3722_v1 = vrot.slane %v3721_v27, 4  ;;  %v4119_v39 = vsel %vm12171_vm14, %v9836_v26, %v4118_v59  ;;  %v9799_v29 = vrot.slane %v2714_v54, 11  ;;  %v4598_v17 = vpop.permute.xlu1 %4597  ;;  %v11591_v18 = vld [vmem:[#allocation2 + $0xe4] sm:$0xf]  ;;  %v11592_v27 = vld [vmem:[#allocation2 + $0xe8] sm:$0xf] }
 0x2d8   : > { %v2734_v61 = vsel %vm12171_vm14, %v2726_v40, %v16937_v37  ;;  %v5324_v10 = vsel %vm5170_vm0, %v5284_v41, %v14381_v44  ;;  %v5155_v50 = vsel %vm5137_vm15, %v14447_v38, %v14385_v60  ;;  %v9948_v7 = vcombine.low %v4119_v39, %v4128_v3  ;;  %v11589_v41 = vld [vmem:[#allocation2 + $0xd0] sm:$0xf] }
 0x2d9   : > { %10904 = vmatprep.mubr.msk.bf16.mxu1 %vm1746_vm12, %v9979_v48  ;;  %v3719_v13 = vsel %vm11887_vm8, %v3717_v0, %v3718_v51  ;;  %5642 = vmatprep.mubr.bf16.mxu0 %v5324_v10  ;;  %v2736_v59 = vshrl.u32 %v2476_v32, 16  ;;  %v3727_v9 = vsel %vm11887_vm8, %v3722_v1, %v3726_v63  ;;  %v2725_v44 = vsel %vm12171_vm14, %v9799_v29, %v16938_v52  ;;  %v2485_v63 = vld [vmem:[#allocation2 + $0x11c] sm:$0x8] }
 0x2da   : > { %v9910_v60 = vcombine.low %v11589_v41, %v11590_v35  ;;  %v5196_v38 = vsel %vm5170_vm0, %v5155_v50, %v14433_v33  ;;  %4927 = vrot.lane.b32.xlu0 %v9948_v7, %s16747_s15  ;;  %v9847_v51 = vcombine.low %v2725_v44, %v2734_v61  ;;  %v2748_v28 = vrot.slane %v13704_v2, 4  ;;  %v16940_v35 = vld [vmem:[#allocation19_spill] sm:$0xff]  ;;  %s378_s15 = scalar_lea.vmem [#allocation7], %s377_s22 }
 0x2db   : > { %5643 = vmatmul.mubr.bf16.gmra.mrb[160].mxu0 %v5196_v38  ;;  %v9800_v25 = vrot.slane %v2736_v59, 11  ;;  %v9911_v30 = vcombine.low %v11591_v18, %v11592_v27  ;;  %v2758_v26 = vshrl.u32 %v2479_v46, 16  ;;  %v2770_v54 = vrot.slane %v13862_v55, 4  ;;  %v4918_v32 = vpop.permute.xlu0 %4917  ;;  %v14576_v37 = vpop.permute.xlu1 %4519  ;;  %v16943_v18 = vld [vmem:[#allocation18_spill] sm:$0xff]  ;;  %s9562_s12 = sshll.u32 %s378_s15, 4  ;;  %s16635_s12 = int_to_ptr.vmem [resolvable:$true] %s9562_s12 }
 0x2dc   : > { %v5248_v3 = vsel %vm1746_vm12, %v9910_v60, %v14423_v21  ;;  %v9932_v56 = vcombine.low %v3719_v13, %v3727_v9  ;;  %v2756_v40 = vsel %vm12171_vm14, %v2748_v28, %v13720_v49  ;;  %v2482_v21 = vld [vmem:[#allocation2 + $0x108] sm:$0x8]  ;;  %v2792_v10 = vrot.slane %v14018_v62, 4  ;;  %s11602_s21 = scalar_lea.vmem %s16635_s12, 16 }
 0x2dd   : > { %v2747_v33 = vsel %vm12171_vm14, %v9800_v25, %v13712_v5  ;;  %v5286_v2 = vsel %vm5137_vm15, %v5248_v3, %v14488_v45  ;;  %v5251_v55 = vsel %vm1746_vm12, %v9911_v30, %v4838_v15  ;;  %v9964_v5 = vcombine.low %v14456_v16, %v14472_v20  ;;  %v2488_v15 = vld [vmem:[#allocation2 + $0x130] sm:$0x8]  ;;  %v16942_v25 = vld [vmem:[#allocation52_spill] sm:$0xff]  ;;  %p11603_p11 = scmp.ne.s32.totalorder %s16635_s12, %s11602_s21 }
 0x2de   : > { %v14559_v48 = vcombine.low %v2747_v33, %v2756_v40  ;;  %v5327_v0 = vsel %vm5170_vm0, %v5286_v2, %v14465_v42  ;;  %4847 = vrot.lane.b32.xlu0 %v9932_v56, %s11668_s24  ;;  %v9801_v1 = vrot.slane %v2758_v26, 11  ;;  %v2778_v49 = vsel %vm12171_vm14, %v2770_v54, %v13878_v8  ;;  %v4129_v56 = vld [vmem:[#allocation2 + $0x38] sm:$0x1]  ;;  %s9550_s24 = scalar_lea.sflag [#allocation8], %s377_s22 }
 0x2df   : > { %5650 = vmatprep.mubr.bf16.mxu0 %v5327_v0  ;;  %v5288_v45 = vsel %vm5137_vm15, %v5251_v55, %v4918_v32  ;;  %v5118_v42 = vsel %vm1746_vm12, %v14468_v14, %v14412_v53  ;;  %v2780_v39 = vshrl.u32 %v2482_v21, 16  ;;  %v2802_v14 = vshrl.u32 %v2485_v63, 16  ;;  %v4678_v44 = vpop.permute.xlu1 %4677  ;;  %v16948_v63 = vld [vmem:[#allocation11_spill] sm:$0xff]  ;;  %p11604_p12 = pnand %p11603_p11, %p11769_p5 }
 0x2e0   : > { %v5157_v29 = vsel %vm5137_vm15, %v5118_v42, %v14479_v19  ;;  %v2769_v61 = vsel %vm12171_vm14, %v9801_v1, %v13870_v31  ;;  %v5330_v8 = vsel %vm5170_vm0, %v5288_v45, %v5030_v47  ;;  %v16939_v13 = vshll.u32 %v14456_v16, 16  ;;  %v2183_v47 = vld [vmem:[#allocation2 + $0x164] sm:$0x1]  ;;  %v16949_v42 = vld [vmem:[#allocation10_spill] sm:$0xff] }
 0x2e1   : > { %v5199_v50 = vsel %vm5170_vm0, %v5157_v29, %v14519_v11  ;;  %v14585_v7 = vcombine.low %v2769_v61, %v2778_v49  ;;  %v9802_v53 = vrot.slane %v2780_v39, 11  ;;  %v2800_v31 = vsel %vm12171_vm14, %v2792_v10, %v14036_v23  ;;  %v16951_v29 = vld [vmem:[#allocation13_spill] sm:$0xff]  ;;  %v16952_v61 = vld [vmem:[#allocation12_spill] sm:$0xff]  ;;  %p11605_p13 = pneg %p11604_p12 }
 0x2e2   : > { %v4356_v19 = vrot.slane %v16939_v13, 5  ;;  %5039 = vrot.lane.b32.xlu0 %v9964_v5, %s11669_s29  ;;  %v2814_v59 = vrot.slane %v14192_v34, 4  ;;  %v2824_v62 = vshrl.u32 %v2488_v15, 16  ;;  %v5121_v11 = vsel %vm1746_vm12, %v9847_v51, %v14507_v43  ;;  %v10510_v43 = vpop.f32.mrb[128].mxu0  ;;  %v16941_v51 = vld [vmem:[#allocation17_spill] sm:$0xff]  ;;  %v16954_v13 = vld [vmem:[#allocation22_spill] sm:$0xff] }
 0x2e3   : > { %5651 = vmatmul.mubr.bf16.gmra.mrb[164].mxu0 %v5199_v50  ;;  %v2791_v46 = vsel %vm12171_vm14, %v9802_v53, %v14026_v24  ;;  %v9803_v9 = vrot.slane %v2802_v14, 11  ;;  %v2836_v52 = vrot.slane %v14336_v4, 4  ;;  %v9915_v60 = vcombine.low %v16940_v35, %v14344_v12  ;;  %v10511_v28 = vpop.f32.mrb[129].mxu0  ;;  %v4131_v5 = vld [vmem:[#allocation2 + $0x60] sm:$0x1]  ;;  %s11670_s29 = smov [#allocation7]  }
 0x2e4   : > { %5658 = vmatprep.mubr.bf16.mxu0 %v5330_v8  ;;  %v14600_v41 = vcombine.low %v2791_v46, %v2800_v31  ;;  %v2822_v23 = vsel %vm12171_vm14, %v2814_v59, %v14208_v6  ;;  %v9804_v34 = vrot.slane %v2824_v62, 11  ;;  %v5159_v38 = vsel %vm5137_vm15, %v5121_v11, %v4598_v17  ;;  %v14621_v30 = vpop.f32.mrb[0].mxu1  ;;  %v10513_v2 = vpop.f32.mrb[130].mxu0  ;;  %v16955_v31 = vld [vmem:[#allocation21_spill] sm:$0xff]  ;;  %v16957_v62 = vld [vmem:[#allocation24_spill] sm:$0xff]  ;;  %s11606_s0 = sshll.u32 %s11670_s29, 4  ;;  %s11607_s0 = int_to_ptr.vmem [resolvable:$false] %s11606_s0 }
 0x2e5   : > { %v2813_v24 = vsel %vm12171_vm14, %v9803_v9, %v16941_v51  ;;  %v2844_v4 = vsel %vm12171_vm14, %v2836_v52, %v16942_v25  ;;  %v2184_v3 = vsel %vm11866_vm5, 0, %v2183_v47  ;;  %v14623_v17 = vadd.f32 %v10511_v28, %v10510_v43  ;;  %v14630_v36 = vpop.f32.mrb[1].mxu1  ;;  %v10514_v53 = vpop.f32.mrb[131].mxu0  ;;  %v16958_v47 = vld [vmem:[#allocation23_spill] sm:$0xff]  ;;  %v16960_v28 = vld [vmem:[#allocation29_spill] sm:$0xff]  ;;  %p11609_p0 = scmp.lt.s32.totalorder %s16635_s12, %s11607_s0 }
 0x2e6   : > { %v14616_v6 = vcombine.low %v2813_v24, %v2822_v23  ;;  %v2835_v27 = vsel %vm12171_vm14, %v9804_v34, %v16943_v18  ;;  %2185 = vst [vmem:[#allocation2 + $0x164] sm:$0x1] %v2184_v3  ;;  %v16944_v26 = vshrl.u32 %v14456_v16, 16  ;;  %v5202_v33 = vsel %vm5170_vm0, %v5159_v38, %v4678_v44  ;;  %v14636_v1 = vpop.f32.mrb[2].mxu1  ;;  %v16947_v16 = vld [vmem:[#allocation53_spill] sm:$0xff]  ;;  %v16961_v3 = vld [vmem:[#allocation28_spill] sm:$0xff] }
 0x2e7   : > { %v14628_v40 = vcombine.low %v2835_v27, %v2844_v4  ;;  %v16945_v32 = vshll.u32 %v14472_v20, 16  ;;  %v16946_v0 = vshrl.u32 %v14472_v20, 16  ;;  %v9916_v45 = vcombine.low %v16947_v16, %v14431_v22  ;;  %v14646_v50 = vpop.f32.mrb[3].mxu1  ;;  %v4132_v34 = vld [vmem:[#allocation2 + $0x74] sm:$0x1]  ;;  %v16978_v22 = vld [vmem:[#allocation20_spill] sm:$0xff] }
 0x2e8   : > { %v4355_v54 = vrot.slane %v16944_v26, 4  ;;  %v16950_v39 = vor.u32 %v16948_v63, %v16949_v42  ;;  %v16953_v8 = vor.u32 %v16951_v29, %v16952_v61  ;;  %v4155_v14 = vshll.u32 %v4129_v56, 16  ;;  %v4133_v24 = vld [vmem:[#allocation2 + $0x88] sm:$0x1]  ;;  %v16963_v26 = vld [vmem:[#allocation30_spill] sm:$0xff] }
 0x2e9   : > { %v4359_v21 = vrot.slane %v16945_v32, 5  ;;  %v4361_v55 = vrot.slane %v16946_v0, 4  ;;  %v16956_v59 = vor.u32 %v16954_v13, %v16955_v31  ;;  %v16959_v11 = vor.u32 %v16957_v62, %v16958_v47  ;;  %v16973_v62 = vld [vmem:[#allocation42_spill] sm:$0xff] }
 0x2ea   : > { %v4357_v49 = vor.u32 %v4356_v19, %v4355_v54  ;;  %v4148_v15 = vrot.slane %v16950_v39, 4  ;;  %v4153_v10 = vrot.slane %v16953_v8, 4  ;;  %v14654_v9 = vadd.f32 %v10514_v53, %v10513_v2  ;;  %v16964_v54 = vld [vmem:[#allocation31_spill] sm:$0xff]  ;;  %v4134_v2 = vld [vmem:[#allocation2 + $0x9c] sm:$0x1]  ;;  %v16970_v39 = vld [vmem:[#allocation37_spill] sm:$0xff] }
 0x2eb   : > { %v4362_v20 = vor.u32 %v4361_v55, %v4359_v21  ;;  %v4176_v19 = vrot.slane %v16956_v59, 4  ;;  %v4181_v46 = vrot.slane %v16959_v11, 4  ;;  %5659 = vmatmul.mubr.bf16.gmra.mrb[168].mxu0 %v5202_v33  ;;  %v4183_v23 = vshll.u32 %v4131_v5, 16  ;;  %v16966_v5 = vld [vmem:[#allocation36_spill] sm:$0xff] }
 0x2ec   : > { %v4358_v52 = vrot.slane %v4357_v49, 4  ;;  %v4150_v44 = vsel %vm11887_vm8, %v4148_v15, %v16952_v61  ;;  %v4157_v38 = vrot.slane %v4155_v14, 5  ;;  %v16962_v18 = vor.u32 %v16960_v28, %v16961_v3  ;;  %v16967_v49 = vld [vmem:[#allocation35_spill] sm:$0xff] }
 0x2ed   : > { %v4363_v43 = vrot.slane %v4362_v20, 4  ;;  %v4178_v51 = vsel %vm11887_vm8, %v4176_v19, %v16958_v47  ;;  %v4185_v4 = vrot.slane %v4183_v23, 5  ;;  %v16965_v56 = vor.u32 %v16963_v26, %v16964_v54  ;;  %v4144_v32 = vld [vmem:[#allocation2 + $0x164] sm:$0x1]  ;;  %v16972_v19 = vld [vmem:[#allocation43_spill] sm:$0xff] }
 0x2ee   : > { %v4360_v25 = vsel %vm11887_vm8, %v4358_v52, %v4359_v21  ;;  %v4190_v27 = vrot.slane %v16962_v18, 4  ;;  %v4158_v0 = vsel %vm11887_vm8, %v4153_v10, %v4157_v38  ;;  %v4197_v55 = vshll.u32 %v4132_v34, 16  ;;  %v16969_v21 = vld [vmem:[#allocation38_spill] sm:$0xff]  ;;  %v16975_v52 = vld [vmem:[#allocation45_spill] sm:$0xff]  ;;  %v4600_v38 = vpop.permute.xlu1 %4599 }
 0x2ef   : > { %v4195_v33 = vrot.slane %v16965_v56, 4  ;;  %v16968_v63 = vor.u32 %v16966_v5, %v16967_v49  ;;  %v16971_v15 = vor.u32 %v16969_v21, %v16970_v39  ;;  %v4365_v61 = vshll.u32 %v4144_v32, 16 }
 0x2f0   : > { %v14678_v8 = vcombine.low %v4150_v44, %v4158_v0  ;;  %v4186_v53 = vsel %vm11887_vm8, %v4181_v46, %v4185_v4  ;;  %v4192_v20 = vsel %vm11887_vm8, %v4190_v27, %v16964_v54  ;;  %v4199_v14 = vrot.slane %v4197_v55, 5  ;;  %v16976_v44 = vld [vmem:[#allocation44_spill] sm:$0xff]  ;;  %v4840_v4 = vpop.permute.xlu0 %4839 }
 0x2f1   : > { %v4204_v42 = vrot.slane %v16968_v63, 4  ;;  %v4209_v29 = vrot.slane %v16971_v15, 4  ;;  %v14685_v10 = vcombine.low %v4178_v51, %v4186_v53  ;;  %v4211_v31 = vshll.u32 %v4133_v24, 16  ;;  %v11593_v0 = vld [vmem:[#allocation2 + $0xf8] sm:$0xf] }
 0x2f2   : > { %v4367_v59 = vrot.slane %v4365_v61, 5  ;;  %v16974_v47 = vor.u32 %v16972_v19, %v16973_v62  ;;  %v16977_v46 = vor.u32 %v16975_v52, %v16976_v44  ;;  %v4225_v34 = vshll.u32 %v4134_v2, 16  ;;  %v11594_v55 = vld [vmem:[#allocation2 + $0xfc] sm:$0xf]  ;;  %v11595_v62 = vld [vmem:[#allocation2 + $0x10c] sm:$0xf] }
 0x2f3   : > { %v4206_v13 = vsel %vm11887_vm8, %v4204_v42, %v16970_v39  ;;  %v4200_v51 = vsel %vm11887_vm8, %v4195_v33, %v4199_v14  ;;  %v4213_v28 = vrot.slane %v4211_v31, 5  ;;  %v9912_v5 = vcombine.low %v11593_v0, %v11594_v55 }
 0x2f4   : > { %v4218_v11 = vrot.slane %v16974_v47, 4  ;;  %v4223_v23 = vrot.slane %v16977_v46, 4  ;;  %v4368_v3 = vsel %vm11887_vm8, %v4363_v43, %v4367_v59  ;;  %v14700_v24 = vcombine.low %v4192_v20, %v4200_v51  ;;  %v4522_v43 = vpop.permute.xlu1 %4521  ;;  %v5032_v32 = vpop.permute.xlu0 %5031  ;;  %v11596_v47 = vld [vmem:[#allocation2 + $0x110] sm:$0xf] }
 0x2f5   : > { %v4227_v27 = vrot.slane %v4225_v34, 5  ;;  %v9980_v26 = vcombine.low %v4360_v25, %v4368_v3  ;;  %v4214_v54 = vsel %vm11887_vm8, %v4209_v29, %v4213_v28  ;;  %v5254_v25 = vsel %vm1746_vm12, %v9912_v5, %v4840_v4 }
 0x2f6   : > { %v4220_v18 = vsel %vm11887_vm8, %v4218_v11, %v16976_v44  ;;  %v14707_v56 = vcombine.low %v4206_v13, %v4214_v54  ;;  %v5124_v42 = vsel %vm1746_vm12, %v14559_v48, %v14576_v37  ;;  %v9913_v11 = vcombine.low %v11595_v62, %v11596_v47 }
 0x2f7   : > { %v4228_v33 = vsel %vm11887_vm8, %v4223_v23, %v4227_v27  ;;  %10905 = vmatmul.mubr.msk.bf16.gmra.mrb[16].mxu1 %vm1746_vm12, %v9980_v26  ;;  %v5161_v39 = vsel %vm5137_vm15, %v5124_v42, %v4600_v38  ;;  %v5127_v23 = vsel %vm1746_vm12, %v14585_v7, %v4522_v43  ;;  %vm6003_vm2 = vcmask 519171  }
 0x2f8   : > { %v14712_v2 = vcombine.low %v4220_v18, %v4228_v33  ;;  %v4680_v49 = vpop.permute.xlu1 %4679  ;;  %vm14874_vm3 = vmand %vm6003_vm2, %vm2163_vm10  ;;  %vm6010_vm5 = vcmask 516096  }
 0x2f9   : > { %v5205_v29 = vsel %vm5170_vm0, %v5161_v39, %v4680_v49  ;;  %vm14899_vm6 = vmand %vm6010_vm5, %vm2172_vm4  ;;  %vm9547_vm4 = vcmask 8192  }
 0x2fa   : > { %v4920_v63 = vpop.permute.xlu0 %4919 }
 0x2fb   : > { %v5290_v21 = vsel %vm5137_vm15, %v5254_v25, %v4920_v63  ;;  %v11597_v25 = vld [vmem:[#allocation2 + $0x120] sm:$0xf]  ;;  %v11598_v63 = vld [vmem:[#allocation2 + $0x124] sm:$0xf] }
 0x2fc   : > { %v5333_v15 = vsel %vm5170_vm0, %v5290_v21, %v5032_v32  ;;  %v4602_v59 = vpop.permute.xlu1 %4601  ;;  %v9914_v42 = vcombine.low %v11597_v25, %v11598_v63 }
 0x2fd   : > { %5666 = vmatprep.mubr.bf16.mxu0 %v5333_v15  ;;  %v5163_v38 = vsel %vm5137_vm15, %v5127_v23, %v4602_v59 }
 0x2fe   : > { %5667 = vmatmul.mubr.bf16.gmra.mrb[172].mxu0 %v5205_v29 }
 0x300   : > { %v4524_v37 = vpop.permute.xlu1 %4523 }
 0x301   : > { %v5130_v29 = vsel %vm1746_vm12, %v14600_v41, %v4524_v37 }
 0x302   : > { %v10516_v61 = vpop.f32.mrb[132].mxu0 }
 0x303   : > { %v10517_v53 = vpop.f32.mrb[133].mxu0  ;;  %v4842_v48 = vpop.permute.xlu0 %4841 }
 0x304   : > { %v14722_v20 = vadd.f32 %v10517_v53, %v10516_v61  ;;  %v10519_v14 = vpop.f32.mrb[134].mxu0  ;;  %v4682_v52 = vpop.permute.xlu1 %4681  ;;  %v5257_v44 = vsel %vm1746_vm12, %v9913_v11, %v4842_v48 }
 0x305   : > { %v10520_v13 = vpop.f32.mrb[135].mxu0  ;;  %v5208_v51 = vsel %vm5170_vm0, %v5163_v38, %v4682_v52 }
 0x306   : > { %v14724_v31 = vadd.f32 %v10520_v13, %v10519_v14 }
 0x307   : > { %v5034_v19 = vpop.permute.xlu0 %5033 }
 0x308   : > { %v4604_v0 = vpop.permute.xlu1 %4603 }
 0x309   : > { %v5165_v53 = vsel %vm5137_vm15, %v5130_v29, %v4604_v0 }
 0x30c   : > { %v4526_v5 = vpop.permute.xlu1 %4525 }
 0x30d   : > { %v5133_v38 = vsel %vm1746_vm12, %v14616_v6, %v4526_v5 }
 0x319   : > { %v4922_v46 = vpop.permute.xlu0 %4921 }
 0x31a   : > { %v5292_v34 = vsel %vm5137_vm15, %v5257_v44, %v4922_v46  ;;  %v4684_v21 = vpop.permute.xlu1 %4683 }
 0x31b   : > { %v5336_v4 = vsel %vm5170_vm0, %v5292_v34, %v5034_v19  ;;  %v5211_v13 = vsel %vm5170_vm0, %v5165_v53, %v4684_v21 }
 0x31c   : > { %5674 = vmatprep.mubr.bf16.mxu0 %v5336_v4 }
 0x31d   : > { %5675 = vmatmul.mubr.bf16.gmra.mrb[176].mxu0 %v5208_v51 }
 0x31f   : > { %v10522_v28 = vpop.f32.mrb[136].mxu0 }
 0x320   : > { %v10523_v3 = vpop.f32.mrb[137].mxu0  ;;  %v4844_v55 = vpop.permute.xlu0 %4843 }
 0x321   : > { %v14733_v18 = vadd.f32 %v10523_v3, %v10522_v28  ;;  %v10525_v27 = vpop.f32.mrb[138].mxu0  ;;  %v5260_v39 = vsel %vm1746_vm12, %v9914_v42, %v4844_v55  ;;  %v4606_v59 = vpop.permute.xlu1 %4605 }
 0x322   : > { %v10526_v7 = vpop.f32.mrb[139].mxu0  ;;  %v5167_v51 = vsel %vm5137_vm15, %v5133_v38, %v4606_v59 }
 0x323   : > { %v14741_v43 = vadd.f32 %v10526_v7, %v10525_v27 }
 0x324   : > { %v14735_v26 = vpop.f32.mrb[4].mxu1  ;;  %v5036_v49 = vpop.permute.xlu0 %5035 }
 0x325   : > { %v14737_v54 = vpop.f32.mrb[5].mxu1  ;;  %v4528_v47 = vpop.permute.xlu1 %4527 }
 0x326   : > { %v14739_v33 = vpop.f32.mrb[6].mxu1 }
 0x327   : > { %v14743_v32 = vpop.f32.mrb[7].mxu1 }
 0x333   : > { %v4924_v15 = vpop.permute.xlu0 %4923 }
 0x334   : > { %v5294_v61 = vsel %vm5137_vm15, %v5260_v39, %v4924_v15  ;;  %v4686_v46 = vpop.permute.xlu1 %4685 }
 0x335   : > { %v5339_v14 = vsel %vm5170_vm0, %v5294_v61, %v5036_v49  ;;  %v5214_v3 = vsel %vm5170_vm0, %v5167_v51, %v4686_v46 }
 0x336   : > { %5682 = vmatprep.mubr.bf16.mxu0 %v5339_v14 }
 0x337   : > { %5683 = vmatmul.mubr.bf16.gmra.mrb[180].mxu0 %v5211_v13 }
 0x338   : > { %v4846_v48 = vpop.permute.xlu0 %4845 }
 0x339   : > { %v5263_v23 = vsel %vm1746_vm12, %v9915_v60, %v4846_v48  ;;  %v4608_v7 = vpop.permute.xlu1 %4607  ;;  %v5136_v60 = vsel %vm1746_vm12, %v14628_v40, %v4528_v47 }
 0x33a   : > { %v5169_v5 = vsel %vm5137_vm15, %v5136_v60, %v4608_v7 }
 0x33c   : > { %v5038_v44 = vpop.permute.xlu0 %5037 }
 0x33e   : > { %v10528_v19 = vpop.f32.mrb[140].mxu0 }
 0x33f   : > { %v10529_v62 = vpop.f32.mrb[141].mxu0 }
 0x340   : > { %v14752_v11 = vadd.f32 %v10529_v62, %v10528_v19  ;;  %v10531_v52 = vpop.f32.mrb[142].mxu0 }
 0x341   : > { %v10532_v41 = vpop.f32.mrb[143].mxu0 }
 0x342   : > { %v14754_v37 = vadd.f32 %v10532_v41, %v10531_v52 }
 0x348   : > { %v4926_v34 = vpop.permute.xlu0 %4925 }
 0x349   : > { %v5296_v4 = vsel %vm5137_vm15, %v5263_v23, %v4926_v34  ;;  %v4688_v35 = vpop.permute.xlu1 %4687 }
 0x34a   : > { %v5342_v28 = vsel %vm5170_vm0, %v5296_v4, %v5038_v44  ;;  %v5217_v25 = vsel %vm5170_vm0, %v5169_v5, %v4688_v35 }
 0x34b   : > { %5690 = vmatprep.mubr.bf16.mxu0 %v5342_v28 }
 0x34c   : > { %5691 = vmatmul.mubr.bf16.gmra.mrb[184].mxu0 %v5214_v3  ;;  %v4928_v27 = vpop.permute.xlu0 %4927 }
 0x350   : > { %v4848_v0 = vpop.permute.xlu0 %4847 }
 0x351   : > { %v5266_v12 = vsel %vm1746_vm12, %v9916_v45, %v4848_v0 }
 0x352   : > { %v5298_v55 = vsel %vm5137_vm15, %v5266_v12, %v4928_v27 }
 0x354   : > { %v5040_v6 = vpop.permute.xlu0 %5039 }
 0x355   : > { %v5345_v49 = vsel %vm5170_vm0, %v5298_v55, %v5040_v6 }
 0x356   : > { %5698 = vmatprep.mubr.bf16.mxu0 %v5345_v49 }
 0x357   : > { %5699 = vmatmul.mubr.bf16.gmra.mrb[188].mxu0 %v5217_v25 }
 0x358   : > { %10876 = vmatprep.mubr.msk.bf16.mxu0 %vm1746_vm12, %v14678_v8 }
 0x35f   : > { %10877 = vmatmul.mubr.msk.bf16.vlgmr.msra.gmra.mrb[192].mxu0 %vm1746_vm12, %v16978_v22  ;;  %v10534_v16 = vpop.f32.mrb[144].mxu0 }
 0x360   : > { %10880 = vmatprep.mubr.msk.bf16.mxu0 %vm1746_vm12, %v14685_v10  ;;  %v10535_v40 = vpop.f32.mrb[145].mxu0 }
 0x361   : > { %v14782_v45 = vadd.f32 %v10535_v40, %v10534_v16  ;;  %v10537_v63 = vpop.f32.mrb[146].mxu0 }
 0x362   : > { %v14784_v42 = vpop.f32.mrb[8].mxu1  ;;  %v10538_v21 = vpop.f32.mrb[147].mxu0 }
 0x363   : > { %v14786_v39 = vpop.f32.mrb[9].mxu1  ;;  %v14788_v15 = vadd.f32 %v10538_v21, %v10537_v63 }
 0x364   : > { %v14790_v29 = vpop.f32.mrb[10].mxu1 }
 0x365   : > { %v14792_v8 = vpop.f32.mrb[11].mxu1 }
 0x367   : > { %10881 = vmatmul.mubr.msk.bf16.gmra.mrb[196].mxu0 %vm1746_vm12, %v14700_v24  ;;  %v14807_v24 = vld [vmem:[%s16679_s4] ss:$0 sm:$0xff] }
 0x368   : > { %10884 = vmatprep.mubr.msk.bf16.mxu0 %vm1746_vm12, %v14707_v56 }
 0x36f   : > { %10885 = vmatmul.mubr.msk.bf16.gmra.mrb[200].mxu0 %vm1746_vm12, %v14712_v2 }
 0x37c   : > { %v10540_v10 = vpop.f32.mrb[148].mxu0 }
 0x37d   : > { %v10541_v61 = vpop.f32.mrb[149].mxu0 }
 0x37e   : > { %v14800_v53 = vadd.f32 %v10541_v61, %v10540_v10  ;;  %v10543_v14 = vpop.f32.mrb[150].mxu0 }
 0x37f   : > { %v10544_v13 = vpop.f32.mrb[151].mxu0 }
 0x380   : > { %v14802_v59 = vadd.f32 %v10544_v13, %v10543_v14 }
 0x390   : > { %v10546_v48 = vpop.f32.mrb[152].mxu0 }
 0x391   : > { %v10547_v19 = vpop.f32.mrb[153].mxu0 }
 0x392   : > { %v10548_v62 = vadd.f32 %v10547_v19, %v10546_v48  ;;  %v10549_v47 = vpop.f32.mrb[154].mxu0 }
 0x393   : > { %v10550_v56 = vpop.f32.mrb[155].mxu0 }
 0x394   : > { %v5629_v2 = vadd.f32 %v10548_v62, %v14807_v24  ;;  %v10551_v52 = vadd.f32 %v10550_v56, %v10549_v47 }
 0x396   : > { %v5790_v44 = vadd.f32 %v14630_v36, %v5629_v2  ;;  %v5632_v41 = vadd.f32 %v10551_v52, %v14807_v24 }
 0x398   : > { %v14812_v46 = vpop.f32.mrb[12].mxu1  ;;  %v5793_v34 = vadd.f32 %v14646_v50, %v5632_v41  ;;  %v5880_v12 = vmax.f32 %v5790_v44, 0.0 }
 0x399   : > { %v14814_v23 = vpop.f32.mrb[13].mxu1 }
 0x39a   : > { %v14817_v38 = vpop.f32.mrb[14].mxu1  ;;  %v5881_v6 = vmax.f32 %v5793_v34, 0.0  ;;  %v5918_v5 = vsel %vm5137_vm15, %v5880_v12, -inf }
 0x39b   : > { %v14819_v4 = vpop.f32.mrb[15].mxu1 }
 0x39c   : > { %v5921_v63 = vsel %vm5137_vm15, %v5881_v6, -inf }
 0x3a3   : > { %v10552_v51 = vpop.f32.mrb[156].mxu0 }
 0x3a4   : > { %v10553_v28 = vpop.f32.mrb[157].mxu0 }
 0x3a5   : > { %v10554_v3 = vadd.f32 %v10553_v28, %v10552_v51  ;;  %v10555_v27 = vpop.f32.mrb[158].mxu0 }
 0x3a6   : > { %v10556_v7 = vpop.f32.mrb[159].mxu0 }
 0x3a7   : > { %v5637_v0 = vadd.f32 %v10554_v3, %v14807_v24  ;;  %v10557_v36 = vadd.f32 %v10556_v7, %v10555_v27 }
 0x3a9   : > { %v5798_v35 = vadd.f32 %v14621_v30, %v5637_v0  ;;  %v5640_v60 = vadd.f32 %v10557_v36, %v14807_v24 }
 0x3ab   : > { %v5882_v55 = vmax.f32 %v5798_v35, 0.0  ;;  %v5801_v50 = vadd.f32 %v14636_v1, %v5640_v60 }
 0x3ad   : > { %v5919_v49 = vsel %vm5137_vm15, %v5882_v55, -inf  ;;  %v5883_v25 = vmax.f32 %v5801_v50, 0.0 }
 0x3ae   : > { %v10558_v22 = vpop.f32.mrb[160].mxu0  ;;  %v5920_v16 = vmax.f32 %v5918_v5, %v5919_v49 }
 0x3af   : > { %v10559_v40 = vpop.f32.mrb[161].mxu0  ;;  %v5922_v21 = vsel %vm5137_vm15, %v5883_v25, -inf }
 0x3b0   : > { %v10560_v10 = vadd.f32 %v10559_v40, %v10558_v22  ;;  %v10561_v30 = vpop.f32.mrb[162].mxu0  ;;  %5954 = vst.msk [vmem:[#allocation5 + $0x30] sm:$0xff] %vm5137_vm15, %v5920_v16  ;;  %v5923_v61 = vmax.f32 %v5921_v63, %v5922_v21  ;;  %v16979_v21 = vmov 0  }
 0x3b1   : > { %v10562_v14 = vpop.f32.mrb[163].mxu0  ;;  %6009 = vst.msk [vmem:[#allocation3 + $0x8] sm:$0xf] %vm6008_vm1, %v16979_v21  ;;  %6019 = vst.msk [vmem:[#allocation3 + $0x98] sm:$0xf] %vm6008_vm1, %v16979_v21 }
 0x3b2   : > { %v5645_v1 = vadd.f32 %v10560_v10, %v14807_v24  ;;  %v10563_v13 = vadd.f32 %v10562_v14, %v10561_v30  ;;  %5955 = vst.msk [vmem:[#allocation5 + $0x38] sm:$0xff] %vm5137_vm15, %v5923_v61 }
 0x3b4   : > { %v5806_v48 = vadd.f32 %v14737_v54, %v5645_v1  ;;  %v5648_v19 = vadd.f32 %v10563_v13, %v14807_v24 }
 0x3b6   : > { %v5809_v62 = vadd.f32 %v14743_v32, %v5648_v19  ;;  %v10564_v47 = vpop.f32.mrb[164].mxu0  ;;  %v5884_v27 = vmax.f32 %v5806_v48, 0.0 }
 0x3b7   : > { %v10565_v56 = vpop.f32.mrb[165].mxu0 }
 0x3b8   : > { %v10566_v2 = vadd.f32 %v10565_v56, %v10564_v47  ;;  %v10567_v52 = vpop.f32.mrb[166].mxu0  ;;  %v5885_v0 = vmax.f32 %v5809_v62, 0.0  ;;  %v5924_v6 = vsel %vm5137_vm15, %v5884_v27, -inf  ;;  %v11121_v27 = vld [vmem:[%s16680_s5 + $0x100] sm:$0xff]  }
 0x3b9   : > { %v10568_v44 = vpop.f32.mrb[167].mxu0  ;;  %v5970_v41 = vld [vmem:[#allocation5 + $0x30] ss:$2 sm:$0xff]  ;;  %v5986_v34 = vld [vmem:[#allocation5 + $0x31] ss:$2 sm:$0xff]  ;;  %10908 = vmatprep.subr.bf16.mxu0 %v11121_v27 }
 0x3ba   : > { %v5653_v51 = vadd.f32 %v10566_v2, %v14807_v24  ;;  %v10569_v28 = vadd.f32 %v10568_v44, %v10567_v52  ;;  %v5998_v3 = vmax.f32 %v5970_v41, %v5986_v34  ;;  %v5927_v25 = vsel %vm5137_vm15, %v5885_v0, -inf  ;;  %10909 = vmatpush3.bf16.msra.mxu0 %v11121_v27 }
 0x3bc   : > { %v5814_v7 = vadd.f32 %v14735_v26, %v5653_v51  ;;  %v5656_v54 = vadd.f32 %v10569_v28, %v14807_v24  ;;  %v6075_v35 = vpack.c.bf16 %v5998_v3, %v5998_v3 }
 0x3be   : > { %v5886_v36 = vmax.f32 %v5814_v7, 0.0  ;;  %v5817_v32 = vadd.f32 %v14739_v33, %v5656_v54  ;;  %v10570_v12 = vpop.f32.mrb[168].mxu0  ;;  %6083 = vst.msk [vmem:[#allocation3 + $0x48] sm:$0xf] %vm6008_vm1, %v6075_v35  ;;  %v11122_v7 = vld [vmem:[%s16680_s5 + $0x108] sm:$0xff]  }
 0x3bf   : > { %v10571_v60 = vpop.f32.mrb[169].mxu0  ;;  %v6027_v35 = vld [vmem:[#allocation3 + $0x24] sm:$0x8]  ;;  %10910 = vmatprep.subr.bf16.mxu0 %v11122_v7 }
 0x3c0   : > { %v5925_v55 = vsel %vm5137_vm15, %v5886_v36, -inf  ;;  %v5887_v50 = vmax.f32 %v5817_v32, 0.0  ;;  %v10572_v5 = vadd.f32 %v10571_v60, %v10570_v12  ;;  %v10573_v49 = vpop.f32.mrb[170].mxu0  ;;  %v16980_v32 = vmov 0  ;;  %10911 = vmatpush3.bf16.msra.mxu0 %v11122_v7 }
 0x3c1   : > { %v5926_v22 = vmax.f32 %v5924_v6, %v5925_v55  ;;  %v10574_v26 = vpop.f32.mrb[171].mxu0  ;;  %v16981_v32 = vsel %vm14874_vm3, 4294967295, %v16980_v32 }
 0x3c2   : > { %v5928_v16 = vsel %vm5137_vm15, %v5887_v50, -inf  ;;  %v5661_v40 = vadd.f32 %v10572_v5, %v14807_v24  ;;  %v10575_v63 = vadd.f32 %v10574_v26, %v10573_v49  ;;  %16982 = vst [vmem:[#allocation54_spill] sm:$0xff] %v16981_v32  ;;  %v11126_v26 = vld [vmem:[%s16680_s5 + $0x118] sm:$0xff]  }
 0x3c3   : > { %5956 = vst.msk [vmem:[#allocation5 + $0x40] sm:$0xff] %vm5137_vm15, %v5926_v22  ;;  %v5929_v33 = vmax.f32 %v5927_v25, %v5928_v16  ;;  %v11124_v22 = vld [vmem:[%s16680_s5 + $0x110] sm:$0xff]   ;;  %v6030_v16 = vld [vmem:[#allocation3 + $0x34] sm:$0x8] }
 0x3c4   : > { %v5822_v10 = vadd.f32 %v14786_v39, %v5661_v40  ;;  %v5664_v30 = vadd.f32 %v10575_v63, %v14807_v24  ;;  %10912 = vmatprep.subr.bf16.mxu0 %v11124_v22 }
 0x3c5   : > { %5957 = vst.msk [vmem:[#allocation5 + $0x48] sm:$0xff] %vm5137_vm15, %v5929_v33  ;;  %10913 = vmatpush3.bf16.msra.mxu0 %v11124_v22  ;;  %v6031_v33 = vsel %vm14874_vm3, 0, %v6030_v16  ;;  %v6069_v16 = vld [vmem:[#allocation3 + $0x8c] sm:$0x1] }
 0x3c6   : > { %v5825_v61 = vadd.f32 %v14792_v8, %v5664_v30  ;;  %v5888_v51 = vmax.f32 %v5822_v10, 0.0  ;;  %10914 = vmatprep.subr.bf16.mxu0 %v11126_v26  ;;  %6032 = vst [vmem:[#allocation3 + $0x34] sm:$0x8] %v6031_v33  ;;  %v6033_v10 = vld [vmem:[#allocation3 + $0x44] sm:$0x8]  ;;  %v11132_v33 = vld [vmem:[%s16680_s5 + $0x40] sm:$0xff]  }
 0x3c7   : > { %v6034_v30 = vsel %vm14874_vm3, 0, %v6033_v10  ;;  %10624 = vmatprep.subr.bf16.mxu1 %v11132_v33  ;;  %v11134_v10 = vld [vmem:[%s16680_s5 + $0x48] sm:$0xff]   ;;  %v14996_v33 = vadd.f32 %v14654_v9, %v14807_v24 }
 0x3c8   : > { %v5889_v54 = vmax.f32 %v5825_v61, 0.0  ;;  %v5930_v60 = vsel %vm5137_vm15, %v5888_v51, -inf  ;;  %6035 = vst [vmem:[#allocation3 + $0x44] sm:$0x8] %v6034_v30  ;;  %v11135_v30 = vld [vmem:[%s16680_s5 + $0x8] sm:$0xff]  }
 0x3c9   : > { %10915 = vmatpush3.bf16.msra.mxu0 %v11126_v26  ;;  %v6045_v26 = vld [vmem:[#allocation3 + $0x84] sm:$0x8] }
 0x3ca   : > { %v14854_v14 = vpop.f32.mrb[16].mxu1  ;;  %v5933_v5 = vsel %vm5137_vm15, %v5889_v54, -inf }
 0x3cb   : > { %v14856_v1 = vpop.f32.mrb[17].mxu1 }
 0x3cc   : > { %v14858_v13 = vpop.f32.mrb[18].mxu1  ;;  %v5972_v48 = vld [vmem:[#allocation5 + $0x40] ss:$2 sm:$0xff]  ;;  %v5988_v19 = vld [vmem:[#allocation5 + $0x41] ss:$2 sm:$0xff] }
 0x3cd   : > { %v14860_v62 = vpop.f32.mrb[19].mxu1  ;;  %v5999_v47 = vmax.f32 %v5972_v48, %v5988_v19  ;;  %v6051_v48 = vld [vmem:[#allocation3 + $0x2c] sm:$0x1]  ;;  %v6054_v19 = vld [vmem:[#allocation3 + $0x3c] sm:$0x1] }
 0x3cf   : > { %v6076_v56 = vpack.c.bf16 %v5999_v47, %v5999_v47 }
 0x3d1   : > { %6084 = vst.msk [vmem:[#allocation3 + $0x58] sm:$0xf] %vm6008_vm1, %v6076_v56  ;;  %v10576_v39 = vpop.f32.mrb[172].mxu0  ;;  %v6052_v56 = vsel %vm14899_vm6, 0, %v6051_v48  ;;  %v11136_v48 = vld [vmem:[%s16680_s5 + $0x50] sm:$0xff]  }
 0x3d2   : > { %v10577_v2 = vpop.f32.mrb[173].mxu0  ;;  %6053 = vst [vmem:[#allocation3 + $0x2c] sm:$0x1] %v6052_v56 }
 0x3d3   : > { %v10578_v52 = vadd.f32 %v10577_v2, %v10576_v39  ;;  %v10579_v44 = vpop.f32.mrb[174].mxu0  ;;  %v6055_v39 = vsel %vm14899_vm6, 0, %v6054_v19  ;;  %v6057_v2 = vld [vmem:[#allocation3 + $0x4c] sm:$0x1] }
 0x3d4   : > { %v10580_v41 = vpop.f32.mrb[175].mxu0  ;;  %6056 = vst [vmem:[#allocation3 + $0x3c] sm:$0x1] %v6055_v39 }
 0x3d5   : > { %v5669_v8 = vadd.f32 %v10578_v52, %v14807_v24  ;;  %v10581_v34 = vadd.f32 %v10580_v41, %v10579_v44  ;;  %v6060_v52 = vld [vmem:[#allocation3 + $0x5c] sm:$0x1]  ;;  %v6058_v44 = vsel %vm14899_vm6, 0, %v6057_v2 }
 0x3d6   : > { %v6061_v41 = vsel %vm14899_vm6, 0, %v6060_v52  ;;  %6059 = vst [vmem:[#allocation3 + $0x4c] sm:$0x1] %v6058_v44  ;;  %v11137_v52 = vld [vmem:[%s16680_s5 + $0x10] sm:$0xff]  }
 0x3d7   : > { %v5830_v28 = vadd.f32 %v14784_v42, %v5669_v8  ;;  %v5672_v3 = vadd.f32 %v10581_v34, %v14807_v24  ;;  %v6024_v42 = vld [vmem:[#allocation3 + $0x14] sm:$0x8]  ;;  %6062 = vst [vmem:[#allocation3 + $0x5c] sm:$0x1] %v6061_v41  ;;  %v6063_v8 = vld [vmem:[#allocation3 + $0x6c] sm:$0x1] }
 0x3d8   : > { %v6025_v12 = vsel %vm14874_vm3, 0, %v6024_v42  ;;  %v6064_v51 = vsel %vm14899_vm6, 0, %v6063_v8  ;;  %v11138_v8 = vld [vmem:[%s16680_s5 + $0x58] sm:$0xff]  }
 0x3d9   : > { %v5890_v0 = vmax.f32 %v5830_v28, 0.0  ;;  %v5833_v36 = vadd.f32 %v14790_v29, %v5672_v3  ;;  %6026 = vst [vmem:[#allocation3 + $0x14] sm:$0x8] %v6025_v12  ;;  %v6028_v29 = vsel %vm14874_vm3, 0, %v6027_v35  ;;  %v6066_v28 = vld [vmem:[#allocation3 + $0x7c] sm:$0x1] }
 0x3da   : > { %6029 = vst [vmem:[#allocation3 + $0x24] sm:$0x8] %v6028_v29  ;;  %6065 = vst [vmem:[#allocation3 + $0x6c] sm:$0x1] %v6064_v51  ;;  %v6067_v54 = vsel %vm14899_vm6, 0, %v6066_v28 }
 0x3db   : > { %v5931_v6 = vsel %vm5137_vm15, %v5890_v0, -inf  ;;  %v5891_v55 = vmax.f32 %v5833_v36, 0.0  ;;  %6068 = vst [vmem:[#allocation3 + $0x7c] sm:$0x1] %v6067_v54  ;;  %v6036_v36 = vld [vmem:[#allocation3 + $0x54] sm:$0x8] }
 0x3dc   : > { %v5932_v50 = vmax.f32 %v5930_v60, %v5931_v6  ;;  %v6037_v35 = vsel %vm14874_vm3, 0, %v6036_v36 }
 0x3dd   : > { %v5934_v49 = vsel %vm5137_vm15, %v5891_v55, -inf  ;;  %6038 = vst [vmem:[#allocation3 + $0x54] sm:$0x8] %v6037_v35 }
 0x3de   : > { %5958 = vst.msk [vmem:[#allocation5 + $0x50] sm:$0xff] %vm5137_vm15, %v5932_v50  ;;  %v5935_v25 = vmax.f32 %v5933_v5, %v5934_v49  ;;  %v6039_v50 = vld [vmem:[#allocation3 + $0x64] sm:$0x8]  ;;  %v6048_v5 = vld [vmem:[#allocation3 + $0x1c] sm:$0x1] }
 0x3df   : > { %v6040_v29 = vsel %vm14874_vm3, 0, %v6039_v50  ;;  %v6049_v49 = vsel %vm14899_vm6, 0, %v6048_v5  ;;  %v14975_v5 = vld [vmem:[#allocation3 + $0x48] sm:$0xf] }
 0x3e0   : > { %5959 = vst.msk [vmem:[#allocation5 + $0x58] sm:$0xff] %vm5137_vm15, %v5935_v25  ;;  %6041 = vst [vmem:[#allocation3 + $0x64] sm:$0x8] %v6040_v29  ;;  %v6042_v25 = vld [vmem:[#allocation3 + $0x74] sm:$0x8] }
 0x3e1   : > { %6050 = vst [vmem:[#allocation3 + $0x1c] sm:$0x1] %v6049_v49  ;;  %v6043_v22 = vsel %vm14874_vm3, 0, %v6042_v25  ;;  %v6288_v50 = vld [vmem:[#allocation3 + $0x14] sm:$0x8] }
 0x3e2   : > { %6044 = vst [vmem:[#allocation3 + $0x74] sm:$0x8] %v6043_v22  ;;  %v14977_v49 = vld [vmem:[#allocation3 + $0x58] sm:$0xf]  ;;  %v6305_v25 = vshrl.u32 %v6288_v50, 16 }
 0x3e3   : > { %16985 = vst [vmem:[#allocation55_spill] sm:$0xff] %v14977_v49  ;;  %v14980_v22 = vld [vmem:[#allocation3 + $0x58] sm:$0xf] }
 0x3e7   : > { %v5974_v40 = vld [vmem:[#allocation5 + $0x50] ss:$2 sm:$0xff]  ;;  %v5990_v63 = vld [vmem:[#allocation5 + $0x51] ss:$2 sm:$0xff] }
 0x3e8   : > { %v6000_v21 = vmax.f32 %v5974_v40, %v5990_v63  ;;  %v6070_v63 = vsel %vm14899_vm6, 0, %v6069_v16  ;;  %v16752_v16 = vshrl.u32 %v14977_v49, 16 }
 0x3e9   : > { %6071 = vst [vmem:[#allocation3 + $0x8c] sm:$0x1] %v6070_v63  ;;  %v14992_v63 = vadd.f32 %v14623_v17, %v14807_v24  ;;  %v15008_v17 = vrot.slane %v6305_v25, 11  ;;  %v6611_v25 = vld [vmem:[#allocation3 + $0x4c] sm:$0x1] }
 0x3ea   : > { %v6077_v61 = vpack.c.bf16 %v6000_v21, %v6000_v21  ;;  %v11133_v21 = vld [vmem:[%s16680_s5] sm:$0xff]  }
 0x3eb   : > { %10625 = vmatpush3.bf16.msra.mxu1 %v11133_v21  ;;  %v14998_v21 = vld [vmem:[#allocation3 + $0x48] sm:$0xf] }
 0x3ec   : > { %6085 = vst.msk [vmem:[#allocation3 + $0x68] sm:$0xf] %vm6008_vm1, %v6077_v61  ;;  %10626 = vmatprep.subr.bf16.mxu1 %v11134_v10  ;;  %v16750_v10 = vshll.u32 %v14977_v49, 16 }
 0x3ef   : > { %10627 = vmatpush3.bf16.msra.mxu1 %v11135_v30  ;;  %v15003_v30 = vadd.f32 %v14724_v31, %v14807_v24 }
 0x3f0   : > { %v10582_v34 = vpop.f32.mrb[176].mxu0  ;;  %10628 = vmatprep.subr.bf16.mxu1 %v11136_v48  ;;  %v16753_v48 = vshll.u32 %v14980_v22, 16 }
 0x3f1   : > { %v10583_v3 = vpop.f32.mrb[177].mxu0 }
 0x3f2   : > { %v10584_v27 = vadd.f32 %v10583_v3, %v10582_v34  ;;  %v10585_v7 = vpop.f32.mrb[178].mxu0  ;;  %v6005_v34 = vld [vmem:[#allocation3 + $0x4] sm:$0x8] }
 0x3f3   : > { %v10586_v0 = vpop.f32.mrb[179].mxu0  ;;  %10629 = vmatpush3.bf16.msra.mxu1 %v11137_v52  ;;  %v6292_v52 = vld [vmem:[#allocation3 + $0x34] sm:$0x8] }
 0x3f4   : > { %v5677_v42 = vadd.f32 %v10584_v27, %v14807_v24  ;;  %v10587_v12 = vadd.f32 %v10586_v0, %v10585_v7  ;;  %v11139_v27 = vld [vmem:[%s16680_s5 + $0x18] sm:$0xff]   ;;  %v6006_v7 = vsel %vm14874_vm3, 0, %v6005_v34  ;;  %10630 = vmatprep.subr.bf16.mxu1 %v11138_v8  ;;  %v15025_v34 = vadd.f32 %v14733_v18, %v14807_v24 }
 0x3f5   : > { %6007 = vst [vmem:[#allocation3 + $0x4] sm:$0x8] %v6006_v7  ;;  %v15039_v18 = vadd.f32 %v14800_v53, %v14807_v24  ;;  %v15054_v53 = vld [vmem:[#allocation3 + $0x68] sm:$0xf] }
 0x3f6   : > { %v5838_v60 = vadd.f32 %v14814_v23, %v5677_v42  ;;  %v5680_v6 = vadd.f32 %v10587_v12, %v14807_v24  ;;  %v6046_v23 = vsel %vm14874_vm3, 0, %v6045_v26  ;;  %v11140_v42 = vld [vmem:[%s16680_s5 + $0x60] sm:$0xff]   ;;  %v6290_v26 = vld [vmem:[#allocation3 + $0x24] sm:$0x8]  ;;  %16987 = vst [vmem:[#allocation27_spill] sm:$0xff] %v15054_v53 }
 0x3f7   : > { %6047 = vst [vmem:[#allocation3 + $0x84] sm:$0x8] %v6046_v23  ;;  %10631 = vmatpush3.bf16.msra.mxu1 %v11139_v27  ;;  %v16758_v23 = vshrl.u32 %v14975_v5, 16  ;;  %v6645_v27 = vrot.slane %v16750_v10, 5  ;;  %v6613_v10 = vld [vmem:[#allocation3 + $0x6c] sm:$0x1] }
 0x3f8   : > { %v5841_v55 = vadd.f32 %v14819_v4, %v5680_v6  ;;  %v6020_v4 = vld [vmem:[#allocation3 + $0x9c] sm:$0x1]  ;;  %v5892_v51 = vmax.f32 %v5838_v60, 0.0  ;;  %10632 = vmatprep.subr.bf16.mxu1 %v11140_v42 }
 0x3f9   : > { %v6021_v40 = vsel %vm14899_vm6, 0, %v6020_v4  ;;  %v11141_v6 = vld [vmem:[%s16680_s5 + $0x20] sm:$0xff]   ;;  %v14983_v4 = vld [vmem:[#allocation3 + $0x48] sm:$0xf]  ;;  %v15018_v31 = vrot.slane %v16758_v23, 4 }
 0x3fa   : > { %6022 = vst [vmem:[#allocation3 + $0x9c] sm:$0x1] %v6021_v40  ;;  %v5893_v54 = vmax.f32 %v5841_v55, 0.0  ;;  %16986 = vst [vmem:[#allocation25_spill] sm:$0xff] %v14983_v4  ;;  %v14988_v40 = vadd.f32 %v14722_v20, %v14807_v24  ;;  %v16757_v20 = vshrl.u32 %v14980_v22, 16  ;;  %v16751_v9 = vshrl.u32 %v14983_v4, 16 }
 0x3fb   : > { %10633 = vmatpush3.bf16.msra.mxu1 %v11141_v6 }
 0x3fc   : > { %v5939_v55 = vsel %vm5137_vm15, %v5893_v54, -inf }
 0x40a   : > { %v10588_v61 = vpop.f32.mrb[180].mxu0 }
 0x40b   : > { %v10589_v19 = vpop.f32.mrb[181].mxu0 }
 0x40c   : > { %v10590_v56 = vadd.f32 %v10589_v19, %v10588_v61  ;;  %v10591_v39 = vpop.f32.mrb[182].mxu0  ;;  %v16756_v61 = vshll.u32 %v14975_v5, 16  ;;  %v6318_v19 = vshrl.u32 %v6290_v26, 16 }
 0x40d   : > { %v10592_v2 = vpop.f32.mrb[183].mxu0 }
 0x40e   : > { %v5685_v44 = vadd.f32 %v10590_v56, %v14807_v24  ;;  %v10593_v41 = vadd.f32 %v10592_v2, %v10591_v39  ;;  %v16749_v56 = vshll.u32 %v14983_v4, 16  ;;  %v15014_v2 = vadd.f32 %v14752_v11, %v14807_v24 }
 0x40f   : > { %v15033_v11 = vadd.f32 %v14741_v43, %v14807_v24  ;;  %v15047_v43 = vrot.slane %v16756_v61, 5 }
 0x410   : > { %v5846_v28 = vadd.f32 %v14812_v46, %v5685_v44  ;;  %v5688_v3 = vadd.f32 %v10593_v41, %v14807_v24  ;;  %v5936_v46 = vsel %vm5137_vm15, %v5892_v51, -inf  ;;  %v6349_v44 = vshrl.u32 %v14998_v21, 16 }
 0x411   : > { %v6644_v41 = vrot.slane %v16752_v16, 4  ;;  %v15029_v51 = vadd.f32 %v14754_v37, %v14807_v24  ;;  %v15043_v37 = vadd.f32 %v14782_v45, %v14807_v24 }
 0x412   : > { %v5894_v0 = vmax.f32 %v5846_v28, 0.0  ;;  %v5849_v36 = vadd.f32 %v14817_v38, %v5688_v3  ;;  %v6294_v28 = vld [vmem:[#allocation3 + $0x44] sm:$0x8]  ;;  %v6612_v3 = vld [vmem:[#allocation3 + $0x5c] sm:$0x1] }
 0x413   : > { %v6646_v26 = vor.u32 %v6645_v27, %v6644_v41 }
 0x414   : > { %v5937_v12 = vsel %vm5137_vm15, %v5894_v0, -inf  ;;  %v5895_v35 = vmax.f32 %v5849_v36, 0.0 }
 0x415   : > { %v5938_v60 = vmax.f32 %v5936_v46, %v5937_v12  ;;  %v6352_v12 = vshll.u32 %v14998_v21, 16 }
 0x416   : > { %v5940_v38 = vsel %vm5137_vm15, %v5895_v35, -inf  ;;  %v6635_v35 = vrot.slane %v16751_v9, 4  ;;  %v15093_v9 = vld [vmem:[#allocation3 + $0x58] sm:$0xf] }
 0x417   : > { %5960 = vst.msk [vmem:[#allocation5 + $0x60] sm:$0xff] %vm5137_vm15, %v5938_v60  ;;  %v5941_v29 = vmax.f32 %v5939_v55, %v5940_v38  ;;  %v6636_v60 = vrot.slane %v16749_v56, 5  ;;  %v6331_v55 = vshrl.u32 %v6292_v52, 16  ;;  %v6351_v38 = vrot.slane %v6349_v44, 7 }
 0x418   : > { %v15066_v52 = vrot.slane %v6318_v19, 11 }
 0x419   : > { %5961 = vst.msk [vmem:[#allocation5 + $0x68] sm:$0xff] %vm5137_vm15, %v5941_v29  ;;  %v6344_v29 = vshrl.u32 %v6294_v28, 16  ;;  %v15070_v28 = vrot.slane %v16757_v20, 4  ;;  %v6637_v41 = vor.u32 %v6636_v60, %v6635_v35  ;;  %v15079_v27 = vor.u32 %v6352_v12, %v6351_v38 }
 0x41a   : > { %v15083_v19 = vrot.slane %v6331_v55, 11  ;;  %v6647_v35 = vrot.slane %v6646_v26, 4  ;;  %v15103_v26 = vadd.f32 %v14788_v15, %v14807_v24 }
 0x41b   : > { %16988 = vst [vmem:[#allocation26_spill] sm:$0xff] %v15070_v28  ;;  %v6638_v55 = vrot.slane %v6637_v41, 4 }
 0x41f   : > { %v10594_v39 = vpop.f32.mrb[184].mxu0 }
 0x420   : > { %v10595_v8 = vpop.f32.mrb[185].mxu0  ;;  %v5976_v7 = vld [vmem:[#allocation5 + $0x60] ss:$2 sm:$0xff]  ;;  %v5992_v54 = vld [vmem:[#allocation5 + $0x61] ss:$2 sm:$0xff] }
 0x421   : > { %v10596_v0 = vadd.f32 %v10595_v8, %v10594_v39  ;;  %v10597_v36 = vpop.f32.mrb[186].mxu0  ;;  %v6001_v42 = vmax.f32 %v5976_v7, %v5992_v54  ;;  %v6649_v39 = vshll.u32 %v6612_v3, 16  ;;  %v15061_v7 = vld [vmem:[#allocation3 + $0x68] sm:$0xf]  ;;  %v16755_v54 = vshrl.u32 %v15054_v53, 16 }
 0x422   : > { %v10598_v46 = vpop.f32.mrb[187].mxu0  ;;  %v16763_v56 = vshll.u32 %v15061_v7, 16 }
 0x423   : > { %v10599_v6 = vadd.f32 %v10598_v46, %v10597_v36  ;;  %v5693_v45 = vadd.f32 %v10596_v0, %v14807_v24  ;;  %v6078_v50 = vpack.c.bf16 %v6001_v42, %v6001_v42  ;;  %v16754_v36 = vshll.u32 %v15054_v53, 16  ;;  %v6609_v0 = vld [vmem:[#allocation3 + $0x2c] sm:$0x1]  ;;  %v6610_v42 = vld [vmem:[#allocation3 + $0x3c] sm:$0x1] }
 0x424   : > { %v6640_v46 = vshll.u32 %v6611_v25, 16  ;;  %v6651_v60 = vrot.slane %v6649_v39, 5  ;;  %v6653_v38 = vrot.slane %v16755_v54, 4  ;;  %v6658_v54 = vshll.u32 %v6613_v10, 16 }
 0x425   : > { %v15058_v21 = vadd.f32 %v14856_v1, %v5693_v45  ;;  %v5696_v8 = vadd.f32 %v10599_v6, %v14807_v24  ;;  %6086 = vst.msk [vmem:[#allocation3 + $0x78] sm:$0xf] %vm6008_vm1, %v6078_v50  ;;  %v15074_v1 = vrot.slane %v16753_v48, 5  ;;  %v15081_v6 = vrot.slane %v6349_v44, 4 }
 0x426   : > { %v15085_v45 = vrot.slane %v6344_v29, 11  ;;  %v16762_v50 = vshrl.u32 %v15061_v7, 16  ;;  %v6654_v25 = vrot.slane %v16754_v36, 5  ;;  %v6622_v44 = vshll.u32 %v6609_v0, 16  ;;  %v6296_v0 = vld [vmem:[#allocation3 + $0x54] sm:$0x8] }
 0x427   : > { %16989 = vst [vmem:[#allocation57_spill] sm:$0xff] %v15074_v1  ;;  %v15077_v3 = vadd.f32 %v14860_v62, %v5696_v8  ;;  %v6614_v62 = vld [vmem:[#allocation3 + $0x7c] sm:$0x1]  ;;  %v6631_v8 = vshll.u32 %v6610_v42, 16  ;;  %v15095_v29 = vrot.slane %v6352_v12, 5  ;;  %v15099_v48 = vadd.f32 %v14802_v59, %v14807_v24 }
 0x428   : > { %v6642_v36 = vrot.slane %v6640_v46, 5  ;;  %v15107_v42 = vld [vmem:[#allocation3 + $0x68] sm:$0xf]  ;;  %v15115_v59 = vrot.slane %v16762_v50, 4  ;;  %v6667_v15 = vshll.u32 %v6614_v62, 16  ;;  %v15119_v46 = vrot.slane %v16763_v56, 5 }
 0x429   : > { %v6652_v23 = vsel %vm11887_vm8, %v6647_v35, %v6651_v60  ;;  %v6655_v39 = vor.u32 %v6654_v25, %v6653_v38  ;;  %v15123_v53 = vrot.slane %v6622_v44, 5  ;;  %v6357_v12 = vshrl.u32 %v6296_v0, 16  ;;  %v6409_v25 = vld [vmem:[#allocation3 + $0x2c] sm:$0x1] }
 0x42a   : > { %v10600_v16 = vpop.f32.mrb[188].mxu0  ;;  %16990 = vst [vmem:[#allocation60_spill] sm:$0xff] %v15115_v59  ;;  %16991 = vst [vmem:[#allocation61_spill] sm:$0xff] %v15119_v46  ;;  %v6362_v1 = vshrl.u32 %v15093_v9, 16  ;;  %v16764_v50 = vshrl.u32 %v15107_v42, 16  ;;  %v15128_v62 = vrot.slane %v6631_v8, 5 }
 0x42b   : > { %v10601_v41 = vpop.f32.mrb[189].mxu0  ;;  %v15134_v35 = vrot.slane %v6658_v54, 5  ;;  %v15136_v60 = vrot.slane %v6667_v15, 5  ;;  %v5896_v44 = vmax.f32 %v15058_v21, 0.0  ;;  %v15144_v8 = vrot.slane %v6357_v12, 11 }
 0x42c   : > { %v10602_v61 = vadd.f32 %v10601_v41, %v10600_v16  ;;  %v10603_v20 = vpop.f32.mrb[190].mxu0  ;;  %v6643_v41 = vsel %vm11887_vm8, %v6638_v55, %v6642_v36  ;;  %v15148_v54 = vrot.slane %v16764_v50, 7  ;;  %v5897_v55 = vmax.f32 %v15077_v3, 0.0 }
 0x42d   : > { %v10604_v32 = vpop.f32.mrb[191].mxu0  ;;  %v15132_v56 = vcombine.low %v6643_v41, %v6652_v23  ;;  %v6364_v23 = vrot.slane %v6362_v1, 7  ;;  %v6445_v41 = vor.u32 %v15095_v29, %v15081_v6  ;;  %v15156_v38 = vrot.slane %v6362_v1, 4 }
 0x42e   : > { %v5701_v10 = vadd.f32 %v10602_v61, %v14807_v24  ;;  %v10605_v16 = vadd.f32 %v10604_v32, %v10603_v20  ;;  %v15142_v61 = vrot.slane %v6655_v39, 4  ;;  %v6410_v20 = vld [vmem:[#allocation3 + $0x3c] sm:$0x1]  ;;  %v5942_v50 = vsel %vm5137_vm15, %v5896_v44, -inf }
 0x42f   : > { %v6439_v12 = vshll.u32 %v6410_v20, 16  ;;  %v5945_v1 = vsel %vm5137_vm15, %v5897_v55, -inf }
 0x430   : > { %v5862_v0 = vadd.f32 %v14854_v14, %v5701_v10  ;;  %v5704_v32 = vadd.f32 %v10605_v16, %v14807_v24  ;;  %v6430_v10 = vshll.u32 %v6409_v25, 16  ;;  %v6411_v24 = vld [vmem:[#allocation3 + $0x4c] sm:$0x1] }
 0x431   : > { %v6448_v59 = vshll.u32 %v6411_v24, 16 }
 0x432   : > { %v5898_v15 = vmax.f32 %v5862_v0, 0.0  ;;  %v5865_v21 = vadd.f32 %v14858_v13, %v5704_v32  ;;  %v10878_v14 = vpop.f32.mrb[192].mxu0  ;;  %v15161_v32 = vld [vmem:[#allocation3 + $0x98] sm:$0xf] }
 0x433   : > { %v5750_v39 = vadd.f32 %v10878_v14, %v14988_v40  ;;  %v5741_v16 = vpop.f32.mrb[193].mxu0  ;;  %16992 = vst [vmem:[#allocation62_spill] sm:$0xff] %v15161_v32  ;;  %v6298_v14 = vld [vmem:[#allocation3 + $0x64] sm:$0x8]  ;;  %v16765_v55 = vshll.u32 %v15161_v32, 16 }
 0x434   : > { %v5943_v36 = vsel %vm5137_vm15, %v5898_v15, -inf  ;;  %v5899_v3 = vmax.f32 %v5865_v21, 0.0  ;;  %v5742_v0 = vadd.f32 %v5741_v16, %v14992_v63  ;;  %v10879_v13 = vpop.f32.mrb[194].mxu0  ;;  %v6370_v24 = vshrl.u32 %v6298_v14, 16 }
 0x435   : > { %v5944_v25 = vmax.f32 %v5942_v50, %v5943_v36  ;;  %v5870_v46 = vmax.f32 %v5750_v39, 0.0  ;;  %v5753_v40 = vadd.f32 %v10879_v13, %v15003_v30  ;;  %v5744_v20 = vpop.f32.mrb[195].mxu0  ;;  %v16766_v50 = vshrl.u32 %v15161_v32, 16  ;;  %v6412_v36 = vld [vmem:[#allocation3 + $0x5c] sm:$0x1] }
 0x436   : > { %v5946_v6 = vsel %vm5137_vm15, %v5899_v3, -inf  ;;  %v5868_v29 = vmax.f32 %v5742_v0, 0.0  ;;  %v5745_v44 = vadd.f32 %v5744_v20, %v14996_v33  ;;  %v16993_v3 = vshll.u32 %v15093_v9, 16 }
 0x437   : > { %5962 = vst.msk [vmem:[#allocation5 + $0x70] sm:$0xff] %vm5137_vm15, %v5944_v25  ;;  %v5947_v63 = vmax.f32 %v5945_v1, %v5946_v6  ;;  %v5901_v15 = vsel %vm5137_vm15, %v5870_v46, -inf  ;;  %v5871_v21 = vmax.f32 %v5753_v40, 0.0  ;;  %v15178_v46 = vrot.slane %v6430_v10, 5 }
 0x438   : > { %v5900_v30 = vsel %vm5137_vm15, %v5868_v29, -inf  ;;  %v5869_v39 = vmax.f32 %v5745_v44, 0.0  ;;  %v15176_v0 = vor.u32 %v16993_v3, %v6364_v23  ;;  %v15181_v40 = vrot.slane %v6439_v12, 5  ;;  %v6408_v44 = vld [vmem:[#allocation3 + $0x1c] sm:$0x1] }
 0x439   : > { %5963 = vst.msk [vmem:[#allocation5 + $0x78] sm:$0xff] %vm5137_vm15, %v5947_v63  ;;  %v5902_v16 = vmax.f32 %v5900_v30, %v5901_v15  ;;  %v5904_v33 = vsel %vm5137_vm15, %v5871_v21, -inf  ;;  %v15183_v20 = vrot.slane %v6445_v41, 4  ;;  %v6457_v14 = vshll.u32 %v6412_v36, 16 }
 0x43a   : > { %v5903_v13 = vsel %vm5137_vm15, %v5869_v39, -inf  ;;  %v10882_v25 = vpop.f32.mrb[196].mxu0  ;;  %v15187_v63 = vrot.slane %v6448_v59, 5  ;;  %v15191_v23 = vrot.slane %v16766_v50, 4  ;;  %v15194_v15 = vrot.slane %v6370_v24, 11 }
 0x43b   : > { %5948 = vst.msk [vmem:[#allocation5] sm:$0xff] %vm5137_vm15, %v5902_v16  ;;  %v5905_v1 = vmax.f32 %v5903_v13, %v5904_v33  ;;  %v5766_v6 = vadd.f32 %v10882_v25, %v15014_v2  ;;  %v5757_v29 = vpop.f32.mrb[197].mxu0  ;;  %v6681_v41 = vrot.slane %v16765_v55, 5  ;;  %v16994_v21 = vmov %v16993_v3  ;;  %v15204_v39 = vld [vmem:[#allocation3 + $0x6c] sm:$0x1] }
 0x43c   : > { %v5758_v10 = vadd.f32 %v5757_v29, %v15025_v34  ;;  %v10883_v12 = vpop.f32.mrb[198].mxu0  ;;  %v15200_v36 = vrot.slane %v16994_v21, 5  ;;  %v16995_v34 = vshrl.u32 %v15107_v42, 16  ;;  %v16996_v24 = vshll.u32 %v15107_v42, 16  ;;  %v6300_v25 = vld [vmem:[#allocation3 + $0x74] sm:$0x8] }
 0x43d   : > { %5949 = vst.msk [vmem:[#allocation5 + $0x8] sm:$0xff] %vm5137_vm15, %v5905_v1  ;;  %v5874_v2 = vmax.f32 %v5766_v6, 0.0  ;;  %v5769_v59 = vadd.f32 %v10883_v12, %v15029_v51  ;;  %v5760_v30 = vpop.f32.mrb[199].mxu0  ;;  %v6421_v13 = vshll.u32 %v6408_v44, 16  ;;  %v15215_v1 = vrot.slane %v6457_v14, 5 }
 0x43e   : > { %v15208_v16 = vrot.slane %v16995_v34, 4  ;;  %v15212_v33 = vrot.slane %v16996_v24, 5  ;;  %v5872_v3 = vmax.f32 %v5758_v10, 0.0  ;;  %v5761_v9 = vadd.f32 %v5760_v30, %v15033_v11  ;;  %v15218_v29 = vld [vmem:[#allocation3 + $0x78] sm:$0xf] }
 0x43f   : > { %v5907_v51 = vsel %vm5137_vm15, %v5874_v2, -inf  ;;  %v5875_v6 = vmax.f32 %v5769_v59, 0.0  ;;  %16997 = vst [vmem:[#allocation32_spill] sm:$0xff] %v15218_v29  ;;  %v16998_v21 = vmov %v16996_v24  ;;  %v6302_v11 = vld [vmem:[#allocation3 + $0x84] sm:$0x8]  ;;  %v6682_v59 = vor.u32 %v6681_v41, %v15191_v23 }
 0x440   : > { %v15227_v10 = vor.u32 %v16998_v21, %v15148_v54  ;;  %v5978_v44 = vld [vmem:[#allocation5 + $0x70] ss:$2 sm:$0xff]  ;;  %v5994_v30 = vld [vmem:[#allocation5 + $0x71] ss:$2 sm:$0xff]  ;;  %v5906_v14 = vsel %vm5137_vm15, %v5872_v3, -inf  ;;  %v5873_v34 = vmax.f32 %v5761_v9, 0.0 }
 0x441   : > { %v6002_v24 = vmax.f32 %v5978_v44, %v5994_v30  ;;  %v5908_v55 = vmax.f32 %v5906_v14, %v5907_v51  ;;  %v5910_v50 = vsel %vm5137_vm15, %v5875_v6, -inf  ;;  %v6383_v42 = vshrl.u32 %v6300_v25, 16  ;;  %v6615_v30 = vld [vmem:[#allocation3 + $0x8c] sm:$0x1]  ;;  %v6616_v14 = vld [vmem:[#allocation3 + $0x9c] sm:$0x1] }
 0x442   : > { %v5909_v54 = vsel %vm5137_vm15, %v5873_v34, -inf  ;;  %v10886_v21 = vpop.f32.mrb[200].mxu0  ;;  %v15237_v12 = vrot.slane %v6421_v13, 5  ;;  %v6396_v32 = vshrl.u32 %v6302_v11, 16  ;;  %v6466_v3 = vshll.u32 %v15204_v39, 16 }
 0x443   : > { %v6079_v9 = vpack.c.bf16 %v6002_v24, %v6002_v24  ;;  %5950 = vst.msk [vmem:[#allocation5 + $0x10] sm:$0xff] %vm5137_vm15, %v5908_v55  ;;  %v5911_v28 = vmax.f32 %v5909_v54, %v5910_v50  ;;  %v5782_v2 = vadd.f32 %v10886_v21, %v15039_v18  ;;  %v5773_v23 = vpop.f32.mrb[201].mxu0  ;;  %v16770_v41 = vshrl.u32 %v15218_v29, 16 }
 0x444   : > { %v5964_v51 = vld [vmem:[#allocation5] ss:$2 sm:$0xff]  ;;  %v5980_v6 = vld [vmem:[#allocation5 + $0x1] ss:$2 sm:$0xff]  ;;  %v5774_v25 = vadd.f32 %v5773_v23, %v15043_v37  ;;  %v10887_v44 = vpop.f32.mrb[202].mxu0  ;;  %v16769_v13 = vshll.u32 %v15218_v29, 16  ;;  %v6381_v39 = vsel %vm12171_vm14, %v15194_v15, %v15227_v10  ;;  %v6454_v50 = vor.u32 %v15200_v36, %v15156_v38 }
 0x445   : > { %6087 = vst.msk [vmem:[#allocation3 + $0x88] sm:$0xf] %vm6008_vm1, %v6079_v9  ;;  %v5995_v18 = vmax.f32 %v5964_v51, %v5980_v6  ;;  %v5878_v55 = vmax.f32 %v5782_v2, 0.0  ;;  %v5785_v11 = vadd.f32 %v10887_v44, %v15099_v48  ;;  %v5776_v37 = vpop.f32.mrb[203].mxu0  ;;  %v6463_v34 = vor.u32 %v15212_v33, %v15208_v16  ;;  %v11143_v48 = vld [vmem:[%s16680_s5 + $0x28] sm:$0xff]   ;;  %v11144_v36 = vld [vmem:[%s16680_s5 + $0x70] sm:$0xff]  }
 0x446   : > { %5951 = vst.msk [vmem:[#allocation5 + $0x18] sm:$0xff] %vm5137_vm15, %v5911_v28  ;;  %v5876_v24 = vmax.f32 %v5774_v25, 0.0  ;;  %v5777_v15 = vadd.f32 %v5776_v37, %v15103_v26  ;;  %v15257_v10 = vrot.slane %v6383_v42, 11  ;;  %v15259_v38 = vrot.slane %v6682_v59, 4  ;;  %v11142_v28 = vld [vmem:[%s16680_s5 + $0x68] sm:$0xff]   ;;  %v11145_v44 = vld [vmem:[%s16680_s5 + $0x30] sm:$0xff]  }
 0x447   : > { %v6072_v16 = vpack.c.bf16 %v5995_v18, %v5995_v18  ;;  %v5913_v33 = vsel %vm5137_vm15, %v5878_v55, -inf  ;;  %v5879_v26 = vmax.f32 %v5785_v11, 0.0  ;;  %v15271_v2 = vrot.slane %v6396_v32, 11  ;;  %v15273_v59 = vld [vmem:[#allocation3 + $0x7c] sm:$0x1]  ;;  %10634 = vmatprep.subr.bf16.mxu1 %v11142_v28 }
 0x448   : > { %v5912_v42 = vsel %vm5137_vm15, %v5876_v24, -inf  ;;  %v5877_v54 = vmax.f32 %v5777_v15, 0.0  ;;  %v6662_v21 = vrot.slane %v16770_v41, 4  ;;  %v6663_v9 = vrot.slane %v16769_v13, 5  ;;  %v15280_v23 = vld [vmem:[#allocation3 + $0x78] sm:$0xf]  ;;  %10635 = vmatpush3.bf16.msra.mxu1 %v11143_v48 }
 0x449   : > { %16999 = vst [vmem:[#allocation34_spill] sm:$0xff] %v15280_v23  ;;  %6080 = vst.msk [vmem:[#allocation3 + $0x18] sm:$0xf] %vm6008_vm1, %v6072_v16  ;;  %v5914_v51 = vmax.f32 %v5912_v42, %v5913_v33  ;;  %v5916_v32 = vsel %vm5137_vm15, %v5879_v26, -inf  ;;  %v6676_v6 = vshll.u32 %v6615_v30, 16  ;;  %v6685_v25 = vshll.u32 %v6616_v14, 16  ;;  %10636 = vmatprep.subr.bf16.mxu1 %v11144_v36 }
 0x44a   : > { %v5915_v18 = vsel %vm5137_vm15, %v5877_v54, -inf  ;;  %v15288_v55 = vrot.slane %v6454_v50, 4  ;;  %v6464_v11 = vrot.slane %v6463_v34, 4  ;;  %v6468_v37 = vrot.slane %v6466_v3, 5  ;;  %v11146_v24 = vld [vmem:[%s16680_s5 + $0x78] sm:$0xff]  }
 0x44b   : > { %5952 = vst.msk [vmem:[#allocation5 + $0x20] sm:$0xff] %vm5137_vm15, %v5914_v51  ;;  %v5917_v30 = vmax.f32 %v5915_v18, %v5916_v32  ;;  %v6388_v14 = vshrl.u32 %v15280_v23, 16  ;;  %v6391_v15 = vshll.u32 %v15280_v23, 16  ;;  %v6415_v28 = vld [vmem:[#allocation3 + $0x8c] sm:$0x1]  ;;  %v6475_v48 = vshll.u32 %v15273_v59, 16 }
 0x44c   : > { %v6664_v33 = vor.u32 %v6663_v9, %v6662_v21  ;;  %v17000_v3 = vsel %vm12171_vm14, %v15144_v8, %v15176_v0  ;;  %v15304_v36 = vld [vmem:[#allocation3 + $0x88] sm:$0xf]  ;;  %v15316_v8 = vrot.slane %v6676_v6, 5  ;;  %v15318_v0 = vrot.slane %v6685_v25, 5  ;;  %10637 = vmatpush3.bf16.msra.mxu1 %v11145_v44  ;;  %v15328_v6 = vld [vmem:[#allocation3 + $0x78] sm:$0xf] }
 0x44d   : > { %v5966_v16 = vld [vmem:[#allocation5 + $0x10] ss:$2 sm:$0xff]  ;;  %v5982_v50 = vld [vmem:[#allocation5 + $0x11] ss:$2 sm:$0xff]  ;;  %v15302_v34 = vcombine.low %v17000_v3, %v6381_v39  ;;  %17001 = vst [vmem:[#allocation33_spill] sm:$0xff] %v15304_v36  ;;  %5953 = vst.msk [vmem:[#allocation5 + $0x28] sm:$0xff] %vm5137_vm15, %v5917_v30  ;;  %10638 = vmatprep.subr.bf16.mxu1 %v11146_v24  ;;  %v6460_v26 = vsel %vm11887_vm8, %v15288_v55, %v15215_v1  ;;  %v6469_v24 = vsel %vm11887_vm8, %v6464_v11, %v6468_v37 }
 0x44e   : > { %v5996_v42 = vmax.f32 %v5966_v16, %v5982_v50  ;;  %v6401_v54 = vshrl.u32 %v15304_v36, 16  ;;  %v15314_v21 = vld [vmem:[#allocation3 + $0x88] sm:$0xf]  ;;  %v11147_v39 = vld [vmem:[%s16680_s5 + $0x38] sm:$0xff]   ;;  %v6404_v51 = vshll.u32 %v15304_v36, 16  ;;  %v6484_v30 = vshll.u32 %v6415_v28, 16 }
 0x44f   : > { %17002 = vst [vmem:[#allocation39_spill] sm:$0xff] %v15314_v21  ;;  %v15323_v9 = vld [vmem:[#allocation3 + $0x8] sm:$0xf]  ;;  %v16772_v32 = vshrl.u32 %v15314_v21, 16  ;;  %v16774_v18 = vshll.u32 %v15314_v21, 16  ;;  %v6390_v25 = vrot.slane %v6388_v14, 7 }
 0x450   : > { %17003 = vst [vmem:[#allocation41_spill] sm:$0xff] %v15323_v9  ;;  %v6073_v16 = vpack.c.bf16 %v5996_v42, %v5996_v42  ;;  %v6470_v50 = vrot.slane %v6388_v14, 4  ;;  %v6471_v44 = vrot.slane %v6391_v15, 5  ;;  %v15330_v3 = vld [vmem:[#allocation3 + $0x18] sm:$0xf]  ;;  %v6665_v41 = vrot.slane %v6664_v33, 4  ;;  %10639 = vmatpush3.bf16.msra.mxu1 %v11147_v39 }
 0x451   : > { %17004 = vst [vmem:[#allocation40_spill] sm:$0xff] %v15330_v3  ;;  %v15332_v13 = vld [vmem:[#allocation3 + $0x18] sm:$0xf]  ;;  %v6403_v59 = vrot.slane %v6401_v54, 7  ;;  %v10044_v14 = vcombine.low %v15323_v9, %v15330_v3  ;;  %v6671_v42 = vrot.slane %v16772_v32, 4  ;;  %v6672_v33 = vrot.slane %v16774_v18, 5 }
 0x452   : > { %6081 = vst.msk [vmem:[#allocation3 + $0x28] sm:$0xf] %vm6008_vm1, %v6073_v16  ;;  %v6310_v28 = vshrl.u32 %v15332_v13, 16  ;;  %v6313_v23 = vshll.u32 %v15332_v13, 16  ;;  %v15349_v1 = vrot.slane %v6475_v48, 5  ;;  %v6479_v55 = vrot.slane %v6401_v54, 4 }
 0x453   : > { %v6480_v11 = vrot.slane %v6404_v51, 5  ;;  %6721 = vrot.lane.b32.xlu1 %v10044_v14, %s17005_s25  ;;  %v6472_v36 = vor.u32 %v6471_v44, %v6470_v50  ;;  %v6393_v3 = vor.u32 %v6391_v15, %v6390_v25  ;;  %v6406_v9 = vor.u32 %v6404_v51, %v6403_v59  ;;  %v6012_v29 = vld [vmem:[#allocation3 + $0xc] sm:$0x1]  ;;  %v11148_v15 = vld [vmem:[%s16680_s5 + $0xc0] sm:$0xff]  }
 0x454   : > { %v5968_v18 = vld [vmem:[#allocation5 + $0x20] ss:$2 sm:$0xff]  ;;  %v5984_v39 = vld [vmem:[#allocation5 + $0x21] ss:$2 sm:$0xff]  ;;  %v15358_v48 = vcombine.low %v6460_v26, %v6469_v24  ;;  %v15360_v54 = vrot.slane %v6484_v30, 5  ;;  %v6312_v14 = vrot.slane %v6310_v28, 7  ;;  %v6670_v16 = vsel %vm11887_vm8, %v6665_v41, %v15136_v60  ;;  %10664 = vmatprep.subr.bf16.mxu1 %v11148_v15 }
 0x455   : > { %v5997_v21 = vmax.f32 %v5968_v18, %v5984_v39  ;;  %v6673_v37 = vor.u32 %v6672_v33, %v6671_v42  ;;  %v6417_v49 = vrot.slane %v6313_v23, 5  ;;  %v6416_v4 = vrot.slane %v6310_v28, 4 }
 0x456   : > { %v6481_v32 = vor.u32 %v6480_v11, %v6479_v55  ;;  %v6013_v50 = vsel %vm14899_vm6, 0, %v6012_v29  ;;  %v17006_v59 = vshrl.u32 %v15328_v6, 16  ;;  %v17007_v18 = vshll.u32 %v15328_v6, 16 }
 0x457   : > { %v6074_v26 = vpack.c.bf16 %v5997_v21, %v5997_v21  ;;  %v15378_v41 = vrot.slane %v6472_v36, 4  ;;  %6014 = vst [vmem:[#allocation3 + $0xc] sm:$0x1] %v6013_v50  ;;  %v10047_v29 = vcombine.low %v15061_v7, %v15328_v6  ;;  %v17008_v21 = vsel %vm11887_vm8, %v15142_v61, %v15134_v35 }
 0x458   : > { %v15372_v51 = vrot.slane %v17006_v59, 4  ;;  %v15376_v60 = vrot.slane %v17007_v18, 5  ;;  %v15393_v44 = vcombine.low %v17008_v21, %v6670_v16  ;;  %v6394_v36 = vsel %vm12171_vm14, %v15257_v10, %v6393_v3  ;;  %v15406_v10 = vld [vmem:[#allocation3 + $0x44] sm:$0x8] }
 0x459   : > { %v15380_v30 = vld [vmem:[#allocation3 + $0x28] sm:$0xf]  ;;  %v6407_v24 = vsel %vm12171_vm14, %v15271_v2, %v6406_v9  ;;  %6082 = vst.msk [vmem:[#allocation3 + $0x38] sm:$0xf] %vm6008_vm1, %v6074_v26  ;;  %v6315_v28 = vor.u32 %v6313_v23, %v6312_v14  ;;  %v6674_v55 = vrot.slane %v6673_v37, 4  ;;  %v6418_v11 = vor.u32 %v6417_v49, %v6416_v4 }
 0x45a   : > { %v15382_v47 = vld [vmem:[#allocation3 + $0x28] sm:$0xf]  ;;  %v6323_v42 = vshrl.u32 %v15380_v30, 16  ;;  %v6326_v33 = vshll.u32 %v15380_v30, 16  ;;  %v6482_v16 = vrot.slane %v6481_v32, 4  ;;  %v6478_v49 = vsel %vm11887_vm8, %v15378_v41, %v15349_v1 }
 0x45b   : > { %v15386_v25 = vld [vmem:[#allocation3 + $0x28] sm:$0xf]  ;;  %v6136_v2 = vshrl.u32 %v15382_v47, 16  ;;  %v6139_v9 = vshll.u32 %v15382_v47, 16  ;;  %v6679_v32 = vsel %vm11887_vm8, %v6674_v55, %v15316_v8  ;;  %v6316_v26 = vsel %vm12171_vm14, %v15008_v17, %v6315_v28 }
 0x45c   : > { %v16788_v35 = vshrl.u32 %v15386_v25, 16  ;;  %v16787_v61 = vshll.u32 %v15386_v25, 16  ;;  %v6325_v3 = vrot.slane %v6323_v42, 7  ;;  %v6426_v39 = vrot.slane %v6326_v33, 5 }
 0x45d   : > { %v6425_v14 = vrot.slane %v6323_v42, 4  ;;  %v6419_v59 = vrot.slane %v6418_v11, 4  ;;  %v15427_v18 = vcombine.low %v6394_v36, %v6407_v24  ;;  %v6487_v1 = vsel %vm11887_vm8, %v6482_v16, %v15360_v54 }
 0x45e   : > { %v6617_v23 = vrot.slane %v16788_v35, 4  ;;  %v6618_v37 = vrot.slane %v16787_v61, 5  ;;  %v6328_v4 = vor.u32 %v6326_v33, %v6325_v3  ;;  %v6234_v41 = vrot.slane %v6136_v2, 4  ;;  %v6210_v33 = vld [vmem:[#allocation3 + $0x2c] sm:$0x1] }
 0x45f   : > { %v6235_v21 = vrot.slane %v6139_v9, 5  ;;  %v6427_v42 = vor.u32 %v6426_v39, %v6425_v14 }
 0x460   : > { %v6329_v8 = vsel %vm12171_vm14, %v15066_v52, %v6328_v4  ;;  %v15439_v28 = vld [vmem:[#allocation3 + $0x38] sm:$0xf]  ;;  %v6619_v54 = vor.u32 %v6618_v37, %v6617_v23  ;;  %v17009_v52 = vsel %vm11887_vm8, %v15259_v38, %v15318_v0  ;;  %v6424_v37 = vsel %vm11887_vm8, %v6419_v59, %v15237_v12 }
 0x461   : > { %v10052_v17 = vcombine.low %v6316_v26, %v6329_v8  ;;  %v15441_v36 = vld [vmem:[#allocation3 + $0x38] sm:$0xf]  ;;  %v15450_v55 = vcombine.low %v6679_v32, %v17009_v52  ;;  %v6149_v16 = vshrl.u32 %v15439_v28, 16  ;;  %v6152_v3 = vshll.u32 %v15439_v28, 16  ;;  %v6211_v26 = vld [vmem:[#allocation3 + $0x3c] sm:$0x1] }
 0x462   : > { %v15443_v24 = vld [vmem:[#allocation3 + $0x38] sm:$0xf]  ;;  %v10045_v39 = vcombine.low %v15382_v47, %v15439_v28  ;;  %v6336_v14 = vshrl.u32 %v15441_v36, 16  ;;  %v6339_v23 = vshll.u32 %v15441_v36, 16  ;;  %v6428_v32 = vrot.slane %v6427_v42, 4 }
 0x463   : > { %6753 = vrot.lane.b32.xlu0 %v10052_v17, %s17005_s25  ;;  %v6524_v38 = vshrl.u32 %v15443_v24, 16  ;;  %v6527_v0 = vshll.u32 %v15443_v24, 16  ;;  %v6236_v8 = vor.u32 %v6235_v21, %v6234_v41  ;;  %v6239_v52 = vshll.u32 %v6210_v33, 16 }
 0x464   : > { %6723 = vrot.lane.b32.xlu1 %v10045_v39, %s17005_s25  ;;  %v6338_v4 = vrot.slane %v6336_v14, 7  ;;  %v6620_v11 = vrot.slane %v6619_v54, 4  ;;  %v6434_v35 = vrot.slane %v6336_v14, 4  ;;  %v6243_v15 = vrot.slane %v6149_v16, 4 }
 0x465   : > { %v6626_v17 = vrot.slane %v6524_v38, 4  ;;  %v6627_v61 = vrot.slane %v6527_v0, 5  ;;  %v6244_v50 = vrot.slane %v6152_v3, 5  ;;  %v6435_v59 = vrot.slane %v6339_v23, 5 }
 0x466   : > { %v6341_v12 = vor.u32 %v6339_v23, %v6338_v4  ;;  %v6433_v41 = vsel %vm11887_vm8, %v6428_v32, %v15178_v46  ;;  %v15476_v21 = vcombine.low %v6478_v49, %v6487_v1  ;;  %v6248_v42 = vshll.u32 %v6211_v26, 16 }
 0x467   : > { %v6628_v39 = vor.u32 %v6627_v61, %v6626_v17  ;;  %v17010_v33 = vcombine.low %v14975_v5, %v14980_v22  ;;  %v6436_v14 = vor.u32 %v6435_v59, %v6434_v35  ;;  %v6237_v4 = vrot.slane %v6236_v8, 4  ;;  %v6092_v61 = vld [vmem:[#allocation3 + $0x24] sm:$0x8]  ;;  %v6094_v17 = vld [vmem:[#allocation3 + $0x34] sm:$0x8] }
 0x468   : > { %v6342_v54 = vsel %vm12171_vm14, %v15083_v19, %v6341_v12  ;;  %v6241_v23 = vrot.slane %v6239_v52, 5  ;;  %v17011_v46 = vsel %vm12171_vm14, %v15085_v45, %v15079_v27  ;;  %v6625_v1 = vsel %vm11887_vm8, %v6620_v11, %v15123_v53  ;;  %v6212_v11 = vld [vmem:[#allocation3 + $0x4c] sm:$0x1] }
 0x469   : > { %6725 = vrot.lane.b32.xlu1 %v17010_v33, %s17005_s25  ;;  %v10053_v49 = vcombine.low %v6342_v54, %v17011_v46  ;;  %v6629_v32 = vrot.slane %v6628_v39, 4  ;;  %v10068_v26 = vcombine.low %v15386_v25, %v15443_v24  ;;  %v10060_v19 = vcombine.low %v6424_v37, %v6433_v41  ;;  %v6213_v39 = vld [vmem:[#allocation3 + $0x5c] sm:$0x1]  ;;  %v6016_v24 = vld [vmem:[#allocation3 + $0x94] sm:$0x8] }
 0x46a   : > { %v6437_v35 = vrot.slane %v6436_v14, 4  ;;  %v6242_v8 = vsel %vm11887_vm8, %v6237_v4, %v6241_v23  ;;  %v6245_v52 = vor.u32 %v6244_v50, %v6243_v15  ;;  %v6250_v45 = vrot.slane %v6248_v42, 5  ;;  %v6098_v23 = vld [vmem:[#allocation3 + $0x54] sm:$0x8] }
 0x46b   : > { %6755 = vrot.lane.b32.xlu0 %v10053_v49, %s17005_s25  ;;  %v6634_v27 = vsel %vm11887_vm8, %v6629_v32, %v15128_v62  ;;  %v6131_v12 = vshrl.u32 %v6092_v61, 16  ;;  %v6138_v53 = vrot.slane %v6136_v2, 7  ;;  %v6144_v59 = vshrl.u32 %v6094_v17, 16 }
 0x46c   : > { %v10072_v37 = vcombine.low %v6625_v1, %v6634_v27  ;;  %v6442_v50 = vsel %vm11887_vm8, %v6437_v35, %v15181_v40  ;;  %v6246_v15 = vrot.slane %v6245_v52, 4  ;;  %v17012_v62 = vsel %vm11887_vm8, %v15183_v20, %v15187_v63  ;;  %v6214_v1 = vld [vmem:[#allocation3 + $0x6c] sm:$0x1] }
 0x46d   : > { %6727 = vrot.lane.b32.xlu1 %v10047_v29, %s17005_s25  ;;  %v10061_v2 = vcombine.low %v6442_v50, %v17012_v62  ;;  %v10018_v41 = vrot.slane %v6131_v12, 11  ;;  %v6141_v42 = vor.u32 %v6139_v9, %v6138_v53  ;;  %v6151_v33 = vrot.slane %v6149_v16, 7 }
 0x46e   : > { %10916 = vmatprep.mubr.msk.bf16.mxu0 %vm5137_vm15, %v10072_v37  ;;  %v6251_v29 = vsel %vm11887_vm8, %v6246_v15, %v6250_v45  ;;  %v10019_v40 = vrot.slane %v6144_v59, 11  ;;  %v17013_v54 = vor.u32 %v15047_v43, %v15018_v31  ;;  %v6257_v4 = vshll.u32 %v6212_v11, 16  ;;  %v17014_v43 = vld [vmem:[#allocation26_spill] sm:$0xff]  ;;  %v17021_v11 = vld [vmem:[#allocation60_spill] sm:$0xff]  ;;  %v17022_v37 = vld [vmem:[#allocation61_spill] sm:$0xff] }
 0x46f   : > { %10917 = vmatmul.mubr.msk.bf16.vlgmr.msra.gmra.mrb[204].mxu0 %vm5137_vm15, %v15132_v56  ;;  %6757 = vrot.lane.b32.xlu0 %v15302_v34, %s17005_s25  ;;  %v15527_v20 = vcombine.low %v6242_v8, %v6251_v29  ;;  %v6142_v63 = vsel %vm12171_vm14, %v10018_v41, %v6141_v42  ;;  %v6154_v47 = vor.u32 %v6152_v3, %v6151_v33  ;;  %v6266_v9 = vshll.u32 %v6213_v39, 16  ;;  %v17015_v56 = vld [vmem:[#allocation57_spill] sm:$0xff]  ;;  %v6100_v59 = vld [vmem:[#allocation3 + $0x64] sm:$0x8]  ;;  %v6102_v41 = vld [vmem:[#allocation3 + $0x74] sm:$0x8] }
 0x470   : > { %v6255_v14 = vrot.slane %v17013_v54, 4  ;;  %10920 = vmatprep.mubr.msk.bf16.mxu0 %vm5137_vm15, %v15393_v44  ;;  %v6259_v31 = vrot.slane %v6257_v4, 5  ;;  %v6263_v16 = vor.u32 %v17015_v56, %v17014_v43  ;;  %v17016_v34 = vshrl.u32 %v15406_v10, 16 }
 0x471   : > { %6793 = vrot.lane.b32.xlu1 %v10060_v19, %s17005_s25  ;;  %v17017_v46 = vshrl.u32 %v14975_v5, 16  ;;  %v6155_v28 = vsel %vm12171_vm14, %v10019_v40, %v6154_v47  ;;  %v6268_v3 = vrot.slane %v6266_v9, 5  ;;  %v6170_v32 = vshrl.u32 %v6098_v23, 16  ;;  %v6215_v19 = vld [vmem:[#allocation3 + $0x7c] sm:$0x1] }
 0x472   : > { %v10020_v61 = vrot.slane %v17016_v34, 11  ;;  %v17018_v44 = vshrl.u32 %v14980_v22, 16  ;;  %v15546_v35 = vcombine.low %v6142_v63, %v6155_v28  ;;  %v6260_v8 = vsel %vm11887_vm8, %v6255_v14, %v6259_v31  ;;  %v6489_v40 = vld [vmem:[#allocation3 + $0x24] sm:$0x8]  ;;  %v6491_v31 = vld [vmem:[#allocation3 + $0x34] sm:$0x8] }
 0x473   : > { %v6164_v49 = vrot.slane %v17017_v46, 7  ;;  %v6264_v10 = vrot.slane %v6263_v16, 4  ;;  %v17019_v52 = vshll.u32 %v14975_v5, 16  ;;  %6759 = vrot.lane.b32.xlu0 %v15427_v18, %s17005_s25  ;;  %v10021_v45 = vrot.slane %v6170_v32, 11 }
 0x474   : > { %v6177_v17 = vrot.slane %v17018_v44, 7  ;;  %v17020_v12 = vshll.u32 %v14980_v22, 16  ;;  %v6272_v50 = vor.u32 %v17022_v37, %v17021_v11  ;;  %v6275_v15 = vshll.u32 %v6214_v1, 16 }
 0x475   : > { %v6167_v27 = vor.u32 %v17019_v52, %v6164_v49  ;;  %6795 = vrot.lane.b32.xlu1 %v10061_v2, %s17005_s25  ;;  %v6269_v39 = vsel %vm11887_vm8, %v6264_v10, %v6268_v3  ;;  %v6281_v18 = vor.u32 %v15376_v60, %v15372_v51  ;;  %v6284_v62 = vshll.u32 %v6215_v19, 16  ;;  %v17029_v19 = vld [vmem:[#allocation25_spill] sm:$0xff] }
 0x476   : > { %v6180_v53 = vor.u32 %v17020_v12, %v6177_v17  ;;  %v15565_v22 = vcombine.low %v6260_v8, %v6269_v39  ;;  %v6273_v33 = vrot.slane %v6272_v50, 4  ;;  %v6277_v29 = vrot.slane %v6275_v15, 5  ;;  %v17030_v8 = vld [vmem:[#allocation55_spill] sm:$0xff]  ;;  %v11151_v39 = vld [vmem:[%s16680_s5 + $0x88] sm:$0xff]  }
 0x477   : > { %v6168_v5 = vsel %vm12171_vm14, %v10020_v61, %v6167_v27  ;;  %v6282_v54 = vrot.slane %v6281_v18, 4  ;;  %v6286_v14 = vrot.slane %v6284_v62, 5  ;;  %v6183_v4 = vshrl.u32 %v6100_v59, 16  ;;  %10921 = vmatmul.mubr.msk.bf16.gmra.mrb[208].mxu0 %vm5137_vm15, %v15450_v55  ;;  %6833 = vrot.lane.b32.xlu0 %v10068_v26, %s17005_s25  ;;  %v17032_v27 = vld [vmem:[#allocation32_spill] sm:$0xff]  ;;  %v17035_v50 = vld [vmem:[#allocation39_spill] sm:$0xff] }
 0x478   : > { %v6181_v42 = vsel %vm12171_vm14, %v10021_v45, %v6180_v53  ;;  %v6278_v51 = vsel %vm11887_vm8, %v6273_v33, %v6277_v29  ;;  %v17023_v60 = vshrl.u32 %v15061_v7, 16  ;;  %v6196_v63 = vshrl.u32 %v6102_v41, 16  ;;  %v17033_v45 = vld [vmem:[#allocation27_spill] sm:$0xff]  ;;  %v17039_v41 = vld [vmem:[#allocation41_spill] sm:$0xff]  ;;  %v17040_v29 = vld [vmem:[#allocation40_spill] sm:$0xff] }
 0x479   : > { %v15569_v2 = vcombine.low %v6168_v5, %v6181_v42  ;;  %v17024_v47 = vshrl.u32 %v15328_v6, 16  ;;  %6797 = vrot.lane.b32.xlu1 %v15358_v48, %s17005_s25  ;;  %v6287_v55 = vsel %vm11887_vm8, %v6282_v54, %v6286_v14  ;;  %v10022_v43 = vrot.slane %v6183_v4, 11 }
 0x47a   : > { %v6190_v23 = vrot.slane %v17023_v60, 7  ;;  %v6506_v56 = vshrl.u32 %v6489_v40, 16  ;;  %v17025_v26 = vshrl.u32 %v15386_v25, 16  ;;  %v15589_v34 = vcombine.low %v6278_v51, %v6287_v55 }
 0x47b   : > { %v6203_v9 = vrot.slane %v17024_v47, 7  ;;  %v17026_v61 = vshll.u32 %v15061_v7, 16  ;;  %v10023_v49 = vrot.slane %v6196_v63, 11  ;;  %v17027_v1 = vshll.u32 %v15328_v6, 16  ;;  %v6209_v63 = vld [vmem:[#allocation3 + $0x1c] sm:$0x1] }
 0x47c   : > { %v6513_v16 = vrot.slane %v17025_v26, 7  ;;  %v10032_v3 = vrot.slane %v6506_v56, 11  ;;  %v17028_v48 = vshll.u32 %v15386_v25, 16  ;;  %v6519_v44 = vshrl.u32 %v6491_v31, 16  ;;  %v6088_v47 = vld [vmem:[#allocation3 + $0x4] sm:$0x8] }
 0x47d   : > { %v6193_v46 = vor.u32 %v17026_v61, %v6190_v23  ;;  %v6206_v28 = vor.u32 %v17027_v1, %v6203_v9  ;;  %v6526_v17 = vrot.slane %v6524_v38, 7  ;;  %v17031_v10 = vcombine.low %v17029_v19, %v17030_v8  ;;  %6799 = vrot.lane.b32.xlu1 %v15476_v21, %s17005_s25  ;;  %v17034_v21 = vld [vmem:[#allocation62_spill] sm:$0xff]  ;;  %v6208_v23 = vld [vmem:[#allocation3 + $0xc] sm:$0x1]  ;;  %v6090_v9 = vld [vmem:[#allocation3 + $0x14] sm:$0x8] }
 0x47e   : > { %v6516_v32 = vor.u32 %v17028_v48, %v6513_v16  ;;  %v10033_v52 = vrot.slane %v6519_v44, 11  ;;  %v10070_v12 = vcombine.low %v17033_v45, %v17032_v27  ;;  %v10071_v15 = vcombine.low %v17035_v50, %v17034_v21  ;;  %v11168_v48 = vld [vmem:[%s16682_s7] ss:$8 sps:$4 sm:$0xff]  }
 0x47f   : > { %6835 = vrot.lane.b32.xlu0 %v17031_v10, %s17005_s25  ;;  %v6194_v7 = vsel %vm12171_vm14, %v10022_v43, %v6193_v46  ;;  %v6207_v6 = vsel %vm12171_vm14, %v10023_v49, %v6206_v28  ;;  %v6529_v38 = vor.u32 %v6527_v0, %v6526_v17  ;;  %v17036_v0 = vshrl.u32 %v17035_v50, 16 }
 0x480   : > { %v15609_v25 = vcombine.low %v6194_v7, %v6207_v6  ;;  %v6517_v53 = vsel %vm12171_vm14, %v10032_v3, %v6516_v32  ;;  %v6017_v5 = vsel %vm14874_vm3, 0, %v6016_v24  ;;  %v17038_v18 = vshll.u32 %v17035_v50, 16  ;;  %v11170_v7 = vld [vmem:[%s16682_s7 + $0x4] ss:$8 sps:$4 sm:$0xff]  }
 0x481   : > { %v6530_v11 = vsel %vm12171_vm14, %v10033_v52, %v6529_v38  ;;  %v6591_v59 = vrot.slane %v17036_v0, 7  ;;  %6018 = vst [vmem:[#allocation3 + $0x94] sm:$0x8] %v6017_v5  ;;  %v6110_v42 = vshrl.u32 %v17039_v41, 16  ;;  %v6113_v33 = vshll.u32 %v17039_v41, 16  ;;  %9046 = vmatprep.subr.bf16.mxu0 %v11170_v7  ;;  %v11149_v24 = vld [vmem:[%s16680_s5 + $0x80] sm:$0xff]  }
 0x482   : > { %v15620_v37 = vcombine.low %v6517_v53, %v6530_v11  ;;  %v6123_v40 = vshrl.u32 %v17040_v29, 16  ;;  %v6126_v54 = vshll.u32 %v17040_v29, 16  ;;  %v6221_v55 = vshll.u32 %v6208_v23, 16  ;;  %9047 = vmatpush1.bf16.msra.mxu0 %v11168_v48  ;;  %v11152_v5 = vld [vmem:[%s16680_s5 + $0xd0] sm:$0xff]   ;;  %v11154_v29 = vld [vmem:[%s16680_s5 + $0xd8] sm:$0xff]   ;;  %v11158_v23 = vld [vmem:[%s16680_s5 + $0xe8] sm:$0xff]  }
 0x483   : > { %6837 = vrot.lane.b32.xlu0 %v10070_v12, %s17005_s25  ;;  %v15631_v62 = vor.u32 %v17038_v18, %v6591_v59  ;;  %v6216_v14 = vrot.slane %v6110_v42, 4  ;;  %v6217_v4 = vrot.slane %v6113_v33, 5  ;;  %v6230_v56 = vshll.u32 %v6209_v63, 16 }
 0x484   : > { %v6225_v51 = vrot.slane %v6123_v40, 4  ;;  %v6226_v60 = vrot.slane %v6126_v54, 5  ;;  %v6112_v26 = vrot.slane %v6110_v42, 7  ;;  %v6125_v16 = vrot.slane %v6123_v40, 7  ;;  %v11153_v42 = vld [vmem:[%s16680_s5 + $0x90] sm:$0xff]  }
 0x485   : > { %v6218_v31 = vor.u32 %v6217_v4, %v6216_v14  ;;  %v6105_v61 = vshrl.u32 %v6088_v47, 16  ;;  %v6118_v46 = vshrl.u32 %v6090_v9, 16  ;;  %v6223_v1 = vrot.slane %v6221_v55, 5  ;;  %v11155_v14 = vld [vmem:[%s16680_s5 + $0x98] sm:$0xff]   ;;  %v11159_v9 = vld [vmem:[%s16680_s5 + $0xa8] sm:$0xff]  }
 0x486   : > { %v6227_v43 = vor.u32 %v6226_v60, %v6225_v51  ;;  %v6232_v3 = vrot.slane %v6230_v56, 5  ;;  %v6115_v32 = vor.u32 %v6113_v33, %v6112_v26  ;;  %v6128_v44 = vor.u32 %v6126_v54, %v6125_v16  ;;  %v6495_v47 = vld [vmem:[#allocation3 + $0x54] sm:$0x8]  ;;  %v6493_v55 = vld [vmem:[#allocation3 + $0x44] sm:$0x8] }
 0x487   : > { %6839 = vrot.lane.b32.xlu0 %v10071_v15, %s17005_s25  ;;  %v6219_v49 = vrot.slane %v6218_v31, 4  ;;  %v10016_v17 = vrot.slane %v6105_v61, 11  ;;  %v10017_v10 = vrot.slane %v6118_v46, 11  ;;  %v11160_v31 = vld [vmem:[%s16680_s5 + $0xf0] sm:$0xff]   ;;  %v6532_v61 = vshrl.u32 %v6493_v55, 16  ;;  %s11608_s25 = scalar_lea.vmem %s11607_s0, 32 }
 0x488   : > { %v6228_v28 = vrot.slane %v6227_v43, 4  ;;  %v6545_v43 = vshrl.u32 %v6495_v47, 16  ;;  %v17042_v46 = vshrl.u32 %v17029_v19, 16  ;;  %v17043_v48 = vshll.u32 %v17030_v8, 16  ;;  %p11610_p1 = scmp.lt.s32.totalorder %s11608_s25, %s11602_s21 }
 0x489   : > { %v6224_v6 = vsel %vm11887_vm8, %v6219_v49, %v6223_v1  ;;  %v6116_v38 = vsel %vm12171_vm14, %v10016_v17, %v6115_v32  ;;  %v6129_v12 = vsel %vm12171_vm14, %v10017_v10, %v6128_v44  ;;  %v11162_v1 = vld [vmem:[%s16680_s5 + $0xf8] sm:$0xff]   ;;  %v10034_v7 = vrot.slane %v6532_v61, 11  ;;  %v11601_v61 = vld [vmem:[#allocation3 + $0x68] sm:$0xf] }
 0x48a   : > { %v6233_v52 = vsel %vm11887_vm8, %v6228_v28, %v6232_v3  ;;  %v10040_v50 = vcombine.low %v6116_v38, %v6129_v12  ;;  %v6539_v49 = vrot.slane %v17042_v46, 7  ;;  %v10035_v3 = vrot.slane %v6545_v43, 11  ;;  %v6499_v17 = vld [vmem:[#allocation3 + $0x74] sm:$0x8]  ;;  %p11611_p2 = por %p11610_p1, %p11609_p0 }
 0x48b   : > { %v10048_v11 = vcombine.low %v6224_v6, %v6233_v52  ;;  %v11163_v10 = vld [vmem:[%s16680_s5 + $0xb8] sm:$0xff]   ;;  %v17044_v6 = vshll.u32 %v17029_v19, 16  ;;  %v6571_v38 = vshrl.u32 %v6499_v17, 16  ;;  %v17045_v12 = vshrl.u32 %v17032_v27, 16 }
 0x48c   : > { %v17051_v55 = vshll.u32 %v17034_v21, 16  ;;  %v11174_v17 = vld [vmem:[%s16682_s7 + $0x10] ss:$8 sps:$4 sm:$0xff]   ;;  %p11612_p3 = pnand %p11611_p2, %p11605_p13 }
 0x48d   : > { %v6542_v52 = vor.u32 %v17044_v6, %v6539_v49  ;;  %v11179_v6 = vld [vmem:[%s16682_s7 + $0x124] ss:$8 sps:$4 sm:$0xff]  }
 0x48f   : > { %v6543_v19 = vsel %vm12171_vm14, %v10034_v7, %v6542_v52  ;;  %v11177_v7 = vld [vmem:[%s16682_s7 + $0x120] ss:$8 sps:$4 sm:$0xff]  }
 0x490   : > { %v11180_v52 = vld [vmem:[%s16682_s7 + $0x20] ss:$8 sps:$4 sm:$0xff]  }
 0x4c5   : > { %v6722_v53 = vpop.permute.xlu1 %6721 }
 0x4c6   : > { %v6855_v59 = vsel %vm5137_vm15, %v10040_v50, %v6722_v53  ;;  %v6578_v53 = vrot.slane %v17045_v12, 7  ;;  %v11188_v12 = vld [vmem:[%s16682_s7 + $0x34] ss:$8 sps:$4 sm:$0xff]  }
 0x4d5   : > { %v6754_v15 = vpop.permute.xlu0 %6753 }
 0x4d6   : > { %v6871_v0 = vsel %vm5137_vm15, %v10048_v11, %v6754_v15  ;;  %v6724_v18 = vpop.permute.xlu1 %6723 }
 0x4d7   : > { %7256 = vmatprep.mubr.bf16.mxu1 %v6871_v0  ;;  %v6859_v40 = vsel %vm5137_vm15, %v15546_v35, %v6724_v18  ;;  %v11157_v35 = vld [vmem:[%s16680_s5 + $0xa0] sm:$0xff]   ;;  %v10037_v18 = vrot.slane %v6571_v38, 11  ;;  %v11186_v38 = vld [vmem:[%s16682_s7 + $0x30] ss:$8 sps:$4 sm:$0xff]  }
 0x4d8   : > { %7257 = vmatmul.mubr.bf16.vlgmr.msra.gmra.mrb[20].mxu1 %v6855_v59 }
 0x4d9   : > { %10665 = vmatpush3.bf16.msra.mxu1 %v11149_v24  ;;  %v17046_v24 = vshrl.u32 %v17033_v45, 16 }
 0x4da   : > { %10666 = vmatprep.subr.bf16.mxu1 %v11150_v58  ;;  %v11165_v58 = vld [vmem:[%s16682_s7 + $0x100] ss:$8 sps:$4 sm:$0xff]  }
 0x4db   : > { %v6726_v51 = vpop.permute.xlu1 %6725  ;;  %v6565_v0 = vrot.slane %v17046_v24, 7  ;;  %v11195_v24 = vld [vmem:[%s16682_s7 + $0x150] ss:$8 sps:$4 sm:$0xff]  }
 0x4dd   : > { %10667 = vmatpush3.bf16.msra.mxu1 %v11151_v39  ;;  %v6756_v41 = vpop.permute.xlu0 %6755  ;;  %v17047_v39 = vcombine.low %v15332_v13, %v15380_v30 }
 0x4de   : > { %v6875_v33 = vsel %vm5137_vm15, %v15527_v20, %v6756_v41  ;;  %10668 = vmatprep.subr.bf16.mxu1 %v11152_v5  ;;  %v11156_v20 = vld [vmem:[%s16680_s5 + $0xe0] sm:$0xff]   ;;  %v17048_v41 = vshll.u32 %v17032_v27, 16 }
 0x4df   : > { %7264 = vmatprep.mubr.bf16.mxu1 %v6875_v33  ;;  %v6728_v26 = vpop.permute.xlu1 %6727 }
 0x4e0   : > { %7265 = vmatmul.mubr.bf16.gmra.mrb[24].mxu1 %v6859_v40  ;;  %v6867_v28 = vsel %vm5137_vm15, %v15609_v25, %v6728_v26  ;;  %v6497_v25 = vld [vmem:[#allocation3 + $0x64] sm:$0x8]  ;;  %v6503_v40 = vld [vmem:[#allocation3 + $0x94] sm:$0x8] }
 0x4e1   : > { %10669 = vmatpush3.bf16.msra.mxu1 %v11153_v42  ;;  %v6758_v54 = vpop.permute.xlu0 %6757  ;;  %v6558_v15 = vshrl.u32 %v6497_v25, 16  ;;  %v6581_v42 = vor.u32 %v17048_v41, %v6578_v53  ;;  %v11182_v25 = vld [vmem:[%s16682_s7 + $0x24] ss:$8 sps:$4 sm:$0xff]   ;;  %v11189_v53 = vld [vmem:[%s16682_s7 + $0x140] ss:$8 sps:$4 sm:$0xff]  }
 0x4e2   : > { %v6879_v4 = vsel %vm5137_vm15, %v15565_v22, %v6758_v54  ;;  %10670 = vmatprep.subr.bf16.mxu1 %v11154_v29  ;;  %v6863_v22 = vsel %vm5137_vm15, %v15569_v2, %v6726_v51  ;;  %v17041_v2 = vshrl.u32 %v17030_v8, 16  ;;  %v11167_v8 = vld [vmem:[%s16682_s7 + $0x104] ss:$8 sps:$4 sm:$0xff]   ;;  %v17050_v51 = vshrl.u32 %v17034_v21, 16 }
 0x4e3   : > { %7272 = vmatprep.mubr.bf16.mxu1 %v6879_v4  ;;  %v6794_v11 = vpop.permute.xlu1 %6793  ;;  %v6501_v29 = vld [vmem:[#allocation3 + $0x84] sm:$0x8]  ;;  %v10036_v54 = vrot.slane %v6558_v15, 11  ;;  %v6582_v13 = vsel %vm12171_vm14, %v10037_v18, %v6581_v42  ;;  %v11197_v15 = vld [vmem:[%s16682_s7 + $0x154] ss:$8 sps:$4 sm:$0xff]  }
 0x4e4   : > { %v6552_v56 = vrot.slane %v17041_v2, 7  ;;  %v6887_v5 = vsel %vm5137_vm15, %v17047_v39, %v6794_v11  ;;  %v6584_v30 = vshrl.u32 %v6501_v29, 16  ;;  %v6604_v27 = vrot.slane %v17050_v51, 7  ;;  %v11191_v11 = vld [vmem:[%s16682_s7 + $0x144] ss:$8 sps:$4 sm:$0xff]  }
 0x4e5   : > { %10671 = vmatpush3.bf16.msra.mxu1 %v11155_v14  ;;  %v6760_v60 = vpop.permute.xlu0 %6759  ;;  %v17049_v14 = vshll.u32 %v17033_v45, 16  ;;  %v11203_v39 = vld [vmem:[%s16682_s7 + $0x164] ss:$8 sps:$4 sm:$0xff]   ;;  %v11204_v18 = vld [vmem:[%s16682_s7 + $0x60] ss:$8 sps:$4 sm:$0xff]  }
 0x4e6   : > { %10672 = vmatprep.subr.bf16.mxu1 %v11156_v20  ;;  %v6883_v63 = vsel %vm5137_vm15, %v15589_v34, %v6760_v60  ;;  %v11161_v34 = vld [vmem:[%s16680_s5 + $0xb0] sm:$0xff]   ;;  %v6555_v32 = vor.u32 %v17043_v48, %v6552_v56  ;;  %v6597_v20 = vshrl.u32 %v6503_v40, 16  ;;  %v6607_v43 = vor.u32 %v17051_v55, %v6604_v27  ;;  %v11206_v41 = vld [vmem:[%s16682_s7 + $0x64] ss:$8 sps:$4 sm:$0xff]   ;;  %v11216_v51 = vld [vmem:[%s16682_s7 + $0x80] ss:$8 sps:$4 sm:$0xff]  }
 0x4e7   : > { %v6568_v4 = vor.u32 %v17049_v14, %v6565_v0  ;;  %v6796_v60 = vpop.permute.xlu1 %6795  ;;  %v17053_v48 = vld [vmem:[#allocation34_spill] sm:$0xff] }
 0x4e8   : > { %7273 = vmatmul.mubr.bf16.gmra.mrb[28].mxu1 %v6863_v22  ;;  %v11198_v0 = vld [vmem:[%s16682_s7 + $0x50] ss:$8 sps:$4 sm:$0xff]   ;;  %v11218_v27 = vld [vmem:[%s16682_s7 + $0x84] ss:$8 sps:$4 sm:$0xff]   ;;  %v11228_v55 = vld [vmem:[%s16682_s7 + $0xa0] ss:$8 sps:$4 sm:$0xff]  }
 0x4e9   : > { %10673 = vmatpush3.bf16.msra.mxu1 %v11157_v35  ;;  %7280 = vmatprep.mubr.bf16.mxu1 %v6883_v63  ;;  %v6834_v16 = vpop.permute.xlu0 %6833  ;;  %v6569_v63 = vsel %vm12171_vm14, %v10036_v54, %v6568_v4  ;;  %v11207_v40 = vld [vmem:[%s16682_s7 + $0x170] ss:$8 sps:$4 sm:$0xff]   ;;  %v11212_v4 = vld [vmem:[%s16682_s7 + $0x74] ss:$8 sps:$4 sm:$0xff]  }
 0x4ea   : > { %10674 = vmatprep.subr.bf16.mxu1 %v11158_v23  ;;  %v6903_v44 = vsel %vm5137_vm15, %v15620_v37, %v6834_v16  ;;  %v6556_v37 = vsel %vm12171_vm14, %v10035_v3, %v6555_v32  ;;  %v11599_v23 = vld [vmem:[#allocation3 + $0x48] sm:$0xf]  ;;  %v10066_v47 = vcombine.low %v6569_v63, %v6582_v13  ;;  %v17052_v3 = vld [vmem:[#allocation33_spill] sm:$0xff] }
 0x4eb   : > { %v10065_v59 = vcombine.low %v6543_v19, %v6556_v37  ;;  %v10057_v22 = vcombine.low %v15441_v36, %v11599_v23  ;;  %v6798_v26 = vpop.permute.xlu1 %6797  ;;  %v10059_v32 = vcombine.low %v17053_v48, %v17052_v3  ;;  %v11183_v37 = vld [vmem:[%s16682_s7 + $0x130] ss:$8 sps:$4 sm:$0xff]   ;;  %v11194_v19 = vld [vmem:[%s16682_s7 + $0x44] ss:$8 sps:$4 sm:$0xff]   ;;  %v11213_v13 = vld [vmem:[%s16682_s7 + $0x180] ss:$8 sps:$4 sm:$0xff]  }
 0x4ec   : > { %v11210_v14 = vld [vmem:[%s16682_s7 + $0x70] ss:$8 sps:$4 sm:$0xff]   ;;  %v11249_v3 = vld [vmem:[%s16682_s7 + $0x1e0] ss:$8 sps:$4 sm:$0xff]   ;;  %v11251_v48 = vld [vmem:[%s16682_s7 + $0x1e4] ss:$8 sps:$4 sm:$0xff]  }
 0x4ed   : > { %10675 = vmatpush3.bf16.msra.mxu1 %v11159_v9  ;;  %v6891_v45 = vsel %vm5137_vm15, %v10057_v22, %v6796_v60  ;;  %v10038_v9 = vrot.slane %v6584_v30, 11  ;;  %v11215_v30 = vld [vmem:[%s16682_s7 + $0x184] ss:$8 sps:$4 sm:$0xff]   ;;  %v11219_v22 = vld [vmem:[%s16682_s7 + $0x190] ss:$8 sps:$4 sm:$0xff]  }
 0x4ee   : > { %10676 = vmatprep.subr.bf16.mxu1 %v11160_v31  ;;  %v10039_v31 = vrot.slane %v6597_v20, 11 }
 0x4ef   : > { %v6595_v56 = vsel %vm12171_vm14, %v10038_v9, %v15631_v62  ;;  %v11225_v9 = vld [vmem:[%s16682_s7 + $0x1a0] ss:$8 sps:$4 sm:$0xff]  }
 0x4f0   : > { %7281 = vmatmul.mubr.bf16.gmra.mrb[32].mxu1 %v6867_v28  ;;  %v6608_v36 = vsel %vm12171_vm14, %v10039_v31, %v6607_v43  ;;  %v6800_v28 = vpop.permute.xlu1 %6799  ;;  %v11227_v31 = vld [vmem:[%s16682_s7 + $0x1a4] ss:$8 sps:$4 sm:$0xff]  }
 0x4f1   : > { %10677 = vmatpush3.bf16.msra.mxu1 %v11161_v34  ;;  %7321 = vmatprep.mubr.bf16.mxu1 %v6903_v44  ;;  %v6836_v50 = vpop.permute.xlu0 %6835  ;;  %v11600_v34 = vld [vmem:[#allocation3 + $0x58] sm:$0xf]  ;;  %v10067_v49 = vcombine.low %v6595_v56, %v6608_v36  ;;  %v6899_v62 = vsel %vm5137_vm15, %v10059_v32, %v6800_v28  ;;  %v11173_v44 = vld [vmem:[%s16682_s7 + $0x114] ss:$8 sps:$4 sm:$0xff]   ;;  %v11230_v43 = vld [vmem:[%s16682_s7 + $0xa4] ss:$8 sps:$4 sm:$0xff]  }
 0x4f2   : > { %10678 = vmatprep.subr.bf16.mxu1 %v11162_v1  ;;  %v6907_v33 = vsel %vm5137_vm15, %v10065_v59, %v6836_v50  ;;  %v10058_v46 = vcombine.low %v11600_v34, %v11601_v61  ;;  %v11192_v50 = vld [vmem:[%s16682_s7 + $0x40] ss:$8 sps:$4 sm:$0xff]   ;;  %v11236_v56 = vld [vmem:[%s16682_s7 + $0xb4] ss:$8 sps:$4 sm:$0xff]   ;;  %v11231_v36 = vld [vmem:[%s16682_s7 + $0x1b0] ss:$8 sps:$4 sm:$0xff]  }
 0x4f3   : > { %v11201_v59 = vld [vmem:[%s16682_s7 + $0x160] ss:$8 sps:$4 sm:$0xff]   ;;  %v11239_v34 = vld [vmem:[%s16682_s7 + $0x1c4] ss:$8 sps:$4 sm:$0xff]   ;;  %v11246_v28 = vld [vmem:[%s16682_s7 + $0xd0] ss:$8 sps:$4 sm:$0xff]  }
 0x4f4   : > { %v6895_v21 = vsel %vm5137_vm15, %v10058_v46, %v6798_v26  ;;  %v11234_v26 = vld [vmem:[%s16682_s7 + $0xb0] ss:$8 sps:$4 sm:$0xff]   ;;  %v11240_v61 = vld [vmem:[%s16682_s7 + $0xc0] ss:$8 sps:$4 sm:$0xff]   ;;  %v11242_v46 = vld [vmem:[%s16682_s7 + $0xc4] ss:$8 sps:$4 sm:$0xff]  }
 0x4f5   : > { %10679 = vmatpush3.bf16.msra.mxu1 %v11163_v10  ;;  %v6838_v35 = vpop.permute.xlu0 %6837  ;;  %v11176_v10 = vld [vmem:[%s16682_s7 + $0x14] ss:$8 sps:$4 sm:$0xff]   ;;  %v11252_v32 = vld [vmem:[%s16682_s7 + $0xe0] ss:$8 sps:$4 sm:$0xff]  }
 0x4f6   : > { %9087 = vmatprep.subr.bf16.mxu1 %v11167_v8  ;;  %v6911_v2 = vsel %vm5137_vm15, %v10066_v47, %v6838_v35  ;;  %9048 = vmatprep.subr.bf16.mxu0 %v11176_v10  ;;  %v11185_v8 = vld [vmem:[%s16682_s7 + $0x134] ss:$8 sps:$4 sm:$0xff]   ;;  %v11222_v47 = vld [vmem:[%s16682_s7 + $0x90] ss:$8 sps:$4 sm:$0xff]  }
 0x4f7   : > { %9049 = vmatpush1.bf16.msra.mxu0 %v11174_v17  ;;  %v11221_v35 = vld [vmem:[%s16682_s7 + $0x194] ss:$8 sps:$4 sm:$0xff]   ;;  %v11255_v17 = vld [vmem:[%s16682_s7 + $0x1f0] ss:$8 sps:$4 sm:$0xff]  }
 0x4f8   : > { %7322 = vmatmul.mubr.bf16.vlgmr.msra.gmra.mrb[36].mxu1 %v6887_v5  ;;  %9050 = vmatprep.subr.bf16.mxu0 %v11182_v25  ;;  %v11258_v10 = vld [vmem:[%s16682_s7 + $0xf0] ss:$8 sps:$4 sm:$0xff]  }
 0x4f9   : > { %7329 = vmatprep.mubr.bf16.mxu1 %v6907_v33  ;;  %9088 = vmatpush1.bf16.msra.mxu1 %v11165_v58  ;;  %v6840_v16 = vpop.permute.xlu0 %6839  ;;  %v11200_v58 = vld [vmem:[%s16682_s7 + $0x54] ss:$8 sps:$4 sm:$0xff]  }
 0x4fa   : > { %v6915_v1 = vsel %vm5137_vm15, %v10067_v49, %v6840_v16  ;;  %9089 = vmatprep.subr.bf16.mxu1 %v11173_v44  ;;  %v11209_v33 = vld [vmem:[%s16682_s7 + $0x174] ss:$8 sps:$4 sm:$0xff]   ;;  %v11237_v16 = vld [vmem:[%s16682_s7 + $0x1c0] ss:$8 sps:$4 sm:$0xff]  }
 0x4fb   : > { %9051 = vmatpush1.bf16.msra.mxu0 %v11180_v52  ;;  %v11245_v49 = vld [vmem:[%s16682_s7 + $0x1d4] ss:$8 sps:$4 sm:$0xff]  }
 0x4fc   : > { %9052 = vmatprep.subr.bf16.mxu0 %v11188_v12  ;;  %v11260_v44 = vld [vmem:[%s16682_s7 + $0xf4] ss:$8 sps:$4 sm:$0xff]  }
 0x4fd   : > { %9090 = vmatpush1.bf16.msra.mxu1 %v11171_v57  ;;  %v11257_v57 = vld [vmem:[%s16682_s7 + $0x1f4] ss:$8 sps:$4 sm:$0xff]  }
 0x4fe   : > { %9091 = vmatprep.subr.bf16.mxu1 %v11179_v6 }
 0x4ff   : > { %9053 = vmatpush1.bf16.msra.mxu0 %v11186_v38 }
 0x500   : > { %7330 = vmatmul.mubr.bf16.gmra.mrb[40].mxu1 %v6891_v45  ;;  %9054 = vmatprep.subr.bf16.mxu0 %v11194_v19  ;;  %v11224_v45 = vld [vmem:[%s16682_s7 + $0x94] ss:$8 sps:$4 sm:$0xff]  }
 0x501   : > { %7337 = vmatprep.mubr.bf16.mxu1 %v6911_v2  ;;  %9092 = vmatpush1.bf16.msra.mxu1 %v11177_v7  ;;  %v11233_v2 = vld [vmem:[%s16682_s7 + $0x1b4] ss:$8 sps:$4 sm:$0xff]   ;;  %v11263_v7 = vld [vmem:[%s16682_s7 + $0x204] ss:$8 sps:$4 sm:$0xff]  }
 0x502   : > { %9093 = vmatprep.subr.bf16.mxu1 %v11185_v8 }
 0x503   : > { %9055 = vmatpush1.bf16.msra.mxu0 %v11192_v50 }
 0x504   : > { %9056 = vmatprep.subr.bf16.mxu0 %v11200_v58 }
 0x505   : > { %9094 = vmatpush1.bf16.msra.mxu1 %v11183_v37 }
 0x506   : > { %9095 = vmatprep.subr.bf16.mxu1 %v11191_v11 }
 0x507   : > { %9057 = vmatpush1.bf16.msra.mxu0 %v11198_v0 }
 0x508   : > { %7338 = vmatmul.mubr.bf16.gmra.mrb[44].mxu1 %v6895_v21  ;;  %9058 = vmatprep.subr.bf16.mxu0 %v11206_v41  ;;  %v11248_v21 = vld [vmem:[%s16682_s7 + $0xd4] ss:$8 sps:$4 sm:$0xff]  }
 0x509   : > { %7345 = vmatprep.mubr.bf16.mxu1 %v6915_v1  ;;  %9096 = vmatpush1.bf16.msra.mxu1 %v11189_v53  ;;  %v11243_v1 = vld [vmem:[%s16682_s7 + $0x1d0] ss:$8 sps:$4 sm:$0xff]  }
 0x50a   : > { %9097 = vmatprep.subr.bf16.mxu1 %v11197_v15 }
 0x50b   : > { %9059 = vmatpush1.bf16.msra.mxu0 %v11204_v18 }
 0x50c   : > { %9060 = vmatprep.subr.bf16.mxu0 %v11212_v4 }
 0x50d   : > { %9098 = vmatpush1.bf16.msra.mxu1 %v11195_v24 }
 0x50e   : > { %9099 = vmatprep.subr.bf16.mxu1 %v11203_v39 }
 0x50f   : > { %9061 = vmatpush1.bf16.msra.mxu0 %v11210_v14 }
 0x510   : > { %7346 = vmatmul.mubr.bf16.gmra.mrb[48].mxu1 %v6899_v62  ;;  %9062 = vmatprep.subr.bf16.mxu0 %v11218_v27  ;;  %v11254_v62 = vld [vmem:[%s16682_s7 + $0xe4] ss:$8 sps:$4 sm:$0xff]  }
 0x511   : > { %9100 = vmatpush1.bf16.msra.mxu1 %v11201_v59 }
 0x512   : > { %9101 = vmatprep.subr.bf16.mxu1 %v11209_v33 }
 0x513   : > { %9063 = vmatpush1.bf16.msra.mxu0 %v11216_v51 }
 0x514   : > { %9064 = vmatprep.subr.bf16.mxu0 %v11224_v45 }
 0x515   : > { %9102 = vmatpush1.bf16.msra.mxu1 %v11207_v40 }
 0x516   : > { %9103 = vmatprep.subr.bf16.mxu1 %v11215_v30  ;;  %v10076_v30 = vld [vmem:[%s16681_s6] ss:$0 sm:$0xff] }
 0x517   : > { %9065 = vmatpush1.bf16.msra.mxu0 %v11222_v47 }
 0x518   : > { %9066 = vmatprep.subr.bf16.mxu0 %v11230_v43 }
 0x519   : > { %9104 = vmatpush1.bf16.msra.mxu1 %v11213_v13 }
 0x51a   : > { %9105 = vmatprep.subr.bf16.mxu1 %v11221_v35 }
 0x51b   : > { %9067 = vmatpush1.bf16.msra.mxu0 %v11228_v55 }
 0x51c   : > { %9068 = vmatprep.subr.bf16.mxu0 %v11236_v56 }
 0x51d   : > { %9106 = vmatpush1.bf16.msra.mxu1 %v11219_v22 }
 0x51e   : > { %9107 = vmatprep.subr.bf16.mxu1 %v11227_v31 }
 0x51f   : > { %9069 = vmatpush1.bf16.msra.mxu0 %v11234_v26 }
 0x520   : > { %9070 = vmatprep.subr.bf16.mxu0 %v11242_v46 }
 0x521   : > { %9108 = vmatpush1.bf16.msra.mxu1 %v11225_v9 }
 0x522   : > { %9109 = vmatprep.subr.bf16.mxu1 %v11233_v2 }
 0x523   : > { %9071 = vmatpush1.bf16.msra.mxu0 %v11240_v61 }
 0x524   : > { %9072 = vmatprep.subr.bf16.mxu0 %v11248_v21 }
 0x525   : > { %9110 = vmatpush1.bf16.msra.mxu1 %v11231_v36 }
 0x526   : > { %9111 = vmatprep.subr.bf16.mxu1 %v11239_v34 }
 0x527   : > { %9073 = vmatpush1.bf16.msra.mxu0 %v11246_v28 }
 0x528   : > { %9074 = vmatprep.subr.bf16.mxu0 %v11254_v62 }
 0x529   : > { %9112 = vmatpush1.bf16.msra.mxu1 %v11237_v16 }
 0x52a   : > { %9113 = vmatprep.subr.bf16.mxu1 %v11245_v49 }
 0x52b   : > { %9075 = vmatpush1.bf16.msra.mxu0 %v11252_v32 }
 0x52c   : > { %9076 = vmatprep.subr.bf16.mxu0 %v11260_v44 }
 0x52d   : > { %9114 = vmatpush1.bf16.msra.mxu1 %v11243_v1 }
 0x52e   : > { %9115 = vmatprep.subr.bf16.mxu1 %v11251_v48 }
 0x52f   : > { %9077 = vmatpush1.bf16.msra.mxu0 %v11258_v10 }
 0x531   : > { %9116 = vmatpush1.bf16.msra.mxu1 %v11249_v3 }
 0x532   : > { %9117 = vmatprep.subr.bf16.mxu1 %v11257_v57 }
 0x535   : > { %9118 = vmatpush1.bf16.msra.mxu1 %v11255_v17 }
 0x536   : > { %9128 = vmatprep.subr.bf16.mxu1 %v11263_v7 }
 0x542   : > { %v15830_v5 = vpop.f32.mrb[204].mxu0 }
 0x543   : > { %v15838_v42 = vpop.f32.mrb[205].mxu0 }
 0x544   : > { %v15843_v29 = vpop.f32.mrb[206].mxu0 }
 0x545   : > { %v15848_v54 = vpop.f32.mrb[207].mxu0 }
 0x54a   : > { %v15862_v20 = vpop.f32.mrb[208].mxu0 }
 0x54b   : > { %v15870_v60 = vpop.f32.mrb[209].mxu0 }
 0x54c   : > { %v15875_v23 = vpop.f32.mrb[210].mxu0 }
 0x54d   : > { %v15880_v63 = vpop.f32.mrb[211].mxu0 }
 0x5ab   : > { %v10640_v6 = vpop.f32.mrb[20].mxu1 }
 0x5ac   : > { %v10641_v52 = vpop.f32.mrb[21].mxu1 }
 0x5ad   : > { %v10642_v25 = vadd.f32 %v10641_v52, %v10640_v6  ;;  %v10643_v8 = vpop.f32.mrb[22].mxu1 }
 0x5ae   : > { %v10644_v37 = vpop.f32.mrb[23].mxu1 }
 0x5af   : > { %v10645_v38 = vadd.f32 %v10644_v37, %v10643_v8  ;;  %v7259_v35 = vadd.f32 %v10642_v25, %v10076_v30 }
 0x5b1   : > { %v7262_v9 = vadd.f32 %v10645_v38, %v10076_v30 }
 0x5b3   : > { %v10646_v12 = vpop.f32.mrb[24].mxu1 }
 0x5b4   : > { %v10647_v53 = vpop.f32.mrb[25].mxu1 }
 0x5b5   : > { %v10648_v11 = vadd.f32 %v10647_v53, %v10646_v12  ;;  %v10649_v50 = vpop.f32.mrb[26].mxu1 }
 0x5b6   : > { %v10650_v19 = vpop.f32.mrb[27].mxu1 }
 0x5b7   : > { %v10651_v15 = vadd.f32 %v10650_v19, %v10649_v50  ;;  %v7267_v16 = vadd.f32 %v10648_v11, %v10076_v30 }
 0x5b9   : > { %v7270_v1 = vadd.f32 %v10651_v15, %v10076_v30 }
 0x5bb   : > { %v10652_v24 = vpop.f32.mrb[28].mxu1 }
 0x5bc   : > { %v10653_v0 = vpop.f32.mrb[29].mxu1 }
 0x5bd   : > { %v10654_v58 = vadd.f32 %v10653_v0, %v10652_v24  ;;  %v10655_v59 = vpop.f32.mrb[30].mxu1 }
 0x5be   : > { %v10656_v39 = vpop.f32.mrb[31].mxu1 }
 0x5bf   : > { %v10657_v18 = vadd.f32 %v10656_v39, %v10655_v59  ;;  %v7275_v44 = vadd.f32 %v10654_v58, %v10076_v30 }
 0x5c1   : > { %v7278_v25 = vadd.f32 %v10657_v18, %v10076_v30 }
 0x5c3   : > { %v10658_v41 = vpop.f32.mrb[32].mxu1 }
 0x5c4   : > { %v10659_v33 = vpop.f32.mrb[33].mxu1 }
 0x5c5   : > { %v10660_v40 = vadd.f32 %v10659_v33, %v10658_v41  ;;  %v10661_v14 = vpop.f32.mrb[34].mxu1 }
 0x5c6   : > { %v10662_v4 = vpop.f32.mrb[35].mxu1 }
 0x5c7   : > { %v10663_v13 = vadd.f32 %v10662_v4, %v10661_v14  ;;  %v7283_v0 = vadd.f32 %v10660_v40, %v10076_v30  ;;  %v11266_v40 = vld [vmem:[%s16682_s7 + $0x214] ss:$8 sps:$4 sm:$0xff]  }
 0x5cb   : > { %v10680_v51 = vpop.f32.mrb[36].mxu1 }
 0x5cc   : > { %v10681_v27 = vpop.f32.mrb[37].mxu1 }
 0x5cd   : > { %v10682_v22 = vadd.f32 %v10681_v27, %v10680_v51  ;;  %v10683_v47 = vpop.f32.mrb[38].mxu1  ;;  %v7286_v51 = vadd.f32 %v10663_v13, %v10076_v30  ;;  %v11264_v30 = vld [vmem:[%s16682_s7 + $0x210] ss:$8 sps:$4 sm:$0xff]  }
 0x5ce   : > { %v10684_v45 = vpop.f32.mrb[39].mxu1 }
 0x5cf   : > { %v7324_v31 = vadd.f32 %v10682_v22, %v7259_v35  ;;  %v10685_v55 = vadd.f32 %v10684_v45, %v10683_v47 }
 0x5d1   : > { %v7389_v43 = vadd.f32 %v15838_v42, %v7324_v31  ;;  %v7327_v2 = vadd.f32 %v10685_v55, %v7262_v9 }
 0x5d3   : > { %v7392_v56 = vadd.f32 %v15848_v54, %v7327_v2  ;;  %v10686_v36 = vpop.f32.mrb[40].mxu1  ;;  %v7419_v34 = vmax.f32 %v7389_v43, 0.0  ;;  %v11269_v2 = vld [vmem:[%s16682_s7 + $0x224] ss:$8 sps:$4 sm:$0xff]  }
 0x5d4   : > { %v10687_v26 = vpop.f32.mrb[41].mxu1 }
 0x5d5   : > { %v7420_v61 = vmax.f32 %v7392_v56, 0.0  ;;  %v10688_v46 = vadd.f32 %v10687_v26, %v10686_v36  ;;  %v10689_v49 = vpop.f32.mrb[42].mxu1 }
 0x5d6   : > { %v10690_v21 = vpop.f32.mrb[43].mxu1 }
 0x5d7   : > { %v7427_v28 = vmax.f32 %v7419_v34, %v7420_v61  ;;  %v7332_v3 = vadd.f32 %v10688_v46, %v7267_v16  ;;  %v10691_v48 = vadd.f32 %v10690_v21, %v10689_v49  ;;  %v11272_v61 = vld [vmem:[%s16682_s7 + $0x234] ss:$8 sps:$4 sm:$0xff]   ;;  %v11275_v49 = vld [vmem:[%s16682_s7 + $0x244] ss:$8 sps:$4 sm:$0xff]   ;;  %v11273_v21 = vld [vmem:[%s16682_s7 + $0x240] ss:$8 sps:$4 sm:$0xff]  }
 0x5d9   : > { %7431 = vst [vmem:[#allocation6] sm:$0xff] %v7427_v28  ;;  %v7397_v32 = vadd.f32 %v15830_v5, %v7332_v3  ;;  %v7335_v62 = vadd.f32 %v10691_v48, %v7270_v1  ;;  %v11278_v1 = vld [vmem:[%s16682_s7 + $0x254] ss:$8 sps:$4 sm:$0xff]   ;;  %v11276_v28 = vld [vmem:[%s16682_s7 + $0x250] ss:$8 sps:$4 sm:$0xff]  }
 0x5da   : > { %v11281_v3 = vld [vmem:[%s16682_s7 + $0x264] ss:$8 sps:$4 sm:$0xff]   ;;  %v11279_v48 = vld [vmem:[%s16682_s7 + $0x260] ss:$8 sps:$4 sm:$0xff]  }
 0x5db   : > { %v7400_v42 = vadd.f32 %v15843_v29, %v7335_v62  ;;  %v10692_v57 = vpop.f32.mrb[44].mxu1  ;;  %v7421_v17 = vmax.f32 %v7397_v32, 0.0  ;;  %v11284_v32 = vld [vmem:[%s16682_s7 + $0x274] ss:$8 sps:$4 sm:$0xff]   ;;  %v11282_v62 = vld [vmem:[%s16682_s7 + $0x270] ss:$8 sps:$4 sm:$0xff]  }
 0x5dc   : > { %v10693_v54 = vpop.f32.mrb[45].mxu1 }
 0x5dd   : > { %v7422_v10 = vmax.f32 %v7400_v42, 0.0  ;;  %v10694_v7 = vadd.f32 %v10693_v54, %v10692_v57  ;;  %v10695_v6 = vpop.f32.mrb[46].mxu1  ;;  %v11287_v42 = vld [vmem:[%s16682_s7 + $0x284] ss:$8 sps:$4 sm:$0xff]   ;;  %v11285_v57 = vld [vmem:[%s16682_s7 + $0x280] ss:$8 sps:$4 sm:$0xff]  }
 0x5de   : > { %v10696_v52 = vpop.f32.mrb[47].mxu1  ;;  %v11290_v54 = vld [vmem:[%s16682_s7 + $0x294] ss:$8 sps:$4 sm:$0xff]  }
 0x5df   : > { %v7428_v8 = vmax.f32 %v7421_v17, %v7422_v10  ;;  %v7340_v37 = vadd.f32 %v10694_v7, %v7275_v44  ;;  %v10697_v38 = vadd.f32 %v10696_v52, %v10695_v6  ;;  %v11288_v44 = vld [vmem:[%s16682_s7 + $0x290] ss:$8 sps:$4 sm:$0xff]   ;;  %v11293_v17 = vld [vmem:[%s16682_s7 + $0x2a4] ss:$8 sps:$4 sm:$0xff]   ;;  %v11291_v10 = vld [vmem:[%s16682_s7 + $0x2a0] ss:$8 sps:$4 sm:$0xff]  }
 0x5e0   : > { %v7435_v12 = vld [vmem:[#allocation6] ss:$2 sm:$0xf]  ;;  %v7443_v53 = vld [vmem:[#allocation6 + $0x1] ss:$2 sm:$0xf] }
 0x5e1   : > { %7432 = vst [vmem:[#allocation6 + $0x8] sm:$0xff] %v7428_v8  ;;  %v7405_v5 = vadd.f32 %v15870_v60, %v7340_v37  ;;  %v7343_v11 = vadd.f32 %v10697_v38, %v7278_v25  ;;  %v7450_v50 = vmax.f32 %v7435_v12, %v7443_v53  ;;  %v11261_v60 = vld [vmem:[%s16682_s7 + $0x200] ss:$8 sps:$4 sm:$0xff]   ;;  %v11296_v7 = vld [vmem:[%s16682_s7 + $0x2b4] ss:$8 sps:$4 sm:$0xff]  }
 0x5e2   : > { %v11294_v6 = vld [vmem:[%s16682_s7 + $0x2b0] ss:$8 sps:$4 sm:$0xff]   ;;  %v11299_v52 = vld [vmem:[%s16682_s7 + $0x2c4] ss:$8 sps:$4 sm:$0xff]   ;;  %v11297_v25 = vld [vmem:[%s16682_s7 + $0x2c0] ss:$8 sps:$4 sm:$0xff]  }
 0x5e3   : > { %v7408_v29 = vadd.f32 %v15880_v63, %v7343_v11  ;;  %v10698_v19 = vpop.f32.mrb[48].mxu1  ;;  %v7455_v15 = vrot.slane %v7450_v50, 1  ;;  %v7459_v24 = vrot.slane %v7450_v50, 3  ;;  %v7423_v58 = vmax.f32 %v7405_v5, 0.0  ;;  %v11302_v8 = vld [vmem:[%s16682_s7 + $0x2d4] ss:$8 sps:$4 sm:$0xff]  }
 0x5e4   : > { %v10699_v59 = vpop.f32.mrb[49].mxu1  ;;  %v7457_v39 = vrot.slane %v7450_v50, 2  ;;  %v7482_v35 = vpack.c.bf16 %v7450_v50, %v7450_v50  ;;  %v11300_v37 = vld [vmem:[%s16682_s7 + $0x2d0] ss:$8 sps:$4 sm:$0xff]   ;;  %v11305_v38 = vld [vmem:[%s16682_s7 + $0x2e4] ss:$8 sps:$4 sm:$0xff]  }
 0x5e5   : > { %v7424_v18 = vmax.f32 %v7408_v29, 0.0  ;;  %v10700_v41 = vadd.f32 %v10699_v59, %v10698_v19  ;;  %v10701_v33 = vpop.f32.mrb[50].mxu1  ;;  %v7483_v14 = vpack.c.bf16 %v7455_v15, %v7455_v15  ;;  %v7485_v4 = vpack.c.bf16 %v7459_v24, %v7459_v24  ;;  %v11303_v12 = vld [vmem:[%s16682_s7 + $0x2e0] ss:$8 sps:$4 sm:$0xff]   ;;  %v11308_v53 = vld [vmem:[%s16682_s7 + $0x2f4] ss:$8 sps:$4 sm:$0xff]  }
 0x5e6   : > { %v10702_v27 = vpop.f32.mrb[51].mxu1  ;;  %v7484_v63 = vpack.c.bf16 %v7457_v39, %v7457_v39  ;;  %v11306_v5 = vld [vmem:[%s16682_s7 + $0x2f0] ss:$8 sps:$4 sm:$0xff]   ;;  %v11311_v11 = vld [vmem:[%s16682_s7 + $0x304] ss:$8 sps:$4 sm:$0xff]  }
 0x5e7   : > { %v7429_v22 = vmax.f32 %v7423_v58, %v7424_v18  ;;  %v7348_v47 = vadd.f32 %v10700_v41, %v7283_v0  ;;  %v10703_v45 = vadd.f32 %v10702_v27, %v10701_v33  ;;  %9078 = vmatprep.mubr.bf16.mxu0 %v7483_v14  ;;  %9119 = vmatprep.mubr.bf16.mxu1 %v7485_v4  ;;  %v11309_v29 = vld [vmem:[%s16682_s7 + $0x300] ss:$8 sps:$4 sm:$0xff]   ;;  %v11314_v15 = vld [vmem:[%s16682_s7 + $0x314] ss:$8 sps:$4 sm:$0xff]   ;;  %v11312_v0 = vld [vmem:[%s16682_s7 + $0x310] ss:$8 sps:$4 sm:$0xff]  }
 0x5e8   : > { %9079 = vmatmul.mubr.bf16.vlgmr.msra.gmra.mrb[212].mxu0 %v7482_v35  ;;  %9120 = vmatmul.mubr.bf16.vlgmr.msra.gmra.mrb[52].mxu1 %v7484_v63  ;;  %v7437_v9 = vld [vmem:[#allocation6 + $0x8] ss:$2 sm:$0xf]  ;;  %v7445_v31 = vld [vmem:[#allocation6 + $0x9] ss:$2 sm:$0xf] }
 0x5e9   : > { %7433 = vst [vmem:[#allocation6 + $0x10] sm:$0xff] %v7429_v22  ;;  %v7413_v55 = vadd.f32 %v15862_v20, %v7348_v47  ;;  %v7351_v13 = vadd.f32 %v10703_v45, %v7286_v51  ;;  %9129 = vmatpush1.bf16.msra.mxu1 %v11261_v60  ;;  %v15982_v43 = vmax.f32 %v7437_v9, %v7445_v31  ;;  %v11267_v20 = vld [vmem:[%s16682_s7 + $0x220] ss:$8 sps:$4 sm:$0xff]   ;;  %v11317_v58 = vld [vmem:[%s16682_s7 + $0x324] ss:$8 sps:$4 sm:$0xff]  }
 0x5ea   : > { %9130 = vmatprep.subr.bf16.mxu1 %v11266_v40  ;;  %v11315_v59 = vld [vmem:[%s16682_s7 + $0x320] ss:$8 sps:$4 sm:$0xff]   ;;  %v11320_v39 = vld [vmem:[%s16682_s7 + $0x334] ss:$8 sps:$4 sm:$0xff]   ;;  %v11318_v18 = vld [vmem:[%s16682_s7 + $0x330] ss:$8 sps:$4 sm:$0xff]  }
 0x5eb   : > { %v7416_v56 = vadd.f32 %v15875_v23, %v7351_v13  ;;  %v7462_v36 = vrot.slane %v15982_v43, 1  ;;  %v7425_v26 = vmax.f32 %v7413_v55, 0.0  ;;  %v11270_v23 = vld [vmem:[%s16682_s7 + $0x230] ss:$8 sps:$4 sm:$0xff]   ;;  %v7466_v50 = vrot.slane %v15982_v43, 3 }
 0x5ec   : > { %v7486_v19 = vpack.c.bf16 %v15982_v43, %v15982_v43  ;;  %v11323_v41 = vld [vmem:[%s16682_s7 + $0x344] ss:$8 sps:$4 sm:$0xff]   ;;  %v11321_v33 = vld [vmem:[%s16682_s7 + $0x340] ss:$8 sps:$4 sm:$0xff]   ;;  %v11326_v14 = vld [vmem:[%s16682_s7 + $0x354] ss:$8 sps:$4 sm:$0xff]  }
 0x5ed   : > { %v7426_v16 = vmax.f32 %v7416_v56, 0.0  ;;  %9131 = vmatpush1.bf16.msra.mxu1 %v11264_v30  ;;  %v7487_v34 = vpack.c.bf16 %v7462_v36, %v7462_v36  ;;  %v7489_v24 = vpack.c.bf16 %v7466_v50, %v7466_v50  ;;  %v11324_v4 = vld [vmem:[%s16682_s7 + $0x350] ss:$8 sps:$4 sm:$0xff]   ;;  %v11329_v60 = vld [vmem:[%s16682_s7 + $0x364] ss:$8 sps:$4 sm:$0xff]  }
 0x5ee   : > { %9132 = vmatprep.subr.bf16.mxu1 %v11269_v2  ;;  %v11327_v51 = vld [vmem:[%s16682_s7 + $0x360] ss:$8 sps:$4 sm:$0xff]   ;;  %v11332_v27 = vld [vmem:[%s16682_s7 + $0x374] ss:$8 sps:$4 sm:$0xff]   ;;  %v11330_v35 = vld [vmem:[%s16682_s7 + $0x370] ss:$8 sps:$4 sm:$0xff]  }
 0x5ef   : > { %v7430_v46 = vmax.f32 %v7425_v26, %v7426_v16  ;;  %9160 = vmatprep.mubr.bf16.mxu1 %v7487_v34  ;;  %v11335_v63 = vld [vmem:[%s16682_s7 + $0x384] ss:$8 sps:$4 sm:$0xff]   ;;  %v11333_v40 = vld [vmem:[%s16682_s7 + $0x380] ss:$8 sps:$4 sm:$0xff]   ;;  %v11338_v22 = vld [vmem:[%s16682_s7 + $0x394] ss:$8 sps:$4 sm:$0xff]  }
 0x5f0   : > { %v11336_v47 = vld [vmem:[%s16682_s7 + $0x390] ss:$8 sps:$4 sm:$0xff]   ;;  %v11341_v45 = vld [vmem:[%s16682_s7 + $0x3a4] ss:$8 sps:$4 sm:$0xff]   ;;  %v11339_v9 = vld [vmem:[%s16682_s7 + $0x3a0] ss:$8 sps:$4 sm:$0xff]  }
 0x5f1   : > { %7434 = vst [vmem:[#allocation6 + $0x18] sm:$0xff] %v7430_v46  ;;  %9133 = vmatpush1.bf16.msra.mxu1 %v11267_v20  ;;  %v11344_v31 = vld [vmem:[%s16682_s7 + $0x3b4] ss:$8 sps:$4 sm:$0xff]   ;;  %v11342_v55 = vld [vmem:[%s16682_s7 + $0x3b0] ss:$8 sps:$4 sm:$0xff]  }
 0x5f2   : > { %9134 = vmatprep.subr.bf16.mxu1 %v11272_v61  ;;  %v11347_v13 = vld [vmem:[%s16682_s7 + $0x3c4] ss:$8 sps:$4 sm:$0xff]   ;;  %v11345_v30 = vld [vmem:[%s16682_s7 + $0x3c0] ss:$8 sps:$4 sm:$0xff]   ;;  %v11350_v2 = vld [vmem:[%s16682_s7 + $0x3d4] ss:$8 sps:$4 sm:$0xff]  }
 0x5f3   : > { %v11348_v56 = vld [vmem:[%s16682_s7 + $0x3d0] ss:$8 sps:$4 sm:$0xff]   ;;  %v11353_v36 = vld [vmem:[%s16682_s7 + $0x3e4] ss:$8 sps:$4 sm:$0xff]   ;;  %v11351_v20 = vld [vmem:[%s16682_s7 + $0x3e0] ss:$8 sps:$4 sm:$0xff]  }
 0x5f4   : > { %v7439_v26 = vld [vmem:[#allocation6 + $0x10] ss:$2 sm:$0xf]  ;;  %v7447_v16 = vld [vmem:[#allocation6 + $0x11] ss:$2 sm:$0xf] }
 0x5f5   : > { %9135 = vmatpush1.bf16.msra.mxu1 %v11270_v23  ;;  %v11356_v34 = vld [vmem:[%s16682_s7 + $0x3f4] ss:$8 sps:$4 sm:$0xff]   ;;  %v16166_v61 = vmax.f32 %v7439_v26, %v7447_v16  ;;  %v11354_v46 = vld [vmem:[%s16682_s7 + $0x3f0] ss:$8 sps:$4 sm:$0xff]   ;;  %v7464_v23 = vrot.slane %v15982_v43, 2 }
 0x5f6   : > { %9136 = vmatprep.subr.bf16.mxu1 %v11275_v49  ;;  %v11359_v49 = vld [vmem:[%s16682_s7 + $0x404] ss:$8 sps:$4 sm:$0xff]   ;;  %v11360_v43 = vld [vmem:[%s16682_s7 + $0x410] ss:$8 sps:$4 sm:$0xff]  }
 0x5f7   : > { %v11390_v50 = vld [vmem:[%s16682_s7 + $0x4b0] ss:$8 sps:$4 sm:$0xff]   ;;  %v11431_v16 = vld [vmem:[%s16682_s7 + $0x584] ss:$8 sps:$4 sm:$0xff]  }
 0x5f8   : > { %v11426_v26 = vld [vmem:[%s16682_s7 + $0x570] ss:$8 sps:$4 sm:$0xff]  }
 0x5f9   : > { %9137 = vmatpush1.bf16.msra.mxu1 %v11273_v21  ;;  %v7469_v21 = vrot.slane %v16166_v61, 1 }
 0x5fa   : > { %9138 = vmatprep.subr.bf16.mxu1 %v11278_v1  ;;  %v11357_v1 = vld [vmem:[%s16682_s7 + $0x400] ss:$8 sps:$4 sm:$0xff]  }
 0x5fd   : > { %9139 = vmatpush1.bf16.msra.mxu1 %v11276_v28  ;;  %v7488_v28 = vpack.c.bf16 %v7464_v23, %v7464_v23  ;;  %v11437_v23 = vld [vmem:[%s16682_s7 + $0x5a4] ss:$8 sps:$4 sm:$0xff]  }
 0x5fe   : > { %9140 = vmatprep.subr.bf16.mxu1 %v11281_v3  ;;  %v11362_v3 = vld [vmem:[%s16682_s7 + $0x414] ss:$8 sps:$4 sm:$0xff]  }
 0x601   : > { %9141 = vmatpush1.bf16.msra.mxu1 %v11279_v48  ;;  %v7491_v48 = vpack.c.bf16 %v7469_v21, %v7469_v21  ;;  %v11440_v21 = vld [vmem:[%s16682_s7 + $0x5b4] ss:$8 sps:$4 sm:$0xff]  }
 0x602   : > { %9142 = vmatprep.subr.bf16.mxu1 %v11284_v32  ;;  %v11365_v32 = vld [vmem:[%s16682_s7 + $0x424] ss:$8 sps:$4 sm:$0xff]  }
 0x605   : > { %9143 = vmatpush1.bf16.msra.mxu1 %v11282_v62  ;;  %v11363_v62 = vld [vmem:[%s16682_s7 + $0x420] ss:$8 sps:$4 sm:$0xff]  }
 0x606   : > { %9144 = vmatprep.subr.bf16.mxu1 %v11287_v42  ;;  %v11368_v42 = vld [vmem:[%s16682_s7 + $0x434] ss:$8 sps:$4 sm:$0xff]  }
 0x609   : > { %9145 = vmatpush1.bf16.msra.mxu1 %v11285_v57  ;;  %v11366_v57 = vld [vmem:[%s16682_s7 + $0x430] ss:$8 sps:$4 sm:$0xff]  }
 0x60a   : > { %9146 = vmatprep.subr.bf16.mxu1 %v11290_v54  ;;  %v11371_v54 = vld [vmem:[%s16682_s7 + $0x444] ss:$8 sps:$4 sm:$0xff]  }
 0x60d   : > { %9147 = vmatpush1.bf16.msra.mxu1 %v11288_v44  ;;  %v11369_v44 = vld [vmem:[%s16682_s7 + $0x440] ss:$8 sps:$4 sm:$0xff]  }
 0x60e   : > { %9148 = vmatprep.subr.bf16.mxu1 %v11293_v17  ;;  %v11374_v17 = vld [vmem:[%s16682_s7 + $0x454] ss:$8 sps:$4 sm:$0xff]  }
 0x611   : > { %9149 = vmatpush1.bf16.msra.mxu1 %v11291_v10  ;;  %v11372_v10 = vld [vmem:[%s16682_s7 + $0x450] ss:$8 sps:$4 sm:$0xff]  }
 0x612   : > { %9150 = vmatprep.subr.bf16.mxu1 %v11296_v7  ;;  %v11377_v7 = vld [vmem:[%s16682_s7 + $0x464] ss:$8 sps:$4 sm:$0xff]  }
 0x615   : > { %9151 = vmatpush1.bf16.msra.mxu1 %v11294_v6  ;;  %v11375_v6 = vld [vmem:[%s16682_s7 + $0x460] ss:$8 sps:$4 sm:$0xff]  }
 0x616   : > { %9152 = vmatprep.subr.bf16.mxu1 %v11299_v52  ;;  %v11380_v52 = vld [vmem:[%s16682_s7 + $0x474] ss:$8 sps:$4 sm:$0xff]  }
 0x619   : > { %9153 = vmatpush1.bf16.msra.mxu1 %v11297_v25  ;;  %v11378_v25 = vld [vmem:[%s16682_s7 + $0x470] ss:$8 sps:$4 sm:$0xff]  }
 0x61a   : > { %9154 = vmatprep.subr.bf16.mxu1 %v11302_v8  ;;  %v11383_v8 = vld [vmem:[%s16682_s7 + $0x484] ss:$8 sps:$4 sm:$0xff]  }
 0x61d   : > { %9155 = vmatpush1.bf16.msra.mxu1 %v11300_v37  ;;  %v11381_v37 = vld [vmem:[%s16682_s7 + $0x480] ss:$8 sps:$4 sm:$0xff]  }
 0x61e   : > { %9156 = vmatprep.subr.bf16.mxu1 %v11305_v38  ;;  %v11386_v38 = vld [vmem:[%s16682_s7 + $0x494] ss:$8 sps:$4 sm:$0xff]  }
 0x621   : > { %9157 = vmatpush1.bf16.msra.mxu1 %v11303_v12  ;;  %v11384_v12 = vld [vmem:[%s16682_s7 + $0x490] ss:$8 sps:$4 sm:$0xff]  }
 0x622   : > { %9158 = vmatprep.subr.bf16.mxu1 %v11308_v53  ;;  %v11389_v53 = vld [vmem:[%s16682_s7 + $0x4a4] ss:$8 sps:$4 sm:$0xff]  }
 0x625   : > { %9159 = vmatpush1.bf16.msra.mxu1 %v11306_v5  ;;  %v11387_v5 = vld [vmem:[%s16682_s7 + $0x4a0] ss:$8 sps:$4 sm:$0xff]  }
 0x626   : > { %9169 = vmatprep.subr.bf16.mxu1 %v11311_v11  ;;  %v11392_v11 = vld [vmem:[%s16682_s7 + $0x4b4] ss:$8 sps:$4 sm:$0xff]  }
 0x628   : > { %9161 = vmatmul.mubr.bf16.vlgmr.msra.gmra.mrb[52].mxu1 %v7486_v19  ;;  %v11393_v19 = vld [vmem:[%s16682_s7 + $0x4c0] ss:$8 sps:$4 sm:$0xff]  }
 0x629   : > { %9170 = vmatpush1.bf16.msra.mxu1 %v11309_v29  ;;  %9201 = vmatprep.mubr.bf16.mxu1 %v7489_v24  ;;  %v11395_v29 = vld [vmem:[%s16682_s7 + $0x4c4] ss:$8 sps:$4 sm:$0xff]   ;;  %v11396_v24 = vld [vmem:[%s16682_s7 + $0x4d0] ss:$8 sps:$4 sm:$0xff]  }
 0x62a   : > { %9171 = vmatprep.subr.bf16.mxu1 %v11314_v15  ;;  %v11398_v15 = vld [vmem:[%s16682_s7 + $0x4d4] ss:$8 sps:$4 sm:$0xff]  }
 0x62d   : > { %9172 = vmatpush1.bf16.msra.mxu1 %v11312_v0  ;;  %v11401_v0 = vld [vmem:[%s16682_s7 + $0x4e4] ss:$8 sps:$4 sm:$0xff]  }
 0x62e   : > { %9173 = vmatprep.subr.bf16.mxu1 %v11317_v58  ;;  %v11399_v58 = vld [vmem:[%s16682_s7 + $0x4e0] ss:$8 sps:$4 sm:$0xff]  }
 0x631   : > { %9174 = vmatpush1.bf16.msra.mxu1 %v11315_v59  ;;  %v11404_v59 = vld [vmem:[%s16682_s7 + $0x4f4] ss:$8 sps:$4 sm:$0xff]  }
 0x632   : > { %9175 = vmatprep.subr.bf16.mxu1 %v11320_v39  ;;  %v11402_v39 = vld [vmem:[%s16682_s7 + $0x4f0] ss:$8 sps:$4 sm:$0xff]  }
 0x635   : > { %9176 = vmatpush1.bf16.msra.mxu1 %v11318_v18  ;;  %v11407_v18 = vld [vmem:[%s16682_s7 + $0x504] ss:$8 sps:$4 sm:$0xff]  }
 0x636   : > { %9177 = vmatprep.subr.bf16.mxu1 %v11323_v41  ;;  %v7473_v41 = vrot.slane %v16166_v61, 3 }
 0x639   : > { %9178 = vmatpush1.bf16.msra.mxu1 %v11321_v33  ;;  %v11405_v33 = vld [vmem:[%s16682_s7 + $0x500] ss:$8 sps:$4 sm:$0xff]  }
 0x63a   : > { %9179 = vmatprep.subr.bf16.mxu1 %v11326_v14  ;;  %v7490_v14 = vpack.c.bf16 %v16166_v61, %v16166_v61 }
 0x63d   : > { %9180 = vmatpush1.bf16.msra.mxu1 %v11324_v4  ;;  %v11410_v4 = vld [vmem:[%s16682_s7 + $0x514] ss:$8 sps:$4 sm:$0xff]  }
 0x63e   : > { %9181 = vmatprep.subr.bf16.mxu1 %v11329_v60  ;;  %v7493_v60 = vpack.c.bf16 %v7473_v41, %v7473_v41  ;;  %v11470_v41 = vld [vmem:[%s16682_s7 + $0x654] ss:$8 sps:$4 sm:$0xff]  }
 0x641   : > { %9182 = vmatpush1.bf16.msra.mxu1 %v11327_v51  ;;  %v11408_v51 = vld [vmem:[%s16682_s7 + $0x510] ss:$8 sps:$4 sm:$0xff]  }
 0x642   : > { %9183 = vmatprep.subr.bf16.mxu1 %v11332_v27  ;;  %v11413_v27 = vld [vmem:[%s16682_s7 + $0x524] ss:$8 sps:$4 sm:$0xff]  }
 0x645   : > { %9184 = vmatpush1.bf16.msra.mxu1 %v11330_v35  ;;  %v11411_v35 = vld [vmem:[%s16682_s7 + $0x520] ss:$8 sps:$4 sm:$0xff]  }
 0x646   : > { %9185 = vmatprep.subr.bf16.mxu1 %v11335_v63  ;;  %v11416_v63 = vld [vmem:[%s16682_s7 + $0x534] ss:$8 sps:$4 sm:$0xff]  }
 0x649   : > { %9186 = vmatpush1.bf16.msra.mxu1 %v11333_v40  ;;  %v11414_v40 = vld [vmem:[%s16682_s7 + $0x530] ss:$8 sps:$4 sm:$0xff]  }
 0x64a   : > { %9187 = vmatprep.subr.bf16.mxu1 %v11338_v22  ;;  %v11419_v22 = vld [vmem:[%s16682_s7 + $0x544] ss:$8 sps:$4 sm:$0xff]  }
 0x64d   : > { %9188 = vmatpush1.bf16.msra.mxu1 %v11336_v47  ;;  %v11417_v47 = vld [vmem:[%s16682_s7 + $0x540] ss:$8 sps:$4 sm:$0xff]  }
 0x64e   : > { %9189 = vmatprep.subr.bf16.mxu1 %v11341_v45  ;;  %v11422_v45 = vld [vmem:[%s16682_s7 + $0x554] ss:$8 sps:$4 sm:$0xff]  }
 0x651   : > { %9190 = vmatpush1.bf16.msra.mxu1 %v11339_v9  ;;  %v11420_v9 = vld [vmem:[%s16682_s7 + $0x550] ss:$8 sps:$4 sm:$0xff]  }
 0x652   : > { %9191 = vmatprep.subr.bf16.mxu1 %v11344_v31  ;;  %v11425_v31 = vld [vmem:[%s16682_s7 + $0x564] ss:$8 sps:$4 sm:$0xff]  }
 0x655   : > { %9192 = vmatpush1.bf16.msra.mxu1 %v11342_v55 }
 0x656   : > { %9193 = vmatprep.subr.bf16.mxu1 %v11347_v13 }
 0x659   : > { %9194 = vmatpush1.bf16.msra.mxu1 %v11345_v30 }
 0x65a   : > { %9195 = vmatprep.subr.bf16.mxu1 %v11350_v2  ;;  %v11423_v2 = vld [vmem:[%s16682_s7 + $0x560] ss:$8 sps:$4 sm:$0xff]  }
 0x65d   : > { %9196 = vmatpush1.bf16.msra.mxu1 %v11348_v56 }
 0x65e   : > { %9197 = vmatprep.subr.bf16.mxu1 %v11353_v36  ;;  %v11428_v36 = vld [vmem:[%s16682_s7 + $0x574] ss:$8 sps:$4 sm:$0xff]  }
 0x661   : > { %9198 = vmatpush1.bf16.msra.mxu1 %v11351_v20  ;;  %v11429_v20 = vld [vmem:[%s16682_s7 + $0x580] ss:$8 sps:$4 sm:$0xff]  }
 0x662   : > { %9199 = vmatprep.subr.bf16.mxu1 %v11356_v34  ;;  %v11434_v34 = vld [vmem:[%s16682_s7 + $0x594] ss:$8 sps:$4 sm:$0xff]  }
 0x665   : > { %9200 = vmatpush1.bf16.msra.mxu1 %v11354_v46  ;;  %v11432_v46 = vld [vmem:[%s16682_s7 + $0x590] ss:$8 sps:$4 sm:$0xff]  }
 0x666   : > { %9210 = vmatprep.subr.bf16.mxu1 %v11359_v49  ;;  %v11435_v49 = vld [vmem:[%s16682_s7 + $0x5a0] ss:$8 sps:$4 sm:$0xff]  }
 0x668   : > { %9202 = vmatmul.mubr.bf16.vlgmr.msra.gmra.mrb[52].mxu1 %v7488_v28  ;;  %v11443_v28 = vld [vmem:[%s16682_s7 + $0x5c4] ss:$8 sps:$4 sm:$0xff]  }
 0x669   : > { %9211 = vmatpush1.bf16.msra.mxu1 %v11357_v1  ;;  %9242 = vmatprep.mubr.bf16.mxu1 %v7491_v48  ;;  %v11438_v1 = vld [vmem:[%s16682_s7 + $0x5b0] ss:$8 sps:$4 sm:$0xff]   ;;  %v11446_v48 = vld [vmem:[%s16682_s7 + $0x5d4] ss:$8 sps:$4 sm:$0xff]  }
 0x66a   : > { %9212 = vmatprep.subr.bf16.mxu1 %v11362_v3  ;;  %v11441_v3 = vld [vmem:[%s16682_s7 + $0x5c0] ss:$8 sps:$4 sm:$0xff]  }
 0x66d   : > { %9213 = vmatpush1.bf16.msra.mxu1 %v11360_v43  ;;  %v11444_v43 = vld [vmem:[%s16682_s7 + $0x5d0] ss:$8 sps:$4 sm:$0xff]  }
 0x66e   : > { %9214 = vmatprep.subr.bf16.mxu1 %v11365_v32  ;;  %v11449_v32 = vld [vmem:[%s16682_s7 + $0x5e4] ss:$8 sps:$4 sm:$0xff]  }
 0x671   : > { %9215 = vmatpush1.bf16.msra.mxu1 %v11363_v62  ;;  %v7441_v62 = vld [vmem:[#allocation6 + $0x18] ss:$2 sm:$0xf] }
 0x672   : > { %9216 = vmatprep.subr.bf16.mxu1 %v11368_v42  ;;  %v7449_v42 = vld [vmem:[#allocation6 + $0x19] ss:$2 sm:$0xf] }
 0x675   : > { %9217 = vmatpush1.bf16.msra.mxu1 %v11366_v57  ;;  %v11447_v57 = vld [vmem:[%s16682_s7 + $0x5e0] ss:$8 sps:$4 sm:$0xff]  }
 0x676   : > { %9218 = vmatprep.subr.bf16.mxu1 %v11371_v54  ;;  %v11452_v54 = vld [vmem:[%s16682_s7 + $0x5f4] ss:$8 sps:$4 sm:$0xff]  }
 0x679   : > { %9219 = vmatpush1.bf16.msra.mxu1 %v11369_v44  ;;  %v16369_v44 = vmax.f32 %v7441_v62, %v7449_v42  ;;  %v11507_v62 = vld [vmem:[%s16682_s7 + $0x720] ss:$8 sps:$4 sm:$0xff]   ;;  %v11512_v42 = vld [vmem:[%s16682_s7 + $0x734] ss:$8 sps:$4 sm:$0xff]  }
 0x67a   : > { %9220 = vmatprep.subr.bf16.mxu1 %v11374_v17  ;;  %v11450_v17 = vld [vmem:[%s16682_s7 + $0x5f0] ss:$8 sps:$4 sm:$0xff]  }
 0x67d   : > { %9221 = vmatpush1.bf16.msra.mxu1 %v11372_v10  ;;  %v7471_v10 = vrot.slane %v16166_v61, 2  ;;  %v11549_v61 = vld [vmem:[%s16684_s9 + $0x40] sm:$0xff]  }
 0x67e   : > { %9222 = vmatprep.subr.bf16.mxu1 %v11377_v7  ;;  %v11455_v7 = vld [vmem:[%s16682_s7 + $0x604] ss:$8 sps:$4 sm:$0xff]   ;;  %10712 = vmatprep.subr.bf16.mxu0 %v11549_v61  ;;  %v11525_v61 = vld [vmem:[%s16682_s7 + $0x780] ss:$8 sps:$4 sm:$0xff]  }
 0x681   : > { %9223 = vmatpush1.bf16.msra.mxu1 %v11375_v6  ;;  %v7476_v6 = vrot.slane %v16369_v44, 1 }
 0x682   : > { %9224 = vmatprep.subr.bf16.mxu1 %v11380_v52  ;;  %v11453_v52 = vld [vmem:[%s16682_s7 + $0x600] ss:$8 sps:$4 sm:$0xff]  }
 0x685   : > { %9225 = vmatpush1.bf16.msra.mxu1 %v11378_v25  ;;  %v7492_v25 = vpack.c.bf16 %v7471_v10, %v7471_v10  ;;  %v11518_v10 = vld [vmem:[%s16682_s7 + $0x754] ss:$8 sps:$4 sm:$0xff]  }
 0x686   : > { %9226 = vmatprep.subr.bf16.mxu1 %v11383_v8  ;;  %v11458_v8 = vld [vmem:[%s16682_s7 + $0x614] ss:$8 sps:$4 sm:$0xff]  }
 0x689   : > { %9227 = vmatpush1.bf16.msra.mxu1 %v11381_v37  ;;  %v7495_v37 = vpack.c.bf16 %v7476_v6, %v7476_v6  ;;  %v11521_v6 = vld [vmem:[%s16682_s7 + $0x764] ss:$8 sps:$4 sm:$0xff]  }
 0x68a   : > { %9228 = vmatprep.subr.bf16.mxu1 %v11386_v38  ;;  %v11550_v38 = vld [vmem:[%s16684_s9] sm:$0xff]  }
 0x68b   : > { %10713 = vmatpush3.bf16.msra.mxu0 %v11550_v38  ;;  %v11530_v38 = vld [vmem:[%s16682_s7 + $0x794] ss:$8 sps:$4 sm:$0xff]  }
 0x68d   : > { %9229 = vmatpush1.bf16.msra.mxu1 %v11384_v12  ;;  %v11551_v12 = vld [vmem:[%s16684_s9 + $0x48] sm:$0xff]  }
 0x68e   : > { %9230 = vmatprep.subr.bf16.mxu1 %v11389_v53  ;;  %v11456_v53 = vld [vmem:[%s16682_s7 + $0x610] ss:$8 sps:$4 sm:$0xff]   ;;  %10714 = vmatprep.subr.bf16.mxu0 %v11551_v12 }
 0x68f   : > { %v11528_v12 = vld [vmem:[%s16682_s7 + $0x790] ss:$8 sps:$4 sm:$0xff]  }
 0x691   : > { %9231 = vmatpush1.bf16.msra.mxu1 %v11387_v5  ;;  %v11461_v5 = vld [vmem:[%s16682_s7 + $0x624] ss:$8 sps:$4 sm:$0xff]  }
 0x692   : > { %9232 = vmatprep.subr.bf16.mxu1 %v11392_v11  ;;  %v11552_v11 = vld [vmem:[%s16684_s9 + $0x8] sm:$0xff]  }
 0x693   : > { %10715 = vmatpush3.bf16.msra.mxu0 %v11552_v11  ;;  %v11536_v11 = vld [vmem:[%s16682_s7 + $0x7b4] ss:$8 sps:$4 sm:$0xff]  }
 0x695   : > { %9233 = vmatpush1.bf16.msra.mxu1 %v11390_v50  ;;  %v11553_v50 = vld [vmem:[%s16684_s9 + $0x50] sm:$0xff]  }
 0x696   : > { %9234 = vmatprep.subr.bf16.mxu1 %v11395_v29  ;;  %v11459_v29 = vld [vmem:[%s16682_s7 + $0x620] ss:$8 sps:$4 sm:$0xff]   ;;  %10716 = vmatprep.subr.bf16.mxu0 %v11553_v50  ;;  %v11534_v50 = vld [vmem:[%s16682_s7 + $0x7b0] ss:$8 sps:$4 sm:$0xff]  }
 0x699   : > { %9235 = vmatpush1.bf16.msra.mxu1 %v11393_v19  ;;  %v11464_v19 = vld [vmem:[%s16682_s7 + $0x634] ss:$8 sps:$4 sm:$0xff]  }
 0x69a   : > { %9236 = vmatprep.subr.bf16.mxu1 %v11398_v15  ;;  %v11554_v15 = vld [vmem:[%s16684_s9 + $0x10] sm:$0xff]  }
 0x69b   : > { %10717 = vmatpush3.bf16.msra.mxu0 %v11554_v15  ;;  %v11542_v15 = vld [vmem:[%s16682_s7 + $0x7d4] ss:$8 sps:$4 sm:$0xff]  }
 0x69d   : > { %9237 = vmatpush1.bf16.msra.mxu1 %v11396_v24  ;;  %v11555_v24 = vld [vmem:[%s16684_s9 + $0x58] sm:$0xff]  }
 0x69e   : > { %9238 = vmatprep.subr.bf16.mxu1 %v11401_v0  ;;  %v11462_v0 = vld [vmem:[%s16682_s7 + $0x630] ss:$8 sps:$4 sm:$0xff]   ;;  %10718 = vmatprep.subr.bf16.mxu0 %v11555_v24 }
 0x69f   : > { %v11540_v24 = vld [vmem:[%s16682_s7 + $0x7d0] ss:$8 sps:$4 sm:$0xff]  }
 0x6a1   : > { %9239 = vmatpush1.bf16.msra.mxu1 %v11399_v58  ;;  %v11467_v58 = vld [vmem:[%s16682_s7 + $0x644] ss:$8 sps:$4 sm:$0xff]  }
 0x6a2   : > { %9240 = vmatprep.subr.bf16.mxu1 %v11404_v59  ;;  %v11556_v59 = vld [vmem:[%s16684_s9 + $0x18] sm:$0xff]  }
 0x6a3   : > { %10719 = vmatpush3.bf16.msra.mxu0 %v11556_v59  ;;  %v11548_v59 = vld [vmem:[%s16682_s7 + $0x7f4] ss:$8 sps:$4 sm:$0xff]  }
 0x6a5   : > { %9241 = vmatpush1.bf16.msra.mxu1 %v11402_v39  ;;  %v11557_v39 = vld [vmem:[%s16684_s9 + $0x60] sm:$0xff]  }
 0x6a6   : > { %9251 = vmatprep.subr.bf16.mxu1 %v11407_v18  ;;  %v11465_v18 = vld [vmem:[%s16682_s7 + $0x640] ss:$8 sps:$4 sm:$0xff]   ;;  %10720 = vmatprep.subr.bf16.mxu0 %v11557_v39  ;;  %v11546_v39 = vld [vmem:[%s16682_s7 + $0x7f0] ss:$8 sps:$4 sm:$0xff]  }
 0x6a8   : > { %9243 = vmatmul.mubr.bf16.vlgmr.msra.gmra.mrb[52].mxu1 %v7490_v14  ;;  %v11559_v14 = vld [vmem:[%s16684_s9 + $0x68] sm:$0xff]  }
 0x6a9   : > { %9252 = vmatpush1.bf16.msra.mxu1 %v11405_v33  ;;  %9283 = vmatprep.mubr.bf16.mxu1 %v7493_v60  ;;  %v11558_v33 = vld [vmem:[%s16684_s9 + $0x20] sm:$0xff]  }
 0x6aa   : > { %9253 = vmatprep.subr.bf16.mxu1 %v11410_v4  ;;  %v11468_v4 = vld [vmem:[%s16682_s7 + $0x650] ss:$8 sps:$4 sm:$0xff]   ;;  %v11473_v60 = vld [vmem:[%s16682_s7 + $0x664] ss:$8 sps:$4 sm:$0xff]   ;;  %10721 = vmatpush3.bf16.msra.mxu0 %v11558_v33 }
 0x6ab   : > { %10722 = vmatprep.subr.bf16.mxu0 %v11559_v14  ;;  %v11561_v33 = vld [vmem:[%s16684_s9 + $0x70] sm:$0xff]  }
 0x6ac   : > { %v11562_v14 = vld [vmem:[%s16684_s9 + $0x30] sm:$0xff]  }
 0x6ad   : > { %9254 = vmatpush1.bf16.msra.mxu1 %v11408_v51  ;;  %v11560_v51 = vld [vmem:[%s16684_s9 + $0x28] sm:$0xff]  }
 0x6ae   : > { %9255 = vmatprep.subr.bf16.mxu1 %v11413_v27  ;;  %v11471_v27 = vld [vmem:[%s16682_s7 + $0x660] ss:$8 sps:$4 sm:$0xff]   ;;  %10723 = vmatpush3.bf16.msra.mxu0 %v11560_v51 }
 0x6af   : > { %10724 = vmatprep.subr.bf16.mxu0 %v11561_v33 }
 0x6b1   : > { %9256 = vmatpush1.bf16.msra.mxu1 %v11411_v35  ;;  %v11476_v35 = vld [vmem:[%s16682_s7 + $0x674] ss:$8 sps:$4 sm:$0xff]  }
 0x6b2   : > { %9257 = vmatprep.subr.bf16.mxu1 %v11416_v63  ;;  %v11474_v63 = vld [vmem:[%s16682_s7 + $0x670] ss:$8 sps:$4 sm:$0xff]   ;;  %10725 = vmatpush3.bf16.msra.mxu0 %v11562_v14 }
 0x6b5   : > { %9258 = vmatpush1.bf16.msra.mxu1 %v11414_v40  ;;  %v11479_v40 = vld [vmem:[%s16682_s7 + $0x684] ss:$8 sps:$4 sm:$0xff]  }
 0x6b6   : > { %9259 = vmatprep.subr.bf16.mxu1 %v11419_v22  ;;  %v11477_v22 = vld [vmem:[%s16682_s7 + $0x680] ss:$8 sps:$4 sm:$0xff]  }
 0x6b9   : > { %9260 = vmatpush1.bf16.msra.mxu1 %v11417_v47  ;;  %v11482_v47 = vld [vmem:[%s16682_s7 + $0x694] ss:$8 sps:$4 sm:$0xff]  }
 0x6ba   : > { %9261 = vmatprep.subr.bf16.mxu1 %v11422_v45  ;;  %v11480_v45 = vld [vmem:[%s16682_s7 + $0x690] ss:$8 sps:$4 sm:$0xff]  }
 0x6bb   : > { %v16311_v55 = vpop.f32.mrb[212].mxu0 }
 0x6bc   : > { %v16313_v13 = vpop.f32.mrb[213].mxu0 }
 0x6bd   : > { %9262 = vmatpush1.bf16.msra.mxu1 %v11420_v9  ;;  %v9084_v30 = vpop.f32.mrb[214].mxu0  ;;  %v11485_v9 = vld [vmem:[%s16682_s7 + $0x6a4] ss:$8 sps:$4 sm:$0xff]  }
 0x6be   : > { %v9085_v56 = vpop.f32.mrb[215].mxu0  ;;  %9263 = vmatprep.subr.bf16.mxu1 %v11425_v31  ;;  %v11483_v31 = vld [vmem:[%s16682_s7 + $0x6a0] ss:$8 sps:$4 sm:$0xff]   ;;  %v11488_v30 = vld [vmem:[%s16682_s7 + $0x6b4] ss:$8 sps:$4 sm:$0xff]  }
 0x6bf   : > { %v11491_v56 = vld [vmem:[%s16682_s7 + $0x6c4] ss:$8 sps:$4 sm:$0xff]  }
 0x6c1   : > { %9264 = vmatpush1.bf16.msra.mxu1 %v11423_v2  ;;  %v11486_v2 = vld [vmem:[%s16682_s7 + $0x6b0] ss:$8 sps:$4 sm:$0xff]  }
 0x6c2   : > { %9265 = vmatprep.subr.bf16.mxu1 %v11428_v36  ;;  %v11489_v36 = vld [vmem:[%s16682_s7 + $0x6c0] ss:$8 sps:$4 sm:$0xff]  }
 0x6c5   : > { %9266 = vmatpush1.bf16.msra.mxu1 %v11426_v26  ;;  %v11494_v26 = vld [vmem:[%s16682_s7 + $0x6d4] ss:$8 sps:$4 sm:$0xff]  }
 0x6c6   : > { %9267 = vmatprep.subr.bf16.mxu1 %v11431_v16  ;;  %v11492_v16 = vld [vmem:[%s16682_s7 + $0x6d0] ss:$8 sps:$4 sm:$0xff]  }
 0x6c9   : > { %9268 = vmatpush1.bf16.msra.mxu1 %v11429_v20  ;;  %v11497_v20 = vld [vmem:[%s16682_s7 + $0x6e4] ss:$8 sps:$4 sm:$0xff]  }
 0x6ca   : > { %9269 = vmatprep.subr.bf16.mxu1 %v11434_v34  ;;  %v11495_v34 = vld [vmem:[%s16682_s7 + $0x6e0] ss:$8 sps:$4 sm:$0xff]  }
 0x6cd   : > { %9270 = vmatpush1.bf16.msra.mxu1 %v11432_v46  ;;  %v11500_v46 = vld [vmem:[%s16682_s7 + $0x6f4] ss:$8 sps:$4 sm:$0xff]  }
 0x6ce   : > { %9271 = vmatprep.subr.bf16.mxu1 %v11437_v23  ;;  %v11498_v23 = vld [vmem:[%s16682_s7 + $0x6f0] ss:$8 sps:$4 sm:$0xff]  }
 0x6d1   : > { %9272 = vmatpush1.bf16.msra.mxu1 %v11435_v49  ;;  %v11503_v49 = vld [vmem:[%s16682_s7 + $0x704] ss:$8 sps:$4 sm:$0xff]  }
 0x6d2   : > { %9273 = vmatprep.subr.bf16.mxu1 %v11440_v21  ;;  %v7480_v21 = vrot.slane %v16369_v44, 3 }
 0x6d5   : > { %9274 = vmatpush1.bf16.msra.mxu1 %v11438_v1  ;;  %v11501_v1 = vld [vmem:[%s16682_s7 + $0x700] ss:$8 sps:$4 sm:$0xff]  }
 0x6d6   : > { %9275 = vmatprep.subr.bf16.mxu1 %v11443_v28  ;;  %v7494_v28 = vpack.c.bf16 %v16369_v44, %v16369_v44 }
 0x6d9   : > { %9276 = vmatpush1.bf16.msra.mxu1 %v11441_v3  ;;  %v11506_v3 = vld [vmem:[%s16682_s7 + $0x714] ss:$8 sps:$4 sm:$0xff]  }
 0x6da   : > { %9277 = vmatprep.subr.bf16.mxu1 %v11446_v48  ;;  %v7497_v48 = vpack.c.bf16 %v7480_v21, %v7480_v21 }
 0x6dd   : > { %9278 = vmatpush1.bf16.msra.mxu1 %v11444_v43  ;;  %v11504_v43 = vld [vmem:[%s16682_s7 + $0x710] ss:$8 sps:$4 sm:$0xff]  }
 0x6de   : > { %9279 = vmatprep.subr.bf16.mxu1 %v11449_v32  ;;  %v11509_v32 = vld [vmem:[%s16682_s7 + $0x724] ss:$8 sps:$4 sm:$0xff]  }
 0x6e1   : > { %9280 = vmatpush1.bf16.msra.mxu1 %v11447_v57  ;;  %v11510_v57 = vld [vmem:[%s16682_s7 + $0x730] ss:$8 sps:$4 sm:$0xff]  }
 0x6e2   : > { %9281 = vmatprep.subr.bf16.mxu1 %v11452_v54  ;;  %v11515_v54 = vld [vmem:[%s16682_s7 + $0x744] ss:$8 sps:$4 sm:$0xff]  }
 0x6e5   : > { %9282 = vmatpush1.bf16.msra.mxu1 %v11450_v17  ;;  %v11513_v17 = vld [vmem:[%s16682_s7 + $0x740] ss:$8 sps:$4 sm:$0xff]  }
 0x6e6   : > { %9292 = vmatprep.subr.bf16.mxu1 %v11455_v7  ;;  %v11516_v7 = vld [vmem:[%s16682_s7 + $0x750] ss:$8 sps:$4 sm:$0xff]  }
 0x6e8   : > { %9284 = vmatmul.mubr.bf16.vlgmr.msra.gmra.mrb[52].mxu1 %v7492_v25  ;;  %v11524_v25 = vld [vmem:[%s16682_s7 + $0x774] ss:$8 sps:$4 sm:$0xff]  }
 0x6e9   : > { %9293 = vmatpush1.bf16.msra.mxu1 %v11453_v52  ;;  %9324 = vmatprep.mubr.bf16.mxu1 %v7495_v37  ;;  %v11519_v52 = vld [vmem:[%s16682_s7 + $0x760] ss:$8 sps:$4 sm:$0xff]   ;;  %v11527_v37 = vld [vmem:[%s16682_s7 + $0x784] ss:$8 sps:$4 sm:$0xff]  }
 0x6ea   : > { %9294 = vmatprep.subr.bf16.mxu1 %v11458_v8  ;;  %v11522_v8 = vld [vmem:[%s16682_s7 + $0x770] ss:$8 sps:$4 sm:$0xff]  }
 0x6ed   : > { %9295 = vmatpush1.bf16.msra.mxu1 %v11456_v53  ;;  %v11533_v53 = vld [vmem:[%s16682_s7 + $0x7a4] ss:$8 sps:$4 sm:$0xff]  }
 0x6ee   : > { %9296 = vmatprep.subr.bf16.mxu1 %v11461_v5  ;;  %v11531_v5 = vld [vmem:[%s16682_s7 + $0x7a0] ss:$8 sps:$4 sm:$0xff]  }
 0x6f1   : > { %9297 = vmatpush1.bf16.msra.mxu1 %v11459_v29  ;;  %v11539_v29 = vld [vmem:[%s16682_s7 + $0x7c4] ss:$8 sps:$4 sm:$0xff]  }
 0x6f2   : > { %9298 = vmatprep.subr.bf16.mxu1 %v11464_v19  ;;  %v11537_v19 = vld [vmem:[%s16682_s7 + $0x7c0] ss:$8 sps:$4 sm:$0xff]  }
 0x6f5   : > { %9299 = vmatpush1.bf16.msra.mxu1 %v11462_v0  ;;  %v11545_v0 = vld [vmem:[%s16682_s7 + $0x7e4] ss:$8 sps:$4 sm:$0xff]  }
 0x6f6   : > { %9300 = vmatprep.subr.bf16.mxu1 %v11467_v58  ;;  %v11543_v58 = vld [vmem:[%s16682_s7 + $0x7e0] ss:$8 sps:$4 sm:$0xff]  }
 0x6f9   : > { %9301 = vmatpush1.bf16.msra.mxu1 %v11465_v18  ;;  %v7478_v18 = vrot.slane %v16369_v44, 2  ;;  %v11564_v44 = vld [vmem:[%s16684_s9 + $0x38] sm:$0xff]  }
 0x6fa   : > { %9302 = vmatprep.subr.bf16.mxu1 %v11470_v41 }
 0x6fb   : > { %v7496_v41 = vpack.c.bf16 %v7478_v18, %v7478_v18 }
 0x6fd   : > { %9303 = vmatpush1.bf16.msra.mxu1 %v11468_v4  ;;  %v11563_v4 = vld [vmem:[%s16684_s9 + $0x78] sm:$0xff]  }
 0x6fe   : > { %9304 = vmatprep.subr.bf16.mxu1 %v11473_v60  ;;  %10726 = vmatprep.subr.bf16.mxu0 %v11563_v4  ;;  %v9036_v60 = vlaneseq }
 0x6ff   : > { %10727 = vmatpush3.bf16.msra.mxu0 %v11564_v44 }
 0x700   : > { %v9037_v51 = vshrl.u32 %v9036_v60, 7 }
 0x701   : > { %9305 = vmatpush1.bf16.msra.mxu1 %v11471_v27 }
 0x702   : > { %9306 = vmatprep.subr.bf16.mxu1 %v11476_v35  ;;  %v9038_v27 = vsub.s32 0, %v9037_v51  ;;  %v7754_v35 = vld [vmem:[%s16683_s8] sm:$0x3] }
 0x705   : > { %9307 = vmatpush1.bf16.msra.mxu1 %v11474_v63  ;;  %v9042_v63 = vsub.s32 1, %v9037_v51 }
 0x706   : > { %9308 = vmatprep.subr.bf16.mxu1 %v11479_v40  ;;  %v9039_v40 = vrot.slane %v7754_v35, %v9038_v27 }
 0x709   : > { %9309 = vmatpush1.bf16.msra.mxu1 %v11477_v22  ;;  %v9043_v22 = vrot.slane %v7754_v35, %v9042_v63 }
 0x70a   : > { %9310 = vmatprep.subr.bf16.mxu1 %v11482_v47  ;;  %v9081_v47 = vadd.f32 %v16311_v55, %v9039_v40  ;;  %v9410_v55 = vld [vmem:[%s16685_s10] sm:$0x1] }
 0x70d   : > { %9311 = vmatpush1.bf16.msra.mxu1 %v11480_v45  ;;  %v9083_v45 = vadd.f32 %v16313_v13, %v9043_v22 }
 0x70e   : > { %9312 = vmatprep.subr.bf16.mxu1 %v11485_v9 }
 0x711   : > { %9313 = vmatpush1.bf16.msra.mxu1 %v11483_v31 }
 0x712   : > { %9314 = vmatprep.subr.bf16.mxu1 %v11488_v30 }
 0x715   : > { %9315 = vmatpush1.bf16.msra.mxu1 %v11486_v2 }
 0x716   : > { %9316 = vmatprep.subr.bf16.mxu1 %v11491_v56 }
 0x719   : > { %9317 = vmatpush1.bf16.msra.mxu1 %v11489_v36 }
 0x71a   : > { %9318 = vmatprep.subr.bf16.mxu1 %v11494_v26 }
 0x71d   : > { %9319 = vmatpush1.bf16.msra.mxu1 %v11492_v16 }
 0x71e   : > { %9320 = vmatprep.subr.bf16.mxu1 %v11497_v20 }
 0x721   : > { %9321 = vmatpush1.bf16.msra.mxu1 %v11495_v34 }
 0x722   : > { %9322 = vmatprep.subr.bf16.mxu1 %v11500_v46 }
 0x725   : > { %9323 = vmatpush1.bf16.msra.mxu1 %v11498_v23 }
 0x726   : > { %9333 = vmatprep.subr.bf16.mxu1 %v11503_v49 }
 0x728   : > { %9325 = vmatmul.mubr.bf16.vlgmr.msra.gmra.mrb[52].mxu1 %v7494_v28 }
 0x729   : > { %9334 = vmatpush1.bf16.msra.mxu1 %v11501_v1  ;;  %9365 = vmatprep.mubr.bf16.mxu1 %v7497_v48 }
 0x72a   : > { %9335 = vmatprep.subr.bf16.mxu1 %v11506_v3 }
 0x72d   : > { %9336 = vmatpush1.bf16.msra.mxu1 %v11504_v43 }
 0x72e   : > { %9337 = vmatprep.subr.bf16.mxu1 %v11509_v32 }
 0x731   : > { %9338 = vmatpush1.bf16.msra.mxu1 %v11507_v62 }
 0x732   : > { %9339 = vmatprep.subr.bf16.mxu1 %v11512_v42 }
 0x735   : > { %9340 = vmatpush1.bf16.msra.mxu1 %v11510_v57 }
 0x736   : > { %9341 = vmatprep.subr.bf16.mxu1 %v11515_v54 }
 0x739   : > { %9342 = vmatpush1.bf16.msra.mxu1 %v11513_v17 }
 0x73a   : > { %9343 = vmatprep.subr.bf16.mxu1 %v11518_v10 }
 0x73d   : > { %9344 = vmatpush1.bf16.msra.mxu1 %v11516_v7 }
 0x73e   : > { %9345 = vmatprep.subr.bf16.mxu1 %v11521_v6 }
 0x741   : > { %9346 = vmatpush1.bf16.msra.mxu1 %v11519_v52 }
 0x742   : > { %9347 = vmatprep.subr.bf16.mxu1 %v11524_v25 }
 0x745   : > { %9348 = vmatpush1.bf16.msra.mxu1 %v11522_v8 }
 0x746   : > { %9349 = vmatprep.subr.bf16.mxu1 %v11527_v37 }
 0x749   : > { %9350 = vmatpush1.bf16.msra.mxu1 %v11525_v61 }
 0x74a   : > { %9351 = vmatprep.subr.bf16.mxu1 %v11530_v38 }
 0x74d   : > { %9352 = vmatpush1.bf16.msra.mxu1 %v11528_v12 }
 0x74e   : > { %9353 = vmatprep.subr.bf16.mxu1 %v11533_v53 }
 0x751   : > { %9354 = vmatpush1.bf16.msra.mxu1 %v11531_v5 }
 0x752   : > { %9355 = vmatprep.subr.bf16.mxu1 %v11536_v11 }
 0x755   : > { %9356 = vmatpush1.bf16.msra.mxu1 %v11534_v50 }
 0x756   : > { %9357 = vmatprep.subr.bf16.mxu1 %v11539_v29 }
 0x759   : > { %9358 = vmatpush1.bf16.msra.mxu1 %v11537_v19 }
 0x75a   : > { %9359 = vmatprep.subr.bf16.mxu1 %v11542_v15 }
 0x75d   : > { %9360 = vmatpush1.bf16.msra.mxu1 %v11540_v24 }
 0x75e   : > { %9361 = vmatprep.subr.bf16.mxu1 %v11545_v0 }
 0x761   : > { %9362 = vmatpush1.bf16.msra.mxu1 %v11543_v58 }
 0x762   : > { %9363 = vmatprep.subr.bf16.mxu1 %v11548_v59 }
 0x765   : > { %9364 = vmatpush1.bf16.msra.mxu1 %v11546_v39 }
 0x768   : > { %9366 = vmatmul.mubr.bf16.vlgmr.msra.gmra.mrb[52].mxu1 %v7496_v41 }
 0x83b   : > { %v9367_v9 = vpop.f32.mrb[52].mxu1 }
 0x83c   : > { %v10929_v31 = vadd.f32 %v9367_v9, %v9081_v47  ;;  %v9369_v30 = vpop.f32.mrb[53].mxu1 }
 0x83d   : > { %v10931_v2 = vadd.f32 %v9369_v30, %v9083_v45  ;;  %v9371_v56 = vpop.f32.mrb[54].mxu1 }
 0x83e   : > { %v9374_v36 = vmax.f32 %v10929_v31, 0.0  ;;  %v9372_v26 = vpop.f32.mrb[55].mxu1 }
 0x83f   : > { %v9375_v16 = vmax.f32 %v10931_v2, 0.0 }
 0x840   : > { %v9376_v34 = vpack.c.bf16 %v9374_v36, %v9374_v36 }
 0x841   : > { %v9377_v20 = vpack.c.bf16 %v9375_v16, %v9375_v16 }
 0x843   : > { %9539 = vmatprep.mubr.bf16.mxu0 %v9377_v20 }
 0x844   : > { %9540 = vmatmul.mubr.bf16.vlgmr.msra.gmra.mrb[216].mxu0 %v9376_v34 }
 0x917   : > { %v10728_v46 = vpop.f32.mrb[216].mxu0 }
 0x918   : > { %v10729_v13 = vpop.f32.mrb[217].mxu0 }
 0x919   : > { %v10730_v23 = vadd.f32 %v10729_v13, %v10728_v46  ;;  %v10731_v49 = vpop.f32.mrb[218].mxu0 }
 0x91a   : > { %v10732_v21 = vpop.f32.mrb[219].mxu0 }
 0x91b   : > { %v9542_v1 = vadd.f32 %v10730_v23, %v9410_v55 }
 0x91d   : > { %9548 = vst.msk [vmem:[%s378_s15] sm:$0x1] %vm9547_vm4, %v9542_v1 }
 0x91e   : > { %11615 = shalt.err (!%p11612_p3)
}
 0x91f   : > { %s11616_s22 = scalar_lea.hbm %s16633_s16, 16  ;;  %s11620_s13 = scalar_lea.hbm %s16686_s11, 32 }
 0x920   : > { %p11617_p4 = scmp.ne.s32.totalorder %s16633_s16, %s11616_s22  ;;  %p11621_p9 = scmp.lt.u32.totalorder %s16633_s16, %s16686_s11 }
 0x921   : > { %p11622_p10 = scmp.lt.u32.totalorder %s11620_s13, %s11616_s22  ;;  %p11624_p12 = scmp.lt.u32.totalorder %s11616_s22, %s16633_s16 }
 0x922   : > { %p11618_p7 = pnand %p11617_p4, %p11769_p5 }
 0x923   : > { %p11623_p11 = por %p11622_p10, %p11621_p9 }
 0x924   : > { %p11619_p8 = pneg %p11618_p7 }
 0x925   : > { %p11625_p13 = por %p11624_p12, %p11623_p11 }
 0x927   : > { %p11626_p0 = pnand %p11625_p13, %p11619_p8 }
 0x929   : > { %11629 = shalt.err (!%p11626_p0)
}
 0x92a   : > { %10957 = dma.vmem_to_hbm [thread:$0]  (%p11769_p5), %s16635_s12, 16, %s16633_s16, %s9550_s24  }
 0x92b PF: > { %p10963_p1 = scmp.ge.s32.totalorder %s11664_s20, 2  ;;  %s9574_s21 = sand.u32 1, %s11652_s17  }
 0x92c   : > { %s9575_s0 = scalar_lea.sflag [#allocation8], %s9574_s21 }
 0x92d   : > { %p10960_p2 = pnand %p10963_p1, %p11773_p6 }
 0x92f   : > { %11647 = dma.done.wait (!%p10960_p2), %s9575_s0, 16  }
 0x930   : > { %11649 = vsyncadd (!%p10960_p2), %s9575_s0, 4294967280  ;;  %p21_p3 = scmp.ge.s32.totalorder %s11756_s23, 4   ;;  %s17054_s17 = smov %s11656_s18 }
 0x931   : > { %s17055_s18 = smov %s11660_s19  ;;  %s17056_s19 = smov %s11767_s26 }
 0x932   : > { %s17057_s20 = smov %s11756_s23  ;;  %23 = sbr.rel (!%p21_p3) target bundleno = 5 (0x5), region = 190 }
 0x939   :  { %9579 = vsyncpa [#allocation8], 1 }
 0x93a   :  { %9581 = vsyncpa [#allocation8 + $0x1], 1 }

</bundles_post_ra>
